<compile_context>
chip_gen: v7x
topology: tpu7x:2x2x1
jax: 0.10.0
libtpu: 0.0.40
codegen_flags: <defaults>
</compile_context>

<pallas_src>
import functools

import jax
import jax.numpy as jnp
from jax.experimental import pallas as pl
from jax.experimental.pallas import tpu as pltpu

LANE = 128
_BUF_C = 32          # widest channel count that ever flows through the shift buffer


# --------------------------- in-kernel building blocks ------------------------

def _conv3x3_sparse(buf_ref, x, w_ref, cin, cout, img_w, stride, m_left, m_right, off):
    """3x3 SAME conv on a sparse flattened image.

    x: (HW, cin), rows in row-major (h, w) order of the ORIGINAL HxW grid; only
    rows with h % stride == 0 and w % stride == 0 carry valid data of the
    downsampled (H/stride, W/stride) image.  Output uses the same convention.
    Out-of-image taps read the zeroed halo rows of buf_ref (row direction) or
    are zeroed by the column masks (column wrap), matching zero padding.
    """
    n = x.shape[0]
    buf_ref[off:off + n, 0:cin] = x                      # interior rows only
    acc = jnp.zeros((n, cout), jnp.float32)
    for dy in range(3):
        for dx in range(3):
            s = stride * ((dy - 1) * img_w + (dx - 1))
            xs = buf_ref[off + s:off + s + n, 0:cin]     # shifted tap (static offset)
            if dx == 0:
                xs = xs * m_left
            elif dx == 2:
                xs = xs * m_right
            wblk = w_ref[(dy * 3 + dx) * cin:(dy * 3 + dx + 1) * cin, :]
            if cin == 1:
                acc = acc + xs * wblk                    # (HW,1)*(1,cout) on the VPU
            else:
                acc = acc + jnp.dot(xs, wblk, preferred_element_type=jnp.float32)
    return acc


def _maxpool2_sparse(buf_ref, y, img_w, stride, off):
    """2x2 max pool (stride 2) in the sparse layout: result lands on the top-left
    row of each 2x2 block; the other rows become don't-care."""
    n, c = y.shape
    buf_ref[off:off + n, 0:c] = y
    m = jnp.maximum(y, buf_ref[off + stride:off + stride + n, 0:c])
    m = jnp.maximum(m, buf_ref[off + stride * img_w:off + stride * img_w + n, 0:c])
    m = jnp.maximum(m, buf_ref[off + stride * img_w + stride:
                               off + stride * img_w + stride + n, 0:c])
    return m


# --------------------------------- fused kernel -------------------------------

def _fused_cnn_kernel(x_ref, m_ref, w1_ref, b1_ref, w2_ref, b2_ref,
                      w3_ref, b3_ref, wl_ref, bl_ref, o_ref, buf_ref,
                      *, img_w, off, inv_gap):
    # Zero the halo; interior rows are always rewritten before they are read.
    buf_ref[...] = jnp.zeros_like(buf_ref)

    x = x_ref[0]                                                  # (HW, 1)

    # layer 1: conv(1->16) + ReLU + maxpool2         (tap stride 1)
    y = _conv3x3_sparse(buf_ref, x, w1_ref, 1, 16, img_w, 1,
                        m_ref[:, 0:1], m_ref[:, 1:2], off)
    y = jnp.maximum(y + b1_ref[...], 0.0)
    y = _maxpool2_sparse(buf_ref, y, img_w, 1, off)

    # layer 2: conv(16->32) + ReLU + maxpool2        (tap stride 2)
    y = _conv3x3_sparse(buf_ref, y, w2_ref, 16, 32, img_w, 2,
                        m_ref[:, 2:3], m_ref[:, 3:4], off)
    y = jnp.maximum(y + b2_ref[...], 0.0)
    y = _maxpool2_sparse(buf_ref, y, img_w, 2, off)

    # layer 3: conv(32->64) + ReLU                   (tap stride 4)
    y = _conv3x3_sparse(buf_ref, y, w3_ref, 32, 64, img_w, 4,
                        m_ref[:, 4:5], m_ref[:, 5:6], off)
    y = jnp.maximum(y + b3_ref[...], 0.0)

    # global average pool over the valid stride-4 rows + Linear(64,1) + Sigmoid
    g = jnp.sum(y * m_ref[:, 6:7], axis=0, keepdims=True) * inv_gap     # (1, 64)
    logit = jnp.sum(g * wl_ref[...], axis=1, keepdims=True) + bl_ref[...]
    o_ref[...] = jnp.broadcast_to(jax.nn.sigmoid(logit), o_ref.shape)   # lane-dense


# ----------------------------------- wrapper ----------------------------------

def _flatten_conv_weight(w_oihw):
    """PyTorch (O,I,3,3) -> (9*I, O), rows ordered (kh, kw, ci)."""
    o, i, kh, kw = w_oihw.shape
    return jnp.transpose(w_oihw, (2, 3, 1, 0)).reshape(kh * kw * i, o)


def _build_masks(H, W):
    """(HW, 8) f32 mask bundle: [L1 left, L1 right, L2 left, L2 right,
    L3 left, L3 right, GAP valid, unused] (left/right = column-wrap masks)."""
    hw = H * W
    idx = jnp.arange(hw, dtype=jnp.int32)
    ww = idx % W
    hh = idx // W
    cols = []
    for st in (1, 2, 4):
        cols.append(ww >= st)
        cols.append(ww < (W - st))
    cols.append(((hh % 4) == 0) & ((ww % 4) == 0))
    cols.append(jnp.zeros((hw,), dtype=bool))
    return jnp.stack(cols, axis=1).astype(jnp.float32)


def audio_cnn_forward(params, x_nchw):
    x = x_nchw.astype(jnp.float32)
    B, C, H, W = x.shape
    if C != 1 or H % 4 != 0 or W % 4 != 0:
        raise ValueError("fused kernel expects 1 input channel and H, W multiples of 4")
    HW = H * W
    off = 8 * ((4 * (W + 1) + 7) // 8)        # halo >= largest tap shift, 8-aligned
    buf_rows = HW + 2 * off

    x2 = jnp.transpose(x, (0, 2, 3, 1)).reshape(B, HW, 1)
    masks = _build_masks(H, W)

    w1 = _flatten_conv_weight(params["w1"]); b1 = params["b1"].reshape(1, -1)
    w2 = _flatten_conv_weight(params["w2"]); b2 = params["b2"].reshape(1, -1)
    w3 = _flatten_conv_weight(params["w3"]); b3 = params["b3"].reshape(1, -1)
    wl = params["wl"].reshape(1, -1)
    bl = params["bl"].reshape(1, 1)

    kernel = functools.partial(_fused_cnn_kernel, img_w=W, off=off,
                               inv_gap=1.0 / ((H // 4) * (W // 4)))
    const = lambda n: (0, 0)

    out = pl.pallas_call(
        kernel,
        out_shape=jax.ShapeDtypeStruct((B, 1, LANE), jnp.float32),
        grid=(B,),
        in_specs=[
            pl.BlockSpec((1, HW, 1), lambda n: (n, 0, 0)),   # image n
            pl.BlockSpec((HW, 8), const),                    # masks (resident)
            pl.BlockSpec((9, 16), const),                    # w1
            pl.BlockSpec((1, 16), const),                    # b1
            pl.BlockSpec((144, 32), const),                  # w2
            pl.BlockSpec((1, 32), const),                    # b2
            pl.BlockSpec((288, 64), const),                  # w3
            pl.BlockSpec((1, 64), const),                    # b3
            pl.BlockSpec((1, 64), const),                    # linear weight
            pl.BlockSpec((1, 1), const),                     # linear bias
        ],
        out_specs=pl.BlockSpec((1, 1, LANE), lambda n: (n, 0, 0)),
        scratch_shapes=[pltpu.VMEM((buf_rows, _BUF_C), jnp.float32)],
        compiler_params=pltpu.CompilerParams(
            dimension_semantics=("parallel",),
            vmem_limit_bytes=32 * 1024 * 1024),
    )(x2, masks, w1, b1, w2, b2, w3, b3, wl, bl)

    return out[:, 0, :1]                                      # (B, 1)


# ------------------------------- params / reference ---------------------------

def init_params(key):
    ks = jax.random.split(key, 8)
    return {
        "w1": 0.10 * jax.random.normal(ks[0], (16, 1, 3, 3), jnp.float32),
        "b1": 0.10 * jax.random.normal(ks[1], (16,), jnp.float32),
        "w2": 0.05 * jax.random.normal(ks[2], (32, 16, 3, 3), jnp.float32),
        "b2": 0.10 * jax.random.normal(ks[3], (32,), jnp.float32),
        "w3": 0.05 * jax.random.normal(ks[4], (64, 32, 3, 3), jnp.float32),
        "b3": 0.10 * jax.random.normal(ks[5], (64,), jnp.float32),
        "wl": 0.10 * jax.random.normal(ks[6], (1, 64), jnp.float32),
        "bl": 0.10 * jax.random.normal(ks[7], (1,), jnp.float32),
    }


def reference_forward(params, x_nchw):
    """Pure-JAX reference (same math as the PyTorch module)."""
    x = jnp.transpose(x_nchw, (0, 2, 3, 1))

    def conv(x, w, b):
        y = jax.lax.conv_general_dilated(
            x, jnp.transpose(w, (2, 3, 1, 0)), window_strides=(1, 1),
            padding="SAME", dimension_numbers=("NHWC", "HWIO", "NHWC"),
            precision=jax.lax.Precision.HIGHEST)
        return y + b.reshape(1, 1, 1, -1)

    def maxpool2(x):
        return jax.lax.reduce_window(x, -jnp.inf, jax.lax.max,
                                     (1, 2, 2, 1), (1, 2, 2, 1), "VALID")

    h = maxpool2(jax.nn.relu(conv(x, params["w1"], params["b1"])))
    h = maxpool2(jax.nn.relu(conv(h, params["w2"], params["b2"])))
    h = jax.nn.relu(conv(h, params["w3"], params["b3"]))
    g = jnp.mean(h, axis=(1, 2))                                  # (B, 64)
    logit = jnp.dot(g, params["wl"].T,
                    precision=jax.lax.Precision.HIGHEST) + params["bl"]
    return jax.nn.sigmoid(logit)


if __name__ == "__main__":
    key = jax.random.PRNGKey(0)
    k_param, k_x = jax.random.split(key)
    params = init_params(k_param)

    # Small spectrogram-like input, NCHW as the PyTorch module expects.
    x = jax.random.normal(k_x, (2, 1, 16, 16), jnp.float32)

    fwd = jax.jit(audio_cnn_forward)
    out = jax.block_until_ready(fwd(params, x))
    ref = jax.block_until_ready(reference_forward(params, x))

    assert out.shape == (2, 1), out.shape
    max_err = float(jnp.max(jnp.abs(out - ref)))
    assert max_err < 1e-3, f"mismatch vs reference: {max_err}"
    print("KERNEL_OK")
</pallas_src>

<mosaic_0001>
module attributes {stable_mosaic.version = 11 : i64} {
  func.func @_fused_cnn_kernel(%arg0: i32, %arg1: memref<1x256x1xf32, #tpu.memory_space<vmem>>, %arg2: memref<256x8xf32, #tpu.memory_space<vmem>>, %arg3: memref<9x16xf32, #tpu.memory_space<vmem>>, %arg4: memref<1x16xf32, #tpu.memory_space<vmem>>, %arg5: memref<144x32xf32, #tpu.memory_space<vmem>>, %arg6: memref<1x32xf32, #tpu.memory_space<vmem>>, %arg7: memref<288x64xf32, #tpu.memory_space<vmem>>, %arg8: memref<1x64xf32, #tpu.memory_space<vmem>>, %arg9: memref<1x64xf32, #tpu.memory_space<vmem>>, %arg10: memref<1x1xf32, #tpu.memory_space<vmem>>, %arg11: memref<1x1x128xf32, #tpu.memory_space<vmem>>, %arg12: memref<400x32xf32, #tpu.memory_space<vmem>>) attributes {dimension_semantics = [#tpu.dimension_semantics<parallel>], iteration_bounds = array<i64: 2>, scalar_prefetch = 0 : i64, scratch_operands = 1 : i64, tpu.core_type = #tpu.core_type<tc>, window_params = [{transform_indices = @transform_0, window_bounds = array<i64: 1, 256, 1>}, {pipeline_mode = #tpu.pipeline_mode<synchronous>, transform_indices = @transform_1, window_bounds = array<i64: 256, 8>}, {pipeline_mode = #tpu.pipeline_mode<synchronous>, transform_indices = @transform_2, window_bounds = array<i64: 9, 16>}, {pipeline_mode = #tpu.pipeline_mode<synchronous>, transform_indices = @transform_3, window_bounds = array<i64: 1, 16>}, {pipeline_mode = #tpu.pipeline_mode<synchronous>, transform_indices = @transform_4, window_bounds = array<i64: 144, 32>}, {pipeline_mode = #tpu.pipeline_mode<synchronous>, transform_indices = @transform_5, window_bounds = array<i64: 1, 32>}, {pipeline_mode = #tpu.pipeline_mode<synchronous>, transform_indices = @transform_6, window_bounds = array<i64: 288, 64>}, {pipeline_mode = #tpu.pipeline_mode<synchronous>, transform_indices = @transform_7, window_bounds = array<i64: 1, 64>}, {pipeline_mode = #tpu.pipeline_mode<synchronous>, transform_indices = @transform_8, window_bounds = array<i64: 1, 64>}, {pipeline_mode = #tpu.pipeline_mode<synchronous>, transform_indices = @transform_9, window_bounds = array<i64: 1, 1>}, {transform_indices = @transform_10, window_bounds = array<i64: 1, 1, 128>}]} {
    %cst = arith.constant 0.000000e+00 : f32
    %0 = vector.broadcast %cst : f32 to vector<400x32xf32>
    %c0 = arith.constant 0 : index
    %c0_0 = arith.constant 0 : index
    %1 = vector.load %arg12[%c0, %c0_0] : memref<400x32xf32, #tpu.memory_space<vmem>>, vector<400x32xf32>
    tpu.vector_store %arg12[%c0, %c0_0], %0 {strides = array<i32>} : memref<400x32xf32, #tpu.memory_space<vmem>>, vector<400x32xf32>,
    %c0_1 = arith.constant 0 : index
    %c0_2 = arith.constant 0 : index
    %c0_3 = arith.constant 0 : index
    %2 = vector.load %arg1[%c0_1, %c0_2, %c0_3] : memref<1x256x1xf32, #tpu.memory_space<vmem>>, vector<1x256x1xf32>
    %3 = vector.shape_cast %2 : vector<1x256x1xf32> to vector<256x1xf32>
    %c0_4 = arith.constant 0 : index
    %c0_5 = arith.constant 0 : index
    %4 = vector.load %arg2[%c0_4, %c0_5] : memref<256x8xf32, #tpu.memory_space<vmem>>, vector<256x1xf32>
    %c0_6 = arith.constant 0 : index
    %c1 = arith.constant 1 : index
    %5 = vector.load %arg2[%c0_6, %c1] : memref<256x8xf32, #tpu.memory_space<vmem>>, vector<256x1xf32>
    %c72 = arith.constant 72 : index
    %c0_7 = arith.constant 0 : index
    %6 = vector.load %arg12[%c72, %c0_7] : memref<400x32xf32, #tpu.memory_space<vmem>>, vector<256x1xf32>
    tpu.vector_store %arg12[%c72, %c0_7], %3 {strides = array<i32>} : memref<400x32xf32, #tpu.memory_space<vmem>>, vector<256x1xf32>,
    %cst_8 = arith.constant 0.000000e+00 : f32
    %7 = vector.broadcast %cst_8 : f32 to vector<256x16xf32>
    %c55 = arith.constant 55 : index
    %c0_9 = arith.constant 0 : index
    %8 = vector.load %arg12[%c55, %c0_9] : memref<400x32xf32, #tpu.memory_space<vmem>>, vector<256x1xf32>
    %9 = arith.mulf %8, %4 : vector<256x1xf32>
    %c0_10 = arith.constant 0 : index
    %c0_11 = arith.constant 0 : index
    %10 = vector.load %arg3[%c0_10, %c0_11] : memref<9x16xf32, #tpu.memory_space<vmem>>, vector<1x16xf32>
    %11 = vector.broadcast %9 : vector<256x1xf32> to vector<256x16xf32>
    %12 = vector.broadcast %10 : vector<1x16xf32> to vector<256x16xf32>
    %13 = arith.mulf %11, %12 : vector<256x16xf32>
    %14 = arith.addf %7, %13 : vector<256x16xf32>
    %c56 = arith.constant 56 : index
    %c0_12 = arith.constant 0 : index
    %15 = vector.load %arg12[%c56, %c0_12] : memref<400x32xf32, #tpu.memory_space<vmem>>, vector<256x1xf32>
    %c1_13 = arith.constant 1 : index
    %c0_14 = arith.constant 0 : index
    %16 = vector.load %arg3[%c1_13, %c0_14] : memref<9x16xf32, #tpu.memory_space<vmem>>, vector<1x16xf32>
    %17 = vector.broadcast %15 : vector<256x1xf32> to vector<256x16xf32>
    %18 = vector.broadcast %16 : vector<1x16xf32> to vector<256x16xf32>
    %19 = arith.mulf %17, %18 : vector<256x16xf32>
    %20 = arith.addf %14, %19 : vector<256x16xf32>
    %c57 = arith.constant 57 : index
    %c0_15 = arith.constant 0 : index
    %21 = vector.load %arg12[%c57, %c0_15] : memref<400x32xf32, #tpu.memory_space<vmem>>, vector<256x1xf32>
    %22 = arith.mulf %21, %5 : vector<256x1xf32>
    %c2 = arith.constant 2 : index
    %c0_16 = arith.constant 0 : index
    %23 = vector.load %arg3[%c2, %c0_16] : memref<9x16xf32, #tpu.memory_space<vmem>>, vector<1x16xf32>
    %24 = vector.broadcast %22 : vector<256x1xf32> to vector<256x16xf32>
    %25 = vector.broadcast %23 : vector<1x16xf32> to vector<256x16xf32>
    %26 = arith.mulf %24, %25 : vector<256x16xf32>
    %27 = arith.addf %20, %26 : vector<256x16xf32>
    %c71 = arith.constant 71 : index
    %c0_17 = arith.constant 0 : index
    %28 = vector.load %arg12[%c71, %c0_17] : memref<400x32xf32, #tpu.memory_space<vmem>>, vector<256x1xf32>
    %29 = arith.mulf %28, %4 : vector<256x1xf32>
    %c3 = arith.constant 3 : index
    %c0_18 = arith.constant 0 : index
    %30 = vector.load %arg3[%c3, %c0_18] : memref<9x16xf32, #tpu.memory_space<vmem>>, vector<1x16xf32>
    %31 = vector.broadcast %29 : vector<256x1xf32> to vector<256x16xf32>
    %32 = vector.broadcast %30 : vector<1x16xf32> to vector<256x16xf32>
    %33 = arith.mulf %31, %32 : vector<256x16xf32>
    %34 = arith.addf %27, %33 : vector<256x16xf32>
    %c72_19 = arith.constant 72 : index
    %c0_20 = arith.constant 0 : index
    %35 = vector.load %arg12[%c72_19, %c0_20] : memref<400x32xf32, #tpu.memory_space<vmem>>, vector<256x1xf32>
    %c4 = arith.constant 4 : index
    %c0_21 = arith.constant 0 : index
    %36 = vector.load %arg3[%c4, %c0_21] : memref<9x16xf32, #tpu.memory_space<vmem>>, vector<1x16xf32>
    %37 = vector.broadcast %35 : vector<256x1xf32> to vector<256x16xf32>
    %38 = vector.broadcast %36 : vector<1x16xf32> to vector<256x16xf32>
    %39 = arith.mulf %37, %38 : vector<256x16xf32>
    %40 = arith.addf %34, %39 : vector<256x16xf32>
    %c73 = arith.constant 73 : index
    %c0_22 = arith.constant 0 : index
    %41 = vector.load %arg12[%c73, %c0_22] : memref<400x32xf32, #tpu.memory_space<vmem>>, vector<256x1xf32>
    %42 = arith.mulf %41, %5 : vector<256x1xf32>
    %c5 = arith.constant 5 : index
    %c0_23 = arith.constant 0 : index
    %43 = vector.load %arg3[%c5, %c0_23] : memref<9x16xf32, #tpu.memory_space<vmem>>, vector<1x16xf32>
    %44 = vector.broadcast %42 : vector<256x1xf32> to vector<256x16xf32>
    %45 = vector.broadcast %43 : vector<1x16xf32> to vector<256x16xf32>
    %46 = arith.mulf %44, %45 : vector<256x16xf32>
    %47 = arith.addf %40, %46 : vector<256x16xf32>
    %c87 = arith.constant 87 : index
    %c0_24 = arith.constant 0 : index
    %48 = vector.load %arg12[%c87, %c0_24] : memref<400x32xf32, #tpu.memory_space<vmem>>, vector<256x1xf32>
    %49 = arith.mulf %48, %4 : vector<256x1xf32>
    %c6 = arith.constant 6 : index
    %c0_25 = arith.constant 0 : index
    %50 = vector.load %arg3[%c6, %c0_25] : memref<9x16xf32, #tpu.memory_space<vmem>>, vector<1x16xf32>
    %51 = vector.broadcast %49 : vector<256x1xf32> to vector<256x16xf32>
    %52 = vector.broadcast %50 : vector<1x16xf32> to vector<256x16xf32>
    %53 = arith.mulf %51, %52 : vector<256x16xf32>
    %54 = arith.addf %47, %53 : vector<256x16xf32>
    %c88 = arith.constant 88 : index
    %c0_26 = arith.constant 0 : index
    %55 = vector.load %arg12[%c88, %c0_26] : memref<400x32xf32, #tpu.memory_space<vmem>>, vector<256x1xf32>
    %c7 = arith.constant 7 : index
    %c0_27 = arith.constant 0 : index
    %56 = vector.load %arg3[%c7, %c0_27] : memref<9x16xf32, #tpu.memory_space<vmem>>, vector<1x16xf32>
    %57 = vector.broadcast %55 : vector<256x1xf32> to vector<256x16xf32>
    %58 = vector.broadcast %56 : vector<1x16xf32> to vector<256x16xf32>
    %59 = arith.mulf %57, %58 : vector<256x16xf32>
    %60 = arith.addf %54, %59 : vector<256x16xf32>
    %c89 = arith.constant 89 : index
    %c0_28 = arith.constant 0 : index
    %61 = vector.load %arg12[%c89, %c0_28] : memref<400x32xf32, #tpu.memory_space<vmem>>, vector<256x1xf32>
    %62 = arith.mulf %61, %5 : vector<256x1xf32>
    %c8 = arith.constant 8 : index
    %c0_29 = arith.constant 0 : index
    %63 = vector.load %arg3[%c8, %c0_29] : memref<9x16xf32, #tpu.memory_space<vmem>>, vector<1x16xf32>
    %64 = vector.broadcast %62 : vector<256x1xf32> to vector<256x16xf32>
    %65 = vector.broadcast %63 : vector<1x16xf32> to vector<256x16xf32>
    %66 = arith.mulf %64, %65 : vector<256x16xf32>
    %67 = arith.addf %60, %66 : vector<256x16xf32>
    %c0_30 = arith.constant 0 : index
    %c0_31 = arith.constant 0 : index
    %68 = vector.load %arg4[%c0_30, %c0_31] : memref<1x16xf32, #tpu.memory_space<vmem>>, vector<1x16xf32>
    %69 = vector.broadcast %68 : vector<1x16xf32> to vector<256x16xf32>
    %70 = arith.addf %67, %69 : vector<256x16xf32>
    %cst_32 = arith.constant 0.000000e+00 : f32
    %71 = vector.broadcast %cst_32 : f32 to vector<256x16xf32>
    %72 = arith.maximumf %70, %71 : vector<256x16xf32>
    %c72_33 = arith.constant 72 : index
    %c0_34 = arith.constant 0 : index
    %73 = vector.load %arg12[%c72_33, %c0_34] : memref<400x32xf32, #tpu.memory_space<vmem>>, vector<256x16xf32>
    tpu.vector_store %arg12[%c72_33, %c0_34], %72 {strides = array<i32>} : memref<400x32xf32, #tpu.memory_space<vmem>>, vector<256x16xf32>,
    %c73_35 = arith.constant 73 : index
    %c0_36 = arith.constant 0 : index
    %74 = vector.load %arg12[%c73_35, %c0_36] : memref<400x32xf32, #tpu.memory_space<vmem>>, vector<256x16xf32>
    %75 = arith.maximumf %72, %74 : vector<256x16xf32>
    %c88_37 = arith.constant 88 : index
    %c0_38 = arith.constant 0 : index
    %76 = vector.load %arg12[%c88_37, %c0_38] : memref<400x32xf32, #tpu.memory_space<vmem>>, vector<256x16xf32>
    %77 = arith.maximumf %75, %76 : vector<256x16xf32>
    %c89_39 = arith.constant 89 : index
    %c0_40 = arith.constant 0 : index
    %78 = vector.load %arg12[%c89_39, %c0_40] : memref<400x32xf32, #tpu.memory_space<vmem>>, vector<256x16xf32>
    %79 = arith.maximumf %77, %78 : vector<256x16xf32>
    %c0_41 = arith.constant 0 : index
    %c2_42 = arith.constant 2 : index
    %80 = vector.load %arg2[%c0_41, %c2_42] : memref<256x8xf32, #tpu.memory_space<vmem>>, vector<256x1xf32>
    %c0_43 = arith.constant 0 : index
    %c3_44 = arith.constant 3 : index
    %81 = vector.load %arg2[%c0_43, %c3_44] : memref<256x8xf32, #tpu.memory_space<vmem>>, vector<256x1xf32>
    %c72_45 = arith.constant 72 : index
    %c0_46 = arith.constant 0 : index
    %82 = vector.load %arg12[%c72_45, %c0_46] : memref<400x32xf32, #tpu.memory_space<vmem>>, vector<256x16xf32>
    tpu.vector_store %arg12[%c72_45, %c0_46], %79 {strides = array<i32>} : memref<400x32xf32, #tpu.memory_space<vmem>>, vector<256x16xf32>,
    %cst_47 = arith.constant 0.000000e+00 : f32
    %83 = vector.broadcast %cst_47 : f32 to vector<256x32xf32>
    %c38 = arith.constant 38 : index
    %c0_48 = arith.constant 0 : index
    %84 = vector.load %arg12[%c38, %c0_48] : memref<400x32xf32, #tpu.memory_space<vmem>>, vector<256x16xf32>
    %85 = vector.broadcast %80 : vector<256x1xf32> to vector<256x16xf32>
    %86 = arith.mulf %84, %85 : vector<256x16xf32>
    %c0_49 = arith.constant 0 : index
    %c0_50 = arith.constant 0 : index
    %87 = vector.load %arg5[%c0_49, %c0_50] : memref<144x32xf32, #tpu.memory_space<vmem>>, vector<16x32xf32>
    %cst_51 = arith.constant dense<0.000000e+00> : vector<256x32xf32>
    %88 = tpu.matmul %86, %87, %cst_51 {dimension_numbers = #tpu.dot_dimension_numbers<[1], [0], [0], [1], [0, 0, 1, 1], [], []>} : vector<256x16xf32>, vector<16x32xf32>, vector<256x32xf32> -> vector<256x32xf32>
    %89 = arith.addf %83, %88 : vector<256x32xf32>
    %c40 = arith.constant 40 : index
    %c0_52 = arith.constant 0 : index
    %90 = vector.load %arg12[%c40, %c0_52] : memref<400x32xf32, #tpu.memory_space<vmem>>, vector<256x16xf32>
    %c16 = arith.constant 16 : index
    %c0_53 = arith.constant 0 : index
    %91 = vector.load %arg5[%c16, %c0_53] : memref<144x32xf32, #tpu.memory_space<vmem>>, vector<16x32xf32>
    %cst_54 = arith.constant dense<0.000000e+00> : vector<256x32xf32>
    %92 = tpu.matmul %90, %91, %cst_54 {dimension_numbers = #tpu.dot_dimension_numbers<[1], [0], [0], [1], [0, 0, 1, 1], [], []>} : vector<256x16xf32>, vector<16x32xf32>, vector<256x32xf32> -> vector<256x32xf32>
    %93 = arith.addf %89, %92 : vector<256x32xf32>
    %c42 = arith.constant 42 : index
    %c0_55 = arith.constant 0 : index
    %94 = vector.load %arg12[%c42, %c0_55] : memref<400x32xf32, #tpu.memory_space<vmem>>, vector<256x16xf32>
    %95 = vector.broadcast %81 : vector<256x1xf32> to vector<256x16xf32>
    %96 = arith.mulf %94, %95 : vector<256x16xf32>
    %c32 = arith.constant 32 : index
    %c0_56 = arith.constant 0 : index
    %97 = vector.load %arg5[%c32, %c0_56] : memref<144x32xf32, #tpu.memory_space<vmem>>, vector<16x32xf32>
    %cst_57 = arith.constant dense<0.000000e+00> : vector<256x32xf32>
    %98 = tpu.matmul %96, %97, %cst_57 {dimension_numbers = #tpu.dot_dimension_numbers<[1], [0], [0], [1], [0, 0, 1, 1], [], []>} : vector<256x16xf32>, vector<16x32xf32>, vector<256x32xf32> -> vector<256x32xf32>
    %99 = arith.addf %93, %98 : vector<256x32xf32>
    %c70 = arith.constant 70 : index
    %c0_58 = arith.constant 0 : index
    %100 = vector.load %arg12[%c70, %c0_58] : memref<400x32xf32, #tpu.memory_space<vmem>>, vector<256x16xf32>
    %101 = vector.broadcast %80 : vector<256x1xf32> to vector<256x16xf32>
    %102 = arith.mulf %100, %101 : vector<256x16xf32>
    %c48 = arith.constant 48 : index
    %c0_59 = arith.constant 0 : index
    %103 = vector.load %arg5[%c48, %c0_59] : memref<144x32xf32, #tpu.memory_space<vmem>>, vector<16x32xf32>
    %cst_60 = arith.constant dense<0.000000e+00> : vector<256x32xf32>
    %104 = tpu.matmul %102, %103, %cst_60 {dimension_numbers = #tpu.dot_dimension_numbers<[1], [0], [0], [1], [0, 0, 1, 1], [], []>} : vector<256x16xf32>, vector<16x32xf32>, vector<256x32xf32> -> vector<256x32xf32>
    %105 = arith.addf %99, %104 : vector<256x32xf32>
    %c72_61 = arith.constant 72 : index
    %c0_62 = arith.constant 0 : index
    %106 = vector.load %arg12[%c72_61, %c0_62] : memref<400x32xf32, #tpu.memory_space<vmem>>, vector<256x16xf32>
    %c64 = arith.constant 64 : index
    %c0_63 = arith.constant 0 : index
    %107 = vector.load %arg5[%c64, %c0_63] : memref<144x32xf32, #tpu.memory_space<vmem>>, vector<16x32xf32>
    %cst_64 = arith.constant dense<0.000000e+00> : vector<256x32xf32>
    %108 = tpu.matmul %106, %107, %cst_64 {dimension_numbers = #tpu.dot_dimension_numbers<[1], [0], [0], [1], [0, 0, 1, 1], [], []>} : vector<256x16xf32>, vector<16x32xf32>, vector<256x32xf32> -> vector<256x32xf32>
    %109 = arith.addf %105, %108 : vector<256x32xf32>
    %c74 = arith.constant 74 : index
    %c0_65 = arith.constant 0 : index
    %110 = vector.load %arg12[%c74, %c0_65] : memref<400x32xf32, #tpu.memory_space<vmem>>, vector<256x16xf32>
    %111 = vector.broadcast %81 : vector<256x1xf32> to vector<256x16xf32>
    %112 = arith.mulf %110, %111 : vector<256x16xf32>
    %c80 = arith.constant 80 : index
    %c0_66 = arith.constant 0 : index
    %113 = vector.load %arg5[%c80, %c0_66] : memref<144x32xf32, #tpu.memory_space<vmem>>, vector<16x32xf32>
    %cst_67 = arith.constant dense<0.000000e+00> : vector<256x32xf32>
    %114 = tpu.matmul %112, %113, %cst_67 {dimension_numbers = #tpu.dot_dimension_numbers<[1], [0], [0], [1], [0, 0, 1, 1], [], []>} : vector<256x16xf32>, vector<16x32xf32>, vector<256x32xf32> -> vector<256x32xf32>
    %115 = arith.addf %109, %114 : vector<256x32xf32>
    %c102 = arith.constant 102 : index
    %c0_68 = arith.constant 0 : index
    %116 = vector.load %arg12[%c102, %c0_68] : memref<400x32xf32, #tpu.memory_space<vmem>>, vector<256x16xf32>
    %117 = vector.broadcast %80 : vector<256x1xf32> to vector<256x16xf32>
    %118 = arith.mulf %116, %117 : vector<256x16xf32>
    %c96 = arith.constant 96 : index
    %c0_69 = arith.constant 0 : index
    %119 = vector.load %arg5[%c96, %c0_69] : memref<144x32xf32, #tpu.memory_space<vmem>>, vector<16x32xf32>
    %cst_70 = arith.constant dense<0.000000e+00> : vector<256x32xf32>
    %120 = tpu.matmul %118, %119, %cst_70 {dimension_numbers = #tpu.dot_dimension_numbers<[1], [0], [0], [1], [0, 0, 1, 1], [], []>} : vector<256x16xf32>, vector<16x32xf32>, vector<256x32xf32> -> vector<256x32xf32>
    %121 = arith.addf %115, %120 : vector<256x32xf32>
    %c104 = arith.constant 104 : index
    %c0_71 = arith.constant 0 : index
    %122 = vector.load %arg12[%c104, %c0_71] : memref<400x32xf32, #tpu.memory_space<vmem>>, vector<256x16xf32>
    %c112 = arith.constant 112 : index
    %c0_72 = arith.constant 0 : index
    %123 = vector.load %arg5[%c112, %c0_72] : memref<144x32xf32, #tpu.memory_space<vmem>>, vector<16x32xf32>
    %cst_73 = arith.constant dense<0.000000e+00> : vector<256x32xf32>
    %124 = tpu.matmul %122, %123, %cst_73 {dimension_numbers = #tpu.dot_dimension_numbers<[1], [0], [0], [1], [0, 0, 1, 1], [], []>} : vector<256x16xf32>, vector<16x32xf32>, vector<256x32xf32> -> vector<256x32xf32>
    %125 = arith.addf %121, %124 : vector<256x32xf32>
    %c106 = arith.constant 106 : index
    %c0_74 = arith.constant 0 : index
    %126 = vector.load %arg12[%c106, %c0_74] : memref<400x32xf32, #tpu.memory_space<vmem>>, vector<256x16xf32>
    %127 = vector.broadcast %81 : vector<256x1xf32> to vector<256x16xf32>
    %128 = arith.mulf %126, %127 : vector<256x16xf32>
    %c128 = arith.constant 128 : index
    %c0_75 = arith.constant 0 : index
    %129 = vector.load %arg5[%c128, %c0_75] : memref<144x32xf32, #tpu.memory_space<vmem>>, vector<16x32xf32>
    %cst_76 = arith.constant dense<0.000000e+00> : vector<256x32xf32>
    %130 = tpu.matmul %128, %129, %cst_76 {dimension_numbers = #tpu.dot_dimension_numbers<[1], [0], [0], [1], [0, 0, 1, 1], [], []>} : vector<256x16xf32>, vector<16x32xf32>, vector<256x32xf32> -> vector<256x32xf32>
    %131 = arith.addf %125, %130 : vector<256x32xf32>
    %c0_77 = arith.constant 0 : index
    %c0_78 = arith.constant 0 : index
    %132 = vector.load %arg6[%c0_77, %c0_78] : memref<1x32xf32, #tpu.memory_space<vmem>>, vector<1x32xf32>
    %133 = vector.broadcast %132 : vector<1x32xf32> to vector<256x32xf32>
    %134 = arith.addf %131, %133 : vector<256x32xf32>
    %cst_79 = arith.constant 0.000000e+00 : f32
    %135 = vector.broadcast %cst_79 : f32 to vector<256x32xf32>
    %136 = arith.maximumf %134, %135 : vector<256x32xf32>
    %c72_80 = arith.constant 72 : index
    %c0_81 = arith.constant 0 : index
    %137 = vector.load %arg12[%c72_80, %c0_81] : memref<400x32xf32, #tpu.memory_space<vmem>>, vector<256x32xf32>
    tpu.vector_store %arg12[%c72_80, %c0_81], %136 {strides = array<i32>} : memref<400x32xf32, #tpu.memory_space<vmem>>, vector<256x32xf32>,
    %c74_82 = arith.constant 74 : index
    %c0_83 = arith.constant 0 : index
    %138 = vector.load %arg12[%c74_82, %c0_83] : memref<400x32xf32, #tpu.memory_space<vmem>>, vector<256x32xf32>
    %139 = arith.maximumf %136, %138 : vector<256x32xf32>
    %c104_84 = arith.constant 104 : index
    %c0_85 = arith.constant 0 : index
    %140 = vector.load %arg12[%c104_84, %c0_85] : memref<400x32xf32, #tpu.memory_space<vmem>>, vector<256x32xf32>
    %141 = arith.maximumf %139, %140 : vector<256x32xf32>
    %c106_86 = arith.constant 106 : index
    %c0_87 = arith.constant 0 : index
    %142 = vector.load %arg12[%c106_86, %c0_87] : memref<400x32xf32, #tpu.memory_space<vmem>>, vector<256x32xf32>
    %143 = arith.maximumf %141, %142 : vector<256x32xf32>
    %c0_88 = arith.constant 0 : index
    %c4_89 = arith.constant 4 : index
    %144 = vector.load %arg2[%c0_88, %c4_89] : memref<256x8xf32, #tpu.memory_space<vmem>>, vector<256x1xf32>
    %c0_90 = arith.constant 0 : index
    %c5_91 = arith.constant 5 : index
    %145 = vector.load %arg2[%c0_90, %c5_91] : memref<256x8xf32, #tpu.memory_space<vmem>>, vector<256x1xf32>
    %c72_92 = arith.constant 72 : index
    %c0_93 = arith.constant 0 : index
    %146 = vector.load %arg12[%c72_92, %c0_93] : memref<400x32xf32, #tpu.memory_space<vmem>>, vector<256x32xf32>
    tpu.vector_store %arg12[%c72_92, %c0_93], %143 {strides = array<i32>} : memref<400x32xf32, #tpu.memory_space<vmem>>, vector<256x32xf32>,
    %cst_94 = arith.constant 0.000000e+00 : f32
    %147 = vector.broadcast %cst_94 : f32 to vector<256x64xf32>
    %c4_95 = arith.constant 4 : index
    %c0_96 = arith.constant 0 : index
    %148 = vector.load %arg12[%c4_95, %c0_96] : memref<400x32xf32, #tpu.memory_space<vmem>>, vector<256x32xf32>
    %149 = vector.broadcast %144 : vector<256x1xf32> to vector<256x32xf32>
    %150 = arith.mulf %148, %149 : vector<256x32xf32>
    %c0_97 = arith.constant 0 : index
    %c0_98 = arith.constant 0 : index
    %151 = vector.load %arg7[%c0_97, %c0_98] : memref<288x64xf32, #tpu.memory_space<vmem>>, vector<32x64xf32>
    %cst_99 = arith.constant dense<0.000000e+00> : vector<256x64xf32>
    %152 = tpu.matmul %150, %151, %cst_99 {dimension_numbers = #tpu.dot_dimension_numbers<[1], [0], [0], [1], [0, 0, 1, 1], [], []>} : vector<256x32xf32>, vector<32x64xf32>, vector<256x64xf32> -> vector<256x64xf32>
    %153 = arith.addf %147, %152 : vector<256x64xf32>
    %c8_100 = arith.constant 8 : index
    %c0_101 = arith.constant 0 : index
    %154 = vector.load %arg12[%c8_100, %c0_101] : memref<400x32xf32, #tpu.memory_space<vmem>>, vector<256x32xf32>
    %c32_102 = arith.constant 32 : index
    %c0_103 = arith.constant 0 : index
    %155 = vector.load %arg7[%c32_102, %c0_103] : memref<288x64xf32, #tpu.memory_space<vmem>>, vector<32x64xf32>
    %cst_104 = arith.constant dense<0.000000e+00> : vector<256x64xf32>
    %156 = tpu.matmul %154, %155, %cst_104 {dimension_numbers = #tpu.dot_dimension_numbers<[1], [0], [0], [1], [0, 0, 1, 1], [], []>} : vector<256x32xf32>, vector<32x64xf32>, vector<256x64xf32> -> vector<256x64xf32>
    %157 = arith.addf %153, %156 : vector<256x64xf32>
    %c12 = arith.constant 12 : index
    %c0_105 = arith.constant 0 : index
    %158 = vector.load %arg12[%c12, %c0_105] : memref<400x32xf32, #tpu.memory_space<vmem>>, vector<256x32xf32>
    %159 = vector.broadcast %145 : vector<256x1xf32> to vector<256x32xf32>
    %160 = arith.mulf %158, %159 : vector<256x32xf32>
    %c64_106 = arith.constant 64 : index
    %c0_107 = arith.constant 0 : index
    %161 = vector.load %arg7[%c64_106, %c0_107] : memref<288x64xf32, #tpu.memory_space<vmem>>, vector<32x64xf32>
    %cst_108 = arith.constant dense<0.000000e+00> : vector<256x64xf32>
    %162 = tpu.matmul %160, %161, %cst_108 {dimension_numbers = #tpu.dot_dimension_numbers<[1], [0], [0], [1], [0, 0, 1, 1], [], []>} : vector<256x32xf32>, vector<32x64xf32>, vector<256x64xf32> -> vector<256x64xf32>
    %163 = arith.addf %157, %162 : vector<256x64xf32>
    %c68 = arith.constant 68 : index
    %c0_109 = arith.constant 0 : index
    %164 = vector.load %arg12[%c68, %c0_109] : memref<400x32xf32, #tpu.memory_space<vmem>>, vector<256x32xf32>
    %165 = vector.broadcast %144 : vector<256x1xf32> to vector<256x32xf32>
    %166 = arith.mulf %164, %165 : vector<256x32xf32>
    %c96_110 = arith.constant 96 : index
    %c0_111 = arith.constant 0 : index
    %167 = vector.load %arg7[%c96_110, %c0_111] : memref<288x64xf32, #tpu.memory_space<vmem>>, vector<32x64xf32>
    %cst_112 = arith.constant dense<0.000000e+00> : vector<256x64xf32>
    %168 = tpu.matmul %166, %167, %cst_112 {dimension_numbers = #tpu.dot_dimension_numbers<[1], [0], [0], [1], [0, 0, 1, 1], [], []>} : vector<256x32xf32>, vector<32x64xf32>, vector<256x64xf32> -> vector<256x64xf32>
    %169 = arith.addf %163, %168 : vector<256x64xf32>
    %c72_113 = arith.constant 72 : index
    %c0_114 = arith.constant 0 : index
    %170 = vector.load %arg12[%c72_113, %c0_114] : memref<400x32xf32, #tpu.memory_space<vmem>>, vector<256x32xf32>
    %c128_115 = arith.constant 128 : index
    %c0_116 = arith.constant 0 : index
    %171 = vector.load %arg7[%c128_115, %c0_116] : memref<288x64xf32, #tpu.memory_space<vmem>>, vector<32x64xf32>
    %cst_117 = arith.constant dense<0.000000e+00> : vector<256x64xf32>
    %172 = tpu.matmul %170, %171, %cst_117 {dimension_numbers = #tpu.dot_dimension_numbers<[1], [0], [0], [1], [0, 0, 1, 1], [], []>} : vector<256x32xf32>, vector<32x64xf32>, vector<256x64xf32> -> vector<256x64xf32>
    %173 = arith.addf %169, %172 : vector<256x64xf32>
    %c76 = arith.constant 76 : index
    %c0_118 = arith.constant 0 : index
    %174 = vector.load %arg12[%c76, %c0_118] : memref<400x32xf32, #tpu.memory_space<vmem>>, vector<256x32xf32>
    %175 = vector.broadcast %145 : vector<256x1xf32> to vector<256x32xf32>
    %176 = arith.mulf %174, %175 : vector<256x32xf32>
    %c160 = arith.constant 160 : index
    %c0_119 = arith.constant 0 : index
    %177 = vector.load %arg7[%c160, %c0_119] : memref<288x64xf32, #tpu.memory_space<vmem>>, vector<32x64xf32>
    %cst_120 = arith.constant dense<0.000000e+00> : vector<256x64xf32>
    %178 = tpu.matmul %176, %177, %cst_120 {dimension_numbers = #tpu.dot_dimension_numbers<[1], [0], [0], [1], [0, 0, 1, 1], [], []>} : vector<256x32xf32>, vector<32x64xf32>, vector<256x64xf32> -> vector<256x64xf32>
    %179 = arith.addf %173, %178 : vector<256x64xf32>
    %c132 = arith.constant 132 : index
    %c0_121 = arith.constant 0 : index
    %180 = vector.load %arg12[%c132, %c0_121] : memref<400x32xf32, #tpu.memory_space<vmem>>, vector<256x32xf32>
    %181 = vector.broadcast %144 : vector<256x1xf32> to vector<256x32xf32>
    %182 = arith.mulf %180, %181 : vector<256x32xf32>
    %c192 = arith.constant 192 : index
    %c0_122 = arith.constant 0 : index
    %183 = vector.load %arg7[%c192, %c0_122] : memref<288x64xf32, #tpu.memory_space<vmem>>, vector<32x64xf32>
    %cst_123 = arith.constant dense<0.000000e+00> : vector<256x64xf32>
    %184 = tpu.matmul %182, %183, %cst_123 {dimension_numbers = #tpu.dot_dimension_numbers<[1], [0], [0], [1], [0, 0, 1, 1], [], []>} : vector<256x32xf32>, vector<32x64xf32>, vector<256x64xf32> -> vector<256x64xf32>
    %185 = arith.addf %179, %184 : vector<256x64xf32>
    %c136 = arith.constant 136 : index
    %c0_124 = arith.constant 0 : index
    %186 = vector.load %arg12[%c136, %c0_124] : memref<400x32xf32, #tpu.memory_space<vmem>>, vector<256x32xf32>
    %c224 = arith.constant 224 : index
    %c0_125 = arith.constant 0 : index
    %187 = vector.load %arg7[%c224, %c0_125] : memref<288x64xf32, #tpu.memory_space<vmem>>, vector<32x64xf32>
    %cst_126 = arith.constant dense<0.000000e+00> : vector<256x64xf32>
    %188 = tpu.matmul %186, %187, %cst_126 {dimension_numbers = #tpu.dot_dimension_numbers<[1], [0], [0], [1], [0, 0, 1, 1], [], []>} : vector<256x32xf32>, vector<32x64xf32>, vector<256x64xf32> -> vector<256x64xf32>
    %189 = arith.addf %185, %188 : vector<256x64xf32>
    %c140 = arith.constant 140 : index
    %c0_127 = arith.constant 0 : index
    %190 = vector.load %arg12[%c140, %c0_127] : memref<400x32xf32, #tpu.memory_space<vmem>>, vector<256x32xf32>
    %191 = vector.broadcast %145 : vector<256x1xf32> to vector<256x32xf32>
    %192 = arith.mulf %190, %191 : vector<256x32xf32>
    %c256 = arith.constant 256 : index
    %c0_128 = arith.constant 0 : index
    %193 = vector.load %arg7[%c256, %c0_128] : memref<288x64xf32, #tpu.memory_space<vmem>>, vector<32x64xf32>
    %cst_129 = arith.constant dense<0.000000e+00> : vector<256x64xf32>
    %194 = tpu.matmul %192, %193, %cst_129 {dimension_numbers = #tpu.dot_dimension_numbers<[1], [0], [0], [1], [0, 0, 1, 1], [], []>} : vector<256x32xf32>, vector<32x64xf32>, vector<256x64xf32> -> vector<256x64xf32>
    %195 = arith.addf %189, %194 : vector<256x64xf32>
    %c0_130 = arith.constant 0 : index
    %c0_131 = arith.constant 0 : index
    %196 = vector.load %arg8[%c0_130, %c0_131] : memref<1x64xf32, #tpu.memory_space<vmem>>, vector<1x64xf32>
    %197 = vector.broadcast %196 : vector<1x64xf32> to vector<256x64xf32>
    %198 = arith.addf %195, %197 : vector<256x64xf32>
    %cst_132 = arith.constant 0.000000e+00 : f32
    %199 = vector.broadcast %cst_132 : f32 to vector<256x64xf32>
    %200 = arith.maximumf %198, %199 : vector<256x64xf32>
    %c0_133 = arith.constant 0 : index
    %c6_134 = arith.constant 6 : index
    %201 = vector.load %arg2[%c0_133, %c6_134] : memref<256x8xf32, #tpu.memory_space<vmem>>, vector<256x1xf32>
    %202 = vector.broadcast %201 : vector<256x1xf32> to vector<256x64xf32>
    %203 = arith.mulf %200, %202 : vector<256x64xf32>
    %cst_135 = arith.constant dense<0.000000e+00> : vector<64xf32>
    %204 = vector.multi_reduction <add>, %203, %cst_135 [0] : vector<256x64xf32> to vector<64xf32>
    %205 = vector.shape_cast %204 : vector<64xf32> to vector<1x64xf32>
    %cst_136 = arith.constant 6.250000e-02 : f32
    %206 = vector.broadcast %cst_136 : f32 to vector<1x64xf32>
    %207 = arith.mulf %205, %206 : vector<1x64xf32>
    %c0_137 = arith.constant 0 : index
    %c0_138 = arith.constant 0 : index
    %208 = vector.load %arg9[%c0_137, %c0_138] : memref<1x64xf32, #tpu.memory_space<vmem>>, vector<1x64xf32>
    %209 = arith.mulf %207, %208 : vector<1x64xf32>
    %cst_139 = arith.constant dense<0.000000e+00> : vector<1xf32>
    %210 = vector.multi_reduction <add>, %209, %cst_139 [1] : vector<1x64xf32> to vector<1xf32>
    %211 = vector.shape_cast %210 : vector<1xf32> to vector<1x1xf32>
    %c0_140 = arith.constant 0 : index
    %c0_141 = arith.constant 0 : index
    %212 = vector.load %arg10[%c0_140, %c0_141] : memref<1x1xf32, #tpu.memory_space<vmem>>, vector<1x1xf32>
    %213 = arith.addf %211, %212 : vector<1x1xf32>
    %214 = arith.negf %213 : vector<1x1xf32>
    %215 = math.exp %214 : vector<1x1xf32>
    %cst_142 = arith.constant 1.000000e+00 : f32
    %216 = vector.broadcast %cst_142 : f32 to vector<1x1xf32>
    %217 = arith.addf %216, %215 : vector<1x1xf32>
    %218 = arith.divf %216, %217 : vector<1x1xf32>
    %219 = vector.shape_cast %218 : vector<1x1xf32> to vector<1x1x1xf32>
    %220 = vector.broadcast %219 : vector<1x1x1xf32> to vector<1x1x128xf32>
    %c0_143 = arith.constant 0 : index
    %c0_144 = arith.constant 0 : index
    %c0_145 = arith.constant 0 : index
    %221 = vector.load %arg11[%c0_143, %c0_144, %c0_145] : memref<1x1x128xf32, #tpu.memory_space<vmem>>, vector<1x1x128xf32>
    tpu.vector_store %arg11[%c0_143, %c0_144, %c0_145], %220 {strides = array<i32>} : memref<1x1x128xf32, #tpu.memory_space<vmem>>, vector<1x1x128xf32>,
    return
  }
  func.func @transform_0(%arg0: i32) -> (i32, i32, i32) {
    %c0_i32 = arith.constant 0 : i32
    %c0_i32_0 = arith.constant 0 : i32
    %c0_i32_1 = arith.constant 0 : i32
    return %arg0, %c0_i32, %c0_i32_0 : i32, i32, i32
  }
  func.func @transform_1(%arg0: i32) -> (i32, i32) {
    %c0_i32 = arith.constant 0 : i32
    %c0_i32_0 = arith.constant 0 : i32
    %c0_i32_1 = arith.constant 0 : i32
    return %c0_i32, %c0_i32_0 : i32, i32
  }
  func.func @transform_2(%arg0: i32) -> (i32, i32) {
    %c0_i32 = arith.constant 0 : i32
    %c0_i32_0 = arith.constant 0 : i32
    %c0_i32_1 = arith.constant 0 : i32
    return %c0_i32, %c0_i32_0 : i32, i32
  }
  func.func @transform_3(%arg0: i32) -> (i32, i32) {
    %c0_i32 = arith.constant 0 : i32
    %c0_i32_0 = arith.constant 0 : i32
    %c0_i32_1 = arith.constant 0 : i32
    return %c0_i32, %c0_i32_0 : i32, i32
  }
  func.func @transform_4(%arg0: i32) -> (i32, i32) {
    %c0_i32 = arith.constant 0 : i32
    %c0_i32_0 = arith.constant 0 : i32
    %c0_i32_1 = arith.constant 0 : i32
    return %c0_i32, %c0_i32_0 : i32, i32
  }
  func.func @transform_5(%arg0: i32) -> (i32, i32) {
    %c0_i32 = arith.constant 0 : i32
    %c0_i32_0 = arith.constant 0 : i32
    %c0_i32_1 = arith.constant 0 : i32
    return %c0_i32, %c0_i32_0 : i32, i32
  }
  func.func @transform_6(%arg0: i32) -> (i32, i32) {
    %c0_i32 = arith.constant 0 : i32
    %c0_i32_0 = arith.constant 0 : i32
    %c0_i32_1 = arith.constant 0 : i32
    return %c0_i32, %c0_i32_0 : i32, i32
  }
  func.func @transform_7(%arg0: i32) -> (i32, i32) {
    %c0_i32 = arith.constant 0 : i32
    %c0_i32_0 = arith.constant 0 : i32
    %c0_i32_1 = arith.constant 0 : i32
    return %c0_i32, %c0_i32_0 : i32, i32
  }
  func.func @transform_8(%arg0: i32) -> (i32, i32) {
    %c0_i32 = arith.constant 0 : i32
    %c0_i32_0 = arith.constant 0 : i32
    %c0_i32_1 = arith.constant 0 : i32
    return %c0_i32, %c0_i32_0 : i32, i32
  }
  func.func @transform_9(%arg0: i32) -> (i32, i32) {
    %c0_i32 = arith.constant 0 : i32
    %c0_i32_0 = arith.constant 0 : i32
    %c0_i32_1 = arith.constant 0 : i32
    return %c0_i32, %c0_i32_0 : i32, i32
  }
  func.func @transform_10(%arg0: i32) -> (i32, i32, i32) {
    %c0_i32 = arith.constant 0 : i32
    %c0_i32_0 = arith.constant 0 : i32
    %c0_i32_1 = arith.constant 0 : i32
    return %arg0, %c0_i32, %c0_i32_0 : i32, i32, i32
  }
}

</mosaic_0001>

<bundles_post_ra>
// kernel: audio_cnn_forward.1
= control target key start
LH: loop header
LB: loop body
LE: loop exit
PB: predicated region body
PF: predicated region fallthrough
CT: control target
= control target key end

     0   :  { %s15083_s15 = smov 0   ;;  %s20796_s0 = inlined_call_operand.vmem [shape: f32[2,256,1], index: 0, kind: input, shape index: {}]   ;;  %s20797_s1 = inlined_call_operand.vmem [shape: f32[256,8], index: 1, kind: input, shape index: {}]   ;;  %s20798_s2 = inlined_call_operand.vmem [shape: f32[9,16], index: 2, kind: input, shape index: {}]   ;;  %s20799_s3 = inlined_call_operand.vmem [shape: f32[1,16], index: 3, kind: input, shape index: {}]   ;;  %s20800_s4 = inlined_call_operand.vmem [shape: f32[144,32], index: 4, kind: input, shape index: {}]   ;;  %s20801_s5 = inlined_call_operand.vmem [shape: f32[1,32], index: 5, kind: input, shape index: {}]   ;;  %s20802_s6 = inlined_call_operand.vmem [shape: f32[288,64], index: 6, kind: input, shape index: {}]   ;;  %s20803_s7 = inlined_call_operand.vmem [shape: f32[1,64], index: 7, kind: input, shape index: {}]   ;;  %s20804_s8 = inlined_call_operand.vmem [shape: f32[1,64], index: 8, kind: input, shape index: {}]   ;;  %s20805_s9 = inlined_call_operand.<no memory space> [shape: f32[1,1], index: 9, kind: input, shape index: {}]   ;;  %s20806_s10 = inlined_call_operand.vmem [shape: f32[2,1,128], index: 10, kind: output, shape index: {}]  }
   0x1   :  { %v15_v0 = vstv %s20805_s9 }
   0x2   :  { %16 = vst [vmem:[#allocation3] sm:$0x1] %v15_v0 }
   0x3 LB: > { %s12085_s16 = sadd.s32 4294967295, %s15015_s15   ;;  %p12089_p0 = scmp.ge.s32.totalorder %s15015_s15, 1  ;;  %s15015_s15 = sphi %s15083_s15, %s22_s15  }
   0x4   : > { %p314_p1 = scmp.lt.s32.totalorder %s15015_s15, 3 }
   0x6   : > { %p315_p2 = pnand %p12089_p0, %p314_p1 }
   0x8   : > { %318 = sbr.rel (%p315_p2) target bundleno = 2687 (0xa7f), region = 60 }
   0xf   : > { %v15094_v1 = vld [vmem:[%s20797_s1 + $0x8] sm:$0xff]  ;;  %v15099_v2 = vld [vmem:[%s20797_s1] sm:$0xff]  ;;  %vm358_vm0 = vcmask 261120   ;;  %s15017_s20 = smov 127   ;;  %p15107_p3 = scmp.lt.s32.totalorder %s12085_s16, 1  ;;  %v15114_v3 = vld [vmem:[%s20797_s1 + $0x18] sm:$0xff] }
  0x10   : > { %1126 = vrot.lane.b32.xlu1 %v15094_v1, %s15017_s20  ;;  %1124 = vrot.lane.b32.xlu0 %v15099_v2, %s15017_s20  ;;  %v20807_v4 = vmov 0   ;;  %v15019_v5 = vmov 0.0   ;;  %vm473_vm1 = vcmask 7168   ;;  %v15180_v6 = vld [vmem:[%s20797_s1 + $0x28] sm:$0xff]  ;;  %v15199_v14 = vld [vmem:[%s20797_s1 + $0x10] sm:$0xff]  ;;  %vm3246_vm2 = vcmask 130048  }
  0x11   : > { %14922 = vset.pattern.permute.xlu0 %v20807_v4  ;;  %365 = vst.msk [vmem:[#allocation2 + $0x30] sm:$0xff] %vm358_vm0, %v15019_v5  ;;  %366 = vst.msk [vmem:[#allocation2 + $0x38] sm:$0xff] %vm358_vm0, %v15019_v5  ;;  %14923 = vset.pattern.permute.xlu1 %v20807_v4  ;;  %s21826_s16 = smov (!%p15107_p3, %s12085_s16), 1  ;;  %v15227_v25 = vld [vmem:[%s20797_s1 + $0x20] sm:$0xff]  ;;  %v15232_v26 = vld [vmem:[%s20797_s1 + $0x38] sm:$0xff]  ;;  %vm11947_vm3 = vcmask 523264  }
  0x12   : > { %359 = vst.msk [vmem:[#allocation2] sm:$0xff] %vm358_vm0, %v15019_v5  ;;  %360 = vst.msk [vmem:[#allocation2 + $0x8] sm:$0xff] %vm358_vm0, %v15019_v5  ;;  %s12683_s24 = sshll.u32 %s21826_s16, 8  ;;  %v15241_v29 = vld [vmem:[%s20797_s1 + $0x30] sm:$0xff]  ;;  %v15250_v30 = vld [vmem:[%s20797_s1 + $0x48] sm:$0xff]  ;;  %vm12020_vm4 = vcmask 516096   ;;  %s357_s28 = scalar_lea.vmem %s20806_s10, %s21826_s16 }
  0x13   : > { %361 = vst.msk [vmem:[#allocation2 + $0x10] sm:$0xff] %vm358_vm0, %v15019_v5  ;;  %362 = vst.msk [vmem:[#allocation2 + $0x18] sm:$0xff] %vm358_vm0, %v15019_v5  ;;  %s15185_s29 = scalar_lea.vmem %s20796_s0, %s12683_s24  ;;  %v15259_v33 = vld [vmem:[%s20797_s1 + $0x40] sm:$0xff]  ;;  %v15268_v34 = vld [vmem:[%s20797_s1 + $0x58] sm:$0xff] }
  0x14   : > { %363 = vst.msk [vmem:[#allocation2 + $0x20] sm:$0xff] %vm358_vm0, %v15019_v5  ;;  %364 = vst.msk [vmem:[#allocation2 + $0x28] sm:$0xff] %vm358_vm0, %v15019_v5  ;;  %1130 = vrot.lane.b32.xlu1 %v15114_v3, %s15017_s20  ;;  %v409_v7 = vld [vmem:[%s15185_s29] sm:$0xff]  ;;  %v410_v8 = vld [vmem:[%s15185_s29 + $0x8] sm:$0xff] }
  0x15   : > { %367 = vst.msk [vmem:[#allocation2 + $0x40] sm:$0xff] %vm358_vm0, %v15019_v5  ;;  %368 = vst.msk [vmem:[#allocation2 + $0x48] sm:$0xff] %vm358_vm0, %v15019_v5  ;;  %v411_v13 = vld [vmem:[%s15185_s29 + $0x10] sm:$0xff]  ;;  %v412_v15 = vld [vmem:[%s15185_s29 + $0x18] sm:$0xff] }
  0x16   : > { %369 = vst.msk [vmem:[#allocation2 + $0x50] sm:$0xff] %vm358_vm0, %v15019_v5  ;;  %370 = vst.msk [vmem:[#allocation2 + $0x58] sm:$0xff] %vm358_vm0, %v15019_v5  ;;  %v413_v16 = vld [vmem:[%s15185_s29 + $0x20] sm:$0xff]  ;;  %v414_v17 = vld [vmem:[%s15185_s29 + $0x28] sm:$0xff] }
  0x17   : > { %371 = vst.msk [vmem:[#allocation2 + $0x60] sm:$0xff] %vm358_vm0, %v15019_v5  ;;  %372 = vst.msk [vmem:[#allocation2 + $0x68] sm:$0xff] %vm358_vm0, %v15019_v5  ;;  %v415_v18 = vld [vmem:[%s15185_s29 + $0x30] sm:$0xff]  ;;  %v416_v22 = vld [vmem:[%s15185_s29 + $0x38] sm:$0xff] }
  0x18   : > { %373 = vst.msk [vmem:[#allocation2 + $0x70] sm:$0xff] %vm358_vm0, %v15019_v5  ;;  %374 = vst.msk [vmem:[#allocation2 + $0x78] sm:$0xff] %vm358_vm0, %v15019_v5  ;;  %v506_v9 = vld [vmem:[#allocation2 + $0x37] sm:$0xff]  ;;  %1134 = vrot.lane.b32.xlu1 %v15180_v6, %s15017_s20  ;;  %v417_v23 = vld [vmem:[%s15185_s29 + $0x40] sm:$0xff] }
  0x19   : > { %375 = vst.msk [vmem:[#allocation2 + $0x80] sm:$0xff] %vm358_vm0, %v15019_v5  ;;  %376 = vst.msk [vmem:[#allocation2 + $0x88] sm:$0xff] %vm358_vm0, %v15019_v5  ;;  %v538_v11 = vmul.f32 %v506_v9, %v15099_v2  ;;  %v418_v27 = vld [vmem:[%s15185_s29 + $0x48] sm:$0xff]  ;;  %v419_v28 = vld [vmem:[%s15185_s29 + $0x50] sm:$0xff] }
  0x1a   : > { %377 = vst.msk [vmem:[#allocation2 + $0x90] sm:$0xff] %vm358_vm0, %v15019_v5  ;;  %378 = vst.msk [vmem:[#allocation2 + $0x98] sm:$0xff] %vm358_vm0, %v15019_v5  ;;  %v420_v31 = vld [vmem:[%s15185_s29 + $0x58] sm:$0xff]  ;;  %v421_v32 = vld [vmem:[%s15185_s29 + $0x60] sm:$0xff] }
  0x1b   : > { %379 = vst.msk [vmem:[#allocation2 + $0xa0] sm:$0xff] %vm358_vm0, %v15019_v5  ;;  %380 = vst.msk [vmem:[#allocation2 + $0xa8] sm:$0xff] %vm358_vm0, %v15019_v5  ;;  %573 = vperm.xlu0 %14922, %v538_v11   ;;  %v422_v35 = vld [vmem:[%s15185_s29 + $0x68] sm:$0xff]  ;;  %v15276_v36 = vld [vmem:[%s20797_s1 + $0x50] sm:$0xff] }
  0x1c   : > { %381 = vst.msk [vmem:[#allocation2 + $0xb0] sm:$0xff] %vm358_vm0, %v15019_v5  ;;  %382 = vst.msk [vmem:[#allocation2 + $0xb8] sm:$0xff] %vm358_vm0, %v15019_v5  ;;  %v507_v10 = vld [vmem:[#allocation2 + $0x3f] sm:$0xff]  ;;  %v423_v37 = vld [vmem:[%s15185_s29 + $0x70] sm:$0xff] }
  0x1d   : > { %383 = vst.msk [vmem:[#allocation2 + $0xc0] sm:$0xff] %vm358_vm0, %v15019_v5  ;;  %384 = vst.msk [vmem:[#allocation2 + $0xc8] sm:$0xff] %vm358_vm0, %v15019_v5  ;;  %v539_v12 = vmul.f32 %v507_v10, %v15094_v1  ;;  %v15286_v38 = vld [vmem:[%s20797_s1 + $0x68] sm:$0xff]  ;;  %v424_v39 = vld [vmem:[%s15185_s29 + $0x78] sm:$0xff] }
  0x1e   : > { %385 = vst.msk [vmem:[#allocation2 + $0xd0] sm:$0xff] %vm358_vm0, %v15019_v5  ;;  %386 = vst.msk [vmem:[#allocation2 + $0xd8] sm:$0xff] %vm358_vm0, %v15019_v5  ;;  %v15294_v40 = vld [vmem:[%s20797_s1 + $0x60] sm:$0xff]  ;;  %v15304_v42 = vld [vmem:[%s20797_s1 + $0x78] sm:$0xff] }
  0x1f   : > { %387 = vst.msk [vmem:[#allocation2 + $0xe0] sm:$0xff] %vm358_vm0, %v15019_v5  ;;  %388 = vst.msk [vmem:[#allocation2 + $0xe8] sm:$0xff] %vm358_vm0, %v15019_v5  ;;  %578 = vperm.xlu0 %14922, %v539_v12   ;;  %v425_v41 = vld [vmem:[%s15185_s29 + $0x80] sm:$0xff]  ;;  %v426_v43 = vld [vmem:[%s15185_s29 + $0x88] sm:$0xff] }
  0x20   : > { %389 = vst.msk [vmem:[#allocation2 + $0xf0] sm:$0xff] %vm358_vm0, %v15019_v5  ;;  %390 = vst.msk [vmem:[#allocation2 + $0xf8] sm:$0xff] %vm358_vm0, %v15019_v5  ;;  %v427_v44 = vld [vmem:[%s15185_s29 + $0x90] sm:$0xff]  ;;  %v15322_v46 = vld [vmem:[%s20797_s1 + $0x88] sm:$0xff] }
  0x21   : > { %391 = vst.msk [vmem:[#allocation2 + $0x100] sm:$0xff] %vm358_vm0, %v15019_v5  ;;  %392 = vst.msk [vmem:[#allocation2 + $0x108] sm:$0xff] %vm358_vm0, %v15019_v5  ;;  %v15313_v45 = vld [vmem:[%s20797_s1 + $0x70] sm:$0xff]  ;;  %v428_v47 = vld [vmem:[%s15185_s29 + $0x98] sm:$0xff] }
  0x22   : > { %393 = vst.msk [vmem:[#allocation2 + $0x110] sm:$0xff] %vm358_vm0, %v15019_v5  ;;  %394 = vst.msk [vmem:[#allocation2 + $0x118] sm:$0xff] %vm358_vm0, %v15019_v5  ;;  %v429_v48 = vld [vmem:[%s15185_s29 + $0xa0] sm:$0xff]  ;;  %v460_v50 = vld [vmem:[%s20797_s1 + $0x98] sm:$0xff] }
  0x23   : > { %395 = vst.msk [vmem:[#allocation2 + $0x120] sm:$0xff] %vm358_vm0, %v15019_v5  ;;  %396 = vst.msk [vmem:[#allocation2 + $0x128] sm:$0xff] %vm358_vm0, %v15019_v5  ;;  %1128 = vrot.lane.b32.xlu0 %v15199_v14, %s15017_s20  ;;  %v15331_v49 = vld [vmem:[%s20797_s1 + $0x80] sm:$0xff]  ;;  %v430_v51 = vld [vmem:[%s15185_s29 + $0xa8] sm:$0xff] }
  0x24   : > { %397 = vst.msk [vmem:[#allocation2 + $0x130] sm:$0xff] %vm358_vm0, %v15019_v5  ;;  %398 = vst.msk [vmem:[#allocation2 + $0x138] sm:$0xff] %vm358_vm0, %v15019_v5  ;;  %v15346_v52 = vld [vmem:[%s20797_s1 + $0x90] sm:$0xff]  ;;  %v462_v54 = vld [vmem:[%s20797_s1 + $0xa8] sm:$0xff] }
  0x25   : > { %399 = vst.msk [vmem:[#allocation2 + $0x140] sm:$0xff] %vm358_vm0, %v15019_v5  ;;  %400 = vst.msk [vmem:[#allocation2 + $0x148] sm:$0xff] %vm358_vm0, %v15019_v5  ;;  %v431_v53 = vld [vmem:[%s15185_s29 + $0xb0] sm:$0xff]  ;;  %v432_v55 = vld [vmem:[%s15185_s29 + $0xb8] sm:$0xff] }
  0x26   : > { %401 = vst.msk [vmem:[#allocation2 + $0x150] sm:$0xff] %vm358_vm0, %v15019_v5  ;;  %402 = vst.msk [vmem:[#allocation2 + $0x158] sm:$0xff] %vm358_vm0, %v15019_v5  ;;  %v461_v56 = vld [vmem:[%s20797_s1 + $0xa0] sm:$0xff]  ;;  %v464_v58 = vld [vmem:[%s20797_s1 + $0xb8] sm:$0xff] }
  0x27   : > { %403 = vst.msk [vmem:[#allocation2 + $0x160] sm:$0xff] %vm358_vm0, %v15019_v5  ;;  %404 = vst.msk [vmem:[#allocation2 + $0x168] sm:$0xff] %vm358_vm0, %v15019_v5  ;;  %1132 = vrot.lane.b32.xlu0 %v15227_v25, %s15017_s20  ;;  %v433_v57 = vld [vmem:[%s15185_s29 + $0xc0] sm:$0xff]  ;;  %v434_v59 = vld [vmem:[%s15185_s29 + $0xc8] sm:$0xff] }
  0x28   : > { %405 = vst.msk [vmem:[#allocation2 + $0x170] sm:$0xff] %vm358_vm0, %v15019_v5  ;;  %406 = vst.msk [vmem:[#allocation2 + $0x178] sm:$0xff] %vm358_vm0, %v15019_v5  ;;  %v435_v60 = vld [vmem:[%s15185_s29 + $0xd0] sm:$0xff]  ;;  %v466_v62 = vld [vmem:[%s20797_s1 + $0xc8] sm:$0xff] }
  0x29   : > { %407 = vst.msk [vmem:[#allocation2 + $0x180] sm:$0xff] %vm358_vm0, %v15019_v5  ;;  %408 = vst.msk [vmem:[#allocation2 + $0x188] sm:$0xff] %vm358_vm0, %v15019_v5  ;;  %v463_v61 = vld [vmem:[%s20797_s1 + $0xb0] sm:$0xff]  ;;  %v436_v63 = vld [vmem:[%s15185_s29 + $0xd8] sm:$0xff] }
  0x2a   : > { %474 = vst.msk [vmem:[#allocation2 + $0x48] sm:$0xff] %vm473_vm1, %v409_v7  ;;  %475 = vst.msk [vmem:[#allocation2 + $0x50] sm:$0xff] %vm473_vm1, %v410_v8  ;;  %v437_v0 = vld [vmem:[%s15185_s29 + $0xe0] sm:$0xff]  ;;  %v468_v7 = vld [vmem:[%s20797_s1 + $0xd8] sm:$0xff] }
  0x2b   : > { %476 = vst.msk [vmem:[#allocation2 + $0x58] sm:$0xff] %vm473_vm1, %v411_v13  ;;  %477 = vst.msk [vmem:[#allocation2 + $0x60] sm:$0xff] %vm473_vm1, %v412_v15  ;;  %1136 = vrot.lane.b32.xlu0 %v15241_v29, %s15017_s20  ;;  %v465_v5 = vld [vmem:[%s20797_s1 + $0xc0] sm:$0xff]  ;;  %v438_v8 = vld [vmem:[%s15185_s29 + $0xe8] sm:$0xff] }
  0x2c   : > { %478 = vst.msk [vmem:[#allocation2 + $0x68] sm:$0xff] %vm473_vm1, %v413_v16  ;;  %479 = vst.msk [vmem:[#allocation2 + $0x70] sm:$0xff] %vm473_vm1, %v414_v17  ;;  %v467_v9 = vld [vmem:[%s20797_s1 + $0xd0] sm:$0xff]  ;;  %v470_v11 = vld [vmem:[%s20797_s1 + $0xe8] sm:$0xff] }
  0x2d   : > { %480 = vst.msk [vmem:[#allocation2 + $0x78] sm:$0xff] %vm473_vm1, %v415_v18  ;;  %481 = vst.msk [vmem:[#allocation2 + $0x80] sm:$0xff] %vm473_vm1, %v416_v22  ;;  %v439_v10 = vld [vmem:[%s15185_s29 + $0xf0] sm:$0xff]  ;;  %v440_v12 = vld [vmem:[%s15185_s29 + $0xf8] sm:$0xff] }
  0x2e   : > { %482 = vst.msk [vmem:[#allocation2 + $0x88] sm:$0xff] %vm473_vm1, %v417_v23  ;;  %483 = vst.msk [vmem:[#allocation2 + $0x90] sm:$0xff] %vm473_vm1, %v418_v27  ;;  %v469_v13 = vld [vmem:[%s20797_s1 + $0xe0] sm:$0xff]  ;;  %v799_v15 = vld [vmem:[#allocation2 + $0x38] sm:$0xff] }
  0x2f   : > { %484 = vst.msk [vmem:[#allocation2 + $0x98] sm:$0xff] %vm473_vm1, %v419_v28  ;;  %485 = vst.msk [vmem:[#allocation2 + $0xa0] sm:$0xff] %vm473_vm1, %v420_v31  ;;  %1140 = vrot.lane.b32.xlu0 %v15259_v33, %s15017_s20  ;;  %v471_v16 = vld [vmem:[%s20797_s1 + $0xf0] sm:$0xff]  ;;  %v800_v18 = vld [vmem:[#allocation2 + $0x40] sm:$0xff] }
  0x30   : > { %486 = vst.msk [vmem:[#allocation2 + $0xa8] sm:$0xff] %vm473_vm1, %v421_v32  ;;  %487 = vst.msk [vmem:[#allocation2 + $0xb0] sm:$0xff] %vm473_vm1, %v422_v35 }
  0x31   : > { %v15208_v19 = vld [vmem:[#allocation2 + $0x47] sm:$0xff]  ;;  %v15210_v20 = vld [vmem:[#allocation2 + $0x4f] sm:$0xff]  ;;  %488 = vst.msk [vmem:[#allocation2 + $0xb8] sm:$0xff] %vm473_vm1, %v423_v37  ;;  %489 = vst.msk [vmem:[#allocation2 + $0xc0] sm:$0xff] %vm473_vm1, %v424_v39 }
  0x32   : > { %v540_v21 = vmul.f32 %v15208_v19, %v15199_v14  ;;  %v541_v24 = vmul.f32 %v15210_v20, %v15114_v3  ;;  %490 = vst.msk [vmem:[#allocation2 + $0xc8] sm:$0xff] %vm473_vm1, %v425_v41  ;;  %491 = vst.msk [vmem:[#allocation2 + $0xd0] sm:$0xff] %vm473_vm1, %v426_v43  ;;  %v801_v17 = vld [vmem:[#allocation2 + $0x48] sm:$0xff]  ;;  %v802_v22 = vld [vmem:[#allocation2 + $0x50] sm:$0xff]  ;;  %v1513_v27 = vmul.f32 %v15208_v19, %v15099_v2 }
  0x33   : > { %1144 = vrot.lane.b32.xlu0 %v15276_v36, %s15017_s20  ;;  %492 = vst.msk [vmem:[#allocation2 + $0xd8] sm:$0xff] %vm473_vm1, %v427_v44  ;;  %493 = vst.msk [vmem:[#allocation2 + $0xe0] sm:$0xff] %vm473_vm1, %v428_v47  ;;  %v15418_v23 = vld [vmem:[#allocation2 + $0x58] sm:$0xff]  ;;  %v15429_v32 = vld [vmem:[#allocation2 + $0x60] sm:$0xff] }
  0x34   : > { %583 = vperm.xlu1 %14923, %v540_v21   ;;  %494 = vst.msk [vmem:[#allocation2 + $0xe8] sm:$0xff] %vm473_vm1, %v429_v48  ;;  %495 = vst.msk [vmem:[#allocation2 + $0xf0] sm:$0xff] %vm473_vm1, %v430_v51  ;;  %v1514_v21 = vmul.f32 %v15210_v20, %v15094_v1  ;;  %v511_v31 = vld [vmem:[#allocation2 + $0x5f] sm:$0xff]  ;;  %v15434_v37 = vld [vmem:[#allocation2 + $0x67] sm:$0xff] }
  0x35   : > { %496 = vst.msk [vmem:[#allocation2 + $0xf8] sm:$0xff] %vm473_vm1, %v431_v53  ;;  %497 = vst.msk [vmem:[#allocation2 + $0x100] sm:$0xff] %vm473_vm1, %v432_v55  ;;  %v543_v35 = vmul.f32 %v511_v31, %v15180_v6  ;;  %v1516_v19 = vmul.f32 %v511_v31, %v15114_v3  ;;  %v544_v39 = vmul.f32 %v15434_v37, %v15241_v29  ;;  %v15439_v41 = vld [vmem:[#allocation2 + $0x68] sm:$0xff]  ;;  %v1060_v43 = vld [vmem:[#allocation2 + $0x39] sm:$0xff] }
  0x36   : > { %498 = vst.msk [vmem:[#allocation2 + $0x108] sm:$0xff] %vm473_vm1, %v433_v57  ;;  %499 = vst.msk [vmem:[#allocation2 + $0x110] sm:$0xff] %vm473_vm1, %v434_v59  ;;  %v1061_v44 = vld [vmem:[#allocation2 + $0x41] sm:$0xff]  ;;  %v1063_v53 = vld [vmem:[#allocation2 + $0x51] sm:$0xff] }
  0x37   : > { %1148 = vrot.lane.b32.xlu0 %v15294_v40, %s15017_s20  ;;  %500 = vst.msk [vmem:[#allocation2 + $0x118] sm:$0xff] %vm473_vm1, %v435_v60  ;;  %501 = vst.msk [vmem:[#allocation2 + $0x120] sm:$0xff] %vm473_vm1, %v436_v63 }
  0x38   : > { %588 = vperm.xlu1 %14923, %v541_v24   ;;  %502 = vst.msk [vmem:[#allocation2 + $0x128] sm:$0xff] %vm473_vm1, %v437_v0  ;;  %503 = vst.msk [vmem:[#allocation2 + $0x130] sm:$0xff] %vm473_vm1, %v438_v8  ;;  %v15420_v24 = vld [vmem:[#allocation2 + $0x57] sm:$0xff] }
  0x39   : > { %504 = vst.msk [vmem:[#allocation2 + $0x138] sm:$0xff] %vm473_vm1, %v439_v10  ;;  %505 = vst.msk [vmem:[#allocation2 + $0x140] sm:$0xff] %vm473_vm1, %v440_v12  ;;  %v1515_v28 = vmul.f32 %v15420_v24, %v15199_v14  ;;  %v542_v20 = vmul.f32 %v15420_v24, %v15227_v25  ;;  %v15473_v10 = vld [vmem:[#allocation2 + $0x61] sm:$0xff] }
  0x3b   : > { %1152 = vrot.lane.b32.xlu0 %v15313_v45, %s15017_s20 }
  0x3c   : > { %1138 = vrot.lane.b32.xlu1 %v15232_v26, %s15017_s20 }
  0x3f   : > { %1156 = vrot.lane.b32.xlu0 %v15331_v49, %s15017_s20 }
  0x40   : > { %1142 = vrot.lane.b32.xlu1 %v15250_v30, %s15017_s20 }
  0x43   : > { %1160 = vrot.lane.b32.xlu0 %v15346_v52, %s15017_s20 }
  0x44   : > { %1146 = vrot.lane.b32.xlu1 %v15268_v34, %s15017_s20 }
  0x47   : > { %1164 = vrot.lane.b32.xlu0 %v461_v56, %s15017_s20 }
  0x48   : > { %1150 = vrot.lane.b32.xlu1 %v15286_v38, %s15017_s20 }
  0x4b   : > { %1168 = vrot.lane.b32.xlu0 %v463_v61, %s15017_s20  ;;  %v1062_v61 = vld [vmem:[#allocation2 + $0x49] sm:$0xff] }
  0x4c   : > { %1154 = vrot.lane.b32.xlu1 %v15304_v42, %s15017_s20 }
  0x4f   : > { %1172 = vrot.lane.b32.xlu0 %v465_v5, %s15017_s20  ;;  %v15466_v5 = vld [vmem:[#allocation2 + $0x59] sm:$0xff] }
  0x50   : > { %1158 = vrot.lane.b32.xlu1 %v15322_v46, %s15017_s20 }
  0x53   : > { %1176 = vrot.lane.b32.xlu0 %v467_v9, %s15017_s20 }
  0x54   : > { %1162 = vrot.lane.b32.xlu1 %v460_v50, %s15017_s20 }
  0x57   : > { %1180 = vrot.lane.b32.xlu0 %v469_v13, %s15017_s20 }
  0x58   : > { %1166 = vrot.lane.b32.xlu1 %v462_v54, %s15017_s20 }
  0x5b   : > { %1184 = vrot.lane.b32.xlu0 %v471_v16, %s15017_s20  ;;  %v1517_v16 = vmul.f32 %v15434_v37, %v15227_v25 }
  0x5c   : > { %1170 = vrot.lane.b32.xlu1 %v464_v58, %s15017_s20 }
  0x5f   : > { %839 = vperm.xlu0 %14922, %v800_v18  }
  0x60   : > { %1174 = vrot.lane.b32.xlu1 %v466_v62, %s15017_s20 }
  0x63   : > { %849 = vperm.xlu0 %14922, %v802_v22  }
  0x64   : > { %1178 = vrot.lane.b32.xlu1 %v468_v7, %s15017_s20 }
  0x67   : > { %1548 = vperm.xlu0 %14922, %v1513_v27   ;;  %v513_v27 = vld [vmem:[#allocation2 + $0x6f] sm:$0xff] }
  0x68   : > { %1182 = vrot.lane.b32.xlu1 %v470_v11, %s15017_s20 }
  0x6b   : > { %593 = vperm.xlu0 %14922, %v542_v20   ;;  %v2361_v20 = vmul.f32 %v511_v31, %v15094_v1  ;;  %v1518_v1 = vmul.f32 %v513_v27, %v15180_v6 }
  0x6c   : > { %834 = vperm.xlu1 %14923, %v799_v15  }
  0x6f   : > { %1809 = vperm.xlu0 %14922, %v801_v17  }
  0x70   : > { %844 = vperm.xlu1 %14923, %v801_v17  }
  0x73   : > { %598 = vperm.xlu0 %14922, %v543_v35   ;;  %v545_v35 = vmul.f32 %v513_v27, %v15232_v26 }
  0x74   : > { %1553 = vperm.xlu1 %14923, %v1514_v21   ;;  %v2360_v21 = vmul.f32 %v15420_v24, %v15099_v2 }
  0x77   : > { %1819 = vperm.xlu0 %14922, %v15418_v23  }
  0x78   : > { %854 = vperm.xlu1 %14923, %v15418_v23  }
  0x7b   : > { %864 = vperm.xlu0 %14922, %v15439_v41  }
  0x7c   : > { %1558 = vperm.xlu1 %14923, %v1515_v28  }
  0x80   : > { %1814 = vperm.xlu1 %14923, %v802_v22  }
  0x82   : > { %v15442_v47 = vpop.permute.xlu1 %1126  ;;  %v15444_v48 = vpop.permute.xlu0 %1124 }
  0x83   : > { %v1220_v50 = vmul.f32 %v15444_v48, %v1060_v43  ;;  %v1221_v51 = vmul.f32 %v15442_v47, %v1061_v44  ;;  %v2067_v8 = vmul.f32 %v15444_v48, %v1062_v61  ;;  %v2068_v13 = vmul.f32 %v15442_v47, %v1063_v53  ;;  %v15501_v43 = vld [vmem:[#allocation2 + $0x69] sm:$0xff] }
  0x84   : > { %859 = vperm.xlu1 %14923, %v15429_v32   ;;  %v15507_v44 = vld [vmem:[#allocation2 + $0x70] sm:$0xff] }
  0x85   : > { %1255 = vperm.xlu0 %14922, %v1220_v50  }
  0x86   : > { %v15448_v54 = vpop.permute.xlu1 %1130 }
  0x87   : > { %v1223_v55 = vmul.f32 %v15448_v54, %v1063_v53 }
  0x88   : > { %1563 = vperm.xlu1 %14923, %v1516_v19  }
  0x89   : > { %1270 = vperm.xlu0 %14922, %v1223_v55   ;;  %v2070_v55 = vmul.f32 %v15448_v54, %v15473_v10 }
  0x8a   : > { %v15453_v57 = vpop.permute.xlu1 %1134 }
  0x8b   : > { %v1225_v11 = vmul.f32 %v15453_v57, %v15473_v10 }
  0x8c   : > { %603 = vperm.xlu1 %14923, %v544_v39  }
  0x90   : > { %1260 = vperm.xlu1 %14923, %v1221_v51   ;;  %v2362_v51 = vmul.f32 %v15434_v37, %v15199_v14 }
  0x9a   : > { %v15451_v56 = vpop.permute.xlu0 %573 }
  0x9e   : > { %v15455_v58 = vpop.permute.xlu0 %578 }
  0xa2   : > { %v15459_v60 = vpop.permute.xlu0 %1128 }
  0xa3   : > { %v1222_v62 = vmul.f32 %v15459_v60, %v1062_v61  ;;  %v2069_v28 = vmul.f32 %v15459_v60, %v15466_v5 }
  0xa5   : > { %1265 = vperm.xlu1 %14923, %v1222_v62   ;;  %v514_v62 = vld [vmem:[#allocation2 + $0x77] sm:$0xff] }
  0xa6   : > { %v15464_v0 = vpop.permute.xlu0 %1132  ;;  %v1519_v37 = vmul.f32 %v514_v62, %v15241_v29 }
  0xa7   : > { %v1224_v7 = vmul.f32 %v15464_v0, %v15466_v5 }
  0xa9   : > { %1275 = vperm.xlu0 %14922, %v1224_v7   ;;  %2102 = vperm.xlu1 %14923, %v2067_v8   ;;  %v546_v8 = vmul.f32 %v514_v62, %v15259_v33 }
  0xaa   : > { %v15477_v12 = vpop.permute.xlu0 %1136 }
  0xab   : > { %v1226_v2 = vmul.f32 %v15477_v12, %v15501_v43 }
  0xad   : > { %2107 = vperm.xlu0 %14922, %v2068_v13   ;;  %1280 = vperm.xlu1 %14923, %v1225_v11   ;;  %v15529_v11 = vld [vmem:[#allocation2 + $0x78] sm:$0xff] }
  0xae   : > { %v15484_v17 = vpop.permute.xlu0 %1140  ;;  %v15535_v13 = vld [vmem:[#allocation2 + $0x71] sm:$0xff] }
  0xb1   : > { %1568 = vperm.xlu0 %14922, %v1517_v16   ;;  %1824 = vperm.xlu1 %14923, %v15429_v32  }
  0xb2   : > { %v15491_v22 = vpop.permute.xlu0 %1144 }
  0xb3   : > { %v15457_v59 = vpop.permute.xlu1 %583  ;;  %21140 = vst [vmem:[#allocation5_spill] sm:$0xff] %v15491_v22 }
  0xb5   : > { %2112 = vperm.xlu0 %14922, %v2069_v28   ;;  %2395 = vperm.xlu1 %14923, %v2360_v21   ;;  %v2071_v21 = vmul.f32 %v15464_v0, %v15501_v43 }
  0xb6   : > { %v15499_v39 = vpop.permute.xlu0 %1148 }
  0xb7   : > { %v15462_v63 = vpop.permute.xlu1 %588 }
  0xb9   : > { %2400 = vperm.xlu0 %14922, %v2361_v20   ;;  %608 = vperm.xlu1 %14923, %v545_v35   ;;  %v2363_v20 = vmul.f32 %v513_v27, %v15114_v3  ;;  %v15561_v3 = vld [vmem:[#allocation2 + $0x80] sm:$0xff] }
  0xba   : > { %v15505_v24 = vpop.permute.xlu0 %1152  ;;  %v15563_v27 = vld [vmem:[#allocation2 + $0x79] sm:$0xff] }
  0xbb   : > { %v15471_v9 = vpop.permute.xlu1 %1138  ;;  %21141 = vst [vmem:[#allocation6_spill] sm:$0xff] %v15505_v24 }
  0xbd   : > { %869 = vperm.xlu0 %14922, %v15507_v44   ;;  %1285 = vperm.xlu1 %14923, %v1226_v2  }
  0xbe   : > { %v15513_v31 = vpop.permute.xlu0 %1156 }
  0xbf   : > { %v15480_v15 = vpop.permute.xlu1 %1142  ;;  %21142 = vst [vmem:[#allocation7_spill] sm:$0xff] %v15513_v31 }
  0xc1   : > { %1573 = vperm.xlu0 %14922, %v1518_v1   ;;  %1829 = vperm.xlu1 %14923, %v15439_v41   ;;  %v515_v1 = vld [vmem:[#allocation2 + $0x7f] sm:$0xff] }
  0xc2   : > { %v15522_v61 = vpop.permute.xlu0 %1160 }
  0xc3   : > { %v15486_v18 = vpop.permute.xlu1 %1146  ;;  %21144 = vst [vmem:[#allocation9_spill] sm:$0xff] %v15522_v61  ;;  %v15714_v61 = vld [vmem:[#allocation2 + $0xa7] sm:$0xff] }
  0xc4   : > { %21139 = vst [vmem:[#allocation4_spill] sm:$0xff] %v15486_v18 }
  0xc5   : > { %2117 = vperm.xlu0 %14922, %v2070_v55   ;;  %2405 = vperm.xlu1 %14923, %v2362_v51   ;;  %v2915_v51 = vmul.f32 %v15442_v47, %v15473_v10  ;;  %v2914_v55 = vmul.f32 %v15444_v48, %v15466_v5  ;;  %v1520_v47 = vmul.f32 %v515_v1, %v15232_v26 }
  0xc6   : > { %v15531_v14 = vpop.permute.xlu0 %1164  ;;  %v1228_v48 = vmul.f32 %v15563_v27, %v15484_v17 }
  0xc7   : > { %v15497_v19 = vpop.permute.xlu1 %1150  ;;  %21146 = vst [vmem:[#allocation11_spill] sm:$0xff] %v15531_v14 }
  0xc9   : > { %2656 = vperm.xlu0 %14922, %v15418_v23   ;;  %2661 = vperm.xlu1 %14923, %v15429_v32   ;;  %v1227_v23 = vmul.f32 %v15535_v13, %v15471_v9 }
  0xca   : > { %v15541_v32 = vpop.permute.xlu0 %1168 }
  0xcb   : > { %v15509_v50 = vpop.permute.xlu1 %1154  ;;  %21148 = vst [vmem:[#allocation13_spill] sm:$0xff] %v15541_v32  ;;  %v15654_v32 = vld [vmem:[#allocation2 + $0x91] sm:$0xff] }
  0xcd   : > { %613 = vperm.xlu0 %14922, %v546_v8   ;;  %874 = vperm.xlu1 %14923, %v15529_v11   ;;  %v547_v8 = vmul.f32 %v515_v1, %v15250_v30 }
  0xce   : > { %v15549_v35 = vpop.permute.xlu0 %1172 }
  0xcf   : > { %v15518_v53 = vpop.permute.xlu1 %1158  ;;  %21150 = vst [vmem:[#allocation15_spill] sm:$0xff] %v15549_v35 }
  0xd0   : > { %21143 = vst [vmem:[#allocation8_spill] sm:$0xff] %v15518_v53 }
  0xd1   : > { %1578 = vperm.xlu1 %14923, %v1519_v37   ;;  %1290 = vperm.xlu0 %14922, %v1227_v23   ;;  %v2072_v23 = vmul.f32 %v15535_v13, %v15453_v57 }
  0xd2   : > { %v15559_v37 = vpop.permute.xlu0 %1176 }
  0xd3   : > { %v15524_v7 = vpop.permute.xlu1 %1162  ;;  %21152 = vst [vmem:[#allocation17_spill] sm:$0xff] %v15559_v37 }
  0xd4   : > { %21145 = vst [vmem:[#allocation10_spill] sm:$0xff] %v15524_v7 }
  0xd5   : > { %2122 = vperm.xlu1 %14923, %v2071_v21   ;;  %1834 = vperm.xlu0 %14922, %v15507_v44   ;;  %v2364_v21 = vmul.f32 %v514_v62, %v15227_v25  ;;  %v15593_v62 = vld [vmem:[#allocation2 + $0x88] sm:$0xff] }
  0xd6   : > { %v15571_v5 = vpop.permute.xlu0 %1180 }
  0xd7   : > { %v15537_v16 = vpop.permute.xlu1 %1166  ;;  %21154 = vst [vmem:[#allocation19_spill] sm:$0xff] %v15571_v5 }
  0xd8   : > { %21147 = vst [vmem:[#allocation12_spill] sm:$0xff] %v15537_v16 }
  0xd9   : > { %2666 = vperm.xlu1 %14923, %v15439_v41   ;;  %2410 = vperm.xlu0 %14922, %v2363_v20  }
  0xda   : > { %v15579_v20 = vpop.permute.xlu0 %1184 }
  0xdb   : > { %v15545_v28 = vpop.permute.xlu1 %1170  ;;  %21156 = vst [vmem:[#allocation21_spill] sm:$0xff] %v15579_v20 }
  0xdc   : > { %21149 = vst [vmem:[#allocation14_spill] sm:$0xff] %v15545_v28  ;;  %v3731_v28 = vld [vmem:[#allocation2 + $0x28] sm:$0xff] }
  0xdd   : > { %2954 = vperm.xlu1 %14923, %v2915_v51   ;;  %2949 = vperm.xlu0 %14922, %v2914_v55   ;;  %v516_v51 = vld [vmem:[#allocation2 + $0x87] sm:$0xff] }
  0xde   : > { %13318 = vmatprep.mubr.msk.f32.mxu0 %vm3246_vm2, %v3731_v28 }
  0xdf   : > { %v15552_v2 = vpop.permute.xlu1 %1174 }
  0xe0   : > { %21151 = vst [vmem:[#allocation16_spill] sm:$0xff] %v15552_v2 }
  0xe1   : > { %879 = vperm.xlu1 %14923, %v15561_v3   ;;  %618 = vperm.xlu0 %14922, %v547_v8   ;;  %v548_v8 = vmul.f32 %v516_v51, %v15276_v36 }
  0xe3   : > { %v15565_v41 = vpop.permute.xlu1 %1178 }
  0xe4   : > { %21153 = vst [vmem:[#allocation18_spill] sm:$0xff] %v15565_v41 }
  0xe5   : > { %1583 = vperm.xlu1 %14923, %v1520_v47   ;;  %1295 = vperm.xlu0 %14922, %v1228_v48   ;;  %v2916_v47 = vmul.f32 %v15459_v60, %v15501_v43  ;;  %v15587_v48 = vpop.permute.xlu0 %839  ;;  %v2365_v43 = vmul.f32 %v515_v1, %v15180_v6  ;;  %v15617_v6 = vld [vmem:[#allocation2 + $0x90] sm:$0xff] }
  0xe6   : > { %v15619_v1 = vld [vmem:[#allocation2 + $0x89] sm:$0xff] }
  0xe7   : > { %v15573_v10 = vpop.permute.xlu1 %1182 }
  0xe8   : > { %21155 = vst [vmem:[#allocation20_spill] sm:$0xff] %v15573_v10  ;;  %v2917_v10 = vmul.f32 %v15535_v13, %v15448_v54 }
  0xe9   : > { %2127 = vperm.xlu1 %14923, %v2072_v23   ;;  %1839 = vperm.xlu0 %14922, %v15529_v11   ;;  %v15589_v23 = vld [vmem:[#allocation2 + $0x81] sm:$0xff] }
  0xea   : > { %v1229_v4 = vmul.f32 %v15589_v23, %v15480_v15 }
  0xeb   : > { %v15581_v55 = vpop.permute.xlu1 %834 }
  0xed   : > { %2671 = vperm.xlu1 %14923, %v15507_v44   ;;  %2415 = vperm.xlu0 %14922, %v2364_v21   ;;  %v1521_v44 = vmul.f32 %v516_v51, %v15259_v33  ;;  %v15599_v21 = vpop.permute.xlu0 %849 }
  0xef   : > { %v15591_v25 = vpop.permute.xlu1 %844 }
  0xf1   : > { %623 = vperm.xlu1 %14923, %v548_v8   ;;  %2959 = vperm.xlu0 %14922, %v2916_v47   ;;  %v2073_v8 = vmul.f32 %v15563_v27, %v15477_v12  ;;  %v15607_v47 = vpop.permute.xlu0 %1548 }
  0xf3   : > { %v15601_v60 = vpop.permute.xlu1 %1553 }
  0xf5   : > { %884 = vperm.xlu0 %14922, %v15593_v62   ;;  %1300 = vperm.xlu1 %14923, %v1229_v4   ;;  %v517_v4 = vld [vmem:[#allocation2 + $0x8f] sm:$0xff]  ;;  %v15615_v5 = vpop.permute.xlu0 %593 }
  0xf6   : > { %21158 = vst [vmem:[#allocation23_spill] sm:$0xff] %v15615_v5  ;;  %v1522_v54 = vmul.f32 %v517_v4, %v15250_v30  ;;  %v15784_v5 = vld [vmem:[#allocation2 + $0xb0] sm:$0xff] }
  0xf7   : > { %v15609_v20 = vpop.permute.xlu1 %854 }
  0xf8   : > { %21157 = vst [vmem:[#allocation22_spill] sm:$0xff] %v15609_v20 }
  0xf9   : > { %1588 = vperm.xlu0 %14922, %v1521_v44   ;;  %1844 = vperm.xlu1 %14923, %v15561_v3   ;;  %v549_v44 = vmul.f32 %v517_v4, %v15268_v34 }
  0xfb   : > { %v15621_v41 = vpop.permute.xlu1 %1558 }
  0xfd   : > { %2132 = vperm.xlu0 %14922, %v2073_v8   ;;  %2420 = vperm.xlu1 %14923, %v2365_v43   ;;  %v1230_v43 = vmul.f32 %v15619_v1, %v15491_v22  ;;  %v2366_v8 = vmul.f32 %v516_v51, %v15241_v29 }
  0xff   : > { %v15629_v13 = vpop.permute.xlu1 %1814 }
 0x101   : > { %2676 = vperm.xlu0 %14922, %v15529_v11   ;;  %2964 = vperm.xlu1 %14923, %v2917_v10   ;;  %v15627_v11 = vpop.permute.xlu0 %1809  ;;  %v2074_v10 = vmul.f32 %v15589_v23, %v15471_v9 }
 0x103   : > { %v15639_v2 = vpop.permute.xlu1 %859 }
 0x104   : > { %21160 = vst [vmem:[#allocation25_spill] sm:$0xff] %v15639_v2 }
 0x105   : > { %628 = vperm.xlu0 %14922, %v549_v44   ;;  %889 = vperm.xlu1 %14923, %v15617_v6   ;;  %v15635_v37 = vpop.permute.xlu0 %598  ;;  %v15637_v44 = vld [vmem:[#allocation2 + $0x97] sm:$0xff] }
 0x106   : > { %21159 = vst [vmem:[#allocation24_spill] sm:$0xff] %v15635_v37  ;;  %v550_v29 = vmul.f32 %v15637_v44, %v15294_v40  ;;  %v2368_v2 = vmul.f32 %v15637_v44, %v15259_v33  ;;  %v15729_v33 = vld [vmem:[#allocation2 + $0xa1] sm:$0xff] }
 0x109   : > { %1305 = vperm.xlu0 %14922, %v1230_v43   ;;  %1593 = vperm.xlu1 %14923, %v1522_v54   ;;  %v3763_v43 = vld [vmem:[%s20800_s4 + $0x10] sm:$0xff]  ;;  %v3764_v54 = vld [vmem:[%s20800_s4 + $0x18] sm:$0xff]  ;;  %v15652_v35 = vpop.permute.xlu0 %1819 }
 0x10a   : > { %v14286_v51 = vpack.c.bf16 %v3764_v54, %v3763_v43  ;;  %v3732_v43 = vld [vmem:[#allocation2 + $0x30] sm:$0xff]  ;;  %v3733_v54 = vld [vmem:[#allocation2 + $0x38] sm:$0xff] }
 0x10c   : > { %14287 = vmatprep.subr.bf16.mxu0 %v14286_v51 }
 0x10d   : > { %1849 = vperm.xlu0 %14922, %v15593_v62   ;;  %2137 = vperm.xlu1 %14923, %v2074_v10   ;;  %v2918_v10 = vmul.f32 %v15563_v27, %v15464_v0  ;;  %v1231_v0 = vmul.f32 %v15654_v32, %v15486_v18  ;;  %v1523_v27 = vmul.f32 %v15637_v44, %v15276_v36  ;;  %v15731_v44 = vld [vmem:[#allocation2 + $0xa8] sm:$0xff] }
 0x10e   : > { %14289 = vmatpush3.bf16.msra.mxu0 %v14286_v51  ;;  %v3734_v51 = vld [vmem:[#allocation2 + $0x40] sm:$0xff] }
 0x111   : > { %2425 = vperm.xlu0 %14922, %v2366_v8   ;;  %2681 = vperm.xlu1 %14923, %v15561_v3   ;;  %v15656_v8 = vpop.permute.xlu1 %1563  ;;  %v15658_v3 = vld [vmem:[#allocation2 + $0x98] sm:$0xff] }
 0x112   : > { %13319 = vmatmul.mubr.msk.f32.vlgmr.msra.gmra.mrb[0].mxu0 %vm3246_vm2, %v3732_v43 }
 0x113   : > { %13321 = vmatprep.mubr.msk.f32.mxu0 %vm3246_vm2, %v3733_v54  ;;  %v519_v54 = vld [vmem:[#allocation2 + $0x9f] sm:$0xff] }
 0x115   : > { %2969 = vperm.xlu0 %14922, %v2918_v10   ;;  %633 = vperm.xlu1 %14923, %v550_v29   ;;  %v15667_v29 = vpop.permute.xlu0 %864  ;;  %v15671_v28 = vpop.permute.xlu1 %603  ;;  %v2367_v10 = vmul.f32 %v517_v4, %v15232_v26  ;;  %v551_v26 = vmul.f32 %v519_v54, %v15286_v38  ;;  %v15689_v4 = vld [vmem:[#allocation2 + $0xa0] sm:$0xff] }
 0x116   : > { %21161 = vst [vmem:[#allocation26_spill] sm:$0xff] %v15667_v29  ;;  %13322 = vmatmul.mubr.msk.f32.gmra.mrb[2].mxu0 %vm3246_vm2, %v3734_v51  ;;  %21162 = vst [vmem:[#allocation27_spill] sm:$0xff] %v15671_v28  ;;  %v2919_v51 = vmul.f32 %v15589_v23, %v15453_v57  ;;  %v1524_v57 = vmul.f32 %v519_v54, %v15268_v34  ;;  %v15697_v23 = vld [vmem:[#allocation2 + $0x99] sm:$0xff] }
 0x119   : > { %894 = vperm.xlu0 %14922, %v15658_v3   ;;  %1310 = vperm.xlu1 %14923, %v1231_v0   ;;  %v15675_v43 = vpop.permute.xlu0 %1255  ;;  %v2075_v0 = vmul.f32 %v15619_v1, %v15484_v17  ;;  %v15679_v16 = vpop.permute.xlu1 %1260 }
 0x11d   : > { %1598 = vperm.xlu0 %14922, %v1523_v27   ;;  %1854 = vperm.xlu1 %14923, %v15617_v6   ;;  %v15683_v14 = vpop.permute.xlu0 %1270 }
 0x121   : > { %2142 = vperm.xlu0 %14922, %v2075_v0   ;;  %2430 = vperm.xlu1 %14923, %v2367_v10   ;;  %v1232_v10 = vmul.f32 %v15697_v23, %v15499_v39 }
 0x124   : > { %v15685_v27 = vpop.permute.xlu1 %1265 }
 0x125   : > { %2686 = vperm.xlu0 %14922, %v15593_v62   ;;  %2974 = vperm.xlu1 %14923, %v2919_v51   ;;  %v2076_v51 = vmul.f32 %v15654_v32, %v15480_v15 }
 0x128   : > { %v15691_v28 = vpop.permute.xlu0 %1275  ;;  %v15693_v29 = vpop.permute.xlu1 %2102 }
 0x129   : > { %21163 = vst [vmem:[#allocation28_spill] sm:$0xff] %v15691_v28  ;;  %638 = vperm.xlu0 %14922, %v551_v26   ;;  %899 = vperm.xlu1 %14923, %v15689_v4  }
 0x12c   : > { %v15701_v62 = vpop.permute.xlu0 %2107  ;;  %v15703_v0 = vpop.permute.xlu1 %1280 }
 0x12d   : > { %21164 = vst [vmem:[#allocation29_spill] sm:$0xff] %v15703_v0  ;;  %1315 = vperm.xlu0 %14922, %v1232_v10   ;;  %1603 = vperm.xlu1 %14923, %v1524_v57   ;;  %v552_v57 = vmul.f32 %v15714_v61, %v15313_v45  ;;  %v2920_v10 = vmul.f32 %v15619_v1, %v15477_v12 }
 0x12e   : > { %v1525_v12 = vmul.f32 %v15714_v61, %v15294_v40  ;;  %v15757_v40 = vld [vmem:[%s20798_s2 + $0x1] ss:$0 sm:$0xff] }
 0x130   : > { %v15707_v7 = vpop.permute.xlu0 %1568  ;;  %v15709_v26 = vpop.permute.xlu1 %1824 }
 0x131   : > { %21165 = vst [vmem:[#allocation30_spill] sm:$0xff] %v15707_v7  ;;  %1859 = vperm.xlu0 %14922, %v15658_v3   ;;  %2147 = vperm.xlu1 %14923, %v2076_v51  }
 0x134   : > { %v15716_v37 = vpop.permute.xlu0 %2112  ;;  %v15718_v0 = vpop.permute.xlu1 %2395 }
 0x135   : > { %2435 = vperm.xlu0 %14922, %v2368_v2   ;;  %2691 = vperm.xlu1 %14923, %v15617_v6   ;;  %v1233_v2 = vmul.f32 %v15729_v33, %v15497_v19 }
 0x138   : > { %v15725_v7 = vpop.permute.xlu0 %2400  ;;  %v15727_v51 = vpop.permute.xlu1 %608 }
 0x139   : > { %21166 = vst [vmem:[#allocation31_spill] sm:$0xff] %v15727_v51  ;;  %2979 = vperm.xlu0 %14922, %v2920_v10   ;;  %643 = vperm.xlu1 %14923, %v552_v57   ;;  %v2369_v10 = vmul.f32 %v519_v54, %v15250_v30  ;;  %v2077_v51 = vmul.f32 %v15697_v23, %v15491_v22  ;;  %v15764_v30 = vld [vmem:[%s20798_s2] ss:$0 sm:$0xff] }
 0x13a   : > { %v2921_v54 = vmul.f32 %v15654_v32, %v15471_v9  ;;  %v735_v9 = vmul.f32 %v15764_v30, %v15451_v56 }
 0x13c   : > { %v15735_v6 = vpop.permute.xlu0 %869  ;;  %v15737_v28 = vpop.permute.xlu1 %1285 }
 0x13d   : > { %21167 = vst [vmem:[#allocation32_spill] sm:$0xff] %v15735_v6  ;;  %21168 = vst [vmem:[#allocation33_spill] sm:$0xff] %v15737_v28  ;;  %904 = vperm.xlu0 %14922, %v15731_v44   ;;  %1320 = vperm.xlu1 %14923, %v1233_v2   ;;  %v15759_v2 = vld [vmem:[#allocation2 + $0xaf] sm:$0xff] }
 0x13e   : > { %v553_v20 = vmul.f32 %v15759_v2, %v15304_v42  ;;  %v1526_v56 = vmul.f32 %v15759_v2, %v15286_v38 }
 0x140   : > { %v15742_v1 = vpop.permute.xlu0 %1573  ;;  %v15744_v57 = vpop.permute.xlu1 %1829 }
 0x141   : > { %21169 = vst [vmem:[#allocation34_spill] sm:$0xff] %v15742_v1  ;;  %21170 = vst [vmem:[#allocation35_spill] sm:$0xff] %v15744_v57  ;;  %1608 = vperm.xlu0 %14922, %v1525_v12   ;;  %1864 = vperm.xlu1 %14923, %v15689_v4   ;;  %v15771_v12 = vld [vmem:[%s20798_s2 + $0x2] ss:$0 sm:$0xff]  ;;  %v996_v1 = vmul.f32 %v15757_v40, %v15581_v55  ;;  %v997_v57 = vmul.f32 %v15757_v40, %v15587_v48 }
 0x142   : > { %v1417_v32 = vmul.f32 %v15771_v12, %v15675_v43  ;;  %v736_v55 = vmul.f32 %v15764_v30, %v15455_v58  ;;  %v1418_v48 = vmul.f32 %v15771_v12, %v15679_v16  ;;  %v15797_v43 = vld [vmem:[#allocation2 + $0xa9] sm:$0xff]  ;;  %v15802_v58 = vld [vmem:[%s20798_s2 + $0x3] ss:$0 sm:$0xff] }
 0x143   : > { %v1028_v53 = vadd.f32 %v996_v1, %v735_v9  ;;  %v1234_v1 = vmul.f32 %v15797_v43, %v15505_v24  ;;  %v1711_v38 = vmul.f32 %v15802_v58, %v15601_v60  ;;  %v15829_v60 = vld [vmem:[%s20798_s2 + $0x6] ss:$0 sm:$0xff] }
 0x144   : > { %v15750_v6 = vpop.permute.xlu0 %2117  ;;  %v15752_v28 = vpop.permute.xlu1 %2405  ;;  %v1029_v22 = vadd.f32 %v997_v57, %v736_v55 }
 0x145   : > { %2152 = vperm.xlu0 %14922, %v2077_v51   ;;  %2440 = vperm.xlu1 %14923, %v2369_v10   ;;  %v1449_v16 = vadd.f32 %v1417_v32, %v1028_v53 }
 0x146   : > { %v1450_v9 = vadd.f32 %v1418_v48, %v1029_v22  ;;  %v15822_v22 = vld [vmem:[%s20798_s2 + $0x4] ss:$0 sm:$0xff] }
 0x147   : > { %v1971_v48 = vmul.f32 %v15822_v22, %v15627_v11  ;;  %v2370_v11 = vmul.f32 %v15714_v61, %v15276_v36 }
 0x148   : > { %v2657_v51 = vpop.permute.xlu0 %2656  ;;  %v2662_v10 = vpop.permute.xlu1 %2661  ;;  %v1743_v32 = vadd.f32 %v1711_v38, %v1450_v9  ;;  %v2557_v38 = vmul.f32 %v15829_v60, %v15718_v0  ;;  %v2922_v0 = vmul.f32 %v15697_v23, %v15484_v17  ;;  %v15880_v17 = vld [vmem:[#allocation2 + $0xb8] sm:$0xff] }
 0x149   : > { %2696 = vperm.xlu0 %14922, %v15658_v3   ;;  %2984 = vperm.xlu1 %14923, %v2921_v54   ;;  %v15884_v23 = vld [vmem:[#allocation2 + $0xb1] sm:$0xff] }
 0x14c   : > { %v15790_v3 = vpop.permute.xlu0 %613  ;;  %v15792_v54 = vpop.permute.xlu1 %874 }
 0x14d   : > { %21171 = vst [vmem:[#allocation36_spill] sm:$0xff] %v15790_v3  ;;  %21172 = vst [vmem:[#allocation37_spill] sm:$0xff] %v15792_v54  ;;  %648 = vperm.xlu0 %14922, %v553_v20   ;;  %909 = vperm.xlu1 %14923, %v15784_v5   ;;  %v1710_v20 = vmul.f32 %v15802_v58, %v15607_v47  ;;  %v15817_v54 = vld [vmem:[%s20798_s2 + $0x5] ss:$0 sm:$0xff]  ;;  %v2078_v47 = vmul.f32 %v15729_v33, %v15486_v18 }
 0x14e   : > { %v2265_v9 = vmul.f32 %v15817_v54, %v15701_v62  ;;  %v2558_v62 = vmul.f32 %v15829_v60, %v15725_v7  ;;  %v15867_v7 = vld [vmem:[%s20798_s2 + $0x8] ss:$0 sm:$0xff] }
 0x14f   : > { %v1742_v53 = vadd.f32 %v1710_v20, %v1449_v16  ;;  %v1972_v16 = vmul.f32 %v15822_v22, %v15629_v13  ;;  %v15846_v20 = vld [vmem:[%s20798_s2 + $0x7] ss:$0 sm:$0xff] }
 0x150   : > { %v15808_v57 = vpop.permute.xlu0 %1290  ;;  %v15810_v55 = vpop.permute.xlu1 %1578  ;;  %v2819_v24 = vmul.f32 %v15846_v20, %v2662_v10 }
 0x151   : > { %21173 = vst [vmem:[#allocation38_spill] sm:$0xff] %v15808_v57  ;;  %21174 = vst [vmem:[#allocation39_spill] sm:$0xff] %v15810_v55  ;;  %1325 = vperm.xlu0 %14922, %v1234_v1   ;;  %1613 = vperm.xlu1 %14923, %v1526_v56   ;;  %v2264_v56 = vmul.f32 %v15817_v54, %v15693_v29  ;;  %v2003_v29 = vadd.f32 %v1971_v48, %v1742_v53  ;;  %v15853_v57 = vld [vmem:[#allocation2 + $0xb7] sm:$0xff] }
 0x152   : > { %v2004_v13 = vadd.f32 %v1972_v16, %v1743_v32  ;;  %v554_v36 = vmul.f32 %v15853_v57, %v15331_v49  ;;  %v998_v53 = vmul.f32 %v15757_v40, %v15591_v25  ;;  %v737_v25 = vmul.f32 %v15764_v30, %v15457_v59 }
 0x153   : > { %v2296_v55 = vadd.f32 %v2264_v56, %v2003_v29 }
 0x154   : > { %v15835_v1 = vpop.permute.xlu0 %1834  ;;  %v15837_v3 = vpop.permute.xlu1 %2122 }
 0x155   : > { %21175 = vst [vmem:[#allocation40_spill] sm:$0xff] %v15835_v1  ;;  %21176 = vst [vmem:[#allocation41_spill] sm:$0xff] %v15837_v3  ;;  %1869 = vperm.xlu0 %14922, %v15731_v44   ;;  %2157 = vperm.xlu1 %14923, %v2078_v47   ;;  %v2818_v1 = vmul.f32 %v15846_v20, %v2657_v51  ;;  %v2297_v47 = vadd.f32 %v2265_v9, %v2004_v13 }
 0x156   : > { %v2589_v61 = vadd.f32 %v2557_v38, %v2296_v55  ;;  %v15878_v55 = vld [vmem:[%s20799_s3] ss:$0 sm:$0xff]  ;;  %v1235_v9 = vmul.f32 %v15884_v23, %v15509_v50  ;;  %v1030_v38 = vadd.f32 %v998_v53, %v737_v25  ;;  %v2079_v53 = vmul.f32 %v15797_v43, %v15499_v39 }
 0x157   : > { %v2590_v51 = vadd.f32 %v2558_v62, %v2297_v47 }
 0x158   : > { %v15858_v18 = vpop.permute.xlu0 %2410  ;;  %v2667_v3 = vpop.permute.xlu1 %2666  ;;  %v2850_v10 = vadd.f32 %v2818_v1, %v2589_v61 }
 0x159   : > { %2445 = vperm.xlu0 %14922, %v2370_v11   ;;  %2701 = vperm.xlu1 %14923, %v15689_v4   ;;  %v2851_v4 = vadd.f32 %v2819_v24, %v2590_v51  ;;  %v1419_v24 = vmul.f32 %v15771_v12, %v15685_v27  ;;  %v1527_v27 = vmul.f32 %v15853_v57, %v15313_v45 }
 0x15a   : > { %v1712_v51 = vmul.f32 %v15802_v58, %v15621_v41  ;;  %v2371_v45 = vmul.f32 %v15759_v2, %v15268_v34  ;;  %v2559_v34 = vmul.f32 %v15829_v60, %v15752_v28  ;;  %v2923_v2 = vmul.f32 %v15729_v33, %v15480_v15  ;;  %v15944_v28 = vld [vmem:[#allocation2 + $0xc0] sm:$0xff] }
 0x15b   : > { %v1451_v62 = vadd.f32 %v1419_v24, %v1030_v38  ;;  %v738_v33 = vmul.f32 %v15764_v30, %v15462_v63 }
 0x15c   : > { %v2950_v32 = vpop.permute.xlu0 %2949  ;;  %v2955_v48 = vpop.permute.xlu1 %2954 }
 0x15d   : > { %v3111_v56 = vmul.f32 %v15867_v7, %v2950_v32  ;;  %v3112_v49 = vmul.f32 %v15867_v7, %v2955_v48  ;;  %2989 = vperm.xlu0 %14922, %v2922_v0   ;;  %653 = vperm.xlu1 %14923, %v554_v36   ;;  %v1973_v48 = vmul.f32 %v15822_v22, %v15652_v35 }
 0x15e   : > { %v2820_v35 = vmul.f32 %v15846_v20, %v2667_v3  ;;  %v1420_v3 = vmul.f32 %v15771_v12, %v15683_v14 }
 0x15f   : > { %v3143_v1 = vadd.f32 %v3111_v56, %v2850_v10  ;;  %v3144_v16 = vadd.f32 %v3112_v49, %v2851_v4  ;;  %v1744_v10 = vadd.f32 %v1712_v51, %v1451_v62  ;;  %v2266_v4 = vmul.f32 %v15817_v54, %v15716_v37  ;;  %v15930_v56 = vld [vmem:[#allocation2 + $0xbf] sm:$0xff] }
 0x160   : > { %v15890_v11 = vpop.permute.xlu0 %618  ;;  %v15892_v29 = vpop.permute.xlu1 %879  ;;  %v555_v37 = vmul.f32 %v15930_v56, %v15322_v46  ;;  %v15953_v46 = vld [vmem:[#allocation2 + $0xb9] sm:$0xff] }
 0x161   : > { %21177 = vst [vmem:[#allocation42_spill] sm:$0xff] %v15892_v29  ;;  %v15895_v13 = vadd.f32 %v15878_v55, %v3143_v1  ;;  %v15898_v59 = vadd.f32 %v15878_v55, %v3144_v16  ;;  %914 = vperm.xlu0 %14922, %v15880_v17   ;;  %1330 = vperm.xlu1 %14923, %v1235_v9  }
 0x162   : > { %v2005_v49 = vadd.f32 %v1973_v48, %v1744_v10  ;;  %v999_v16 = vmul.f32 %v15757_v40, %v15599_v21  ;;  %v1528_v21 = vmul.f32 %v15930_v56, %v15304_v42  ;;  %v1236_v62 = vmul.f32 %v15953_v46, %v15513_v31 }
 0x163   : > { %v20830_v47 = vmax.f32 %v15895_v13, 0.0  ;;  %v20829_v36 = vmax.f32 %v15898_v59, 0.0  ;;  %v1713_v48 = vmul.f32 %v15802_v58, %v15656_v8  ;;  %v1974_v42 = vmul.f32 %v15822_v22, %v15709_v26  ;;  %v14943_v8 = vld [vmem:[%s20797_s1 + $0x60] sm:$0xff] }
 0x164   : > { %v15905_v61 = vpop.permute.xlu0 %1295  ;;  %v15907_v0 = vpop.permute.xlu1 %1583  ;;  %v2298_v1 = vadd.f32 %v2266_v4, %v2005_v49  ;;  %v1031_v51 = vadd.f32 %v999_v16, %v738_v33  ;;  %v2080_v49 = vmul.f32 %v15884_v23, %v15497_v19  ;;  %v2372_v26 = vmul.f32 %v14943_v8, %v15853_v57  ;;  %v16022_v8 = vld [vmem:[%s20797_s1 + $0x80] sm:$0xff] }
 0x165   : > { %1618 = vperm.xlu0 %14922, %v1527_v27   ;;  %3247 = vst.msk [vmem:[#allocation2 + $0x48] sm:$0xff] %vm3246_vm2, %v20830_v47  ;;  %3248 = vst.msk [vmem:[#allocation2 + $0x50] sm:$0xff] %vm3246_vm2, %v20829_v36  ;;  %1874 = vperm.xlu1 %14923, %v15784_v5   ;;  %v2560_v16 = vmul.f32 %v15829_v60, %v15858_v18  ;;  %v21193_v36 = vld [vmem:[#allocation41_spill] sm:$0xff] }
 0x166   : > { %v2591_v9 = vadd.f32 %v2559_v34, %v2298_v1  ;;  %v1452_v14 = vadd.f32 %v1420_v3, %v1031_v51  ;;  %v2268_v47 = vmul.f32 %v15817_v54, %v21193_v36 }
 0x168   : > { %v15922_v32 = vpop.permute.xlu0 %1839  ;;  %v15924_v41 = vpop.permute.xlu1 %2127  ;;  %v1745_v1 = vadd.f32 %v1713_v48, %v1452_v14  ;;  %v16003_v14 = vld [vmem:[#allocation2 + $0xc8] sm:$0xff] }
 0x169   : > { %2162 = vperm.xlu0 %14922, %v2079_v53   ;;  %2450 = vperm.xlu1 %14923, %v2371_v45  }
 0x16c   : > { %v15936_v25 = vpop.permute.xlu0 %2415  ;;  %v2672_v24 = vpop.permute.xlu1 %2671 }
 0x16d   : > { %2706 = vperm.xlu0 %14922, %v15731_v44   ;;  %2994 = vperm.xlu1 %14923, %v2923_v2   ;;  %v2852_v44 = vadd.f32 %v2820_v35, %v2591_v9  ;;  %v2267_v35 = vmul.f32 %v15817_v54, %v15750_v6  ;;  %v15990_v9 = vld [vmem:[#allocation2 + $0xc7] sm:$0xff]  ;;  %v2821_v3 = vmul.f32 %v15846_v20, %v2672_v24 }
 0x16e   : > { %v556_v57 = vmul.f32 %v15990_v9, %v15346_v52  ;;  %v16005_v24 = vld [vmem:[#allocation2 + $0xc1] sm:$0xff] }
 0x170   : > { %v2960_v38 = vpop.permute.xlu0 %2959  ;;  %v15946_v15 = vpop.permute.xlu1 %623 }
 0x171   : > { %21178 = vst [vmem:[#allocation43_spill] sm:$0xff] %v15946_v15  ;;  %v3113_v27 = vmul.f32 %v15867_v7, %v2960_v38  ;;  %658 = vperm.xlu0 %14922, %v555_v37   ;;  %919 = vperm.xlu1 %14923, %v15944_v28   ;;  %v2006_v37 = vadd.f32 %v1974_v42, %v1745_v1 }
 0x173   : > { %v3145_v45 = vadd.f32 %v3113_v27, %v2852_v44  ;;  %v2299_v33 = vadd.f32 %v2267_v35, %v2006_v37  ;;  %v21181_v44 = vld [vmem:[#allocation5_spill] sm:$0xff]  ;;  %v21186_v37 = vld [vmem:[#allocation22_spill] sm:$0xff] }
 0x174   : > { %v15960_v63 = vpop.permute.xlu0 %884  ;;  %v15962_v53 = vpop.permute.xlu1 %1300  ;;  %v2924_v27 = vmul.f32 %v15797_v43, %v21181_v44  ;;  %v21185_v43 = vld [vmem:[#allocation23_spill] sm:$0xff] }
 0x175   : > { %21179 = vst [vmem:[#allocation44_spill] sm:$0xff] %v15960_v63  ;;  %21180 = vst [vmem:[#allocation45_spill] sm:$0xff] %v15962_v53  ;;  %v15965_v10 = vadd.f32 %v15878_v55, %v3145_v45  ;;  %1335 = vperm.xlu0 %14922, %v1236_v62   ;;  %1623 = vperm.xlu1 %14923, %v1528_v21   ;;  %v2592_v21 = vadd.f32 %v2560_v16, %v2299_v33  ;;  %v21187_v33 = vld [vmem:[#allocation28_spill] sm:$0xff] }
 0x176   : > { %v739_v1 = vmul.f32 %v15764_v30, %v21185_v43  ;;  %v1000_v16 = vmul.f32 %v15757_v40, %v21186_v37  ;;  %v21191_v43 = vld [vmem:[#allocation6_spill] sm:$0xff] }
 0x177   : > { %v20828_v4 = vmax.f32 %v15965_v10, 0.0  ;;  %v2853_v51 = vadd.f32 %v2821_v3, %v2592_v21  ;;  %v1421_v3 = vmul.f32 %v15771_v12, %v21187_v33 }
 0x178   : > { %v15974_v34 = vpop.permute.xlu0 %1588  ;;  %v15976_v2 = vpop.permute.xlu1 %1844  ;;  %v1032_v21 = vadd.f32 %v1000_v16, %v739_v1  ;;  %v2081_v1 = vmul.f32 %v15953_v46, %v21191_v43  ;;  %v21192_v16 = vld [vmem:[#allocation35_spill] sm:$0xff] }
 0x179   : > { %1879 = vperm.xlu0 %14922, %v15880_v17   ;;  %3249 = vst.msk [vmem:[#allocation2 + $0x58] sm:$0xff] %vm3246_vm2, %v20828_v4  ;;  %2167 = vperm.xlu1 %14923, %v2080_v49  }
 0x17a   : > { %v1453_v37 = vadd.f32 %v1421_v3, %v1032_v21  ;;  %v2561_v21 = vmul.f32 %v15829_v60, %v15936_v25 }
 0x17c   : > { %v15992_v6 = vpop.permute.xlu0 %2132  ;;  %v15994_v38 = vpop.permute.xlu1 %2420 }
 0x17d   : > { %2455 = vperm.xlu0 %14922, %v2372_v26   ;;  %2711 = vperm.xlu1 %14923, %v15784_v5   ;;  %v21182_v5 = vld [vmem:[#allocation8_spill] sm:$0xff]  ;;  %v1529_v26 = vmul.f32 %v16022_v8, %v15990_v9 }
 0x17e   : > { %v1237_v42 = vmul.f32 %v16005_v24, %v21182_v5 }
 0x180   : > { %v2677_v18 = vpop.permute.xlu0 %2676  ;;  %v2965_v62 = vpop.permute.xlu1 %2964 }
 0x181   : > { %v3114_v45 = vmul.f32 %v15867_v7, %v2965_v62  ;;  %2999 = vperm.xlu0 %14922, %v2924_v27   ;;  %663 = vperm.xlu1 %14923, %v556_v57   ;;  %v21190_v62 = vld [vmem:[#allocation30_spill] sm:$0xff] }
 0x183   : > { %v3146_v48 = vadd.f32 %v3114_v45, %v2853_v51  ;;  %v1714_v51 = vmul.f32 %v15802_v58, %v21190_v62  ;;  %v14945_v45 = vld [vmem:[%s20797_s1 + $0x68] sm:$0xff] }
 0x184   : > { %v16009_v52 = vpop.permute.xlu0 %628  ;;  %v16011_v49 = vpop.permute.xlu1 %889 }
 0x185   : > { %21183 = vst [vmem:[#allocation5_spill] sm:$0xff] %v16009_v52  ;;  %21184 = vst [vmem:[#allocation8_spill] sm:$0xff] %v16011_v49  ;;  %v16016_v35 = vadd.f32 %v15878_v55, %v3146_v48  ;;  %924 = vperm.xlu0 %14922, %v16003_v14   ;;  %1340 = vperm.xlu1 %14923, %v1237_v42   ;;  %v2373_v48 = vmul.f32 %v14945_v45, %v15930_v56  ;;  %v3279_v42 = vld [vmem:[#allocation2 + $0x49] sm:$0xff]  ;;  %v21194_v56 = vmax.f32 %v15895_v13, 0.0  ;;  %v21195_v52 = vld [vmem:[#allocation4_spill] sm:$0xff] }
 0x186   : > { %v1746_v4 = vadd.f32 %v1714_v51, %v1453_v37  ;;  %v16057_v49 = vld [vmem:[#allocation2 + $0xcf] sm:$0xff]  ;;  %v2822_v13 = vmul.f32 %v15846_v20, %v2677_v18 }
 0x187   : > { %v20827_v57 = vmax.f32 %v16016_v35, 0.0  ;;  %v3311_v45 = vmax.f32 %v21194_v56, %v3279_v42 }
 0x188   : > { %v16031_v44 = vpop.permute.xlu0 %1305  ;;  %v16033_v27 = vpop.permute.xlu1 %1593 }
 0x189   : > { %21188 = vst [vmem:[#allocation23_spill] sm:$0xff] %v16031_v44  ;;  %21189 = vst [vmem:[#allocation22_spill] sm:$0xff] %v16033_v27  ;;  %1628 = vperm.xlu0 %14922, %v1529_v26   ;;  %1884 = vperm.xlu1 %14923, %v15944_v28   ;;  %v1975_v26 = vmul.f32 %v15822_v22, %v21192_v16  ;;  %v2925_v44 = vmul.f32 %v15884_v23, %v21195_v52 }
 0x18a   : > { %3250 = vst.msk [vmem:[#allocation2 + $0x60] sm:$0xff] %vm3246_vm2, %v20827_v57  ;;  %v3343_v57 = vld [vmem:[#allocation2 + $0x58] sm:$0xff] }
 0x18b   : > { %v2007_v3 = vadd.f32 %v1975_v26, %v1746_v4  ;;  %v3375_v16 = vmax.f32 %v3311_v45, %v3343_v57  ;;  %v16072_v4 = vld [vmem:[%s20797_s1 + $0x98] sm:$0xff]  ;;  %v16077_v57 = vld [vmem:[#allocation2 + $0xd0] sm:$0xff] }
 0x18c   : > { %v16049_v33 = vpop.permute.xlu0 %1849  ;;  %v16051_v62 = vpop.permute.xlu1 %2137  ;;  %v557_v25 = vmul.f32 %v16072_v4, %v16057_v49  ;;  %v16085_v26 = vld [vmem:[#allocation2 + $0xc9] sm:$0xff]  ;;  %v21198_v45 = vld [vmem:[#allocation9_spill] sm:$0xff] }
 0x18d   : > { %2172 = vperm.xlu0 %14922, %v2081_v1   ;;  %2460 = vperm.xlu1 %14923, %v2373_v48   ;;  %v2300_v36 = vadd.f32 %v2268_v47, %v2007_v3  ;;  %v1238_v3 = vmul.f32 %v16085_v26, %v21198_v45 }
 0x18f   : > { %v2593_v52 = vadd.f32 %v2561_v21, %v2300_v36  ;;  %v21199_v21 = vld [vmem:[#allocation25_spill] sm:$0xff] }
 0x190   : > { %v16063_v15 = vpop.permute.xlu0 %2425  ;;  %v2682_v51 = vpop.permute.xlu1 %2681  ;;  %v21200_v36 = vld [vmem:[#allocation29_spill] sm:$0xff] }
 0x191   : > { %v16065_v37 = vld [vmem:[#allocation2 + $0x59] sm:$0xff]  ;;  %2716 = vperm.xlu0 %14922, %v15880_v17   ;;  %3004 = vperm.xlu1 %14923, %v2925_v44   ;;  %v21197_v17 = vld [vmem:[#allocation24_spill] sm:$0xff]  ;;  %v2854_v42 = vadd.f32 %v2822_v13, %v2593_v52  ;;  %v16091_v44 = vld [vmem:[%s20797_s1 + $0x88] sm:$0xff]  ;;  %v1422_v13 = vmul.f32 %v15771_v12, %v21200_v36 }
 0x192   : > { %v3409_v23 = vmax.f32 %v3375_v16, %v16065_v37  ;;  %v740_v48 = vmul.f32 %v15764_v30, %v21197_v17  ;;  %v1530_v56 = vmul.f32 %v16091_v44, %v16057_v49  ;;  %v1001_v16 = vmul.f32 %v15757_v40, %v21199_v21  ;;  %v21203_v17 = vld [vmem:[#allocation34_spill] sm:$0xff]  ;;  %v21204_v21 = vld [vmem:[#allocation40_spill] sm:$0xff] }
 0x193   : > { %v1976_v29 = vmul.f32 %v15822_v22, %v21204_v21  ;;  %v2823_v21 = vmul.f32 %v15846_v20, %v2682_v51 }
 0x194   : > { %3473 = vst.msk [vmem:[#allocation2 + $0x48] sm:$0xff] %vm3246_vm2, %v3409_v23  ;;  %v2970_v47 = vpop.permute.xlu0 %2969  ;;  %v16080_v18 = vpop.permute.xlu1 %633 }
 0x195   : > { %21196 = vst [vmem:[#allocation28_spill] sm:$0xff] %v16080_v18  ;;  %v3115_v1 = vmul.f32 %v15867_v7, %v2970_v47  ;;  %668 = vperm.xlu0 %14922, %v557_v25   ;;  %929 = vperm.xlu1 %14923, %v16077_v57   ;;  %v1033_v47 = vadd.f32 %v1001_v16, %v740_v48 }
 0x196   : > { %v1715_v18 = vmul.f32 %v15802_v58, %v21203_v17  ;;  %v2082_v48 = vmul.f32 %v16005_v24, %v15509_v50 }
 0x197   : > { %v3147_v25 = vadd.f32 %v3115_v1, %v2854_v42  ;;  %v1454_v53 = vadd.f32 %v1422_v13, %v1033_v47 }
 0x198   : > { %v16101_v23 = vpop.permute.xlu0 %894  ;;  %v16103_v52 = vpop.permute.xlu1 %1310 }
 0x199   : > { %21201 = vst [vmem:[#allocation30_spill] sm:$0xff] %v16101_v23  ;;  %21202 = vst [vmem:[#allocation6_spill] sm:$0xff] %v16103_v52  ;;  %v16108_v63 = vadd.f32 %v15878_v55, %v3147_v25  ;;  %1345 = vperm.xlu0 %14922, %v1238_v3   ;;  %1633 = vperm.xlu1 %14923, %v1530_v56   ;;  %v1747_v36 = vadd.f32 %v1715_v18, %v1454_v53  ;;  %v16132_v18 = vld [vmem:[#allocation2 + $0xd7] sm:$0xff] }
 0x19a   : > { %v2269_v56 = vmul.f32 %v15817_v54, %v15924_v41  ;;  %v2562_v53 = vmul.f32 %v15829_v60, %v15994_v38  ;;  %v3280_v41 = vld [vmem:[#allocation2 + $0x51] sm:$0xff]  ;;  %v21206_v38 = vmax.f32 %v15898_v59, 0.0 }
 0x19b   : > { %v3735_v27 = vld [vmem:[#allocation2 + $0x48] sm:$0xff]  ;;  %v20831_v42 = vmax.f32 %v16108_v63, 0.0  ;;  %v2008_v13 = vadd.f32 %v1976_v29, %v1747_v36  ;;  %v16143_v29 = vld [vmem:[%s20797_s1 + $0xa0] sm:$0xff]  ;;  %v2926_v36 = vmul.f32 %v15953_v46, %v15499_v39  ;;  %v16154_v52 = vld [vmem:[#allocation2 + $0xd8] sm:$0xff] }
 0x19c   : > { %13324 = vmatprep.mubr.msk.f32.mxu0 %vm3246_vm2, %v3735_v27  ;;  %v16116_v1 = vpop.permute.xlu0 %1598  ;;  %v16118_v16 = vpop.permute.xlu1 %1854  ;;  %v14948_v27 = vld [vmem:[%s20797_s1 + $0x70] sm:$0xff] }
 0x19d   : > { %21205 = vst [vmem:[#allocation35_spill] sm:$0xff] %v16116_v1  ;;  %3251 = vst.msk [vmem:[#allocation2 + $0x68] sm:$0xff] %vm3246_vm2, %v20831_v42  ;;  %1889 = vperm.xlu0 %14922, %v16003_v14   ;;  %v2374_v3 = vmul.f32 %v14948_v27, %v15990_v9  ;;  %2177 = vperm.xlu1 %14923, %v2082_v48   ;;  %v2301_v17 = vadd.f32 %v2269_v56, %v2008_v13  ;;  %v3344_v42 = vld [vmem:[#allocation2 + $0x60] sm:$0xff]  ;;  %v16157_v59 = vld [vmem:[#allocation2 + $0xd1] sm:$0xff] }
 0x19e   : > { %v558_v9 = vmul.f32 %v16143_v29, %v16132_v18  ;;  %v3312_v48 = vmax.f32 %v21206_v38, %v3280_v41  ;;  %v21207_v38 = vld [vmem:[#allocation10_spill] sm:$0xff] }
 0x19f   : > { %v2594_v56 = vadd.f32 %v2562_v53, %v2301_v17  ;;  %v1239_v39 = vmul.f32 %v16157_v59, %v21207_v38 }
 0x1a0   : > { %v16134_v25 = vpop.permute.xlu0 %2142  ;;  %v16136_v47 = vpop.permute.xlu1 %2430 }
 0x1a1   : > { %2465 = vperm.xlu0 %14922, %v2374_v3   ;;  %2721 = vperm.xlu1 %14923, %v15944_v28   ;;  %v3376_v28 = vmax.f32 %v3312_v48, %v3344_v42  ;;  %v2855_v13 = vadd.f32 %v2823_v21, %v2594_v56  ;;  %v21210_v42 = vld [vmem:[#allocation26_spill] sm:$0xff]  ;;  %v21211_v48 = vld [vmem:[#allocation27_spill] sm:$0xff] }
 0x1a2   : > { %v1002_v17 = vmul.f32 %v15757_v40, %v21210_v42  ;;  %v21215_v42 = vld [vmem:[#allocation39_spill] sm:$0xff] }
 0x1a4   : > { %v2687_v51 = vpop.permute.xlu0 %2686  ;;  %v2975_v27 = vpop.permute.xlu1 %2974  ;;  %v16151_v3 = vld [vmem:[#allocation2 + $0x61] sm:$0xff] }
 0x1a5   : > { %v3116_v23 = vmul.f32 %v15867_v7, %v2975_v27  ;;  %3009 = vperm.xlu0 %14922, %v2926_v36   ;;  %673 = vperm.xlu1 %14923, %v558_v9   ;;  %v3410_v1 = vmax.f32 %v3376_v28, %v16151_v3  ;;  %v21212_v36 = vld [vmem:[#allocation33_spill] sm:$0xff] }
 0x1a6   : > { %v1423_v56 = vmul.f32 %v15771_v12, %v21212_v36  ;;  %v2083_v36 = vmul.f32 %v16085_v26, %v15513_v31 }
 0x1a7   : > { %v3148_v41 = vadd.f32 %v3116_v23, %v2855_v13  ;;  %3474 = vst.msk [vmem:[#allocation2 + $0x50] sm:$0xff] %vm3246_vm2, %v3410_v1  ;;  %v16175_v23 = vld [vmem:[%s20797_s1 + $0x90] sm:$0xff]  ;;  %v741_v1 = vmul.f32 %v15764_v30, %v21211_v48 }
 0x1a8   : > { %v16161_v46 = vpop.permute.xlu0 %638  ;;  %v16163_v53 = vpop.permute.xlu1 %899  ;;  %v1531_v9 = vmul.f32 %v16175_v23, %v16132_v18 }
 0x1a9   : > { %21208 = vst [vmem:[#allocation41_spill] sm:$0xff] %v16161_v46  ;;  %21209 = vst [vmem:[#allocation4_spill] sm:$0xff] %v16163_v53  ;;  %v16169_v21 = vadd.f32 %v15878_v55, %v3148_v41  ;;  %934 = vperm.xlu0 %14922, %v16154_v52   ;;  %1350 = vperm.xlu1 %14923, %v1239_v39   ;;  %v1034_v41 = vadd.f32 %v1002_v17, %v741_v1  ;;  %v14951_v39 = vld [vmem:[%s20797_s1 + $0x78] sm:$0xff]  ;;  %v3345_v46 = vld [vmem:[#allocation2 + $0x68] sm:$0xff] }
 0x1aa   : > { %v1716_v53 = vmul.f32 %v15802_v58, %v21215_v42  ;;  %v2375_v48 = vmul.f32 %v14951_v39, %v16057_v49  ;;  %v1977_v1 = vmul.f32 %v15822_v22, %v15922_v32  ;;  %v21217_v49 = vmax.f32 %v15965_v10, 0.0 }
 0x1ab   : > { %v20832_v27 = vmax.f32 %v16169_v21, 0.0  ;;  %v1455_v17 = vadd.f32 %v1423_v56, %v1034_v41  ;;  %v16212_v56 = vld [vmem:[#allocation2 + $0xdf] sm:$0xff]  ;;  %v2563_v41 = vmul.f32 %v15829_v60, %v16063_v15  ;;  %v2824_v10 = vmul.f32 %v15846_v20, %v2687_v51 }
 0x1ac   : > { %v16184_v28 = vpop.permute.xlu0 %1315  ;;  %v16186_v13 = vpop.permute.xlu1 %1603  ;;  %v3313_v39 = vmax.f32 %v21217_v49, %v16065_v37  ;;  %v16227_v37 = vld [vmem:[%s20797_s1 + $0xa8] sm:$0xff] }
 0x1ad   : > { %21213 = vst [vmem:[#allocation24_spill] sm:$0xff] %v16184_v28  ;;  %21214 = vst [vmem:[#allocation9_spill] sm:$0xff] %v16186_v13  ;;  %1638 = vperm.xlu0 %14922, %v1531_v9   ;;  %1894 = vperm.xlu1 %14923, %v16077_v57   ;;  %v1748_v28 = vadd.f32 %v1716_v53, %v1455_v17  ;;  %v2270_v13 = vmul.f32 %v15817_v54, %v15992_v6 }
 0x1ae   : > { %3252 = vst.msk [vmem:[#allocation2 + $0x70] sm:$0xff] %vm3246_vm2, %v20832_v27  ;;  %v3736_v42 = vld [vmem:[#allocation2 + $0x50] sm:$0xff]  ;;  %v559_v15 = vmul.f32 %v16227_v37, %v16212_v56 }
 0x1af   : > { %13325 = vmatmul.mubr.msk.f32.gmra.mrb[4].mxu0 %vm3246_vm2, %v3736_v42  ;;  %v2009_v32 = vadd.f32 %v1977_v1, %v1748_v28  ;;  %v3377_v42 = vmax.f32 %v3313_v39, %v3345_v46  ;;  %v16232_v46 = vld [vmem:[#allocation2 + $0xe0] sm:$0xff]  ;;  %v21221_v39 = vld [vmem:[#allocation31_spill] sm:$0xff] }
 0x1b0   : > { %v16203_v9 = vpop.permute.xlu0 %1859  ;;  %v16205_v27 = vpop.permute.xlu1 %2147  ;;  %v16240_v1 = vld [vmem:[#allocation2 + $0xd9] sm:$0xff] }
 0x1b1   : > { %21216 = vst [vmem:[#allocation25_spill] sm:$0xff] %v16203_v9  ;;  %2182 = vperm.xlu0 %14922, %v2083_v36   ;;  %2470 = vperm.xlu1 %14923, %v2375_v48   ;;  %v2927_v9 = vmul.f32 %v16005_v24, %v15497_v19  ;;  %v2302_v31 = vadd.f32 %v2270_v13, %v2009_v32 }
 0x1b2   : > { %v742_v32 = vmul.f32 %v15764_v30, %v21221_v39  ;;  %v1978_v39 = vmul.f32 %v15822_v22, %v15976_v2  ;;  %v2376_v2 = vmul.f32 %v16022_v8, %v16132_v18  ;;  %v16294_v8 = vld [vmem:[%s20797_s1 + $0xb0] sm:$0xff] }
 0x1b3   : > { %v2595_v24 = vadd.f32 %v2563_v41, %v2302_v31  ;;  %v1532_v31 = vmul.f32 %v16072_v4, %v16212_v56  ;;  %v21222_v41 = vld [vmem:[#allocation38_spill] sm:$0xff] }
 0x1b4   : > { %v16218_v53 = vpop.permute.xlu0 %2435  ;;  %v2692_v17 = vpop.permute.xlu1 %2691 }
 0x1b5   : > { %v16220_v6 = vld [vmem:[#allocation2 + $0x69] sm:$0xff]  ;;  %2726 = vperm.xlu0 %14922, %v16003_v14   ;;  %3014 = vperm.xlu1 %14923, %v2927_v9   ;;  %v21219_v14 = vld [vmem:[#allocation32_spill] sm:$0xff]  ;;  %v2856_v48 = vadd.f32 %v2824_v10, %v2595_v24 }
 0x1b6   : > { %v3411_v19 = vmax.f32 %v3377_v42, %v16220_v6  ;;  %v1003_v13 = vmul.f32 %v15757_v40, %v21219_v14  ;;  %v21220_v9 = vld [vmem:[#allocation11_spill] sm:$0xff]  ;;  %v1424_v42 = vmul.f32 %v15771_v12, %v21222_v41 }
 0x1b7   : > { %v1240_v49 = vmul.f32 %v16240_v1, %v21220_v9  ;;  %v16280_v41 = vld [vmem:[#allocation2 + $0xe7] sm:$0xff] }
 0x1b8   : > { %3475 = vst.msk [vmem:[#allocation2 + $0x58] sm:$0xff] %vm3246_vm2, %v3411_v19  ;;  %v2980_v28 = vpop.permute.xlu0 %2979  ;;  %v16235_v51 = vpop.permute.xlu1 %643  ;;  %v1035_v24 = vadd.f32 %v1003_v13, %v742_v32  ;;  %v2084_v13 = vmul.f32 %v16157_v59, %v21182_v5  ;;  %v560_v18 = vmul.f32 %v16294_v8, %v16280_v41 }
 0x1b9   : > { %21218 = vst [vmem:[#allocation29_spill] sm:$0xff] %v16235_v51  ;;  %v3117_v36 = vmul.f32 %v15867_v7, %v2980_v28  ;;  %678 = vperm.xlu0 %14922, %v559_v15   ;;  %939 = vperm.xlu1 %14923, %v16232_v46   ;;  %v1717_v28 = vmul.f32 %v15802_v58, %v15907_v0 }
 0x1ba   : > { %v1456_v9 = vadd.f32 %v1424_v42, %v1035_v24  ;;  %v21223_v24 = vmax.f32 %v16016_v35, 0.0 }
 0x1bb   : > { %v3149_v10 = vadd.f32 %v3117_v36, %v2856_v48 }
 0x1bc   : > { %v16251_v19 = vpop.permute.xlu0 %904  ;;  %v16253_v15 = vpop.permute.xlu1 %1320  ;;  %v1749_v32 = vadd.f32 %v1717_v28, %v1456_v9  ;;  %v3346_v9 = vld [vmem:[#allocation2 + $0x70] sm:$0xff]  ;;  %v3314_v28 = vmax.f32 %v21223_v24, %v16151_v3 }
 0x1bd   : > { %v16258_v14 = vadd.f32 %v15878_v55, %v3149_v10  ;;  %1355 = vperm.xlu0 %14922, %v1240_v49   ;;  %1643 = vperm.xlu1 %14923, %v1532_v31   ;;  %v2271_v31 = vmul.f32 %v15817_v54, %v16051_v62  ;;  %v2564_v49 = vmul.f32 %v15829_v60, %v16136_v47 }
 0x1be   : > { %v2928_v47 = vmul.f32 %v16085_v26, %v21191_v43  ;;  %v21224_v43 = vld [vmem:[#allocation12_spill] sm:$0xff] }
 0x1bf   : > { %v3737_v51 = vld [vmem:[#allocation2 + $0x58] sm:$0xff]  ;;  %v20834_v48 = vmax.f32 %v16258_v14, 0.0 }
 0x1c0   : > { %13327 = vmatprep.mubr.msk.f32.mxu0 %vm3246_vm2, %v3737_v51  ;;  %v16266_v36 = vpop.permute.xlu0 %1608  ;;  %v16268_v0 = vpop.permute.xlu1 %1864  ;;  %v2010_v51 = vadd.f32 %v1978_v39, %v1749_v32 }
 0x1c1   : > { %3253 = vst.msk [vmem:[#allocation2 + $0x78] sm:$0xff] %vm3246_vm2, %v20834_v48  ;;  %1899 = vperm.xlu0 %14922, %v16154_v52   ;;  %2187 = vperm.xlu1 %14923, %v2084_v13   ;;  %v2825_v48 = vmul.f32 %v15846_v20, %v2692_v17  ;;  %v3378_v13 = vmax.f32 %v3314_v28, %v3346_v9  ;;  %v21228_v28 = vld [vmem:[#allocation37_spill] sm:$0xff] }
 0x1c2   : > { %v2303_v10 = vadd.f32 %v2271_v31, %v2010_v51  ;;  %v16306_v51 = vld [vmem:[#allocation2 + $0xe1] sm:$0xff] }
 0x1c3   : > { %v1241_v26 = vmul.f32 %v16306_v51, %v21224_v43 }
 0x1c4   : > { %v16282_v42 = vpop.permute.xlu0 %2152  ;;  %v16284_v62 = vpop.permute.xlu1 %2440  ;;  %v2596_v39 = vadd.f32 %v2564_v49, %v2303_v10 }
 0x1c5   : > { %2475 = vperm.xlu0 %14922, %v2376_v2   ;;  %2731 = vperm.xlu1 %14923, %v16077_v57   ;;  %v16304_v2 = vld [vmem:[#allocation2 + $0xe8] sm:$0xff] }
 0x1c6   : > { %v2857_v32 = vadd.f32 %v2825_v48, %v2596_v39  ;;  %v21227_v48 = vld [vmem:[#allocation36_spill] sm:$0xff]  ;;  %v1533_v39 = vmul.f32 %v16143_v29, %v16280_v41 }
 0x1c7   : > { %v743_v10 = vmul.f32 %v15764_v30, %v21227_v48  ;;  %v2085_v48 = vmul.f32 %v16240_v1, %v21198_v45 }
 0x1c8   : > { %v16300_v35 = vld [vmem:[#allocation2 + $0x71] sm:$0xff]  ;;  %v2697_v3 = vpop.permute.xlu0 %2696  ;;  %v2985_v17 = vpop.permute.xlu1 %2984 }
 0x1c9   : > { %v3118_v57 = vmul.f32 %v15867_v7, %v2985_v17  ;;  %3019 = vperm.xlu0 %14922, %v2928_v47   ;;  %v3412_v31 = vmax.f32 %v3378_v13, %v16300_v35  ;;  %683 = vperm.xlu1 %14923, %v560_v18   ;;  %v1004_v18 = vmul.f32 %v15757_v40, %v21228_v28 }
 0x1ca   : > { %v1425_v13 = vmul.f32 %v15771_v12, %v15905_v61  ;;  %v2377_v61 = vmul.f32 %v16091_v44, %v16212_v56  ;;  %v21229_v44 = vmax.f32 %v16108_v63, 0.0  ;;  %v2826_v63 = vmul.f32 %v15846_v20, %v2697_v3 }
 0x1cb   : > { %v3150_v24 = vadd.f32 %v3118_v57, %v2857_v32  ;;  %3476 = vst.msk [vmem:[#allocation2 + $0x60] sm:$0xff] %vm3246_vm2, %v3412_v31  ;;  %v1036_v31 = vadd.f32 %v1004_v18, %v743_v10  ;;  %v1979_v10 = vmul.f32 %v15822_v22, %v16049_v33 }
 0x1cc   : > { %v16311_v49 = vpop.permute.xlu0 %648  ;;  %v16313_v9 = vpop.permute.xlu1 %909  ;;  %v3315_v56 = vmax.f32 %v21229_v44, %v16220_v6  ;;  %v16369_v6 = vld [vmem:[%s20797_s1 + $0xb8] sm:$0xff]  ;;  %v21231_v44 = vld [vmem:[#allocation42_spill] sm:$0xff] }
 0x1cd   : > { %21225 = vst [vmem:[#allocation34_spill] sm:$0xff] %v16311_v49  ;;  %21226 = vst [vmem:[#allocation40_spill] sm:$0xff] %v16313_v9  ;;  %v16320_v47 = vadd.f32 %v15878_v55, %v3150_v24  ;;  %944 = vperm.xlu0 %14922, %v16304_v2   ;;  %1360 = vperm.xlu1 %14923, %v1241_v26   ;;  %v1718_v24 = vmul.f32 %v15802_v58, %v15974_v34  ;;  %v3347_v34 = vld [vmem:[#allocation2 + $0x78] sm:$0xff] }
 0x1ce   : > { %v1457_v28 = vadd.f32 %v1425_v13, %v1036_v31  ;;  %v2272_v9 = vmul.f32 %v15817_v54, %v16134_v25  ;;  %v16354_v13 = vld [vmem:[#allocation2 + $0xef] sm:$0xff]  ;;  %v2565_v31 = vmul.f32 %v15829_v60, %v16218_v53  ;;  %v2929_v49 = vmul.f32 %v16157_v59, %v15509_v50 }
 0x1cf   : > { %v20835_v17 = vmax.f32 %v16320_v47, 0.0  ;;  %v561_v53 = vmul.f32 %v16369_v6, %v16354_v13 }
 0x1d0   : > { %v16328_v32 = vpop.permute.xlu0 %1325  ;;  %v16330_v57 = vpop.permute.xlu1 %1613 }
 0x1d1   : > { %3254 = vst.msk [vmem:[#allocation2 + $0x80] sm:$0xff] %vm3246_vm2, %v20835_v17  ;;  %1648 = vperm.xlu0 %14922, %v1533_v39   ;;  %1904 = vperm.xlu1 %14923, %v16232_v46   ;;  %v1750_v39 = vadd.f32 %v1718_v24, %v1457_v28 }
 0x1d2   : > { %v3738_v26 = vld [vmem:[#allocation2 + $0x60] sm:$0xff] }
 0x1d3   : > { %13328 = vmatmul.mubr.msk.f32.gmra.mrb[6].mxu0 %vm3246_vm2, %v3738_v26  ;;  %v2011_v33 = vadd.f32 %v1979_v10, %v1750_v39  ;;  %v3379_v26 = vmax.f32 %v3315_v56, %v3347_v34  ;;  %v16380_v34 = vld [vmem:[#allocation2 + $0xe9] sm:$0xff]  ;;  %v744_v39 = vmul.f32 %v15764_v30, %v15890_v11  ;;  %v1534_v56 = vmul.f32 %v16227_v37, %v16354_v13  ;;  %v21236_v11 = vld [vmem:[#allocation22_spill] sm:$0xff] }
 0x1d4   : > { %v16345_v18 = vpop.permute.xlu0 %1869  ;;  %v16347_v17 = vpop.permute.xlu1 %2157 }
 0x1d5   : > { %2192 = vperm.xlu0 %14922, %v2085_v48   ;;  %2480 = vperm.xlu1 %14923, %v2377_v61   ;;  %v2304_v48 = vadd.f32 %v2272_v9, %v2011_v33  ;;  %v16374_v61 = vld [vmem:[#allocation2 + $0xf0] sm:$0xff]  ;;  %v21232_v33 = vld [vmem:[#allocation13_spill] sm:$0xff] }
 0x1d7   : > { %v2597_v59 = vadd.f32 %v2565_v31, %v2304_v48  ;;  %v1242_v31 = vmul.f32 %v16380_v34, %v21232_v33  ;;  %v21233_v48 = vld [vmem:[#allocation45_spill] sm:$0xff] }
 0x1d8   : > { %v16360_v24 = vld [vmem:[#allocation2 + $0x79] sm:$0xff]  ;;  %v16362_v28 = vpop.permute.xlu0 %2445  ;;  %v2702_v25 = vpop.permute.xlu1 %2701 }
 0x1d9   : > { %2736 = vperm.xlu0 %14922, %v16154_v52   ;;  %v3413_v50 = vmax.f32 %v3379_v26, %v16360_v24  ;;  %3024 = vperm.xlu1 %14923, %v2929_v49   ;;  %v2858_v52 = vadd.f32 %v2826_v63, %v2597_v59  ;;  %v1005_v49 = vmul.f32 %v15757_v40, %v21231_v44 }
 0x1da   : > { %v1426_v63 = vmul.f32 %v15771_v12, %v21233_v48  ;;  %v1719_v59 = vmul.f32 %v15802_v58, %v21236_v11  ;;  %v2086_v12 = vmul.f32 %v16306_v51, %v21207_v38  ;;  %v16420_v48 = vld [vmem:[#allocation2 + $0xf7] sm:$0xff] }
 0x1db   : > { %3477 = vst.msk [vmem:[#allocation2 + $0x68] sm:$0xff] %vm3246_vm2, %v3413_v50  ;;  %v1037_v40 = vadd.f32 %v1005_v49, %v744_v39  ;;  %v2378_v49 = vmul.f32 %v16175_v23, %v16280_v41  ;;  %v21238_v23 = vmax.f32 %v16169_v21, 0.0 }
 0x1dc   : > { %v2990_v9 = vpop.permute.xlu0 %2989  ;;  %v16377_v3 = vpop.permute.xlu1 %653 }
 0x1dd   : > { %21230 = vst [vmem:[#allocation10_spill] sm:$0xff] %v16377_v3  ;;  %v3119_v10 = vmul.f32 %v15867_v7, %v2990_v9  ;;  %688 = vperm.xlu0 %14922, %v561_v53   ;;  %949 = vperm.xlu1 %14923, %v16374_v61   ;;  %v3316_v41 = vmax.f32 %v21238_v23, %v16300_v35  ;;  %v16446_v23 = vld [vmem:[#allocation2 + $0xf8] sm:$0xff] }
 0x1df   : > { %v3151_v26 = vadd.f32 %v3119_v10, %v2858_v52  ;;  %v1458_v52 = vadd.f32 %v1426_v63, %v1037_v40  ;;  %v1980_v10 = vmul.f32 %v15822_v22, %v16118_v16  ;;  %v2566_v63 = vmul.f32 %v15829_v60, %v16284_v62  ;;  %v3348_v40 = vld [vmem:[#allocation2 + $0x80] sm:$0xff] }
 0x1e0   : > { %v16393_v53 = vpop.permute.xlu0 %914  ;;  %v16398_v30 = vpop.permute.xlu1 %1330 }
 0x1e1   : > { %21234 = vst [vmem:[#allocation26_spill] sm:$0xff] %v16393_v53  ;;  %v16396_v50 = vadd.f32 %v15878_v55, %v3151_v26  ;;  %21235 = vst [vmem:[#allocation27_spill] sm:$0xff] %v16398_v30  ;;  %1365 = vperm.xlu0 %14922, %v1242_v31   ;;  %1653 = vperm.xlu1 %14923, %v1534_v56   ;;  %v1751_v56 = vadd.f32 %v1719_v59, %v1458_v52  ;;  %v21240_v52 = vld [vmem:[#allocation7_spill] sm:$0xff] }
 0x1e2   : > { %v3739_v9 = vld [vmem:[#allocation2 + $0x68] sm:$0xff]  ;;  %v2273_v31 = vmul.f32 %v15817_v54, %v16205_v27  ;;  %v2827_v27 = vmul.f32 %v15846_v20, %v2702_v25 }
 0x1e3   : > { %v20836_v44 = vmax.f32 %v16396_v50, 0.0  ;;  %13330 = vmatprep.mubr.msk.f32.mxu0 %vm3246_vm2, %v3739_v9  ;;  %v2012_v16 = vadd.f32 %v1980_v10, %v1751_v56  ;;  %v2930_v10 = vmul.f32 %v16240_v1, %v21240_v52  ;;  %v21241_v1 = vld [vmem:[#allocation14_spill] sm:$0xff]  ;;  %v21250_v30 = vld [vmem:[#allocation11_spill] sm:$0xff] }
 0x1e4   : > { %v16408_v26 = vpop.permute.xlu0 %1618  ;;  %v16413_v39 = vpop.permute.xlu1 %1874 }
 0x1e5   : > { %21237 = vst [vmem:[#allocation33_spill] sm:$0xff] %v16408_v26  ;;  %3255 = vst.msk [vmem:[#allocation2 + $0x88] sm:$0xff] %vm3246_vm2, %v20836_v44  ;;  %1909 = vperm.xlu0 %14922, %v16304_v2   ;;  %2197 = vperm.xlu1 %14923, %v2086_v12   ;;  %v2305_v59 = vadd.f32 %v2273_v31, %v2012_v16  ;;  %v16436_v12 = vld [vmem:[%s20797_s1 + $0xc0] sm:$0xff]  ;;  %v16448_v44 = vld [vmem:[#allocation2 + $0xf1] sm:$0xff] }
 0x1e6   : > { %21239 = vst [vmem:[#allocation39_spill] sm:$0xff] %v16436_v12  ;;  %v562_v62 = vmul.f32 %v16436_v12, %v16420_v48 }
 0x1e7   : > { %v2598_v56 = vadd.f32 %v2566_v63, %v2305_v59  ;;  %v1243_v63 = vmul.f32 %v16448_v44, %v21241_v1  ;;  %v16458_v59 = vld [vmem:[%s20798_s2 + $0x1] ss:$0 sm:$0xff] }
 0x1e8   : > { %v16424_v11 = vpop.permute.xlu0 %2162  ;;  %v16426_v9 = vpop.permute.xlu1 %2450 }
 0x1e9   : > { %2485 = vperm.xlu0 %14922, %v2378_v49   ;;  %2741 = vperm.xlu1 %14923, %v16232_v46   ;;  %v3380_v49 = vmax.f32 %v3316_v41, %v3348_v40  ;;  %v2859_v25 = vadd.f32 %v2827_v27, %v2598_v56  ;;  %v21243_v27 = vld [vmem:[#allocation44_spill] sm:$0xff]  ;;  %v16473_v56 = vld [vmem:[%s20798_s2] ss:$0 sm:$0xff] }
 0x1ec   : > { %v16442_v21 = vld [vmem:[#allocation2 + $0x81] sm:$0xff]  ;;  %v2707_v35 = vpop.permute.xlu0 %2706  ;;  %v2995_v31 = vpop.permute.xlu1 %2994 }
 0x1ed   : > { %3029 = vperm.xlu0 %14922, %v2930_v10   ;;  %v3414_v46 = vmax.f32 %v3380_v49, %v16442_v21  ;;  %v3120_v16 = vmul.f32 %v15867_v7, %v2995_v31  ;;  %693 = vperm.xlu1 %14923, %v562_v62   ;;  %v1006_v62 = vmul.f32 %v16458_v59, %v21243_v27  ;;  %v21245_v31 = vld [vmem:[#allocation43_spill] sm:$0xff] }
 0x1ee   : > { %v1535_v10 = vmul.f32 %v16294_v8, %v16420_v48 }
 0x1ef   : > { %3478 = vst.msk [vmem:[#allocation2 + $0x70] sm:$0xff] %vm3246_vm2, %v3414_v46  ;;  %v3152_v40 = vadd.f32 %v3120_v16, %v2859_v25  ;;  %v745_v46 = vmul.f32 %v16473_v56, %v21245_v31  ;;  %v16480_v25 = vld [vmem:[%s20798_s2 + $0x2] ss:$0 sm:$0xff]  ;;  %v21246_v16 = vld [vmem:[#allocation23_spill] sm:$0xff] }
 0x1f0   : > { %v16453_v41 = vpop.permute.xlu0 %658  ;;  %v16462_v52 = vpop.permute.xlu1 %919  ;;  %v1427_v27 = vmul.f32 %v16480_v25, %v21246_v16  ;;  %v2379_v16 = vmul.f32 %v16072_v4, %v16354_v13  ;;  %v16508_v4 = vld [vmem:[#allocation2 + $0xff] sm:$0xff]  ;;  %v21252_v13 = vmax.f32 %v16258_v14, 0.0  ;;  %v16526_v14 = vld [vmem:[%s20797_s1 + $0xc8] sm:$0xff] }
 0x1f1   : > { %21242 = vst [vmem:[#allocation32_spill] sm:$0xff] %v16453_v41  ;;  %21244 = vst [vmem:[#allocation31_spill] sm:$0xff] %v16462_v52  ;;  %954 = vperm.xlu0 %14922, %v16446_v23   ;;  %v16468_v49 = vadd.f32 %v15878_v55, %v3152_v40  ;;  %1370 = vperm.xlu1 %14923, %v1243_v63   ;;  %v1038_v63 = vadd.f32 %v1006_v62, %v745_v46  ;;  %v21248_v41 = vld [vmem:[#allocation35_spill] sm:$0xff]  ;;  %v21251_v46 = vld [vmem:[#allocation25_spill] sm:$0xff] }
 0x1f2   : > { %v1720_v3 = vmul.f32 %v15802_v58, %v21248_v41  ;;  %v1981_v58 = vmul.f32 %v15822_v22, %v21251_v46 }
 0x1f3   : > { %v20837_v40 = vmax.f32 %v16468_v49, 0.0  ;;  %v1459_v62 = vadd.f32 %v1427_v27, %v1038_v63  ;;  %v3317_v27 = vmax.f32 %v21252_v13, %v16360_v24  ;;  %v2567_v63 = vmul.f32 %v15829_v60, %v16362_v28  ;;  %v16531_v24 = vld [vmem:[#allocation2 + $0x100] sm:$0xff] }
 0x1f4   : > { %v16485_v52 = vpop.permute.xlu0 %1335  ;;  %v16489_v53 = vpop.permute.xlu1 %1623  ;;  %v563_v60 = vmul.f32 %v16526_v14, %v16508_v4  ;;  %v1536_v13 = vmul.f32 %v16369_v6, %v16508_v4 }
 0x1f5   : > { %21247 = vst [vmem:[#allocation38_spill] sm:$0xff] %v16485_v52  ;;  %21249 = vst [vmem:[#allocation12_spill] sm:$0xff] %v16489_v53  ;;  %1658 = vperm.xlu0 %14922, %v1535_v10   ;;  %1914 = vperm.xlu1 %14923, %v16374_v61   ;;  %v2087_v52 = vmul.f32 %v16380_v34, %v21250_v30  ;;  %v1752_v10 = vadd.f32 %v1720_v3, %v1459_v62  ;;  %v3349_v53 = vld [vmem:[#allocation2 + $0x88] sm:$0xff] }
 0x1f6   : > { %3256 = vst.msk [vmem:[#allocation2 + $0x90] sm:$0xff] %vm3246_vm2, %v20837_v40  ;;  %v3740_v31 = vld [vmem:[#allocation2 + $0x70] sm:$0xff]  ;;  %v2274_v40 = vmul.f32 %v15817_v54, %v16282_v42  ;;  %v2931_v3 = vmul.f32 %v16306_v51, %v21182_v5  ;;  %v3381_v54 = vmax.f32 %v3317_v27, %v3349_v53 }
 0x1f7   : > { %13331 = vmatmul.mubr.msk.f32.gmra.mrb[8].mxu0 %vm3246_vm2, %v3740_v31  ;;  %v2013_v22 = vadd.f32 %v1981_v58, %v1752_v10  ;;  %v21255_v58 = vld [vmem:[#allocation8_spill] sm:$0xff]  ;;  %v21256_v27 = vld [vmem:[#allocation15_spill] sm:$0xff] }
 0x1f8   : > { %v16502_v41 = vpop.permute.xlu0 %1879  ;;  %v16506_v26 = vpop.permute.xlu1 %2167  ;;  %v1007_v10 = vmul.f32 %v16458_v59, %v21255_v58 }
 0x1f9   : > { %2202 = vperm.xlu0 %14922, %v2087_v52   ;;  %2490 = vperm.xlu1 %14923, %v2379_v16   ;;  %v2306_v42 = vadd.f32 %v2274_v40, %v2013_v22  ;;  %v2828_v52 = vmul.f32 %v15846_v20, %v2707_v35  ;;  %v16537_v35 = vld [vmem:[#allocation2 + $0xf9] sm:$0xff] }
 0x1fa   : > { %v21254_v40 = vld [vmem:[#allocation5_spill] sm:$0xff]  ;;  %v1244_v22 = vmul.f32 %v16537_v35, %v21256_v27 }
 0x1fb   : > { %v2599_v51 = vadd.f32 %v2567_v63, %v2306_v42  ;;  %v746_v46 = vmul.f32 %v16473_v56, %v21254_v40  ;;  %v21257_v63 = vld [vmem:[#allocation6_spill] sm:$0xff] }
 0x1fc   : > { %v16517_v31 = vpop.permute.xlu0 %2455  ;;  %v2712_v62 = vpop.permute.xlu1 %2711 }
 0x1fd   : > { %v16520_v16 = vld [vmem:[#allocation2 + $0x89] sm:$0xff]  ;;  %2746 = vperm.xlu0 %14922, %v16304_v2   ;;  %3034 = vperm.xlu1 %14923, %v2931_v3   ;;  %v2860_v28 = vadd.f32 %v2828_v52, %v2599_v51  ;;  %v1428_v3 = vmul.f32 %v16480_v25, %v21257_v63  ;;  %v21260_v51 = vld [vmem:[#allocation9_spill] sm:$0xff] }
 0x1fe   : > { %v3415_v5 = vmax.f32 %v3381_v54, %v16520_v16 }
 0x200   : > { %v3000_v20 = vpop.permute.xlu0 %2999  ;;  %3479 = vst.msk [vmem:[#allocation2 + $0x78] sm:$0xff] %vm3246_vm2, %v3415_v5  ;;  %v16535_v53 = vpop.permute.xlu1 %663  ;;  %v16560_v5 = vld [vmem:[%s20798_s2 + $0x3] ss:$0 sm:$0xff] }
 0x201   : > { %v3121_v2 = vmul.f32 %v15867_v7, %v3000_v20  ;;  %21253 = vst [vmem:[#allocation36_spill] sm:$0xff] %v16535_v53  ;;  %698 = vperm.xlu0 %14922, %v563_v60   ;;  %959 = vperm.xlu1 %14923, %v16531_v24   ;;  %v1039_v60 = vadd.f32 %v1007_v10, %v746_v46  ;;  %v16570_v46 = vld [vmem:[%s20798_s2 + $0x4] ss:$0 sm:$0xff]  ;;  %v16630_v53 = vld [vmem:[%s20798_s2 + $0x8] ss:$0 sm:$0xff] }
 0x202   : > { %v1721_v20 = vmul.f32 %v16560_v5, %v21260_v51  ;;  %v1982_v58 = vmul.f32 %v16570_v46, %v16268_v0  ;;  %v16588_v0 = vld [vmem:[%s20798_s2 + $0x5] ss:$0 sm:$0xff]  ;;  %v16597_v51 = vld [vmem:[%s20798_s2 + $0x6] ss:$0 sm:$0xff] }
 0x203   : > { %v3153_v7 = vadd.f32 %v3121_v2, %v2860_v28  ;;  %v1460_v40 = vadd.f32 %v1428_v3, %v1039_v60  ;;  %v2275_v63 = vmul.f32 %v16588_v0, %v16347_v17  ;;  %v16592_v3 = vld [vmem:[#allocation2 + $0x107] sm:$0xff]  ;;  %v21262_v17 = vmax.f32 %v16320_v47, 0.0 }
 0x204   : > { %v16550_v54 = vpop.permute.xlu0 %924  ;;  %v16555_v52 = vpop.permute.xlu1 %1340  ;;  %v2932_v47 = vmul.f32 %v16380_v34, %v21198_v45  ;;  %v16635_v45 = vld [vmem:[#allocation2 + $0x101] sm:$0xff]  ;;  %v21263_v34 = vld [vmem:[#allocation16_spill] sm:$0xff] }
 0x205   : > { %21258 = vst [vmem:[#allocation37_spill] sm:$0xff] %v16550_v54  ;;  %v16553_v42 = vadd.f32 %v15878_v55, %v3153_v7  ;;  %21259 = vst [vmem:[#allocation42_spill] sm:$0xff] %v16555_v52  ;;  %1375 = vperm.xlu0 %14922, %v1244_v22   ;;  %1663 = vperm.xlu1 %14923, %v1536_v13   ;;  %v2088_v55 = vmul.f32 %v16448_v44, %v21224_v43  ;;  %v16633_v52 = vld [vmem:[#allocation2 + $0x108] sm:$0xff] }
 0x206   : > { %v2380_v22 = vmul.f32 %v16143_v29, %v16420_v48  ;;  %v1753_v7 = vadd.f32 %v1721_v20, %v1460_v40  ;;  %v2568_v29 = vmul.f32 %v16597_v51, %v16426_v9  ;;  %v3350_v48 = vld [vmem:[#allocation2 + $0x90] sm:$0xff] }
 0x207   : > { %v20838_v28 = vmax.f32 %v16553_v42, 0.0  ;;  %v3741_v2 = vld [vmem:[#allocation2 + $0x78] sm:$0xff]  ;;  %v16618_v9 = vld [vmem:[%s20797_s1 + $0xd0] sm:$0xff] }
 0x208   : > { %13333 = vmatprep.mubr.msk.f32.mxu0 %vm3246_vm2, %v3741_v2  ;;  %v16575_v10 = vpop.permute.xlu0 %1628  ;;  %v16580_v13 = vpop.permute.xlu1 %1884  ;;  %v2014_v60 = vadd.f32 %v1982_v58, %v1753_v7  ;;  %v16611_v58 = vld [vmem:[%s20798_s2 + $0x7] ss:$0 sm:$0xff] }
 0x209   : > { %21261 = vst [vmem:[#allocation13_spill] sm:$0xff] %v16575_v10  ;;  %3257 = vst.msk [vmem:[#allocation2 + $0x98] sm:$0xff] %vm3246_vm2, %v20838_v28  ;;  %1919 = vperm.xlu0 %14922, %v16446_v23   ;;  %2207 = vperm.xlu1 %14923, %v2088_v55   ;;  %v3318_v55 = vmax.f32 %v21262_v17, %v16442_v21  ;;  %v2829_v7 = vmul.f32 %v16611_v58, %v2712_v62 }
 0x20a   : > { %v2307_v40 = vadd.f32 %v2275_v63, %v2014_v60  ;;  %v1722_v10 = vmul.f32 %v16560_v5, %v16266_v36  ;;  %v1983_v36 = vmul.f32 %v16570_v46, %v16345_v18 }
 0x20b   : > { %v3382_v21 = vmax.f32 %v3318_v55, %v3350_v48 }
 0x20c   : > { %v16601_v20 = vpop.permute.xlu0 %2172  ;;  %v16603_v2 = vpop.permute.xlu1 %2460  ;;  %v2600_v63 = vadd.f32 %v2568_v29, %v2307_v40  ;;  %v1245_v29 = vmul.f32 %v16635_v45, %v21263_v34  ;;  %v21265_v40 = vld [vmem:[#allocation30_spill] sm:$0xff] }
 0x20d   : > { %2495 = vperm.xlu0 %14922, %v2380_v22   ;;  %2751 = vperm.xlu1 %14923, %v16374_v61   ;;  %v564_v22 = vmul.f32 %v16618_v9, %v16592_v3 }
 0x20e   : > { %v2861_v62 = vadd.f32 %v2829_v7, %v2600_v63  ;;  %v1008_v7 = vmul.f32 %v16458_v59, %v21265_v40 }
 0x210   : > { %v16624_v60 = vld [vmem:[#allocation2 + $0x91] sm:$0xff]  ;;  %v2717_v17 = vpop.permute.xlu0 %2716  ;;  %v3005_v28 = vpop.permute.xlu1 %3004 }
 0x211   : > { %3039 = vperm.xlu0 %14922, %v2932_v47   ;;  %v3416_v61 = vmax.f32 %v3382_v21, %v16624_v60  ;;  %v3122_v54 = vmul.f32 %v16630_v53, %v3005_v28  ;;  %703 = vperm.xlu1 %14923, %v564_v22   ;;  %v1537_v28 = vmul.f32 %v16436_v12, %v16592_v3  ;;  %v16652_v22 = vld [vmem:[%s20799_s3] ss:$0 sm:$0xff] }
 0x213   : > { %3480 = vst.msk [vmem:[#allocation2 + $0x80] sm:$0xff] %vm3246_vm2, %v3416_v61  ;;  %v3154_v48 = vadd.f32 %v3122_v54, %v2861_v62  ;;  %v21267_v54 = vld [vmem:[#allocation28_spill] sm:$0xff] }
 0x214   : > { %v16640_v55 = vpop.permute.xlu0 %668  ;;  %v16644_v47 = vpop.permute.xlu1 %929  ;;  %v747_v63 = vmul.f32 %v16473_v56, %v21267_v54  ;;  %v21268_v61 = vld [vmem:[#allocation24_spill] sm:$0xff]  ;;  %v2089_v54 = vmul.f32 %v16537_v35, %v21232_v33 }
 0x215   : > { %21264 = vst [vmem:[#allocation45_spill] sm:$0xff] %v16640_v55  ;;  %21266 = vst [vmem:[#allocation22_spill] sm:$0xff] %v16644_v47  ;;  %964 = vperm.xlu0 %14922, %v16633_v52   ;;  %v16655_v21 = vadd.f32 %v16652_v22, %v3154_v48  ;;  %1380 = vperm.xlu1 %14923, %v1245_v29   ;;  %v1429_v62 = vmul.f32 %v16480_v25, %v21268_v61 }
 0x216   : > { %v1040_v55 = vadd.f32 %v1008_v7, %v747_v63  ;;  %v2381_v48 = vmul.f32 %v16227_v37, %v16508_v4  ;;  %v2276_v61 = vmul.f32 %v16588_v0, %v16424_v11  ;;  %v16685_v37 = vld [vmem:[#allocation2 + $0x10f] sm:$0xff]  ;;  %v21271_v4 = vmax.f32 %v16396_v50, 0.0  ;;  %v16703_v50 = vld [vmem:[%s20797_s1 + $0xd8] sm:$0xff] }
 0x217   : > { %v20840_v40 = vmax.f32 %v16655_v21, 0.0 }
 0x218   : > { %v16662_v47 = vpop.permute.xlu0 %1345  ;;  %v16666_v12 = vpop.permute.xlu1 %1633  ;;  %v1461_v7 = vadd.f32 %v1429_v62, %v1040_v55  ;;  %v3319_v55 = vmax.f32 %v21271_v4, %v16520_v16  ;;  %v2569_v62 = vmul.f32 %v16597_v51, %v16517_v31  ;;  %v565_v31 = vmul.f32 %v16703_v50, %v16685_v37  ;;  %v16708_v16 = vld [vmem:[#allocation2 + $0x110] sm:$0xff] }
 0x219   : > { %21269 = vst [vmem:[#allocation7_spill] sm:$0xff] %v16662_v47  ;;  %21270 = vst [vmem:[#allocation14_spill] sm:$0xff] %v16666_v12  ;;  %1668 = vperm.xlu0 %14922, %v1537_v28   ;;  %1924 = vperm.xlu1 %14923, %v16531_v24  }
 0x21a   : > { %3258 = vst.msk [vmem:[#allocation2 + $0xa0] sm:$0xff] %vm3246_vm2, %v20840_v40  ;;  %v3742_v29 = vld [vmem:[#allocation2 + $0x80] sm:$0xff]  ;;  %v1754_v63 = vadd.f32 %v1722_v10, %v1461_v7  ;;  %v3351_v40 = vld [vmem:[#allocation2 + $0x98] sm:$0xff]  ;;  %v2933_v10 = vmul.f32 %v16448_v44, %v21207_v38 }
 0x21b   : > { %13334 = vmatmul.mubr.msk.f32.gmra.mrb[10].mxu0 %vm3246_vm2, %v3742_v29  ;;  %v3383_v11 = vmax.f32 %v3319_v55, %v3351_v40  ;;  %v21274_v55 = vld [vmem:[#allocation4_spill] sm:$0xff] }
 0x21c   : > { %v16679_v28 = vpop.permute.xlu0 %1889  ;;  %v16683_v47 = vpop.permute.xlu1 %2177  ;;  %v2015_v18 = vadd.f32 %v1983_v36, %v1754_v63  ;;  %v16714_v63 = vld [vmem:[#allocation2 + $0x109] sm:$0xff] }
 0x21d   : > { %2212 = vperm.xlu0 %14922, %v2089_v54   ;;  %2500 = vperm.xlu1 %14923, %v2381_v48   ;;  %v2830_v54 = vmul.f32 %v16611_v58, %v2717_v17 }
 0x21e   : > { %v2308_v7 = vadd.f32 %v2276_v61, %v2015_v18  ;;  %v21273_v61 = vld [vmem:[#allocation41_spill] sm:$0xff]  ;;  %v1009_v18 = vmul.f32 %v16458_v59, %v21274_v55 }
 0x21f   : > { %v748_v4 = vmul.f32 %v16473_v56, %v21273_v61  ;;  %v1723_v61 = vmul.f32 %v16560_v5, %v16330_v57 }
 0x220   : > { %v16694_v29 = vpop.permute.xlu0 %2465  ;;  %v2722_v12 = vpop.permute.xlu1 %2721  ;;  %v2601_v44 = vadd.f32 %v2569_v62, %v2308_v7  ;;  %v1538_v62 = vmul.f32 %v16526_v14, %v16685_v37 }
 0x221   : > { %v16697_v48 = vld [vmem:[#allocation2 + $0x99] sm:$0xff]  ;;  %2756 = vperm.xlu0 %14922, %v16446_v23   ;;  %3044 = vperm.xlu1 %14923, %v2933_v10  }
 0x222   : > { %v3417_v38 = vmax.f32 %v3383_v11, %v16697_v48  ;;  %v2862_v40 = vadd.f32 %v2830_v54, %v2601_v44  ;;  %v21275_v10 = vld [vmem:[#allocation17_spill] sm:$0xff]  ;;  %v1430_v54 = vmul.f32 %v16480_v25, %v16253_v15 }
 0x223   : > { %v1246_v11 = vmul.f32 %v16714_v63, %v21275_v10 }
 0x224   : > { %v3010_v17 = vpop.permute.xlu0 %3009  ;;  %3481 = vst.msk [vmem:[#allocation2 + $0x88] sm:$0xff] %vm3246_vm2, %v3417_v38  ;;  %v16712_v36 = vpop.permute.xlu1 %673 }
 0x225   : > { %v3123_v23 = vmul.f32 %v16630_v53, %v3010_v17  ;;  %21272 = vst [vmem:[#allocation44_spill] sm:$0xff] %v16712_v36  ;;  %708 = vperm.xlu0 %14922, %v565_v31   ;;  %969 = vperm.xlu1 %14923, %v16708_v16   ;;  %v1041_v17 = vadd.f32 %v1009_v18, %v748_v4 }
 0x226   : > { %v2382_v4 = vmul.f32 %v16294_v8, %v16592_v3  ;;  %v21277_v8 = vmax.f32 %v16468_v49, 0.0 }
 0x227   : > { %v3155_v7 = vadd.f32 %v3123_v23, %v2862_v40  ;;  %v2090_v40 = vmul.f32 %v16635_v45, %v21241_v1  ;;  %v1462_v15 = vadd.f32 %v1430_v54, %v1041_v17  ;;  %v1984_v23 = vmul.f32 %v16570_v46, %v16413_v39  ;;  %v16754_v39 = vld [vmem:[#allocation2 + $0x117] sm:$0xff]  ;;  %v3352_v54 = vld [vmem:[#allocation2 + $0xa0] sm:$0xff] }
 0x228   : > { %v16727_v31 = vpop.permute.xlu0 %934  ;;  %v16732_v44 = vpop.permute.xlu1 %1350  ;;  %v3320_v3 = vmax.f32 %v21277_v8, %v16624_v60  ;;  %v16782_v8 = vld [vmem:[#allocation2 + $0x111] sm:$0xff] }
 0x229   : > { %21276 = vst [vmem:[#allocation43_spill] sm:$0xff] %v16727_v31  ;;  %v16730_v38 = vadd.f32 %v16652_v22, %v3155_v7  ;;  %1385 = vperm.xlu0 %14922, %v1246_v11   ;;  %1673 = vperm.xlu1 %14923, %v1538_v62   ;;  %v1755_v18 = vadd.f32 %v1723_v61, %v1462_v15 }
 0x22a   : > { %v2277_v62 = vmul.f32 %v16588_v0, %v16506_v26  ;;  %v2570_v11 = vmul.f32 %v16597_v51, %v16603_v2  ;;  %v2831_v26 = vmul.f32 %v16611_v58, %v2722_v12  ;;  %v2934_v15 = vmul.f32 %v16537_v35, %v21250_v30  ;;  %v21278_v30 = vld [vmem:[#allocation18_spill] sm:$0xff] }
 0x22b   : > { %v20841_v55 = vmax.f32 %v16730_v38, 0.0  ;;  %v3743_v36 = vld [vmem:[#allocation2 + $0x88] sm:$0xff]  ;;  %v1247_v35 = vmul.f32 %v16782_v8, %v21278_v30 }
 0x22c   : > { %13336 = vmatprep.mubr.msk.f32.mxu0 %vm3246_vm2, %v3743_v36  ;;  %v16742_v7 = vpop.permute.xlu0 %1638  ;;  %v16747_v57 = vpop.permute.xlu1 %1894  ;;  %v2016_v36 = vadd.f32 %v1984_v23, %v1755_v18  ;;  %v3384_v23 = vmax.f32 %v3320_v3, %v3352_v54  ;;  %v1010_v3 = vmul.f32 %v16458_v59, %v16251_v19 }
 0x22d   : > { %3259 = vst.msk [vmem:[#allocation2 + $0xa8] sm:$0xff] %vm3246_vm2, %v20841_v55  ;;  %1929 = vperm.xlu0 %14922, %v16633_v52   ;;  %2217 = vperm.xlu1 %14923, %v2090_v40   ;;  %v16770_v40 = vld [vmem:[%s20797_s1 + $0xe0] sm:$0xff] }
 0x22e   : > { %v2309_v61 = vadd.f32 %v2277_v62, %v2016_v36  ;;  %v566_v2 = vmul.f32 %v16770_v40, %v16754_v39  ;;  %v16780_v36 = vld [vmem:[#allocation2 + $0x118] sm:$0xff] }
 0x230   : > { %v16758_v17 = vpop.permute.xlu0 %2182  ;;  %v16760_v55 = vpop.permute.xlu1 %2470 }
 0x231   : > { %2505 = vperm.xlu0 %14922, %v2382_v4   ;;  %2761 = vperm.xlu1 %14923, %v16531_v24   ;;  %v2602_v4 = vadd.f32 %v2570_v11, %v2309_v61 }
 0x233   : > { %v2863_v24 = vadd.f32 %v2831_v26, %v2602_v4  ;;  %v1539_v26 = vmul.f32 %v16618_v9, %v16754_v39  ;;  %v1431_v4 = vmul.f32 %v16480_v25, %v16328_v32  ;;  %v2383_v32 = vmul.f32 %v16369_v6, %v16685_v37  ;;  %v16827_v6 = vld [vmem:[#allocation2 + $0x11f] sm:$0xff] }
 0x234   : > { %v16776_v49 = vld [vmem:[#allocation2 + $0xa1] sm:$0xff]  ;;  %v2727_v60 = vpop.permute.xlu0 %2726  ;;  %v3015_v18 = vpop.permute.xlu1 %3014  ;;  %v21285_v37 = vmax.f32 %v16553_v42, 0.0 }
 0x235   : > { %3049 = vperm.xlu0 %14922, %v2934_v15   ;;  %v3418_v12 = vmax.f32 %v3384_v23, %v16776_v49  ;;  %v3124_v62 = vmul.f32 %v16630_v53, %v3015_v18  ;;  %713 = vperm.xlu1 %14923, %v566_v2   ;;  %v21281_v15 = vld [vmem:[#allocation29_spill] sm:$0xff]  ;;  %v16845_v42 = vld [vmem:[%s20797_s1 + $0xe8] sm:$0xff] }
 0x236   : > { %v749_v23 = vmul.f32 %v16473_v56, %v21281_v15  ;;  %v1985_v15 = vmul.f32 %v16570_v46, %v16502_v41 }
 0x237   : > { %3482 = vst.msk [vmem:[#allocation2 + $0x90] sm:$0xff] %vm3246_vm2, %v3418_v12  ;;  %v3156_v11 = vadd.f32 %v3124_v62, %v2863_v24  ;;  %v21283_v24 = vld [vmem:[#allocation33_spill] sm:$0xff] }
 0x238   : > { %v16787_v54 = vpop.permute.xlu0 %678  ;;  %v16791_v61 = vpop.permute.xlu1 %939  ;;  %v1042_v12 = vadd.f32 %v1010_v3, %v749_v23  ;;  %v1724_v62 = vmul.f32 %v16560_v5, %v21283_v24  ;;  %v2278_v24 = vmul.f32 %v16588_v0, %v16601_v20 }
 0x239   : > { %21279 = vst [vmem:[#allocation23_spill] sm:$0xff] %v16787_v54  ;;  %21280 = vst [vmem:[#allocation35_spill] sm:$0xff] %v16791_v61  ;;  %974 = vperm.xlu0 %14922, %v16780_v36   ;;  %v16797_v2 = vadd.f32 %v16652_v22, %v3156_v11  ;;  %1390 = vperm.xlu1 %14923, %v1247_v35   ;;  %v2091_v11 = vmul.f32 %v16714_v63, %v21256_v27 }
 0x23a   : > { %v1463_v3 = vadd.f32 %v1431_v4, %v1042_v12  ;;  %v3321_v4 = vmax.f32 %v21285_v37, %v16697_v48  ;;  %v2571_v12 = vmul.f32 %v16597_v51, %v16694_v29  ;;  %v567_v29 = vmul.f32 %v16845_v42, %v16827_v6  ;;  %v16850_v48 = vld [vmem:[#allocation2 + $0x120] sm:$0xff] }
 0x23b   : > { %v20842_v18 = vmax.f32 %v16797_v2, 0.0 }
 0x23c   : > { %v16804_v19 = vpop.permute.xlu0 %1355  ;;  %v16808_v61 = vpop.permute.xlu1 %1643  ;;  %v1756_v23 = vadd.f32 %v1724_v62, %v1463_v3  ;;  %v2935_v62 = vmul.f32 %v16635_v45, %v21224_v43 }
 0x23d   : > { %21282 = vst [vmem:[#allocation11_spill] sm:$0xff] %v16804_v19  ;;  %21284 = vst [vmem:[#allocation25_spill] sm:$0xff] %v16808_v61  ;;  %1678 = vperm.xlu0 %14922, %v1539_v26   ;;  %1934 = vperm.xlu1 %14923, %v16708_v16  }
 0x23e   : > { %3260 = vst.msk [vmem:[#allocation2 + $0xb0] sm:$0xff] %vm3246_vm2, %v20842_v18  ;;  %v3744_v35 = vld [vmem:[#allocation2 + $0x90] sm:$0xff]  ;;  %v3353_v18 = vld [vmem:[#allocation2 + $0xa8] sm:$0xff]  ;;  %v2017_v41 = vadd.f32 %v1985_v15, %v1756_v23  ;;  %v16856_v23 = vld [vmem:[#allocation2 + $0x119] sm:$0xff] }
 0x23f   : > { %13337 = vmatmul.mubr.msk.f32.gmra.mrb[12].mxu0 %vm3246_vm2, %v3744_v35  ;;  %v3385_v20 = vmax.f32 %v3321_v4, %v3353_v18  ;;  %v21288_v4 = vld [vmem:[#allocation40_spill] sm:$0xff] }
 0x240   : > { %v16821_v26 = vpop.permute.xlu0 %1899  ;;  %v16825_v54 = vpop.permute.xlu1 %2187  ;;  %v2310_v3 = vadd.f32 %v2278_v24, %v2017_v41  ;;  %v21287_v24 = vld [vmem:[#allocation34_spill] sm:$0xff]  ;;  %v1011_v41 = vmul.f32 %v16458_v59, %v21288_v4  ;;  %v21293_v4 = vld [vmem:[#allocation12_spill] sm:$0xff] }
 0x241   : > { %2222 = vperm.xlu0 %14922, %v2091_v11   ;;  %2510 = vperm.xlu1 %14923, %v2383_v32   ;;  %v2832_v11 = vmul.f32 %v16611_v58, %v2727_v60  ;;  %v750_v37 = vmul.f32 %v16473_v56, %v21287_v24 }
 0x242   : > { %v2603_v45 = vadd.f32 %v2571_v12, %v2310_v3  ;;  %v1540_v12 = vmul.f32 %v16703_v50, %v16827_v6 }
 0x243   : > { %v1043_v24 = vadd.f32 %v1011_v41, %v750_v37  ;;  %v21294_v41 = vld [vmem:[#allocation39_spill] sm:$0xff] }
 0x244   : > { %v16836_v35 = vpop.permute.xlu0 %2475  ;;  %v2732_v19 = vpop.permute.xlu1 %2731  ;;  %v2864_v18 = vadd.f32 %v2832_v11, %v2603_v45  ;;  %v21290_v11 = vld [vmem:[#allocation27_spill] sm:$0xff] }
 0x245   : > { %v16839_v32 = vld [vmem:[#allocation2 + $0xa9] sm:$0xff]  ;;  %2766 = vperm.xlu0 %14922, %v16633_v52   ;;  %3054 = vperm.xlu1 %14923, %v2935_v62  }
 0x246   : > { %v3419_v43 = vmax.f32 %v3385_v20, %v16839_v32  ;;  %v21289_v62 = vld [vmem:[#allocation19_spill] sm:$0xff] }
 0x247   : > { %v1248_v20 = vmul.f32 %v16856_v23, %v21289_v62 }
 0x248   : > { %v3020_v60 = vpop.permute.xlu0 %3019  ;;  %3483 = vst.msk [vmem:[#allocation2 + $0x98] sm:$0xff] %vm3246_vm2, %v3419_v43  ;;  %v16854_v15 = vpop.permute.xlu1 %683 }
 0x249   : > { %v3125_v52 = vmul.f32 %v16630_v53, %v3020_v60  ;;  %21286 = vst [vmem:[#allocation5_spill] sm:$0xff] %v16854_v15  ;;  %718 = vperm.xlu0 %14922, %v567_v29   ;;  %979 = vperm.xlu1 %14923, %v16850_v48   ;;  %v1432_v29 = vmul.f32 %v16480_v25, %v21290_v11 }
 0x24a   : > { %v1725_v15 = vmul.f32 %v16560_v5, %v21293_v4  ;;  %v1986_v11 = vmul.f32 %v16570_v46, %v16580_v13  ;;  %v16896_v13 = vld [vmem:[#allocation2 + $0x127] sm:$0xff]  ;;  %v3354_v4 = vld [vmem:[#allocation2 + $0xb0] sm:$0xff] }
 0x24b   : > { %v3157_v3 = vadd.f32 %v3125_v52, %v2864_v18  ;;  %v2092_v18 = vmul.f32 %v16782_v8, %v21263_v34  ;;  %v1464_v52 = vadd.f32 %v1432_v29, %v1043_v24  ;;  %v2279_v29 = vmul.f32 %v16588_v0, %v16683_v47 }
 0x24c   : > { %v16869_v43 = vpop.permute.xlu0 %944  ;;  %v16874_v60 = vpop.permute.xlu1 %1360  ;;  %v2572_v24 = vmul.f32 %v16597_v51, %v16760_v55  ;;  %v2833_v47 = vmul.f32 %v16611_v58, %v2732_v19 }
 0x24d   : > { %21291 = vst [vmem:[#allocation8_spill] sm:$0xff] %v16869_v43  ;;  %v16872_v45 = vadd.f32 %v16652_v22, %v3157_v3  ;;  %21292 = vst [vmem:[#allocation15_spill] sm:$0xff] %v16874_v60  ;;  %1395 = vperm.xlu0 %14922, %v1248_v20   ;;  %1683 = vperm.xlu1 %14923, %v1540_v12   ;;  %v2384_v12 = vmul.f32 %v21294_v41, %v16754_v39  ;;  %v21295_v39 = vmax.f32 %v16655_v21, 0.0 }
 0x24e   : > { %v1757_v20 = vadd.f32 %v1725_v15, %v1464_v52 }
 0x24f   : > { %v20843_v31 = vmax.f32 %v16872_v45, 0.0  ;;  %v3745_v61 = vld [vmem:[#allocation2 + $0x98] sm:$0xff]  ;;  %v3322_v15 = vmax.f32 %v21295_v39, %v16776_v49  ;;  %v16924_v39 = vld [vmem:[#allocation2 + $0x121] sm:$0xff] }
 0x250   : > { %13339 = vmatprep.mubr.msk.f32.mxu0 %vm3246_vm2, %v3745_v61  ;;  %v16884_v3 = vpop.permute.xlu0 %1648  ;;  %v16889_v37 = vpop.permute.xlu1 %1904  ;;  %v2018_v61 = vadd.f32 %v1986_v11, %v1757_v20  ;;  %v2936_v11 = vmul.f32 %v16714_v63, %v21232_v33  ;;  %v21296_v33 = vld [vmem:[#allocation20_spill] sm:$0xff] }
 0x251   : > { %3261 = vst.msk [vmem:[#allocation2 + $0xb8] sm:$0xff] %vm3246_vm2, %v20843_v31  ;;  %1939 = vperm.xlu0 %14922, %v16780_v36   ;;  %2227 = vperm.xlu1 %14923, %v2092_v18   ;;  %v16912_v18 = vld [vmem:[%s20797_s1 + $0xf0] sm:$0xff]  ;;  %v3386_v41 = vmax.f32 %v3322_v15, %v3354_v4  ;;  %v1249_v63 = vmul.f32 %v16924_v39, %v21296_v33  ;;  %v21298_v15 = vld [vmem:[#allocation26_spill] sm:$0xff] }
 0x252   : > { %v2311_v52 = vadd.f32 %v2279_v29, %v2018_v61  ;;  %v568_v55 = vmul.f32 %v16912_v18, %v16896_v13  ;;  %v16922_v61 = vld [vmem:[#allocation2 + $0x128] sm:$0xff] }
 0x254   : > { %v16900_v31 = vpop.permute.xlu0 %2192  ;;  %v16902_v43 = vpop.permute.xlu1 %2480 }
 0x255   : > { %2515 = vperm.xlu0 %14922, %v2384_v12   ;;  %2771 = vperm.xlu1 %14923, %v16708_v16   ;;  %v2604_v12 = vadd.f32 %v2572_v24, %v2311_v52  ;;  %v1012_v52 = vmul.f32 %v16458_v59, %v21298_v15 }
 0x257   : > { %v2865_v19 = vadd.f32 %v2833_v47, %v2604_v12  ;;  %v1541_v47 = vmul.f32 %v16770_v40, %v16896_v13 }
 0x258   : > { %v16918_v21 = vld [vmem:[#allocation2 + $0xb1] sm:$0xff]  ;;  %v2737_v49 = vpop.permute.xlu0 %2736  ;;  %v3025_v20 = vpop.permute.xlu1 %3024 }
 0x259   : > { %3059 = vperm.xlu0 %14922, %v2936_v11   ;;  %v3420_v16 = vmax.f32 %v3386_v41, %v16918_v21  ;;  %v3126_v29 = vmul.f32 %v16630_v53, %v3025_v20  ;;  %723 = vperm.xlu1 %14923, %v568_v55   ;;  %v21300_v41 = vld [vmem:[#allocation10_spill] sm:$0xff] }
 0x25a   : > { %v751_v12 = vmul.f32 %v16473_v56, %v21300_v41  ;;  %v21301_v20 = vld [vmem:[#allocation38_spill] sm:$0xff]  ;;  %v2093_v41 = vmul.f32 %v16856_v23, %v21275_v10 }
 0x25b   : > { %3484 = vst.msk [vmem:[#allocation2 + $0xa0] sm:$0xff] %vm3246_vm2, %v3420_v16  ;;  %v3158_v24 = vadd.f32 %v3126_v29, %v2865_v19  ;;  %v1433_v16 = vmul.f32 %v16480_v25, %v21301_v20  ;;  %v2280_v20 = vmul.f32 %v16588_v0, %v16758_v17 }
 0x25c   : > { %v16929_v4 = vpop.permute.xlu0 %688  ;;  %v16933_v11 = vpop.permute.xlu1 %949  ;;  %v1044_v15 = vadd.f32 %v1012_v52, %v751_v12 }
 0x25d   : > { %21297 = vst [vmem:[#allocation6_spill] sm:$0xff] %v16929_v4  ;;  %21299 = vst [vmem:[#allocation9_spill] sm:$0xff] %v16933_v11  ;;  %984 = vperm.xlu0 %14922, %v16922_v61   ;;  %v16939_v55 = vadd.f32 %v16652_v22, %v3158_v24  ;;  %1400 = vperm.xlu1 %14923, %v1249_v63   ;;  %v21303_v11 = vld [vmem:[#allocation13_spill] sm:$0xff]  ;;  %v2385_v24 = vmul.f32 %v16526_v14, %v16827_v6  ;;  %v21305_v14 = vmax.f32 %v16730_v38, 0.0  ;;  %v16984_v38 = vld [vmem:[#allocation2 + $0x129] sm:$0xff] }
 0x25e   : > { %v1726_v4 = vmul.f32 %v16560_v5, %v21303_v11  ;;  %v1465_v52 = vadd.f32 %v1433_v16, %v1044_v15  ;;  %v1987_v11 = vmul.f32 %v16570_v46, %v16679_v28  ;;  %v2573_v28 = vmul.f32 %v16597_v51, %v16836_v35  ;;  %v16974_v15 = vld [vmem:[#allocation2 + $0x12f] sm:$0xff] }
 0x25f   : > { %v20844_v19 = vmax.f32 %v16939_v55, 0.0  ;;  %v3323_v6 = vmax.f32 %v21305_v14, %v16839_v32  ;;  %v1542_v35 = vmul.f32 %v16845_v42, %v16974_v15 }
 0x260   : > { %v16946_v29 = vpop.permute.xlu0 %1365  ;;  %v16950_v60 = vpop.permute.xlu1 %1653  ;;  %v1758_v12 = vadd.f32 %v1726_v4, %v1465_v52  ;;  %v2937_v4 = vmul.f32 %v16782_v8, %v21241_v1  ;;  %v21306_v1 = vld [vmem:[#allocation21_spill] sm:$0xff] }
 0x261   : > { %21302 = vst [vmem:[#allocation16_spill] sm:$0xff] %v16946_v29  ;;  %21304 = vst [vmem:[#allocation30_spill] sm:$0xff] %v16950_v60  ;;  %1688 = vperm.xlu0 %14922, %v1541_v47   ;;  %1944 = vperm.xlu1 %14923, %v16850_v48   ;;  %v1250_v8 = vmul.f32 %v16984_v38, %v21306_v1 }
 0x262   : > { %3262 = vst.msk [vmem:[#allocation2 + $0xc0] sm:$0xff] %vm3246_vm2, %v20844_v19  ;;  %v3746_v63 = vld [vmem:[#allocation2 + $0xa0] sm:$0xff]  ;;  %v3355_v19 = vld [vmem:[#allocation2 + $0xb8] sm:$0xff]  ;;  %v2019_v16 = vadd.f32 %v1987_v11, %v1758_v12 }
 0x263   : > { %13340 = vmatmul.mubr.msk.f32.gmra.mrb[14].mxu0 %vm3246_vm2, %v3746_v63  ;;  %v3387_v17 = vmax.f32 %v3323_v6, %v3355_v19  ;;  %v21309_v6 = vld [vmem:[#allocation31_spill] sm:$0xff] }
 0x264   : > { %v16963_v47 = vpop.permute.xlu0 %1909  ;;  %v16967_v29 = vpop.permute.xlu1 %2197  ;;  %v2312_v52 = vadd.f32 %v2280_v20, %v2019_v16  ;;  %v1013_v16 = vmul.f32 %v16458_v59, %v21309_v6  ;;  %v1511_v6 = vld [vmem:[#allocation2 + $0x137] sm:$0xff] }
 0x265   : > { %2232 = vperm.xlu0 %14922, %v2093_v41   ;;  %2520 = vperm.xlu1 %14923, %v2385_v24   ;;  %v2834_v41 = vmul.f32 %v16611_v58, %v2737_v49 }
 0x266   : > { %v2605_v19 = vadd.f32 %v2573_v28, %v2312_v52  ;;  %v2094_v28 = vmul.f32 %v16924_v39, %v21278_v30 }
 0x268   : > { %v16978_v63 = vpop.permute.xlu0 %2485  ;;  %v2742_v60 = vpop.permute.xlu1 %2741  ;;  %v2866_v49 = vadd.f32 %v2834_v41, %v2605_v19  ;;  %v2386_v19 = vmul.f32 %v16618_v9, %v16896_v13 }
 0x269   : > { %v16981_v24 = vld [vmem:[#allocation2 + $0xb9] sm:$0xff]  ;;  %2776 = vperm.xlu0 %14922, %v16780_v36   ;;  %3064 = vperm.xlu1 %14923, %v2937_v4   ;;  %v21308_v36 = vld [vmem:[#allocation32_spill] sm:$0xff] }
 0x26a   : > { %v3421_v32 = vmax.f32 %v3387_v17, %v16981_v24  ;;  %v752_v14 = vmul.f32 %v16473_v56, %v21308_v36  ;;  %v21310_v17 = vld [vmem:[#allocation42_spill] sm:$0xff] }
 0x26b   : > { %v1434_v52 = vmul.f32 %v16480_v25, %v21310_v17 }
 0x26c   : > { %v3030_v11 = vpop.permute.xlu0 %3029  ;;  %3485 = vst.msk [vmem:[#allocation2 + $0xa8] sm:$0xff] %vm3246_vm2, %v3421_v32  ;;  %v16993_v20 = vpop.permute.xlu1 %693 }
 0x26d   : > { %v3127_v12 = vmul.f32 %v16630_v53, %v3030_v11  ;;  %21307 = vst [vmem:[#allocation28_spill] sm:$0xff] %v16993_v20  ;;  %1405 = vperm.xlu0 %14922, %v1250_v8   ;;  %1693 = vperm.xlu1 %14923, %v1542_v35   ;;  %v1045_v35 = vadd.f32 %v1013_v16, %v752_v14  ;;  %v21311_v11 = vld [vmem:[#allocation14_spill] sm:$0xff] }
 0x26e   : > { %v2281_v14 = vmul.f32 %v16588_v0, %v16825_v54  ;;  %v1543_v16 = vmul.f32 %v16912_v18, %v1511_v6  ;;  %v21312_v54 = vmax.f32 %v16797_v2, 0.0  ;;  %v2387_v2 = vmul.f32 %v16703_v50, %v16974_v15  ;;  %v21315_v15 = vld [vmem:[#allocation36_spill] sm:$0xff] }
 0x26f   : > { %v3159_v4 = vadd.f32 %v3127_v12, %v2866_v49  ;;  %v1727_v49 = vmul.f32 %v16560_v5, %v21311_v11  ;;  %v1466_v17 = vadd.f32 %v1434_v52, %v1045_v35  ;;  %v2574_v52 = vmul.f32 %v16597_v51, %v16902_v43  ;;  %v3356_v35 = vld [vmem:[#allocation2 + $0xc0] sm:$0xff] }
 0x270   : > { %v17003_v41 = vpop.permute.xlu0 %954  ;;  %v17008_v8 = vpop.permute.xlu1 %1370  ;;  %v2939_v50 = vmul.f32 %v16924_v39, %v21263_v34  ;;  %v2388_v39 = vmul.f32 %v16770_v40, %v1511_v6  ;;  %v21318_v40 = vmax.f32 %v16872_v45, 0.0  ;;  %v2910_v45 = vld [vmem:[#allocation2 + $0x139] sm:$0xff] }
 0x271   : > { %v17006_v32 = vadd.f32 %v16652_v22, %v3159_v4  ;;  %1949 = vperm.xlu0 %14922, %v16922_v61   ;;  %2237 = vperm.xlu1 %14923, %v2094_v28   ;;  %v1988_v4 = vmul.f32 %v16570_v46, %v16747_v57  ;;  %v1759_v13 = vadd.f32 %v1727_v49, %v1466_v17  ;;  %v17042_v17 = vld [vmem:[#allocation2 + $0x130] sm:$0xff] }
 0x272   : > { %v2938_v57 = vmul.f32 %v16856_v23, %v21256_v27  ;;  %v2835_v49 = vmul.f32 %v16611_v58, %v2742_v60  ;;  %21313 = vst [vmem:[#allocation24_spill] sm:$0xff] %v17042_v17  ;;  %v2095_v23 = vmul.f32 %v16984_v38, %v21289_v62  ;;  %v3325_v6 = vmax.f32 %v21318_v40, %v16981_v24  ;;  %v21320_v40 = vld [vmem:[#allocation22_spill] sm:$0xff] }
 0x273   : > { %v20845_v12 = vmax.f32 %v17006_v32, 0.0  ;;  %v3747_v36 = vld [vmem:[#allocation2 + $0xa8] sm:$0xff]  ;;  %v2020_v28 = vadd.f32 %v1988_v4, %v1759_v13 }
 0x274   : > { %13342 = vmatprep.mubr.msk.f32.mxu0 %vm3246_vm2, %v3747_v36  ;;  %v17019_v20 = vpop.permute.xlu0 %1658  ;;  %v17024_v9 = vpop.permute.xlu1 %1914 }
 0x275   : > { %3263 = vst.msk [vmem:[#allocation2 + $0xc8] sm:$0xff] %vm3246_vm2, %v20845_v12  ;;  %2525 = vperm.xlu0 %14922, %v2386_v19   ;;  %2781 = vperm.xlu1 %14923, %v16850_v48   ;;  %v3324_v19 = vmax.f32 %v21312_v54, %v16918_v21  ;;  %v2313_v48 = vadd.f32 %v2281_v14, %v2020_v28  ;;  %v21314_v28 = vld [vmem:[#allocation37_spill] sm:$0xff] }
 0x277   : > { %v3388_v27 = vmax.f32 %v3324_v19, %v3356_v35  ;;  %v2606_v43 = vadd.f32 %v2574_v52, %v2313_v48  ;;  %v1014_v52 = vmul.f32 %v16458_v59, %v21314_v28  ;;  %v21316_v19 = vld [vmem:[#allocation7_spill] sm:$0xff] }
 0x278   : > { %v17034_v11 = vpop.permute.xlu0 %2202  ;;  %v17036_v36 = vpop.permute.xlu1 %2490  ;;  %v1435_v48 = vmul.f32 %v16480_v25, %v21316_v19  ;;  %v2357_v19 = vld [vmem:[#allocation2 + $0x13f] sm:$0xff] }
 0x279   : > { %3069 = vperm.xlu0 %14922, %v2938_v57   ;;  %1698 = vperm.xlu1 %14923, %v1543_v16   ;;  %v2867_v60 = vadd.f32 %v2835_v49, %v2606_v43  ;;  %v1804_v49 = vld [vmem:[#allocation2 + $0x138] sm:$0xff]  ;;  %v2389_v24 = vmul.f32 %v16845_v42, %v2357_v19  ;;  %v1015_v42 = vmul.f32 %v16458_v59, %v21320_v40 }
 0x27a   : > { %v1436_v19 = vmul.f32 %v16480_v25, %v16732_v44  ;;  %v1990_v44 = vmul.f32 %v16570_v46, %v16889_v37  ;;  %v2911_v37 = vld [vmem:[#allocation2 + $0x141] sm:$0xff] }
 0x27c   : > { %v17046_v4 = vld [vmem:[#allocation2 + $0xc1] sm:$0xff]  ;;  %v2747_v13 = vpop.permute.xlu0 %2746  ;;  %v3035_v12 = vpop.permute.xlu1 %3034 }
 0x27d   : > { %1954 = vperm.xlu0 %14922, %v17042_v17   ;;  %v3422_v21 = vmax.f32 %v3388_v27, %v17046_v4  ;;  %v3128_v14 = vmul.f32 %v16630_v53, %v3035_v12  ;;  %2242 = vperm.xlu1 %14923, %v2095_v23   ;;  %v753_v12 = vmul.f32 %v16473_v56, %v21315_v15 }
 0x27f   : > { %3486 = vst.msk [vmem:[#allocation2 + $0xb0] sm:$0xff] %vm3246_vm2, %v3422_v21  ;;  %v3160_v16 = vadd.f32 %v3128_v14, %v2867_v60  ;;  %v1046_v43 = vadd.f32 %v1014_v52, %v753_v12  ;;  %v2282_v52 = vmul.f32 %v16588_v0, %v16900_v31 }
 0x280   : > { %v17054_v57 = vpop.permute.xlu0 %698  ;;  %v17058_v35 = vpop.permute.xlu1 %959 }
 0x281   : > { %2530 = vperm.xlu0 %14922, %v2387_v2   ;;  %v17061_v54 = vadd.f32 %v16652_v22, %v3160_v16  ;;  %2786 = vperm.xlu1 %14923, %v16922_v61   ;;  %v1728_v2 = vmul.f32 %v16560_v5, %v16742_v7  ;;  %v17077_v61 = vld [vmem:[#allocation2 + $0x131] sm:$0xff]  ;;  %v1467_v14 = vadd.f32 %v1435_v48, %v1046_v43 }
 0x282   : > { %21317 = vst [vmem:[#allocation41_spill] sm:$0xff] %v17077_v61  ;;  %v2096_v60 = vmul.f32 %v21296_v33, %v17077_v61  ;;  %v1989_v7 = vmul.f32 %v16570_v46, %v16821_v26  ;;  %v2575_v26 = vmul.f32 %v16597_v51, %v16978_v63  ;;  %v2940_v48 = vmul.f32 %v16984_v38, %v21275_v10 }
 0x283   : > { %v20848_v27 = vmax.f32 %v17061_v54, 0.0  ;;  %v1760_v28 = vadd.f32 %v1728_v2, %v1467_v14  ;;  %v2097_v14 = vmul.f32 %v2910_v45, %v21306_v1 }
 0x284   : > { %v17071_v23 = vpop.permute.xlu0 %1375  ;;  %v17075_v21 = vpop.permute.xlu1 %1663 }
 0x285   : > { %3074 = vperm.xlu0 %14922, %v2939_v50   ;;  %3264 = vst.msk [vmem:[#allocation2 + $0xd0] sm:$0xff] %vm3246_vm2, %v20848_v27  ;;  %1959 = vperm.xlu1 %14923, %v1804_v49   ;;  %v3357_v50 = vld [vmem:[#allocation2 + $0xc8] sm:$0xff]  ;;  %v2021_v12 = vadd.f32 %v1989_v7, %v1760_v28 }
 0x286   : > { %v3748_v34 = vld [vmem:[#allocation2 + $0xb0] sm:$0xff]  ;;  %v3389_v31 = vmax.f32 %v3325_v6, %v3357_v50  ;;  %v2358_v6 = vld [vmem:[#allocation2 + $0x147] sm:$0xff] }
 0x287   : > { %13343 = vmatmul.mubr.msk.f32.gmra.mrb[16].mxu0 %vm3246_vm2, %v3748_v34  ;;  %v2314_v2 = vadd.f32 %v2282_v52, %v2021_v12  ;;  %v2836_v34 = vmul.f32 %v16611_v58, %v2747_v13  ;;  %v21319_v52 = vld [vmem:[#allocation45_spill] sm:$0xff] }
 0x288   : > { %v17088_v16 = vpop.permute.xlu0 %1919  ;;  %v17092_v15 = vpop.permute.xlu1 %2207  ;;  %v754_v50 = vmul.f32 %v16473_v56, %v21319_v52  ;;  %v2390_v56 = vmul.f32 %v16912_v18, %v2358_v6  ;;  %v2912_v6 = vld [vmem:[#allocation2 + $0x149] sm:$0xff] }
 0x289   : > { %2247 = vperm.xlu0 %14922, %v2096_v60   ;;  %2535 = vperm.xlu1 %14923, %v2388_v39   ;;  %v2607_v10 = vadd.f32 %v2575_v26, %v2314_v2  ;;  %v2941_v26 = vmul.f32 %v21278_v30, %v17077_v61 }
 0x28a   : > { %v1047_v59 = vadd.f32 %v1015_v42, %v754_v50  ;;  %v2576_v50 = vmul.f32 %v16597_v51, %v17036_v36  ;;  %v2944_v36 = vmul.f32 %v2912_v6, %v21306_v1  ;;  %v17198_v6 = vld [vmem:[%s20798_s2 + $0x2] ss:$0 sm:$0xff] }
 0x28b   : > { %v2868_v7 = vadd.f32 %v2836_v34, %v2607_v10  ;;  %v21321_v34 = vld [vmem:[#allocation25_spill] sm:$0xff] }
 0x28c   : > { %v17101_v43 = vpop.permute.xlu0 %2495  ;;  %v17104_v60 = vld [vmem:[#allocation2 + $0xc9] sm:$0xff]  ;;  %v2752_v39 = vpop.permute.xlu1 %2751  ;;  %v1468_v25 = vadd.f32 %v1436_v19, %v1047_v59 }
 0x28d   : > { %2791 = vperm.xlu0 %14922, %v17042_v17   ;;  %3079 = vperm.xlu1 %14923, %v2940_v48   ;;  %v3423_v63 = vmax.f32 %v3389_v31, %v17104_v60  ;;  %v3358_v40 = vld [vmem:[#allocation2 + $0xd0] sm:$0xff] }
 0x28f   : > { %3487 = vst.msk [vmem:[#allocation2 + $0xb8] sm:$0xff] %vm3246_vm2, %v3423_v63 }
 0x290   : > { %v3040_v38 = vpop.permute.xlu0 %3039  ;;  %v17112_v28 = vpop.permute.xlu1 %703 }
 0x291   : > { %v3129_v13 = vmul.f32 %v16630_v53, %v3040_v38  ;;  %2252 = vperm.xlu0 %14922, %v2097_v14   ;;  %2540 = vperm.xlu1 %14923, %v2389_v24   ;;  %v1729_v24 = vmul.f32 %v16560_v5, %v21321_v34  ;;  %v2650_v14 = vld [vmem:[#allocation2 + $0x140] sm:$0xff]  ;;  %v2283_v38 = vmul.f32 %v16588_v0, %v16967_v29 }
 0x293   : > { %v3161_v12 = vadd.f32 %v3129_v13, %v2868_v7  ;;  %v2942_v7 = vmul.f32 %v2910_v45, %v21289_v62  ;;  %v2651_v13 = vld [vmem:[#allocation2 + $0x148] sm:$0xff]  ;;  %v2837_v62 = vmul.f32 %v16611_v58, %v2752_v39  ;;  %v2943_v45 = vmul.f32 %v2911_v37, %v21296_v33 }
 0x294   : > { %v17122_v48 = vpop.permute.xlu0 %964  ;;  %v17127_v2 = vpop.permute.xlu1 %1380  ;;  %v17173_v39 = vld [vmem:[%s20797_s1 + $0x8] sm:$0xff] }
 0x295   : > { %v17125_v31 = vadd.f32 %v16652_v22, %v3161_v12  ;;  %2796 = vperm.xlu0 %14922, %v1804_v49   ;;  %3084 = vperm.xlu1 %14923, %v2941_v26   ;;  %v1761_v49 = vadd.f32 %v1729_v24, %v1468_v25  ;;  %v21322_v26 = vmax.f32 %v16939_v55, 0.0 }
 0x296   : > { %v3749_v63 = vld [vmem:[#allocation2 + $0xb8] sm:$0xff] }
 0x297   : > { %v20847_v30 = vmax.f32 %v17125_v31, 0.0  ;;  %13345 = vmatprep.mubr.msk.f32.mxu0 %vm3246_vm2, %v3749_v63  ;;  %v2022_v52 = vadd.f32 %v1990_v44, %v1761_v49  ;;  %v3326_v29 = vmax.f32 %v21322_v26, %v17046_v4  ;;  %v17165_v4 = vld [vmem:[%s20797_s1] sm:$0xff]  ;;  %v21324_v49 = vld [vmem:[#allocation43_spill] sm:$0xff] }
 0x298   : > { %v17136_v10 = vpop.permute.xlu0 %1668  ;;  %v17141_v18 = vpop.permute.xlu1 %1924  ;;  %v17178_v44 = vld [vmem:[%s20798_s2 + $0x1] ss:$0 sm:$0xff]  ;;  %v21327_v26 = vld [vmem:[#allocation11_spill] sm:$0xff] }
 0x299   : > { %3265 = vst.msk [vmem:[#allocation2 + $0xd8] sm:$0xff] %vm3246_vm2, %v20847_v30  ;;  %2545 = vperm.xlu0 %14922, %v2390_v56   ;;  %2801 = vperm.xlu1 %14923, %v2650_v14   ;;  %v2315_v19 = vadd.f32 %v2283_v38, %v2022_v52  ;;  %v3390_v56 = vmax.f32 %v3326_v29, %v3358_v40  ;;  %v17191_v52 = vld [vmem:[%s20798_s2] ss:$0 sm:$0xff] }
 0x29a   : > { %v1016_v38 = vmul.f32 %v17178_v44, %v21324_v49  ;;  %v1437_v29 = vmul.f32 %v17198_v6, %v21327_v26  ;;  %v2577_v26 = vmul.f32 %v16597_v51, %v17101_v43 }
 0x29b   : > { %v2608_v59 = vadd.f32 %v2576_v50, %v2315_v19  ;;  %v21326_v50 = vld [vmem:[#allocation44_spill] sm:$0xff] }
 0x29c   : > { %v17148_v42 = vpop.permute.xlu0 %2212  ;;  %v17150_v12 = vpop.permute.xlu1 %2500  ;;  %v755_v40 = vmul.f32 %v17191_v52, %v21326_v50  ;;  %v17206_v19 = vld [vmem:[%s20797_s1 + $0x18] sm:$0xff] }
 0x29d   : > { %3089 = vperm.xlu0 %14922, %v2942_v7   ;;  %2806 = vperm.xlu1 %14923, %v2651_v13   ;;  %v2869_v25 = vadd.f32 %v2837_v62, %v2608_v59  ;;  %v15020_v13 = vmov 2   ;;  %v1730_v59 = vmul.f32 %v16560_v5, %v16884_v3  ;;  %v17231_v5 = vld [vmem:[%s20797_s1 + $0x28] sm:$0xff] }
 0x2a0   : > { %v17158_v34 = vld [vmem:[#allocation2 + $0xd1] sm:$0xff]  ;;  %v2757_v24 = vpop.permute.xlu0 %2756  ;;  %v3045_v63 = vpop.permute.xlu1 %3044 }
 0x2a1   : > { %3094 = vperm.xlu0 %14922, %v2943_v45   ;;  %v3424_v14 = vmax.f32 %v3390_v56, %v17158_v34  ;;  %v3130_v55 = vmul.f32 %v16630_v53, %v3045_v63  ;;  %3099 = vperm.xlu1 %14923, %v2944_v36   ;;  %v17214_v56 = vld [vmem:[%s20797_s1 + $0x10] sm:$0xff]  ;;  %v1048_v36 = vadd.f32 %v1016_v38, %v755_v40 }
 0x2a3   : > { %3488 = vst.msk [vmem:[#allocation2 + $0xc0] sm:$0xff] %vm3246_vm2, %v3424_v14  ;;  %v3162_v33 = vadd.f32 %v3130_v55, %v2869_v25  ;;  %v1469_v25 = vadd.f32 %v1437_v29, %v1048_v36  ;;  %v1991_v55 = vmul.f32 %v16570_v46, %v16963_v47  ;;  %v2284_v46 = vmul.f32 %v16588_v0, %v17034_v11  ;;  %v3359_v47 = vld [vmem:[#allocation2 + $0xd8] sm:$0xff]  ;;  %v17261_v11 = vld [vmem:[%s20797_s1 + $0x30] sm:$0xff] }
 0x2a4   : > { %v17168_v1 = vpop.permute.xlu0 %708  ;;  %v17182_v7 = vpop.permute.xlu1 %969  ;;  %v17254_v29 = vld [vmem:[%s20797_s1 + $0x38] sm:$0xff]  ;;  %v2838_v36 = vmul.f32 %v16611_v58, %v2757_v24  ;;  %v17277_v58 = vld [vmem:[%s20797_s1 + $0x40] sm:$0xff] }
 0x2a5   : > { %21323 = vst [vmem:[#allocation4_spill] sm:$0xff] %v17168_v1  ;;  %21325 = vst [vmem:[#allocation17_spill] sm:$0xff] %v17182_v7  ;;  %14924 = vset.pattern.permute.xlu0 %v15020_v13  ;;  %v17185_v37 = vadd.f32 %v16652_v22, %v3162_v33  ;;  %14925 = vset.pattern.permute.xlu1 %v15020_v13  ;;  %v17238_v33 = vld [vmem:[%s20797_s1 + $0x20] sm:$0xff]  ;;  %v1762_v49 = vadd.f32 %v1730_v59, %v1469_v25  ;;  %v21328_v13 = vmax.f32 %v17006_v32, 0.0  ;;  %v17272_v25 = vld [vmem:[%s20797_s1 + $0x48] sm:$0xff] }
 0x2a6   : > { %3539 = vperm.xlu0 %14924, %v17165_v4   ;;  %3544 = vperm.xlu1 %14925, %v17173_v39   ;;  %v17407_v7 = vld [vmem:[%s20798_s2 + $0x8] ss:$0 sm:$0xff] }
 0x2a7   : > { %v20846_v62 = vmax.f32 %v17185_v37, 0.0  ;;  %v3327_v50 = vmax.f32 %v21328_v13, %v17104_v60  ;;  %v2023_v40 = vadd.f32 %v1991_v55, %v1762_v49 }
 0x2a8   : > { %v17209_v45 = vpop.permute.xlu0 %1385  ;;  %v17218_v63 = vpop.permute.xlu1 %1673 }
 0x2a9   : > { %3266 = vst.msk [vmem:[#allocation2 + $0xe0] sm:$0xff] %vm3246_vm2, %v20846_v62  ;;  %v3391_v32 = vmax.f32 %v3327_v50, %v3359_v47  ;;  %v2316_v60 = vadd.f32 %v2284_v46, %v2023_v40  ;;  %v21330_v47 = vld [vmem:[#allocation23_spill] sm:$0xff]  ;;  %v17332_v62 = vld [vmem:[%s20798_s2 + $0x4] ss:$0 sm:$0xff] }
 0x2aa   : > { %3554 = vperm.xlu0 %14924, %v17206_v19   ;;  %v3750_v14 = vld [vmem:[#allocation2 + $0xc0] sm:$0xff]  ;;  %3549 = vperm.xlu1 %14925, %v17214_v56   ;;  %v756_v13 = vmul.f32 %v17191_v52, %v21330_v47  ;;  %v21331_v50 = vld [vmem:[#allocation35_spill] sm:$0xff]  ;;  %v1992_v30 = vmul.f32 %v17332_v62, %v17024_v9 }
 0x2ab   : > { %13346 = vmatmul.mubr.msk.f32.gmra.mrb[18].mxu0 %vm3246_vm2, %v3750_v14  ;;  %v2609_v14 = vadd.f32 %v2577_v26, %v2316_v60  ;;  %v1017_v40 = vmul.f32 %v17178_v44, %v21331_v50  ;;  %v21333_v60 = vld [vmem:[#allocation15_spill] sm:$0xff]  ;;  %v21336_v47 = vld [vmem:[#allocation30_spill] sm:$0xff] }
 0x2ac   : > { %v17233_v3 = vpop.permute.xlu0 %1929  ;;  %v17242_v38 = vpop.permute.xlu1 %2217  ;;  %v17352_v9 = vld [vmem:[%s20798_s2 + $0x5] ss:$0 sm:$0xff] }
 0x2ad   : > { %v2870_v24 = vadd.f32 %v2838_v36, %v2609_v14 }
 0x2ae   : > { %3564 = vperm.xlu0 %14924, %v17231_v5   ;;  %3559 = vperm.xlu1 %14925, %v17238_v33  }
 0x2b0   : > { %v17256_v0 = vpop.permute.xlu0 %2505  ;;  %v17264_v59 = vld [vmem:[#allocation2 + $0xd9] sm:$0xff]  ;;  %v2762_v51 = vpop.permute.xlu1 %2761 }
 0x2b1   : > { %v3425_v43 = vmax.f32 %v3391_v32, %v17264_v59  ;;  %v17292_v32 = vld [vmem:[%s20797_s1 + $0x58] sm:$0xff] }
 0x2b2   : > { %3574 = vperm.xlu0 %14924, %v17254_v29   ;;  %3569 = vperm.xlu1 %14925, %v17261_v11   ;;  %21332 = vst [vmem:[#allocation29_spill] sm:$0xff] %v17292_v32 }
 0x2b3   : > { %3489 = vst.msk [vmem:[#allocation2 + $0xc8] sm:$0xff] %vm3246_vm2, %v3425_v43  ;;  %v17301_v43 = vld [vmem:[%s20797_s1 + $0x50] sm:$0xff] }
 0x2b4   : > { %v3050_v55 = vpop.permute.xlu0 %3049  ;;  %v17281_v46 = vpop.permute.xlu1 %713 }
 0x2b5   : > { %v3131_v49 = vmul.f32 %v16630_v53, %v3050_v55  ;;  %21329 = vst [vmem:[#allocation18_spill] sm:$0xff] %v17281_v46  ;;  %v1438_v53 = vmul.f32 %v17198_v6, %v21333_v60  ;;  %v17319_v60 = vld [vmem:[%s20797_s1 + $0x68] sm:$0xff] }
 0x2b6   : > { %3584 = vperm.xlu0 %14924, %v17272_v25   ;;  %3579 = vperm.xlu1 %14925, %v17277_v58   ;;  %21337 = vst [vmem:[#allocation40_spill] sm:$0xff] %v17319_v60 }
 0x2b7   : > { %v3163_v26 = vadd.f32 %v3131_v49, %v2870_v24  ;;  %v1049_v24 = vadd.f32 %v1017_v40, %v756_v13  ;;  %v17311_v49 = vld [vmem:[%s20798_s2 + $0x3] ss:$0 sm:$0xff] }
 0x2b8   : > { %v17296_v36 = vpop.permute.xlu0 %974  ;;  %v17306_v55 = vpop.permute.xlu1 %1390  ;;  %v1731_v50 = vmul.f32 %v17311_v49, %v21336_v47  ;;  %v3729_v40 = vld [vmem:[%s20800_s4] sm:$0xff] }
 0x2b9   : > { %21334 = vst [vmem:[#allocation33_spill] sm:$0xff] %v17296_v36  ;;  %v17304_v14 = vadd.f32 %v16652_v22, %v3163_v26  ;;  %21335 = vst [vmem:[#allocation34_spill] sm:$0xff] %v17306_v55  ;;  %v3730_v26 = vld [vmem:[%s20800_s4 + $0x8] sm:$0xff]  ;;  %v1470_v47 = vadd.f32 %v1438_v53, %v1049_v24  ;;  %v17342_v22 = vld [vmem:[%s20797_s1 + $0x60] sm:$0xff] }
 0x2ba   : > { %3594 = vperm.xlu0 %14924, %v17292_v32   ;;  %3589 = vperm.xlu1 %14925, %v17301_v43   ;;  %v3751_v13 = vld [vmem:[#allocation2 + $0xc8] sm:$0xff]  ;;  %21338 = vst [vmem:[#allocation19_spill] sm:$0xff] %v17342_v22  ;;  %v14290_v61 = vpack.c.bf16 %v3730_v26, %v3729_v40  ;;  %v17361_v40 = vld [vmem:[%s20797_s1 + $0x70] sm:$0xff]  ;;  %v17366_v26 = vld [vmem:[%s20798_s2 + $0x6] ss:$0 sm:$0xff] }
 0x2bb   : > { %13348 = vmatprep.mubr.msk.f32.mxu0 %vm3246_vm2, %v3751_v13  ;;  %v21339_v53 = vmax.f32 %v17304_v14, 0.0  ;;  %v1763_v46 = vadd.f32 %v1731_v50, %v1470_v47  ;;  %v2285_v13 = vmul.f32 %v17352_v9, %v17092_v15  ;;  %21340 = vst [vmem:[#allocation27_spill] sm:$0xff] %v17361_v40  ;;  %v2578_v15 = vmul.f32 %v17366_v26, %v17150_v12  ;;  %v3360_v47 = vld [vmem:[#allocation2 + $0xe0] sm:$0xff] }
 0x2bc   : > { %v17337_v27 = vpop.permute.xlu0 %1678  ;;  %v17347_v24 = vpop.permute.xlu1 %1934  ;;  %14291 = vmatprep.subr.bf16.mxu0 %v14290_v61  ;;  %v17385_v36 = vld [vmem:[%s20798_s2 + $0x7] ss:$0 sm:$0xff] }
 0x2bd   : > { %3267 = vst.msk [vmem:[#allocation2 + $0xe8] sm:$0xff] %vm3246_vm2, %v21339_v53  ;;  %14293 = vmatpush3.bf16.msra.mxu0 %v14290_v61  ;;  %v2024_v50 = vadd.f32 %v1992_v30, %v1763_v46  ;;  %v21341_v61 = vmax.f32 %v17061_v54, 0.0  ;;  %v2839_v12 = vmul.f32 %v17385_v36, %v2762_v51  ;;  %v17394_v32 = vld [vmem:[%s20797_s1 + $0x80] sm:$0xff] }
 0x2be   : > { %3604 = vperm.xlu0 %14924, %v17319_v60   ;;  %3599 = vperm.xlu1 %14925, %v17342_v22   ;;  %v17375_v60 = vld [vmem:[%s20797_s1 + $0xf8] sm:$0xff]  ;;  %21342 = vst [vmem:[#allocation12_spill] sm:$0xff] %v17394_v32 }
 0x2bf   : > { %v3328_v30 = vmax.f32 %v21341_v61, %v17158_v34  ;;  %v2317_v46 = vadd.f32 %v2285_v13, %v2024_v50  ;;  %v17401_v61 = vld [vmem:[%s20797_s1 + $0x78] sm:$0xff] }
 0x2c0   : > { %v17370_v53 = vpop.permute.xlu0 %2222  ;;  %v17377_v22 = vpop.permute.xlu1 %2510  ;;  %21343 = vst [vmem:[#allocation39_spill] sm:$0xff] %v17401_v61 }
 0x2c1   : > { %v3392_v54 = vmax.f32 %v3328_v30, %v3360_v47  ;;  %v2610_v34 = vadd.f32 %v2578_v15, %v2317_v46  ;;  %v17415_v15 = vld [vmem:[%s20797_s1 + $0x90] sm:$0xff] }
 0x2c2   : > { %3609 = vperm.xlu0 %14924, %v17361_v40   ;;  %1186 = vrot.lane.b32.xlu1 %v17375_v60, %s15017_s20  ;;  %21344 = vst [vmem:[#allocation20_spill] sm:$0xff] %v17415_v15 }
 0x2c3   : > { %v2871_v55 = vadd.f32 %v2839_v12, %v2610_v34  ;;  %v17423_v12 = vld [vmem:[%s20797_s1 + $0x88] sm:$0xff] }
 0x2c4   : > { %v17396_v13 = vld [vmem:[#allocation2 + $0xe1] sm:$0xff]  ;;  %v2767_v50 = vpop.permute.xlu0 %2766  ;;  %v3055_v51 = vpop.permute.xlu1 %3054  ;;  %21346 = vst [vmem:[#allocation10_spill] sm:$0xff] %v17423_v12 }
 0x2c5   : > { %v3426_v40 = vmax.f32 %v3392_v54, %v17396_v13  ;;  %v3132_v47 = vmul.f32 %v17407_v7, %v3055_v51  ;;  %v21347_v54 = vld [vmem:[#allocation8_spill] sm:$0xff] }
 0x2c6   : > { %3619 = vperm.xlu0 %14924, %v17394_v32   ;;  %3614 = vperm.xlu1 %14925, %v17401_v61   ;;  %v1018_v34 = vmul.f32 %v17178_v44, %v21347_v54  ;;  %v17432_v32 = vld [vmem:[%s20799_s3] ss:$0 sm:$0xff]  ;;  %v21351_v61 = vld [vmem:[#allocation16_spill] sm:$0xff] }
 0x2c7   : > { %3490 = vst.msk [vmem:[#allocation2 + $0xd0] sm:$0xff] %vm3246_vm2, %v3426_v40  ;;  %v3164_v30 = vadd.f32 %v3132_v47, %v2871_v55  ;;  %v21350_v55 = vld [vmem:[#allocation5_spill] sm:$0xff] }
 0x2c8   : > { %v17418_v46 = vpop.permute.xlu0 %718  ;;  %v17427_v51 = vpop.permute.xlu1 %979  ;;  %v757_v47 = vmul.f32 %v17191_v52, %v21350_v55  ;;  %v17446_v54 = vld [vmem:[%s20797_s1 + $0xa0] sm:$0xff] }
 0x2c9   : > { %21345 = vst [vmem:[#allocation26_spill] sm:$0xff] %v17418_v46  ;;  %21348 = vst [vmem:[#allocation38_spill] sm:$0xff] %v17427_v51  ;;  %v17435_v40 = vadd.f32 %v17432_v32, %v3164_v30  ;;  %v1439_v46 = vmul.f32 %v17198_v6, %v21351_v61  ;;  %v17454_v30 = vld [vmem:[%s20797_s1 + $0x98] sm:$0xff]  ;;  %v1732_v61 = vmul.f32 %v17311_v49, %v17019_v20  ;;  %v17471_v20 = vld [vmem:[%s20797_s1 + $0xb0] sm:$0xff] }
 0x2ca   : > { %3629 = vperm.xlu0 %14924, %v17415_v15   ;;  %3624 = vperm.xlu1 %14925, %v17423_v12   ;;  %21352 = vst [vmem:[#allocation21_spill] sm:$0xff] %v17446_v54  ;;  %21354 = vst [vmem:[#allocation31_spill] sm:$0xff] %v17454_v30  ;;  %v1050_v55 = vadd.f32 %v1018_v34, %v757_v47  ;;  %v17478_v47 = vld [vmem:[%s20797_s1 + $0xa8] sm:$0xff] }
 0x2cb   : > { %21349 = vst [vmem:[#allocation13_spill] sm:$0xff] %v17435_v40  ;;  %v20859_v51 = vmax.f32 %v17435_v40, 0.0  ;;  %21356 = vst [vmem:[#allocation14_spill] sm:$0xff] %v17471_v20 }
 0x2cc   : > { %v17449_v1 = vpop.permute.xlu0 %1395  ;;  %v17458_v15 = vpop.permute.xlu1 %1683  ;;  %v1471_v17 = vadd.f32 %v1439_v46, %v1050_v55  ;;  %21357 = vst [vmem:[#allocation37_spill] sm:$0xff] %v17478_v47  ;;  %v3361_v55 = vld [vmem:[#allocation2 + $0xe8] sm:$0xff] }
 0x2cd   : > { %21353 = vst [vmem:[#allocation32_spill] sm:$0xff] %v17449_v1  ;;  %21355 = vst [vmem:[#allocation42_spill] sm:$0xff] %v17458_v15  ;;  %v1993_v1 = vmul.f32 %v17332_v62, %v17088_v16  ;;  %v2286_v16 = vmul.f32 %v17352_v9, %v17148_v42  ;;  %v2579_v15 = vmul.f32 %v17366_v26, %v17256_v0 }
 0x2ce   : > { %3268 = vst.msk [vmem:[#allocation2 + $0xf0] sm:$0xff] %vm3246_vm2, %v20859_v51  ;;  %3639 = vperm.xlu0 %14924, %v17446_v54   ;;  %v3752_v12 = vld [vmem:[#allocation2 + $0xd0] sm:$0xff]  ;;  %3634 = vperm.xlu1 %14925, %v17454_v30   ;;  %v1764_v46 = vadd.f32 %v1732_v61, %v1471_v17  ;;  %v17494_v17 = vld [vmem:[%s20797_s1 + $0xc0] sm:$0xff]  ;;  %v17501_v61 = vld [vmem:[%s20797_s1 + $0xb8] sm:$0xff] }
 0x2cf   : > { %13349 = vmatmul.mubr.msk.f32.gmra.mrb[20].mxu0 %vm3246_vm2, %v3752_v12  ;;  %v21358_v12 = vmax.f32 %v17125_v31, 0.0  ;;  %21359 = vst [vmem:[#allocation36_spill] sm:$0xff] %v17494_v17  ;;  %21360 = vst [vmem:[#allocation7_spill] sm:$0xff] %v17501_v61 }
 0x2d0   : > { %v17473_v34 = vpop.permute.xlu0 %1939  ;;  %v17482_v51 = vpop.permute.xlu1 %2227  ;;  %v2025_v54 = vadd.f32 %v1993_v1, %v1764_v46  ;;  %v2840_v1 = vmul.f32 %v17385_v36, %v2767_v50  ;;  %v17517_v50 = vld [vmem:[%s20797_s1 + $0xc8] sm:$0xff] }
 0x2d1   : > { %v3329_v30 = vmax.f32 %v21358_v12, %v17264_v59  ;;  %21362 = vst [vmem:[#allocation22_spill] sm:$0xff] %v17517_v50 }
 0x2d2   : > { %3649 = vperm.xlu0 %14924, %v17471_v20   ;;  %3644 = vperm.xlu1 %14925, %v17478_v47   ;;  %v2318_v59 = vadd.f32 %v2286_v16, %v2025_v54  ;;  %v17512_v47 = vld [vmem:[%s20797_s1 + $0xd0] sm:$0xff] }
 0x2d3   : > { %v3393_v31 = vmax.f32 %v3329_v30, %v3361_v55  ;;  %21361 = vst [vmem:[#allocation45_spill] sm:$0xff] %v17512_v47 }
 0x2d4   : > { %v17496_v42 = vpop.permute.xlu0 %2515  ;;  %v2772_v0 = vpop.permute.xlu1 %2771  ;;  %v2611_v20 = vadd.f32 %v2579_v15, %v2318_v59  ;;  %v21364_v15 = vld [vmem:[#allocation6_spill] sm:$0xff] }
 0x2d5   : > { %v17504_v46 = vld [vmem:[#allocation2 + $0xe9] sm:$0xff]  ;;  %v758_v55 = vmul.f32 %v17191_v52, %v21364_v15 }
 0x2d6   : > { %3659 = vperm.xlu0 %14924, %v17494_v17   ;;  %v3427_v12 = vmax.f32 %v3393_v31, %v17504_v46  ;;  %3654 = vperm.xlu1 %14925, %v17501_v61   ;;  %v2872_v54 = vadd.f32 %v2840_v1, %v2611_v20  ;;  %v21365_v31 = vld [vmem:[#allocation9_spill] sm:$0xff]  ;;  %v1994_v61 = vmul.f32 %v17332_v62, %v17141_v18 }
 0x2d7   : > { %v1019_v59 = vmul.f32 %v17178_v44, %v21365_v31  ;;  %v17541_v1 = vld [vmem:[%s20797_s1 + $0xd8] sm:$0xff]  ;;  %v1733_v31 = vmul.f32 %v17311_v49, %v17075_v21  ;;  %v17566_v21 = vld [vmem:[%s20797_s1 + $0xe8] sm:$0xff] }
 0x2d8   : > { %v3060_v40 = vpop.permute.xlu0 %3059  ;;  %3491 = vst.msk [vmem:[#allocation2 + $0xd8] sm:$0xff] %vm3246_vm2, %v3427_v12  ;;  %v17521_v16 = vpop.permute.xlu1 %723  ;;  %v17532_v12 = vld [vmem:[%s20797_s1 + $0xe0] sm:$0xff]  ;;  %21367 = vst [vmem:[#allocation44_spill] sm:$0xff] %v17541_v1 }
 0x2d9   : > { %v3133_v30 = vmul.f32 %v17407_v7, %v3060_v40  ;;  %21363 = vst [vmem:[#allocation25_spill] sm:$0xff] %v17521_v16  ;;  %21366 = vst [vmem:[#allocation43_spill] sm:$0xff] %v17532_v12  ;;  %v1440_v40 = vmul.f32 %v17198_v6, %v17008_v8 }
 0x2da   : > { %3669 = vperm.xlu0 %14924, %v17512_v47   ;;  %3664 = vperm.xlu1 %14925, %v17517_v50   ;;  %v17556_v50 = vld [vmem:[%s20797_s1 + $0xf0] sm:$0xff]  ;;  %21370 = vst [vmem:[#allocation35_spill] sm:$0xff] %v17566_v21 }
 0x2db   : > { %v3165_v17 = vadd.f32 %v3133_v30, %v2872_v54  ;;  %v1051_v30 = vadd.f32 %v1019_v59, %v758_v55  ;;  %21369 = vst [vmem:[#allocation23_spill] sm:$0xff] %v17556_v50 }
 0x2dc   : > { %v17536_v20 = vpop.permute.xlu0 %984  ;;  %v17546_v54 = vpop.permute.xlu1 %1400 }
 0x2dd   : > { %v17544_v15 = vadd.f32 %v17432_v32, %v3165_v17  ;;  %21368 = vst [vmem:[#allocation11_spill] sm:$0xff] %v17546_v54  ;;  %v1472_v17 = vadd.f32 %v1440_v40, %v1051_v30  ;;  %v2287_v40 = vmul.f32 %v17352_v9, %v17242_v38  ;;  %v3362_v30 = vld [vmem:[#allocation2 + $0xf0] sm:$0xff]  ;;  %v2841_v38 = vmul.f32 %v17385_v36, %v2772_v0 }
 0x2de   : > { %3679 = vperm.xlu0 %14924, %v17532_v12   ;;  %3674 = vperm.xlu1 %14925, %v17541_v1   ;;  %v15021_v54 = vmov 3  }
 0x2df   : > { %v20871_v8 = vmax.f32 %v17544_v15, 0.0  ;;  %v3753_v47 = vld [vmem:[#allocation2 + $0xd8] sm:$0xff]  ;;  %v1765_v12 = vadd.f32 %v1733_v31, %v1472_v17 }
 0x2e0   : > { %13351 = vmatprep.mubr.msk.f32.mxu0 %vm3246_vm2, %v3753_v47  ;;  %v17561_v55 = vpop.permute.xlu0 %1688  ;;  %v17571_v59 = vpop.permute.xlu1 %1944  ;;  %v2580_v47 = vmul.f32 %v17366_v26, %v17377_v22 }
 0x2e1   : > { %3269 = vst.msk [vmem:[#allocation2 + $0xf8] sm:$0xff] %vm3246_vm2, %v20871_v8  ;;  %v2026_v18 = vadd.f32 %v1994_v61, %v1765_v12  ;;  %v21371_v8 = vmax.f32 %v17185_v37, 0.0 }
 0x2e2   : > { %3689 = vperm.xlu0 %14924, %v17556_v50   ;;  %3684 = vperm.xlu1 %14925, %v17566_v21   ;;  %v1020_v21 = vmul.f32 %v17178_v44, %v17003_v41 }
 0x2e3   : > { %v3330_v31 = vmax.f32 %v21371_v8, %v17396_v13  ;;  %v2319_v17 = vadd.f32 %v2287_v40, %v2026_v18  ;;  %v21372_v40 = vld [vmem:[#allocation28_spill] sm:$0xff] }
 0x2e4   : > { %v17579_v1 = vpop.permute.xlu0 %2232  ;;  %v17581_v16 = vpop.permute.xlu1 %2520  ;;  %v759_v18 = vmul.f32 %v17191_v52, %v21372_v40 }
 0x2e5   : > { %v3394_v22 = vmax.f32 %v3330_v31, %v3362_v30  ;;  %v2612_v61 = vadd.f32 %v2580_v47, %v2319_v17  ;;  %v1734_v31 = vmul.f32 %v17311_v49, %v17136_v10  ;;  %v2288_v10 = vmul.f32 %v17352_v9, %v17370_v53 }
 0x2e6   : > { %14926 = vset.pattern.permute.xlu0 %v15021_v54  ;;  %3694 = vperm.xlu1 %14925, %v17375_v60   ;;  %v1052_v30 = vadd.f32 %v1020_v21, %v759_v18  ;;  %v760_v53 = vmul.f32 %v17191_v52, %v17054_v57 }
 0x2e7   : > { %4440 = vperm.xlu0 %14926, %v17165_v4   ;;  %v2873_v8 = vadd.f32 %v2841_v38, %v2612_v61  ;;  %v1441_v4 = vmul.f32 %v17198_v6, %v17071_v23 }
 0x2e8   : > { %v17590_v12 = vld [vmem:[#allocation2 + $0xf1] sm:$0xff]  ;;  %v2777_v50 = vpop.permute.xlu0 %2776  ;;  %v3065_v37 = vpop.permute.xlu1 %3064 }
 0x2e9   : > { %v3428_v13 = vmax.f32 %v3394_v22, %v17590_v12  ;;  %v3134_v0 = vmul.f32 %v17407_v7, %v3065_v37  ;;  %v1473_v23 = vadd.f32 %v1441_v4, %v1052_v30  ;;  %v2842_v40 = vmul.f32 %v17385_v36, %v2777_v50  ;;  %v537_v4 = vld [vmem:[#allocation2 + $0x12f] sm:$0xff] }
 0x2ea   : > { %14927 = vset.pattern.permute.xlu1 %v15021_v54  ;;  %v569_v30 = vmul.f32 %v537_v4, %v17375_v60  ;;  %v1735_v50 = vmul.f32 %v17311_v49, %v17218_v63 }
 0x2eb   : > { %4452 = vperm.xlu0 %14926, %v17206_v19   ;;  %3492 = vst.msk [vmem:[#allocation2 + $0xe0] sm:$0xff] %vm3246_vm2, %v3428_v13  ;;  %v3166_v47 = vadd.f32 %v3134_v0, %v2873_v8  ;;  %4444 = vperm.xlu1 %14927, %v17173_v39   ;;  %v1995_v19 = vmul.f32 %v17332_v62, %v17233_v3  ;;  %v3363_v0 = vld [vmem:[#allocation2 + $0xf8] sm:$0xff] }
 0x2ec   : > { %v17604_v41 = vpop.permute.xlu0 %1405  ;;  %v17608_v17 = vpop.permute.xlu1 %1693  ;;  %v1766_v21 = vadd.f32 %v1734_v31, %v1473_v23  ;;  %v1021_v13 = vmul.f32 %v17178_v44, %v17058_v35 }
 0x2ed   : > { %v17611_v38 = vadd.f32 %v17432_v32, %v3166_v47 }
 0x2ee   : > { %v2027_v3 = vadd.f32 %v1995_v19, %v1766_v21  ;;  %v1053_v31 = vadd.f32 %v1021_v13, %v760_v53  ;;  %v1022_v13 = vmul.f32 %v17178_v44, %v17122_v48 }
 0x2ef   : > { %4460 = vperm.xlu0 %14926, %v17231_v5   ;;  %v3237_v22 = vmax.f32 %v17611_v38, 0.0  ;;  %4448 = vperm.xlu1 %14927, %v17214_v56   ;;  %v2581_v5 = vmul.f32 %v17366_v26, %v17496_v42 }
 0x2f0   : > { %v17618_v39 = vpop.permute.xlu0 %1949  ;;  %v17622_v61 = vpop.permute.xlu1 %2237  ;;  %v2320_v8 = vadd.f32 %v2288_v10, %v2027_v3  ;;  %v21374_v10 = vmov 0   ;;  %v2289_v3 = vmul.f32 %v17352_v9, %v17482_v51  ;;  %v2582_v51 = vmul.f32 %v17366_v26, %v17581_v16 }
 0x2f1   : > { %3270 = vst.msk [vmem:[#allocation2 + $0x100] sm:$0xff] %vm3246_vm2, %v3237_v22 }
 0x2f2   : > { %v3754_v37 = vld [vmem:[#allocation2 + $0xe0] sm:$0xff]  ;;  %v2613_v47 = vadd.f32 %v2581_v5, %v2320_v8 }
 0x2f3   : > { %4468 = vperm.xlu0 %14926, %v17254_v29   ;;  %13352 = vmatmul.mubr.msk.f32.gmra.mrb[22].mxu0 %vm3246_vm2, %v3754_v37  ;;  %v21373_v29 = vmax.f32 %v17304_v14, 0.0 }
 0x2f4   : > { %4456 = vperm.xlu1 %14927, %v17238_v33   ;;  %v17632_v56 = vpop.permute.xlu0 %2525  ;;  %v2782_v18 = vpop.permute.xlu1 %2781  ;;  %v1442_v33 = vmul.f32 %v17198_v6, %v17127_v2  ;;  %v2874_v23 = vadd.f32 %v2842_v40, %v2613_v47 }
 0x2f5   : > { %v3331_v42 = vmax.f32 %v21373_v29, %v17504_v46  ;;  %v761_v29 = vmul.f32 %v17191_v52, %v17112_v28  ;;  %v1736_v28 = vmul.f32 %v17311_v49, %v17337_v27  ;;  %v21376_v27 = vld [vmem:[#allocation13_spill] sm:$0xff] }
 0x2f7   : > { %4476 = vperm.xlu0 %14926, %v17272_v25   ;;  %v3395_v35 = vmax.f32 %v3331_v42, %v3363_v0  ;;  %v1474_v25 = vadd.f32 %v1442_v33, %v1053_v31  ;;  %v1443_v42 = vmul.f32 %v17198_v6, %v17209_v45  ;;  %v2843_v33 = vmul.f32 %v17385_v36, %v2782_v18 }
 0x2f8   : > { %4464 = vperm.xlu1 %14927, %v17261_v11   ;;  %v3070_v57 = vpop.permute.xlu0 %3069  ;;  %v17649_v14 = vld [vmem:[#allocation2 + $0xf9] sm:$0xff]  ;;  %v17652_v19 = vpop.permute.xlu1 %1698  ;;  %v1996_v11 = vmul.f32 %v17332_v62, %v17347_v24  ;;  %v1054_v47 = vadd.f32 %v1022_v13, %v761_v29 }
 0x2f9   : > { %v3135_v46 = vmul.f32 %v17407_v7, %v3070_v57  ;;  %v3429_v2 = vmax.f32 %v3395_v35, %v17649_v14  ;;  %v1767_v63 = vadd.f32 %v1735_v50, %v1474_v25  ;;  %v4599_v24 = vld [vmem:[%s20800_s4 + $0x20] sm:$0xff] }
 0x2fa   : > { %v1475_v45 = vadd.f32 %v1443_v42, %v1054_v47  ;;  %v2583_v42 = vmul.f32 %v17366_v26, %v17632_v56 }
 0x2fb   : > { %v3167_v21 = vadd.f32 %v3135_v46, %v2874_v23  ;;  %14928 = vset.pattern.permute.xlu0 %v21374_v10  ;;  %3493 = vst.msk [vmem:[#allocation2 + $0xe8] sm:$0xff] %vm3246_vm2, %v3429_v2  ;;  %v2028_v0 = vadd.f32 %v1996_v11, %v1767_v63  ;;  %v21375_v23 = vld [vmem:[#allocation24_spill] sm:$0xff]  ;;  %v21377_v2 = vmax.f32 %v21376_v27, 0.0  ;;  %v21383_v27 = vld [vmem:[#allocation33_spill] sm:$0xff] }
 0x2fc   : > { %4472 = vperm.xlu1 %14927, %v17277_v58   ;;  %v17659_v37 = vpop.permute.xlu0 %1954  ;;  %728 = vperm.xlu0 %14928, %v569_v30   ;;  %v17667_v53 = vpop.permute.xlu1 %2242  ;;  %v4600_v58 = vld [vmem:[%s20800_s4 + $0x28] sm:$0xff]  ;;  %v3364_v30 = vld [vmem:[#allocation2 + $0x100] sm:$0xff]  ;;  %v21378_v11 = vld [vmem:[#allocation4_spill] sm:$0xff] }
 0x2fd   : > { %v17665_v5 = vadd.f32 %v17432_v32, %v3167_v21  ;;  %v17677_v8 = vpack.c.bf16 %v4600_v58, %v4599_v24  ;;  %v2321_v48 = vadd.f32 %v2289_v3, %v2028_v0  ;;  %v3332_v25 = vmax.f32 %v21377_v2, %v17590_v12  ;;  %v21379_v21 = vld [vmem:[#allocation17_spill] sm:$0xff]  ;;  %v21380_v0 = vld [vmem:[#allocation34_spill] sm:$0xff] }
 0x2fe   : > { %v1023_v63 = vmul.f32 %v17178_v44, %v21379_v21  ;;  %v1768_v3 = vadd.f32 %v1736_v28, %v1475_v45  ;;  %v2290_v24 = vmul.f32 %v17352_v9, %v17579_v1  ;;  %v1024_v2 = vmul.f32 %v17178_v44, %v21383_v27 }
 0x2ff   : > { %v3238_v40 = vmax.f32 %v17665_v5, 0.0  ;;  %14295 = vmatprep.subr.bf16.mxu0 %v17677_v8  ;;  %v2614_v57 = vadd.f32 %v2582_v51, %v2321_v48  ;;  %v3396_v13 = vmax.f32 %v3332_v25, %v3364_v30  ;;  %v1444_v51 = vmul.f32 %v17198_v6, %v21380_v0  ;;  %v21384_v25 = vld [vmem:[#allocation26_spill] sm:$0xff] }
 0x300   : > { %4480 = vperm.xlu1 %14927, %v17301_v43   ;;  %v2531_v4 = vpop.permute.xlu0 %2530  ;;  %v2787_v16 = vpop.permute.xlu1 %2786  ;;  %v1997_v43 = vmul.f32 %v17332_v62, %v17473_v34  ;;  %v762_v34 = vmul.f32 %v17191_v52, %v21378_v11  ;;  %v764_v11 = vmul.f32 %v17191_v52, %v21384_v25  ;;  %v1026_v27 = vmul.f32 %v17178_v44, %v17536_v20  ;;  %v17842_v5 = vld [vmem:[#allocation2 + $0x13f] sm:$0xff] }
 0x301   : > { %3271 = vst.msk [vmem:[#allocation2 + $0x108] sm:$0xff] %vm3246_vm2, %v3238_v40  ;;  %v2875_v31 = vadd.f32 %v2843_v33, %v2614_v57  ;;  %v21381_v57 = vld [vmem:[#allocation42_spill] sm:$0xff]  ;;  %v2844_v56 = vmul.f32 %v17385_v36, %v2787_v16 }
 0x302   : > { %v3755_v35 = vld [vmem:[#allocation2 + $0xe8] sm:$0xff]  ;;  %v2029_v29 = vadd.f32 %v1997_v43, %v1768_v3  ;;  %v1055_v28 = vadd.f32 %v1023_v63, %v762_v34  ;;  %v21382_v43 = vld [vmem:[#allocation29_spill] sm:$0xff] }
 0x303   : > { %13354 = vmatprep.mubr.msk.f32.mxu0 %vm3246_vm2, %v3755_v35  ;;  %v1737_v35 = vmul.f32 %v17311_v49, %v21381_v57  ;;  %v21385_v34 = vld [vmem:[#allocation38_spill] sm:$0xff] }
 0x304   : > { %14929 = vset.pattern.permute.xlu1 %v21374_v10  ;;  %v3075_v18 = vpop.permute.xlu0 %3074  ;;  %v17700_v46 = vpop.permute.xlu1 %1959  ;;  %v2322_v45 = vadd.f32 %v2290_v24, %v2029_v29  ;;  %v1025_v16 = vmul.f32 %v17178_v44, %v21385_v34  ;;  %v21390_v34 = vld [vmem:[#allocation40_spill] sm:$0xff]  ;;  %v21392_v44 = vld [vmem:[#allocation25_spill] sm:$0xff] }
 0x305   : > { %v3136_v50 = vmul.f32 %v17407_v7, %v3075_v18  ;;  %989 = vperm.xlu1 %14929, %v21375_v23   ;;  %v1476_v18 = vadd.f32 %v1444_v51, %v1055_v28  ;;  %v21388_v51 = vld [vmem:[#allocation32_spill] sm:$0xff]  ;;  %v2584_v28 = vmul.f32 %v17366_v26, %v2531_v4  ;;  %v765_v20 = vmul.f32 %v17191_v52, %v21392_v44 }
 0x306   : > { %v1445_v29 = vmul.f32 %v17198_v6, %v21388_v51  ;;  %v21423_v10 = vld [vmem:[#allocation36_spill] sm:$0xff] }
 0x307   : > { %v3168_v58 = vadd.f32 %v3136_v50, %v2875_v31  ;;  %v1998_v31 = vmul.f32 %v17332_v62, %v17571_v59  ;;  %v2615_v50 = vadd.f32 %v2583_v42, %v2322_v45  ;;  %v1769_v63 = vadd.f32 %v1737_v35, %v1476_v18 }
 0x308   : > { %v17715_v12 = vld [vmem:[#allocation2 + $0x101] sm:$0xff]  ;;  %v17717_v48 = vpop.permute.xlu0 %2247  ;;  %v17723_v47 = vpop.permute.xlu1 %2535  ;;  %v2291_v59 = vmul.f32 %v17352_v9, %v17622_v61  ;;  %v1738_v61 = vmul.f32 %v17311_v49, %v17561_v55  ;;  %v21389_v18 = vmax.f32 %v17544_v15, 0.0  ;;  %v1999_v15 = vmul.f32 %v17332_v62, %v17618_v39 }
 0x309   : > { %v17720_v33 = vadd.f32 %v17432_v32, %v3168_v58  ;;  %14930 = vset.pattern.permute.xlu1 %v15021_v54  ;;  %v3430_v1 = vmax.f32 %v3396_v13, %v17715_v12  ;;  %v2876_v3 = vadd.f32 %v2844_v56, %v2615_v50  ;;  %v21386_v58 = vld [vmem:[#allocation19_spill] sm:$0xff]  ;;  %v21387_v13 = vld [vmem:[#allocation18_spill] sm:$0xff]  ;;  %v2030_v42 = vadd.f32 %v1998_v31, %v1769_v63 }
 0x30a   : > { %4484 = vperm.xlu1 %14930, %v21382_v43   ;;  %v763_v0 = vmul.f32 %v17191_v52, %v21387_v13  ;;  %v1057_v43 = vadd.f32 %v1025_v16, %v764_v11  ;;  %v3333_v50 = vmax.f32 %v21389_v18, %v17649_v14  ;;  %v21391_v16 = vld [vmem:[#allocation11_spill] sm:$0xff]  ;;  %v2292_v39 = vmul.f32 %v17352_v9, %v17667_v53 }
 0x30b   : > { %v3239_v30 = vmax.f32 %v17720_v33, 0.0  ;;  %3494 = vst.msk [vmem:[#allocation2 + $0xf0] sm:$0xff] %vm3246_vm2, %v3430_v1  ;;  %v3365_v1 = vld [vmem:[#allocation2 + $0x108] sm:$0xff]  ;;  %v2323_v25 = vadd.f32 %v2291_v59, %v2030_v42  ;;  %v1446_v55 = vmul.f32 %v17198_v6, %v21391_v16  ;;  %v1058_v52 = vadd.f32 %v1026_v27, %v765_v20 }
 0x30c   : > { %v2792_v23 = vpop.permute.xlu0 %2791  ;;  %v3080_v21 = vpop.permute.xlu1 %3079  ;;  %v1056_v45 = vadd.f32 %v1024_v2, %v763_v0  ;;  %v3397_v14 = vmax.f32 %v3333_v50, %v3365_v1  ;;  %v2000_v53 = vmul.f32 %v17332_v62, %v17659_v37  ;;  %v2585_v1 = vmul.f32 %v17366_v26, %v17723_v47 }
 0x30d   : > { %3272 = vst.msk [vmem:[#allocation2 + $0x110] sm:$0xff] %vm3246_vm2, %v3239_v30  ;;  %v3137_v24 = vmul.f32 %v17407_v7, %v3080_v21  ;;  %v2845_v31 = vmul.f32 %v17385_v36, %v2792_v23  ;;  %v1447_v23 = vmul.f32 %v17198_v6, %v17604_v41  ;;  %v2616_v21 = vadd.f32 %v2584_v28, %v2323_v25 }
 0x30e   : > { %4488 = vperm.xlu1 %14930, %v21386_v58   ;;  %v1477_v11 = vadd.f32 %v1445_v29, %v1056_v45  ;;  %v1739_v58 = vmul.f32 %v17311_v49, %v17608_v17  ;;  %v1740_v6 = vmul.f32 %v17311_v49, %v17652_v19  ;;  %v21393_v29 = vld [vmem:[#allocation27_spill] sm:$0xff]  ;;  %v1478_v17 = vadd.f32 %v1446_v55, %v1057_v43 }
 0x30f   : > { %v3169_v57 = vadd.f32 %v3137_v24, %v2876_v3  ;;  %v2877_v41 = vadd.f32 %v2845_v31, %v2616_v21  ;;  %v1479_v49 = vadd.f32 %v1447_v23, %v1058_v52  ;;  %v2001_v19 = vmul.f32 %v17332_v62, %v17700_v46  ;;  %v21394_v31 = vld [vmem:[#allocation39_spill] sm:$0xff] }
 0x310   : > { %v2253_v35 = vpop.permute.xlu0 %2252  ;;  %v2541_v56 = vpop.permute.xlu1 %2540  ;;  %v1770_v24 = vadd.f32 %v1738_v61, %v1477_v11  ;;  %v1771_v45 = vadd.f32 %v1739_v58, %v1478_v17  ;;  %v2293_v43 = vmul.f32 %v17352_v9, %v17717_v48  ;;  %v3334_v62 = vmax.f32 %v3237_v22, %v17715_v12 }
 0x311   : > { %v17761_v4 = vadd.f32 %v17432_v32, %v3169_v57  ;;  %v1772_v27 = vadd.f32 %v1740_v6, %v1479_v49  ;;  %v2294_v47 = vmul.f32 %v17352_v9, %v2253_v35 }
 0x312   : > { %4492 = vperm.xlu1 %14930, %v21390_v34   ;;  %v3756_v2 = vld [vmem:[#allocation2 + $0xf0] sm:$0xff]  ;;  %v2031_v42 = vadd.f32 %v1999_v15, %v1770_v24  ;;  %v2032_v46 = vadd.f32 %v2000_v53, %v1771_v45 }
 0x313   : > { %13355 = vmatmul.mubr.msk.f32.gmra.mrb[24].mxu0 %vm3246_vm2, %v3756_v2  ;;  %v3240_v59 = vmax.f32 %v17761_v4, 0.0  ;;  %v2586_v2 = vmul.f32 %v17366_v26, %v2541_v56  ;;  %v2033_v48 = vadd.f32 %v2001_v19, %v1772_v27  ;;  %v21395_v56 = vld [vmem:[#allocation12_spill] sm:$0xff] }
 0x314   : > { %v17773_v63 = vld [vmem:[#allocation2 + $0x109] sm:$0xff]  ;;  %v2797_v3 = vpop.permute.xlu0 %2796  ;;  %v3085_v13 = vpop.permute.xlu1 %3084  ;;  %v2324_v61 = vadd.f32 %v2292_v39, %v2031_v42  ;;  %v2325_v35 = vadd.f32 %v2293_v43, %v2032_v46 }
 0x315   : > { %v3431_v0 = vmax.f32 %v3397_v14, %v17773_v63  ;;  %3273 = vst.msk [vmem:[#allocation2 + $0x118] sm:$0xff] %vm3246_vm2, %v3240_v59  ;;  %v3138_v51 = vmul.f32 %v17407_v7, %v3085_v13  ;;  %v3366_v18 = vld [vmem:[#allocation2 + $0x110] sm:$0xff]  ;;  %v2846_v50 = vmul.f32 %v17385_v36, %v2797_v3  ;;  %v2326_v22 = vadd.f32 %v2294_v47, %v2033_v48 }
 0x316   : > { %4496 = vperm.xlu1 %14930, %v21393_v29   ;;  %v2617_v34 = vadd.f32 %v2585_v1, %v2324_v61  ;;  %v3398_v9 = vmax.f32 %v3334_v62, %v3366_v18  ;;  %v2618_v21 = vadd.f32 %v2586_v2, %v2325_v35  ;;  %v3335_v53 = vmax.f32 %v3238_v40, %v17773_v63 }
 0x317   : > { %3495 = vst.msk [vmem:[#allocation2 + $0xf8] sm:$0xff] %vm3246_vm2, %v3431_v0  ;;  %v3170_v28 = vadd.f32 %v3138_v51, %v2877_v41  ;;  %v21396_v41 = vld [vmem:[#allocation10_spill] sm:$0xff] }
 0x318   : > { %v2546_v57 = vpop.permute.xlu0 %2545  ;;  %v2802_v37 = vpop.permute.xlu1 %2801  ;;  %v2878_v14 = vadd.f32 %v2846_v50, %v2617_v34 }
 0x319   : > { %v17800_v25 = vadd.f32 %v17432_v32, %v3170_v28  ;;  %v2587_v16 = vmul.f32 %v17366_v26, %v2546_v57  ;;  %v2847_v44 = vmul.f32 %v17385_v36, %v2802_v37  ;;  %v21397_v28 = vld [vmem:[#allocation20_spill] sm:$0xff]  ;;  %v21398_v37 = vld [vmem:[#allocation21_spill] sm:$0xff] }
 0x31a   : > { %4500 = vperm.xlu1 %14930, %v21394_v31  }
 0x31b   : > { %v3241_v11 = vmax.f32 %v17800_v25, 0.0  ;;  %v2619_v24 = vadd.f32 %v2587_v16, %v2326_v22  ;;  %v2879_v39 = vadd.f32 %v2847_v44, %v2618_v21  ;;  %v21400_v44 = vld [vmem:[#allocation7_spill] sm:$0xff]  ;;  %v21402_v21 = vld [vmem:[#allocation44_spill] sm:$0xff] }
 0x31c   : > { %v3090_v55 = vpop.permute.xlu0 %3089  ;;  %v3304_v15 = vld [vmem:[#allocation2 + $0x111] sm:$0xff]  ;;  %v2807_v38 = vpop.permute.xlu1 %2806 }
 0x31d   : > { %v3139_v20 = vmul.f32 %v17407_v7, %v3090_v55  ;;  %3274 = vst.msk [vmem:[#allocation2 + $0x120] sm:$0xff] %vm3246_vm2, %v3241_v11  ;;  %v2848_v12 = vmul.f32 %v17385_v36, %v2807_v38  ;;  %v3432_v23 = vmax.f32 %v3398_v9, %v3304_v15  ;;  %v3367_v51 = vld [vmem:[#allocation2 + $0x118] sm:$0xff]  ;;  %v21401_v38 = vld [vmem:[#allocation22_spill] sm:$0xff] }
 0x31e   : > { %4504 = vperm.xlu1 %14930, %v21395_v56   ;;  %v3757_v26 = vld [vmem:[#allocation2 + $0xf8] sm:$0xff]  ;;  %v3399_v45 = vmax.f32 %v3335_v53, %v3367_v51  ;;  %v3505_v56 = vld [vmem:[#allocation2 + $0x26] sm:$0xff]  ;;  %v5018_v51 = vld [vmem:[%s20800_s4 + $0x30] sm:$0xff] }
 0x31f   : > { %v3171_v3 = vadd.f32 %v3139_v20, %v2878_v14  ;;  %13357 = vmatprep.mubr.msk.f32.mxu0 %vm3246_vm2, %v3757_v26  ;;  %3496 = vst.msk [vmem:[#allocation2 + $0x100] sm:$0xff] %vm3246_vm2, %v3432_v23  ;;  %v2880_v36 = vadd.f32 %v2848_v12, %v2619_v24 }
 0x320   : > { %v3095_v58 = vpop.permute.xlu0 %3094  ;;  %v3100_v52 = vpop.permute.xlu1 %3099 }
 0x321   : > { %v17819_v13 = vadd.f32 %v17432_v32, %v3171_v3  ;;  %v3140_v0 = vmul.f32 %v17407_v7, %v3095_v58  ;;  %v3141_v6 = vmul.f32 %v17407_v7, %v3100_v52  ;;  %v3506_v58 = vld [vmem:[#allocation2 + $0x2e] sm:$0xff] }
 0x322   : > { %4508 = vperm.xlu1 %14930, %v21396_v41  }
 0x323   : > { %v20876_v29 = vmax.f32 %v17819_v13, 0.0  ;;  %v3172_v17 = vadd.f32 %v3140_v0, %v2879_v39  ;;  %v3173_v42 = vadd.f32 %v3141_v6, %v2880_v36  ;;  %v3507_v0 = vld [vmem:[#allocation2 + $0x36] sm:$0xff]  ;;  %v3508_v36 = vld [vmem:[#allocation2 + $0x3e] sm:$0xff]  ;;  %v21403_v6 = vld [vmem:[#allocation35_spill] sm:$0xff] }
 0x324   : > { %v3305_v1 = vld [vmem:[#allocation2 + $0x119] sm:$0xff] }
 0x325   : > { %3275 = vst.msk [vmem:[#allocation2 + $0x128] sm:$0xff] %vm3246_vm2, %v20876_v29  ;;  %v17832_v49 = vadd.f32 %v17432_v32, %v3172_v17  ;;  %v17834_v7 = vpop.permute.xlu0 %3539  ;;  %v17837_v19 = vadd.f32 %v17432_v32, %v3173_v42  ;;  %v17840_v57 = vpop.permute.xlu1 %3544  ;;  %v3368_v61 = vld [vmem:[#allocation2 + $0x120] sm:$0xff]  ;;  %v3433_v43 = vmax.f32 %v3399_v45, %v3305_v1  ;;  %v3336_v32 = vmax.f32 %v3239_v30, %v3304_v15  ;;  %v5019_v17 = vld [vmem:[%s20800_s4 + $0x38] sm:$0xff] }
 0x326   : > { %4512 = vperm.xlu1 %14930, %v21397_v28   ;;  %v3758_v63 = vld [vmem:[#allocation2 + $0x100] sm:$0xff]  ;;  %v3337_v33 = vmax.f32 %v3240_v59, %v3305_v1  ;;  %v3697_v23 = vmul.f32 %v17834_v7, %v3505_v56  ;;  %v3698_v42 = vmul.f32 %v17840_v57, %v3506_v58  ;;  %v17913_v1 = vpack.c.bf16 %v5019_v17, %v5018_v51  ;;  %v17967_v56 = vld [vmem:[#allocation2 + $0x76] sm:$0xff] }
 0x327   : > { %v20875_v40 = vmax.f32 %v17832_v49, 0.0  ;;  %v20874_v18 = vmax.f32 %v17837_v19, 0.0  ;;  %13358 = vmatmul.mubr.msk.f32.gmra.mrb[26].mxu0 %vm3246_vm2, %v3758_v63  ;;  %3497 = vst.msk [vmem:[#allocation2 + $0x108] sm:$0xff] %vm3246_vm2, %v3433_v43  ;;  %v3400_v47 = vmax.f32 %v3336_v32, %v3368_v61  ;;  %v21399_v30 = vld [vmem:[#allocation37_spill] sm:$0xff]  ;;  %v17923_v61 = vld [vmem:[#allocation2 + $0x46] sm:$0xff] }
 0x328   : > { %v21404_v43 = vld [vmem:[#allocation41_spill] sm:$0xff] }
 0x329   : > { %3276 = vst.msk [vmem:[#allocation2 + $0x130] sm:$0xff] %vm3246_vm2, %v20875_v40  ;;  %v17852_v50 = vpop.permute.xlu0 %3554  ;;  %3277 = vst.msk [vmem:[#allocation2 + $0x138] sm:$0xff] %vm3246_vm2, %v20874_v18  ;;  %v17858_v27 = vpop.permute.xlu1 %3549 }
 0x32a   : > { %4520 = vperm.xlu1 %14930, %v21398_v37   ;;  %v3699_v53 = vmul.f32 %v17858_v27, %v3507_v0  ;;  %v3700_v28 = vmul.f32 %v17852_v50, %v3508_v36  ;;  %v17978_v0 = vld [vmem:[#allocation2 + $0x7e] sm:$0xff] }
 0x32c   : > { %v3369_v31 = vld [vmem:[#allocation2 + $0x128] sm:$0xff] }
 0x32d   : > { %v3306_v62 = vld [vmem:[#allocation2 + $0x121] sm:$0xff]  ;;  %v17861_v34 = vpop.permute.xlu0 %3564  ;;  %v17866_v2 = vpop.permute.xlu1 %3559  ;;  %v3401_v16 = vmax.f32 %v3337_v33, %v3369_v31  ;;  %v1544_v31 = vmul.f32 %v17842_v5, %v17375_v60 }
 0x32e   : > { %v3434_v46 = vmax.f32 %v3400_v47, %v3306_v62  ;;  %4524 = vperm.xlu1 %14930, %v21399_v30   ;;  %v3338_v48 = vmax.f32 %v3241_v11, %v3306_v62  ;;  %v3759_v15 = vld [vmem:[#allocation2 + $0x108] sm:$0xff]  ;;  %v3701_v37 = vmul.f32 %v17923_v61, %v17866_v2 }
 0x32f   : > { %13360 = vmatprep.mubr.msk.f32.mxu0 %vm3246_vm2, %v3759_v15  ;;  %v17936_v62 = vld [vmem:[#allocation2 + $0x4e] sm:$0xff] }
 0x330   : > { %3498 = vst.msk [vmem:[#allocation2 + $0x110] sm:$0xff] %vm3246_vm2, %v3434_v46  ;;  %v17871_v55 = vld [vmem:[#allocation2 + $0x129] sm:$0xff]  ;;  %v17876_v59 = vld [vmem:[#allocation2 + $0x131] sm:$0xff]  ;;  %v3702_v33 = vmul.f32 %v17936_v62, %v17861_v34 }
 0x331   : > { %v3370_v9 = vld [vmem:[#allocation2 + $0x130] sm:$0xff]  ;;  %v17873_v14 = vpop.permute.xlu0 %3574  ;;  %v3435_v4 = vmax.f32 %v3401_v16, %v17871_v55  ;;  %v17880_v25 = vpop.permute.xlu1 %3569 }
 0x332   : > { %v3402_v35 = vmax.f32 %v3338_v48, %v3370_v9  ;;  %4532 = vperm.xlu1 %14930, %v21400_v44   ;;  %v17948_v48 = vld [vmem:[#allocation2 + $0x5e] sm:$0xff] }
 0x333   : > { %3499 = vst.msk [vmem:[#allocation2 + $0x118] sm:$0xff] %vm3246_vm2, %v3435_v4  ;;  %v1805_v9 = vld [vmem:[#allocation2 + $0x140] sm:$0xff]  ;;  %v3704_v15 = vmul.f32 %v17948_v48, %v17873_v14 }
 0x334   : > { %v3436_v11 = vmax.f32 %v3402_v35, %v17876_v59  ;;  %v17955_v35 = vld [vmem:[#allocation2 + $0x66] sm:$0xff] }
 0x335   : > { %v17885_v20 = vpop.permute.xlu0 %3584  ;;  %v17888_v22 = vpop.permute.xlu1 %3579  ;;  %v2066_v44 = vld [vmem:[#allocation2 + $0x141] sm:$0xff] }
 0x336   : > { %3500 = vst.msk [vmem:[#allocation2 + $0x120] sm:$0xff] %vm3246_vm2, %v3436_v11  ;;  %4540 = vperm.xlu1 %14930, %v21401_v38   ;;  %v3705_v4 = vmul.f32 %v17955_v35, %v17888_v22  ;;  %v17962_v11 = vld [vmem:[#allocation2 + $0x6e] sm:$0xff] }
 0x337   : > { %v3760_v12 = vld [vmem:[#allocation2 + $0x110] sm:$0xff] }
 0x338   : > { %13361 = vmatmul.mubr.msk.f32.gmra.mrb[28].mxu0 %vm3246_vm2, %v3760_v12  ;;  %v2359_v12 = vld [vmem:[#allocation2 + $0x14f] sm:$0xff] }
 0x339   : > { %v17891_v26 = vpop.permute.xlu0 %3594  ;;  %v17895_v3 = vpop.permute.xlu1 %3589 }
 0x33a   : > { %4548 = vperm.xlu1 %14930, %v21402_v21   ;;  %v3761_v24 = vld [vmem:[#allocation2 + $0x118] sm:$0xff]  ;;  %v3708_v51 = vmul.f32 %v17978_v0, %v17891_v26 }
 0x33b   : > { %13363 = vmatprep.mubr.msk.f32.mxu0 %vm3246_vm2, %v3761_v24  ;;  %v3707_v24 = vmul.f32 %v17967_v56, %v17895_v3 }
 0x33d   : > { %v3762_v39 = vld [vmem:[#allocation2 + $0x120] sm:$0xff]  ;;  %v17898_v52 = vpop.permute.xlu0 %3604  ;;  %v17902_v41 = vpop.permute.xlu1 %3599 }
 0x33e   : > { %13364 = vmatmul.mubr.msk.f32.gmra.mrb[30].mxu0 %vm3246_vm2, %v3762_v39  ;;  %4556 = vperm.xlu1 %14930, %v21403_v6   ;;  %v2391_v39 = vmul.f32 %v2359_v12, %v17375_v60  ;;  %v17983_v6 = vld [vmem:[#allocation2 + $0x86] sm:$0xff] }
 0x33f   : > { %13370 = vmatprep.mubr.msk.f32.mxu0 %vm3246_vm2, %v3697_v23  ;;  %v3706_v23 = vmul.f32 %v17962_v11, %v17885_v20  ;;  %v3709_v17 = vmul.f32 %v17983_v6, %v17902_v41 }
 0x341   : > { %v17916_v45 = vpop.permute.xlu0 %3609  ;;  %v17920_v63 = vpop.permute.xlu1 %1186 }
 0x342   : > { %13371 = vmatmul.mubr.msk.f32.vlgmr.msra.gmra.mrb[0].mxu0 %vm3246_vm2, %v3698_v42  ;;  %4564 = vperm.xlu1 %14930, %v17375_v60   ;;  %v1251_v32 = vmul.f32 %v17920_v63, %v21404_v43  ;;  %v2098_v21 = vmul.f32 %v2066_v44, %v17920_v63  ;;  %v17990_v42 = vld [vmem:[#allocation2 + $0x8e] sm:$0xff]  ;;  %v17999_v43 = vld [vmem:[#allocation2 + $0x96] sm:$0xff] }
 0x343   : > { %13373 = vmatprep.mubr.msk.f32.mxu0 %vm3246_vm2, %v3699_v53  ;;  %14297 = vmatpush3.bf16.msra.mxu0 %v17677_v8  ;;  %v17941_v8 = vld [vmem:[#allocation2 + $0x56] sm:$0xff] }
 0x344   : > { %14299 = vmatprep.subr.bf16.mxu0 %v17913_v1  ;;  %1410 = vperm.xlu0 %14928, %v1251_v32   ;;  %v3703_v30 = vmul.f32 %v17941_v8, %v17880_v25  ;;  %v3710_v32 = vmul.f32 %v17990_v42, %v17898_v52 }
 0x345   : > { %v17931_v47 = vpop.permute.xlu0 %3619  ;;  %v17938_v46 = vpop.permute.xlu1 %3614 }
 0x346   : > { %13374 = vmatmul.mubr.msk.f32.gmra.mrb[2].mxu0 %vm3246_vm2, %v3700_v28  ;;  %v17997_v28 = vld [vmem:[#allocation2 + $0x150] sm:$0xff] }
 0x347   : > { %13376 = vmatprep.mubr.msk.f32.mxu0 %vm3246_vm2, %v3701_v37  ;;  %v3711_v37 = vmul.f32 %v17999_v43, %v17916_v45 }
 0x348   : > { %1703 = vperm.xlu0 %14928, %v1544_v31   ;;  %v18005_v31 = vld [vmem:[#allocation2 + $0x151] sm:$0xff] }
 0x349   : > { %v17950_v5 = vpop.permute.xlu0 %3629  ;;  %v17952_v16 = vpop.permute.xlu1 %3624 }
 0x34a   : > { %13377 = vmatmul.mubr.msk.f32.gmra.mrb[4].mxu0 %vm3246_vm2, %v3702_v33  ;;  %21405 = vst [vmem:[#allocation15_spill] sm:$0xff] %v17950_v5  ;;  %21406 = vst [vmem:[#allocation30_spill] sm:$0xff] %v17952_v16  ;;  %v18009_v33 = vld [vmem:[#allocation2 + $0x9e] sm:$0xff] }
 0x34b   : > { %13379 = vmatprep.mubr.msk.f32.mxu0 %vm3246_vm2, %v3703_v30 }
 0x34c   : > { %1964 = vperm.xlu0 %14928, %v1805_v9   ;;  %v18014_v9 = vld [vmem:[#allocation2 + $0xa6] sm:$0xff] }
 0x34d   : > { %v17964_v38 = vpop.permute.xlu1 %3634  ;;  %v17974_v58 = vpop.permute.xlu0 %3639  ;;  %v3713_v44 = vmul.f32 %v18014_v9, %v17931_v47 }
 0x34e   : > { %13380 = vmatmul.mubr.msk.f32.gmra.mrb[6].mxu0 %vm3246_vm2, %v3704_v15  ;;  %21407 = vst [vmem:[#allocation8_spill] sm:$0xff] %v17964_v38  ;;  %21408 = vst [vmem:[#allocation5_spill] sm:$0xff] %v17974_v58  ;;  %v2945_v15 = vmul.f32 %v18005_v31, %v17920_v63 }
 0x34f   : > { %13382 = vmatprep.mubr.msk.f32.mxu0 %vm3246_vm2, %v3705_v4  ;;  %v3712_v4 = vmul.f32 %v18009_v33, %v17938_v46 }
 0x350   : > { %2257 = vperm.xlu0 %14928, %v2098_v21  }
 0x351   : > { %v17980_v36 = vpop.permute.xlu1 %3644  ;;  %v17992_v60 = vpop.permute.xlu0 %3649 }
 0x352   : > { %13383 = vmatmul.mubr.msk.f32.gmra.mrb[8].mxu0 %vm3246_vm2, %v3706_v23  ;;  %21409 = vst [vmem:[#allocation16_spill] sm:$0xff] %v17980_v36  ;;  %21410 = vst [vmem:[#allocation6_spill] sm:$0xff] %v17992_v60  ;;  %v18025_v23 = vld [vmem:[#allocation2 + $0xae] sm:$0xff] }
 0x353   : > { %13385 = vmatprep.mubr.msk.f32.mxu0 %vm3246_vm2, %v3707_v24  ;;  %v18030_v24 = vld [vmem:[#allocation2 + $0xb6] sm:$0xff]  ;;  %v3714_v63 = vmul.f32 %v18025_v23, %v17952_v16 }
 0x354   : > { %2550 = vperm.xlu0 %14928, %v2391_v39   ;;  %v3715_v39 = vmul.f32 %v18030_v24, %v17950_v5 }
 0x355   : > { %v17994_v53 = vpop.permute.xlu1 %3654  ;;  %v18022_v12 = vpop.permute.xlu0 %3659 }
 0x356   : > { %13386 = vmatmul.mubr.msk.f32.gmra.mrb[10].mxu0 %vm3246_vm2, %v3708_v51  ;;  %21411 = vst [vmem:[#allocation9_spill] sm:$0xff] %v17994_v53  ;;  %21413 = vst [vmem:[#allocation24_spill] sm:$0xff] %v18022_v12  ;;  %v18038_v51 = vld [vmem:[#allocation2 + $0xbe] sm:$0xff] }
 0x357   : > { %13388 = vmatprep.mubr.msk.f32.mxu0 %vm3246_vm2, %v3709_v17 }
 0x358   : > { %2811 = vperm.xlu0 %14928, %v17997_v28  }
 0x359   : > { %v18011_v30 = vpop.permute.xlu1 %3664  ;;  %v18040_v17 = vpop.permute.xlu0 %3669 }
 0x35a   : > { %13389 = vmatmul.mubr.msk.f32.gmra.mrb[12].mxu0 %vm3246_vm2, %v3710_v32  ;;  %21412 = vst [vmem:[#allocation28_spill] sm:$0xff] %v18011_v30  ;;  %21415 = vst [vmem:[#allocation4_spill] sm:$0xff] %v18040_v17  ;;  %v21416_v32 = vld [vmem:[#allocation31_spill] sm:$0xff] }
 0x35b   : > { %13391 = vmatprep.mubr.msk.f32.mxu0 %vm3246_vm2, %v3711_v37 }
 0x35c   : > { %3104 = vperm.xlu0 %14928, %v2945_v15   ;;  %v18046_v15 = vld [vmem:[#allocation2 + $0xc6] sm:$0xff] }
 0x35d   : > { %v18027_v21 = vpop.permute.xlu1 %3674  ;;  %v18065_v29 = vpop.permute.xlu0 %3679 }
 0x35e   : > { %13392 = vmatmul.mubr.msk.f32.gmra.mrb[14].mxu0 %vm3246_vm2, %v3712_v4  ;;  %21414 = vst [vmem:[#allocation13_spill] sm:$0xff] %v18027_v21  ;;  %v3716_v4 = vmul.f32 %v18038_v51, %v17964_v38  ;;  %21421 = vst [vmem:[#allocation29_spill] sm:$0xff] %v18065_v29  ;;  %v21428_v38 = vld [vmem:[#allocation45_spill] sm:$0xff] }
 0x35f   : > { %13394 = vmatprep.mubr.msk.f32.mxu0 %vm3246_vm2, %v3713_v44  ;;  %v18053_v44 = vld [vmem:[#allocation2 + $0xce] sm:$0xff] }
 0x360   : > { %14931 = vset.pattern.permute.xlu0 %v15021_v54  ;;  %v3717_v54 = vmul.f32 %v18046_v15, %v17974_v58 }
 0x361   : > { %4516 = vperm.xlu0 %14931, %v21416_v32   ;;  %v18043_v37 = vpop.permute.xlu1 %3684  ;;  %v18059_v32 = vld [vmem:[#allocation2 + $0xd6] sm:$0xff] }
 0x362   : > { %13395 = vmatmul.mubr.msk.f32.gmra.mrb[16].mxu0 %vm3246_vm2, %v3714_v63  ;;  %21417 = vst [vmem:[#allocation17_spill] sm:$0xff] %v18043_v37  ;;  %v21418_v63 = vld [vmem:[#allocation14_spill] sm:$0xff]  ;;  %21420 = vst [vmem:[#allocation42_spill] sm:$0xff] %v18059_v32  ;;  %v3719_v40 = vmul.f32 %v18059_v32, %v17992_v60 }
 0x363   : > { %13397 = vmatprep.mubr.msk.f32.mxu0 %vm3246_vm2, %v3715_v39  ;;  %v3718_v39 = vmul.f32 %v18053_v44, %v17980_v36  ;;  %v18081_v36 = vld [vmem:[#allocation2 + $0xee] sm:$0xff] }
 0x364   : > { %21426 = vst [vmem:[#allocation19_spill] sm:$0xff] %v18081_v36 }
 0x365   : > { %4528 = vperm.xlu0 %14931, %v21418_v63   ;;  %v18056_v18 = vpop.permute.xlu1 %3694  ;;  %v18072_v63 = vld [vmem:[#allocation2 + $0xe6] sm:$0xff] }
 0x366   : > { %13398 = vmatmul.mubr.msk.f32.gmra.mrb[18].mxu0 %vm3246_vm2, %v3716_v4  ;;  %21419 = vst [vmem:[#allocation34_spill] sm:$0xff] %v18056_v18  ;;  %v18068_v4 = vld [vmem:[#allocation2 + $0xde] sm:$0xff]  ;;  %21424 = vst [vmem:[#allocation26_spill] sm:$0xff] %v18072_v63  ;;  %v3721_v60 = vmul.f32 %v18072_v63, %v18022_v12  ;;  %v21432_v63 = vld [vmem:[#allocation43_spill] sm:$0xff] }
 0x367   : > { %13400 = vmatprep.mubr.msk.f32.mxu0 %vm3246_vm2, %v3717_v54  ;;  %21422 = vst [vmem:[#allocation33_spill] sm:$0xff] %v18068_v4  ;;  %v3720_v54 = vmul.f32 %v18068_v4, %v17994_v53 }
 0x369   : > { %4536 = vperm.xlu0 %14931, %v21423_v10   ;;  %v18087_v10 = vld [vmem:[#allocation2 + $0xf6] sm:$0xff] }
 0x36a   : > { %13401 = vmatmul.mubr.msk.f32.gmra.mrb[20].mxu0 %vm3246_vm2, %v3718_v39  ;;  %v18076_v58 = vpop.permute.xlu1 %4444  ;;  %v18083_v39 = vpop.permute.xlu0 %3689  ;;  %21429 = vst [vmem:[#allocation32_spill] sm:$0xff] %v18087_v10  ;;  %v3723_v12 = vmul.f32 %v18087_v10, %v18040_v17  ;;  %v21437_v17 = vld [vmem:[#allocation23_spill] sm:$0xff] }
 0x36b   : > { %13403 = vmatprep.mubr.msk.f32.mxu0 %vm3246_vm2, %v3719_v40  ;;  %21425 = vst [vmem:[#allocation38_spill] sm:$0xff] %v18076_v58  ;;  %21427 = vst [vmem:[#allocation18_spill] sm:$0xff] %v18083_v39  ;;  %v3722_v40 = vmul.f32 %v18081_v36, %v18011_v30 }
 0x36d   : > { %4544 = vperm.xlu0 %14931, %v21428_v38   ;;  %v18100_v38 = vld [vmem:[#allocation2 + $0x106] sm:$0xff] }
 0x36e   : > { %13404 = vmatmul.mubr.msk.f32.gmra.mrb[22].mxu0 %vm3246_vm2, %v3720_v54  ;;  %v18091_v53 = vpop.permute.xlu1 %4448  ;;  %v18096_v54 = vld [vmem:[#allocation2 + $0xfe] sm:$0xff]  ;;  %21433 = vst [vmem:[#allocation25_spill] sm:$0xff] %v18100_v38  ;;  %v3725_v30 = vmul.f32 %v18100_v38, %v18065_v29  ;;  %v18108_v36 = vpop.permute.xlu0 %4440 }
 0x36f   : > { %13406 = vmatprep.mubr.msk.f32.mxu0 %vm3246_vm2, %v3721_v60  ;;  %21430 = vst [vmem:[#allocation40_spill] sm:$0xff] %v18091_v53  ;;  %21431 = vst [vmem:[#allocation11_spill] sm:$0xff] %v18096_v54  ;;  %v3724_v60 = vmul.f32 %v18096_v54, %v18027_v21  ;;  %v4407_v21 = vld [vmem:[#allocation2 + $0x2a] sm:$0xff] }
 0x370   : > { %21435 = vst [vmem:[#allocation39_spill] sm:$0xff] %v18108_v36  ;;  %v4567_v38 = vmul.f32 %v18108_v36, %v4407_v21  ;;  %v5406_v21 = vld [vmem:[%s20800_s4 + $0x48] sm:$0xff] }
 0x371   : > { %4552 = vperm.xlu0 %14931, %v21432_v63  }
 0x372   : > { %13407 = vmatmul.mubr.msk.f32.gmra.mrb[24].mxu0 %vm3246_vm2, %v3722_v40  ;;  %v18111_v40 = vld [vmem:[#allocation2 + $0x10e] sm:$0xff] }
 0x373   : > { %13409 = vmatprep.mubr.msk.f32.mxu0 %vm3246_vm2, %v3723_v12  ;;  %v18104_v4 = vpop.permute.xlu1 %4456  ;;  %21436 = vst [vmem:[#allocation12_spill] sm:$0xff] %v18111_v40  ;;  %v18115_v12 = vld [vmem:[#allocation2 + $0x116] sm:$0xff]  ;;  %v3726_v63 = vmul.f32 %v18111_v40, %v18043_v37 }
 0x374   : > { %21434 = vst [vmem:[#allocation27_spill] sm:$0xff] %v18104_v4  ;;  %21438 = vst [vmem:[#allocation10_spill] sm:$0xff] %v18115_v12  ;;  %v3727_v29 = vmul.f32 %v18115_v12, %v18083_v39  ;;  %v4409_v40 = vld [vmem:[#allocation2 + $0x3a] sm:$0xff] }
 0x375   : > { %4560 = vperm.xlu0 %14931, %v21437_v17   ;;  %v18127_v17 = vpop.permute.xlu0 %4452 }
 0x376   : > { %13410 = vmatmul.mubr.msk.f32.gmra.mrb[26].mxu0 %vm3246_vm2, %v3724_v60  ;;  %v18124_v60 = vld [vmem:[#allocation2 + $0x11e] sm:$0xff]  ;;  %21441 = vst [vmem:[#allocation37_spill] sm:$0xff] %v18127_v17 }
 0x377   : > { %13412 = vmatprep.mubr.msk.f32.mxu0 %vm3246_vm2, %v3725_v30  ;;  %v18119_v54 = vpop.permute.xlu1 %4464  ;;  %21440 = vst [vmem:[#allocation21_spill] sm:$0xff] %v18124_v60  ;;  %v4408_v30 = vld [vmem:[#allocation2 + $0x32] sm:$0xff]  ;;  %v3728_v37 = vmul.f32 %v18124_v60, %v18056_v18 }
 0x378   : > { %21439 = vst [vmem:[#allocation20_spill] sm:$0xff] %v18119_v54  ;;  %v4568_v32 = vmul.f32 %v18076_v58, %v4408_v30  ;;  %v18153_v30 = vld [vmem:[#allocation2 + $0x4a] sm:$0xff] }
 0x379   : > { %v18146_v18 = vpop.permute.xlu0 %4460  ;;  %21445 = vst [vmem:[#allocation35_spill] sm:$0xff] %v18153_v30 }
 0x37a   : > { %13413 = vmatmul.mubr.msk.f32.gmra.mrb[28].mxu0 %vm3246_vm2, %v3726_v63  ;;  %v5405_v63 = vld [vmem:[%s20800_s4 + $0x40] sm:$0xff]  ;;  %21443 = vst [vmem:[#allocation22_spill] sm:$0xff] %v18146_v18 }
 0x37b   : > { %13415 = vmatprep.mubr.msk.f32.mxu0 %vm3246_vm2, %v3727_v29  ;;  %v18132_v10 = vpop.permute.xlu1 %4472  ;;  %v4569_v29 = vmul.f32 %v18091_v53, %v4409_v40  ;;  %v18144_v36 = vpack.c.bf16 %v5406_v21, %v5405_v63  ;;  %v18160_v63 = vld [vmem:[#allocation2 + $0x52] sm:$0xff]  ;;  %v18167_v21 = vld [vmem:[#allocation2 + $0x5a] sm:$0xff] }
 0x37c   : > { %21442 = vst [vmem:[#allocation7_spill] sm:$0xff] %v18132_v10  ;;  %21446 = vst [vmem:[#allocation41_spill] sm:$0xff] %v18160_v63 }
 0x37d   : > { %21448 = vst [vmem:[#allocation14_spill] sm:$0xff] %v18167_v21 }
 0x37e   : > { %13416 = vmatmul.mubr.msk.f32.gmra.mrb[30].mxu0 %vm3246_vm2, %v3728_v37  ;;  %v4410_v37 = vld [vmem:[#allocation2 + $0x42] sm:$0xff] }
 0x37f   : > { %13422 = vmatprep.mubr.msk.f32.mxu0 %vm3246_vm2, %v4567_v38  ;;  %v18148_v39 = vpop.permute.xlu1 %4480  ;;  %v4570_v58 = vmul.f32 %v18127_v17, %v4410_v37  ;;  %v4571_v38 = vmul.f32 %v18153_v30, %v18104_v4  ;;  %v18174_v4 = vld [vmem:[#allocation2 + $0x62] sm:$0xff] }
 0x380   : > { %21444 = vst [vmem:[#allocation44_spill] sm:$0xff] %v18148_v39  ;;  %21450 = vst [vmem:[#allocation45_spill] sm:$0xff] %v18174_v4 }
 0x382   : > { %13423 = vmatmul.mubr.msk.f32.vlgmr.msra.gmra.mrb[0].mxu0 %vm3246_vm2, %v4568_v32  ;;  %v18162_v32 = vpop.permute.xlu0 %4468 }
 0x383   : > { %13425 = vmatprep.mubr.msk.f32.mxu0 %vm3246_vm2, %v4569_v29  ;;  %14301 = vmatpush3.bf16.msra.mxu0 %v17913_v1  ;;  %21447 = vst [vmem:[#allocation31_spill] sm:$0xff] %v18162_v32  ;;  %v4572_v1 = vmul.f32 %v18160_v63, %v18146_v18  ;;  %v4573_v29 = vmul.f32 %v18167_v21, %v18119_v54  ;;  %v18188_v54 = vld [vmem:[#allocation2 + $0x72] sm:$0xff] }
 0x384   : > { %14303 = vmatprep.subr.bf16.mxu0 %v18144_v36  ;;  %v990_v40 = vpop.permute.xlu1 %989  ;;  %21454 = vst [vmem:[#allocation47_spill] sm:$0xff] %v18188_v54 }
 0x386   : > { %13426 = vmatmul.mubr.msk.f32.gmra.mrb[2].mxu0 %vm3246_vm2, %v4570_v58  ;;  %v18177_v58 = vld [vmem:[#allocation2 + $0x6a] sm:$0xff]  ;;  %v18181_v17 = vpop.permute.xlu0 %4476 }
 0x387   : > { %13428 = vmatprep.mubr.msk.f32.mxu0 %vm3246_vm2, %v4571_v38  ;;  %21451 = vst [vmem:[#allocation43_spill] sm:$0xff] %v18177_v58  ;;  %v4574_v38 = vmul.f32 %v18174_v4, %v18162_v32  ;;  %21452 = vst [vmem:[#allocation23_spill] sm:$0xff] %v18181_v17  ;;  %v4575_v18 = vmul.f32 %v18177_v58, %v18132_v10  ;;  %v18200_v10 = vld [vmem:[#allocation2 + $0x82] sm:$0xff] }
 0x388   : > { %21457 = vst [vmem:[#allocation50_spill] sm:$0xff] %v18200_v10 }
 0x389   : > { %v18171_v37 = vpop.permute.xlu1 %4484 }
 0x38a   : > { %21449 = vst [vmem:[#allocation36_spill] sm:$0xff] %v18171_v37  ;;  %13429 = vmatmul.mubr.msk.f32.gmra.mrb[4].mxu0 %vm3246_vm2, %v4572_v1  ;;  %v18191_v1 = vld [vmem:[#allocation2 + $0x7a] sm:$0xff] }
 0x38b   : > { %13431 = vmatprep.mubr.msk.f32.mxu0 %vm3246_vm2, %v4573_v29  ;;  %21455 = vst [vmem:[#allocation48_spill] sm:$0xff] %v18191_v1  ;;  %v4576_v29 = vmul.f32 %v18188_v54, %v18181_v17  ;;  %v4577_v32 = vmul.f32 %v18191_v1, %v18148_v39  ;;  %v18212_v39 = vld [vmem:[#allocation2 + $0x92] sm:$0xff]  ;;  %v14985_v54 = vld [vmem:[%s20798_s2 + $0x3] ss:$0 sm:$0xff] }
 0x38c   : > { %21460 = vst [vmem:[#allocation53_spill] sm:$0xff] %v18212_v39 }
 0x38d   : > { %v18185_v53 = vpop.permute.xlu1 %4488 }
 0x38e   : > { %21453 = vst [vmem:[#allocation46_spill] sm:$0xff] %v18185_v53  ;;  %13432 = vmatmul.mubr.msk.f32.gmra.mrb[6].mxu0 %vm3246_vm2, %v4574_v38  ;;  %v18203_v38 = vld [vmem:[#allocation2 + $0x8a] sm:$0xff] }
 0x38f   : > { %13434 = vmatprep.mubr.msk.f32.mxu0 %vm3246_vm2, %v4575_v18  ;;  %21458 = vst [vmem:[#allocation51_spill] sm:$0xff] %v18203_v38  ;;  %v4578_v18 = vmul.f32 %v18200_v10, %v18171_v37  ;;  %v4579_v58 = vmul.f32 %v18203_v38, %v18185_v53  ;;  %v18224_v53 = vld [vmem:[#allocation2 + $0xa2] sm:$0xff] }
 0x390   : > { %21463 = vst [vmem:[#allocation56_spill] sm:$0xff] %v18224_v53 }
 0x391   : > { %v18197_v4 = vpop.permute.xlu1 %4492 }
 0x392   : > { %21456 = vst [vmem:[#allocation49_spill] sm:$0xff] %v18197_v4  ;;  %13435 = vmatmul.mubr.msk.f32.gmra.mrb[8].mxu0 %vm3246_vm2, %v4576_v29  ;;  %v18215_v29 = vld [vmem:[#allocation2 + $0x9a] sm:$0xff] }
 0x393   : > { %13437 = vmatprep.mubr.msk.f32.mxu0 %vm3246_vm2, %v4577_v32  ;;  %21461 = vst [vmem:[#allocation54_spill] sm:$0xff] %v18215_v29  ;;  %v4580_v32 = vmul.f32 %v18212_v39, %v18197_v4  ;;  %v18237_v4 = vld [vmem:[#allocation2 + $0xb2] sm:$0xff]  ;;  %v14982_v39 = vld [vmem:[%s20798_s2 + $0x1] ss:$0 sm:$0xff] }
 0x394   : > { %21466 = vst [vmem:[#allocation59_spill] sm:$0xff] %v18237_v4 }
 0x395   : > { %v18209_v17 = vpop.permute.xlu1 %4496 }
 0x396   : > { %21459 = vst [vmem:[#allocation52_spill] sm:$0xff] %v18209_v17  ;;  %13438 = vmatmul.mubr.msk.f32.gmra.mrb[10].mxu0 %vm3246_vm2, %v4578_v18  ;;  %v4581_v1 = vmul.f32 %v18215_v29, %v18209_v17 }
 0x397   : > { %13440 = vmatprep.mubr.msk.f32.mxu0 %vm3246_vm2, %v4579_v58  ;;  %v18229_v58 = vld [vmem:[#allocation2 + $0xaa] sm:$0xff] }
 0x398   : > { %21464 = vst [vmem:[#allocation57_spill] sm:$0xff] %v18229_v58 }
 0x399   : > { %v18221_v37 = vpop.permute.xlu1 %4500 }
 0x39a   : > { %21462 = vst [vmem:[#allocation55_spill] sm:$0xff] %v18221_v37  ;;  %13441 = vmatmul.mubr.msk.f32.gmra.mrb[12].mxu0 %vm3246_vm2, %v4580_v32  ;;  %v4582_v18 = vmul.f32 %v18224_v53, %v18221_v37  ;;  %v18244_v37 = vld [vmem:[#allocation2 + $0xba] sm:$0xff] }
 0x39b   : > { %13443 = vmatprep.mubr.msk.f32.mxu0 %vm3246_vm2, %v4581_v1  ;;  %21468 = vst [vmem:[#allocation61_spill] sm:$0xff] %v18244_v37 }
 0x39d   : > { %v18231_v38 = vpop.permute.xlu1 %4504 }
 0x39e   : > { %21465 = vst [vmem:[#allocation58_spill] sm:$0xff] %v18231_v38  ;;  %13444 = vmatmul.mubr.msk.f32.gmra.mrb[14].mxu0 %vm3246_vm2, %v4582_v18  ;;  %v4583_v17 = vmul.f32 %v18229_v58, %v18231_v38  ;;  %v729_v38 = vpop.permute.xlu0 %728 }
 0x3a0   : > { %13446 = vmatprep.mubr.msk.f32.mxu0 %vm3246_vm2, %v4583_v17 }
 0x3a1   : > { %v18239_v32 = vpop.permute.xlu1 %4508 }
 0x3a2   : > { %21467 = vst [vmem:[#allocation60_spill] sm:$0xff] %v18239_v32  ;;  %v4584_v1 = vmul.f32 %v18237_v4, %v18239_v32  ;;  %v1027_v32 = vmul.f32 %v14982_v39, %v990_v40  ;;  %v14986_v39 = vld [vmem:[%s20798_s2 + $0x4] ss:$0 sm:$0xff] }
 0x3a4   : > { %13447 = vmatmul.mubr.msk.f32.gmra.mrb[16].mxu0 %vm3246_vm2, %v4584_v1  ;;  %v14983_v1 = vld [vmem:[%s20798_s2] ss:$0 sm:$0xff] }
 0x3a5   : > { %v18246_v53 = vpop.permute.xlu1 %4512  ;;  %v766_v4 = vmul.f32 %v14983_v1, %v729_v38 }
 0x3a6   : > { %21469 = vst [vmem:[#allocation62_spill] sm:$0xff] %v18246_v53  ;;  %v4585_v18 = vmul.f32 %v18244_v37, %v18246_v53  ;;  %v14984_v53 = vld [vmem:[%s20798_s2 + $0x2] ss:$0 sm:$0xff] }
 0x3a7   : > { %v1059_v10 = vadd.f32 %v1027_v32, %v766_v4 }
 0x3a8   : > { %13449 = vmatprep.mubr.msk.f32.mxu0 %vm3246_vm2, %v4585_v18 }
 0x3a9   : > { %v18266_v38 = vpop.permute.xlu1 %4520 }
 0x3aa   : > { %21470 = vst [vmem:[#allocation63_spill] sm:$0xff] %v18266_v38 }
 0x3c3   : > { %v1411_v17 = vpop.permute.xlu0 %1410 }
 0x3c4   : > { %v1448_v37 = vmul.f32 %v14984_v53, %v1411_v17  ;;  %v14987_v53 = vld [vmem:[%s20798_s2 + $0x5] ss:$0 sm:$0xff] }
 0x3c6   : > { %v1480_v63 = vadd.f32 %v1448_v37, %v1059_v10 }
 0x3c7   : > { %v1704_v58 = vpop.permute.xlu0 %1703 }
 0x3c8   : > { %v1741_v21 = vmul.f32 %v14985_v54, %v1704_v58  ;;  %v14988_v54 = vld [vmem:[%s20798_s2 + $0x6] ss:$0 sm:$0xff] }
 0x3ca   : > { %v1773_v1 = vadd.f32 %v1741_v21, %v1480_v63 }
 0x3cb   : > { %v1965_v29 = vpop.permute.xlu0 %1964 }
 0x3cc   : > { %v2002_v40 = vmul.f32 %v14986_v39, %v1965_v29  ;;  %v14989_v29 = vld [vmem:[%s20798_s2 + $0x7] ss:$0 sm:$0xff]  ;;  %v18277_v39 = vpop.permute.xlu1 %4524 }
 0x3cd   : > { %21471 = vst [vmem:[#allocation64_spill] sm:$0xff] %v18277_v39 }
 0x3ce   : > { %v2034_v32 = vadd.f32 %v2002_v40, %v1773_v1 }
 0x3cf   : > { %v2258_v18 = vpop.permute.xlu0 %2257 }
 0x3d0   : > { %v2295_v4 = vmul.f32 %v14987_v53, %v2258_v18  ;;  %v14990_v18 = vld [vmem:[%s20798_s2 + $0x8] ss:$0 sm:$0xff] }
 0x3d1   : > { %v18282_v53 = vld [vmem:[#allocation2 + $0xc2] sm:$0xff] }
 0x3d2   : > { %v2327_v58 = vadd.f32 %v2295_v4, %v2034_v32  ;;  %21472 = vst [vmem:[#allocation65_spill] sm:$0xff] %v18282_v53  ;;  %v14991_v4 = vld [vmem:[%s20799_s3] ss:$0 sm:$0xff] }
 0x3d3   : > { %v2551_v30 = vpop.permute.xlu0 %2550 }
 0x3d4   : > { %v2588_v10 = vmul.f32 %v14988_v54, %v2551_v30  ;;  %v18284_v30 = vpop.permute.xlu1 %4532 }
 0x3d5   : > { %21473 = vst [vmem:[#allocation66_spill] sm:$0xff] %v18284_v30 }
 0x3d6   : > { %v2620_v63 = vadd.f32 %v2588_v10, %v2327_v58  ;;  %v18291_v10 = vld [vmem:[#allocation2 + $0xca] sm:$0xff] }
 0x3d7   : > { %v2812_v37 = vpop.permute.xlu0 %2811  ;;  %21475 = vst [vmem:[#allocation68_spill] sm:$0xff] %v18291_v10  ;;  %v4587_v58 = vmul.f32 %v18291_v10, %v18266_v38  ;;  %v18335_v10 = vld [vmem:[#allocation2 + $0xfa] sm:$0xff] }
 0x3d8   : > { %v2849_v17 = vmul.f32 %v14989_v29, %v2812_v37  ;;  %v18298_v29 = vld [vmem:[#allocation2 + $0xd2] sm:$0xff] }
 0x3d9   : > { %21476 = vst [vmem:[#allocation69_spill] sm:$0xff] %v18298_v29 }
 0x3da   : > { %v2881_v60 = vadd.f32 %v2849_v17, %v2620_v63  ;;  %v18300_v17 = vld [vmem:[#allocation2 + $0xda] sm:$0xff] }
 0x3db   : > { %v3105_v21 = vpop.permute.xlu0 %3104  ;;  %21477 = vst [vmem:[#allocation70_spill] sm:$0xff] %v18300_v17 }
 0x3dc   : > { %v3142_v40 = vmul.f32 %v14990_v18, %v3105_v21  ;;  %v4588_v21 = vmul.f32 %v18298_v29, %v18277_v39 }
 0x3de   : > { %v3174_v1 = vadd.f32 %v3142_v40, %v2881_v60  ;;  %v18310_v40 = vpop.permute.xlu1 %4540 }
 0x3e0   : > { %v3213_v32 = vadd.f32 %v14991_v4, %v3174_v1  ;;  %v18289_v54 = vpop.permute.xlu0 %4516  ;;  %v21479_v1 = vmax.f32 %v17819_v13, 0.0  ;;  %v21483_v13 = vmax.f32 %v17832_v49, 0.0 }
 0x3e1   : > { %21474 = vst [vmem:[#allocation67_spill] sm:$0xff] %v18289_v54  ;;  %v4586_v37 = vmul.f32 %v18282_v53, %v18289_v54 }
 0x3e2   : > { %v3245_v60 = vmax.f32 %v3213_v32, 0.0  ;;  %v3339_v4 = vmax.f32 %v21479_v1, %v17871_v55  ;;  %v18316_v32 = vld [vmem:[#allocation2 + $0xe2] sm:$0xff]  ;;  %v3340_v55 = vmax.f32 %v21483_v13, %v17876_v59 }
 0x3e3   : > { %13450 = vmatmul.mubr.msk.f32.gmra.mrb[18].mxu0 %vm3246_vm2, %v4586_v37  ;;  %21480 = vst [vmem:[#allocation72_spill] sm:$0xff] %v18316_v32  ;;  %v18318_v37 = vld [vmem:[#allocation2 + $0xea] sm:$0xff] }
 0x3e4   : > { %3278 = vst.msk [vmem:[#allocation2 + $0x140] sm:$0xff] %vm3246_vm2, %v3245_v60  ;;  %v18303_v63 = vpop.permute.xlu0 %4528  ;;  %13452 = vmatprep.mubr.msk.f32.mxu0 %vm3246_vm2, %v4587_v58  ;;  %21481 = vst [vmem:[#allocation73_spill] sm:$0xff] %v18318_v37  ;;  %v4590_v58 = vmul.f32 %v18316_v32, %v18284_v30  ;;  %v18337_v30 = vpop.permute.xlu1 %4548 }
 0x3e5   : > { %21478 = vst [vmem:[#allocation71_spill] sm:$0xff] %v18303_v63  ;;  %v4589_v18 = vmul.f32 %v18300_v17, %v18303_v63  ;;  %v3371_v63 = vld [vmem:[#allocation2 + $0x138] sm:$0xff] }
 0x3e6   : > { %v3403_v1 = vmax.f32 %v3339_v4, %v3371_v63  ;;  %v3407_v4 = vld [vmem:[#allocation2 + $0x149] sm:$0xff] }
 0x3e7   : > { %13453 = vmatmul.mubr.msk.f32.gmra.mrb[20].mxu0 %vm3246_vm2, %v4588_v21  ;;  %v18330_v21 = vld [vmem:[#allocation2 + $0x148] sm:$0xff] }
 0x3e8   : > { %v18320_v38 = vpop.permute.xlu0 %4536  ;;  %13455 = vmatprep.mubr.msk.f32.mxu0 %vm3246_vm2, %v4589_v18  ;;  %21484 = vst [vmem:[#allocation75_spill] sm:$0xff] %v18330_v21  ;;  %v18333_v18 = vld [vmem:[#allocation2 + $0xf2] sm:$0xff] }
 0x3e9   : > { %21482 = vst [vmem:[#allocation74_spill] sm:$0xff] %v18320_v38  ;;  %v4591_v39 = vmul.f32 %v18318_v37, %v18320_v38  ;;  %v21485_v38 = vmax.f32 %v17837_v19, 0.0  ;;  %v4592_v63 = vmul.f32 %v18333_v18, %v18310_v40 }
 0x3eb   : > { %v3309_v54 = vld [vmem:[#allocation2 + $0x139] sm:$0xff]  ;;  %v3310_v17 = vld [vmem:[#allocation2 + $0x141] sm:$0xff]  ;;  %13456 = vmatmul.mubr.msk.f32.gmra.mrb[22].mxu0 %vm3246_vm2, %v4590_v58 }
 0x3ec   : > { %v3372_v29 = vld [vmem:[#allocation2 + $0x140] sm:$0xff]  ;;  %v3341_v37 = vmax.f32 %v21485_v38, %v3309_v54  ;;  %v3342_v32 = vmax.f32 %v3245_v60, %v3310_v17  ;;  %v3437_v59 = vmax.f32 %v3403_v1, %v3309_v54  ;;  %v18341_v13 = vpop.permute.xlu0 %4544  ;;  %13458 = vmatprep.mubr.msk.f32.mxu0 %vm3246_vm2, %v4591_v39  ;;  %v18352_v38 = vld [vmem:[#allocation2 + $0x10a] sm:$0xff] }
 0x3ed   : > { %v3404_v49 = vmax.f32 %v3340_v55, %v3372_v29  ;;  %21486 = vst [vmem:[#allocation76_spill] sm:$0xff] %v18341_v13  ;;  %v4593_v58 = vmul.f32 %v18335_v10, %v18341_v13  ;;  %v18354_v54 = vld [vmem:[#allocation2 + $0x102] sm:$0xff] }
 0x3ee   : > { %v3405_v53 = vmax.f32 %v3341_v37, %v18330_v21  ;;  %v3406_v12 = vmax.f32 %v3342_v32, %v17997_v28  ;;  %3501 = vst.msk [vmem:[#allocation2 + $0x128] sm:$0xff] %vm3246_vm2, %v3437_v59  ;;  %v4594_v28 = vmul.f32 %v18354_v54, %v18337_v30  ;;  %v18365_v32 = vpop.permute.xlu1 %4556 }
 0x3ef   : > { %v3438_v19 = vmax.f32 %v3404_v49, %v3310_v17  ;;  %13459 = vmatmul.mubr.msk.f32.gmra.mrb[24].mxu0 %vm3246_vm2, %v4592_v63  ;;  %v4986_v63 = vmul.f32 %v17923_v61, %v17834_v7  ;;  %v4988_v61 = vmul.f32 %v17941_v8, %v17858_v27  ;;  %v4992_v8 = vmul.f32 %v17967_v56, %v17880_v25 }
 0x3f0   : > { %v3439_v39 = vmax.f32 %v3405_v53, %v3407_v4  ;;  %v3440_v60 = vmax.f32 %v3406_v12, %v18005_v31  ;;  %v18358_v29 = vpop.permute.xlu0 %4552  ;;  %13461 = vmatprep.mubr.msk.f32.mxu0 %vm3246_vm2, %v4593_v58  ;;  %v18370_v31 = vld [vmem:[#allocation2 + $0x112] sm:$0xff]  ;;  %v18372_v12 = vld [vmem:[#allocation2 + $0x11a] sm:$0xff] }
 0x3f1   : > { %3502 = vst.msk [vmem:[#allocation2 + $0x130] sm:$0xff] %vm3246_vm2, %v3438_v19  ;;  %21487 = vst [vmem:[#allocation77_spill] sm:$0xff] %v18358_v29  ;;  %v4595_v17 = vmul.f32 %v18352_v38, %v18358_v29  ;;  %v4596_v37 = vmul.f32 %v18370_v31, %v18365_v32  ;;  %v5824_v4 = vld [vmem:[%s20800_s4 + $0x50] sm:$0xff]  ;;  %v5825_v58 = vld [vmem:[%s20800_s4 + $0x58] sm:$0xff]  ;;  %v4987_v19 = vmul.f32 %v17936_v62, %v17840_v57 }
 0x3f2   : > { %3503 = vst.msk [vmem:[#allocation2 + $0x138] sm:$0xff] %vm3246_vm2, %v3439_v39  ;;  %3504 = vst.msk [vmem:[#allocation2 + $0x140] sm:$0xff] %vm3246_vm2, %v3440_v60  ;;  %v18384_v49 = vpop.permute.xlu1 %4564  ;;  %v18401_v39 = vpack.c.bf16 %v5825_v58, %v5824_v4  ;;  %v4989_v60 = vmul.f32 %v17948_v48, %v17852_v50  ;;  %v4991_v62 = vmul.f32 %v17962_v11, %v17861_v34 }
 0x3f3   : > { %13462 = vmatmul.mubr.msk.f32.gmra.mrb[26].mxu0 %vm3246_vm2, %v4594_v28  ;;  %v4990_v28 = vmul.f32 %v17955_v35, %v17866_v2  ;;  %v4993_v48 = vmul.f32 %v17978_v0, %v17873_v14  ;;  %v5000_v4 = vmul.f32 %v18030_v24, %v17916_v45  ;;  %v5001_v58 = vmul.f32 %v18038_v51, %v17938_v46 }
 0x3f4   : > { %v18374_v53 = vpop.permute.xlu0 %4560  ;;  %13464 = vmatprep.mubr.msk.f32.mxu0 %vm3246_vm2, %v4595_v17  ;;  %v4995_v17 = vmul.f32 %v17990_v42, %v17885_v20 }
 0x3f5   : > { %21488 = vst [vmem:[#allocation78_spill] sm:$0xff] %v18374_v53  ;;  %v4597_v55 = vmul.f32 %v18372_v12, %v18374_v53  ;;  %v18381_v1 = vld [vmem:[#allocation2 + $0x122] sm:$0xff] }
 0x3f6   : > { %v4598_v59 = vmul.f32 %v18384_v49, %v18381_v1 }
 0x3f7   : > { %13465 = vmatmul.mubr.msk.f32.gmra.mrb[28].mxu0 %vm3246_vm2, %v4596_v37  ;;  %v4996_v37 = vmul.f32 %v17999_v43, %v17895_v3 }
 0x3f8   : > { %13467 = vmatprep.mubr.msk.f32.mxu0 %vm3246_vm2, %v4597_v55  ;;  %v4997_v55 = vmul.f32 %v18009_v33, %v17891_v26 }
 0x3fb   : > { %13468 = vmatmul.mubr.msk.f32.gmra.mrb[30].mxu0 %vm3246_vm2, %v4598_v59  ;;  %v4998_v59 = vmul.f32 %v18014_v9, %v17902_v41 }
 0x3fc   : > { %13474 = vmatprep.mubr.msk.f32.mxu0 %vm3246_vm2, %v4986_v63  ;;  %v4999_v63 = vmul.f32 %v18025_v23, %v17898_v52 }
 0x3ff   : > { %13475 = vmatmul.mubr.msk.f32.vlgmr.msra.gmra.mrb[0].mxu0 %vm3246_vm2, %v4987_v19  ;;  %v5002_v19 = vmul.f32 %v18046_v15, %v17931_v47 }
 0x400   : > { %14305 = vmatpush3.bf16.msra.mxu0 %v18144_v36  ;;  %13477 = vmatprep.mubr.msk.f32.mxu0 %vm3246_vm2, %v4988_v61  ;;  %v4994_v36 = vmul.f32 %v17983_v6, %v17888_v22  ;;  %v5003_v61 = vmul.f32 %v18053_v44, %v17952_v16  ;;  %v21505_v16 = vld [vmem:[#allocation10_spill] sm:$0xff] }
 0x401   : > { %14307 = vmatprep.subr.bf16.mxu0 %v18401_v39 }
 0x403   : > { %13478 = vmatmul.mubr.msk.f32.gmra.mrb[2].mxu0 %vm3246_vm2, %v4989_v60  ;;  %v21489_v60 = vld [vmem:[#allocation42_spill] sm:$0xff] }
 0x404   : > { %13480 = vmatprep.mubr.msk.f32.mxu0 %vm3246_vm2, %v4990_v28  ;;  %v5004_v28 = vmul.f32 %v21489_v60, %v17950_v5  ;;  %v21501_v5 = vld [vmem:[#allocation25_spill] sm:$0xff] }
 0x407   : > { %13481 = vmatmul.mubr.msk.f32.gmra.mrb[4].mxu0 %vm3246_vm2, %v4991_v62  ;;  %v21490_v62 = vld [vmem:[#allocation8_spill] sm:$0xff] }
 0x408   : > { %13483 = vmatprep.mubr.msk.f32.mxu0 %vm3246_vm2, %v4992_v8  ;;  %v21491_v8 = vld [vmem:[#allocation33_spill] sm:$0xff] }
 0x40b   : > { %13484 = vmatmul.mubr.msk.f32.gmra.mrb[6].mxu0 %vm3246_vm2, %v4993_v48  ;;  %v5005_v48 = vmul.f32 %v21491_v8, %v21490_v62  ;;  %v21500_v62 = vld [vmem:[#allocation24_spill] sm:$0xff] }
 0x40c   : > { %13486 = vmatprep.mubr.msk.f32.mxu0 %vm3246_vm2, %v4994_v36  ;;  %v21492_v36 = vld [vmem:[#allocation5_spill] sm:$0xff] }
 0x40f   : > { %13487 = vmatmul.mubr.msk.f32.gmra.mrb[8].mxu0 %vm3246_vm2, %v4995_v17  ;;  %v21493_v17 = vld [vmem:[#allocation26_spill] sm:$0xff] }
 0x410   : > { %13489 = vmatprep.mubr.msk.f32.mxu0 %vm3246_vm2, %v4996_v37  ;;  %v5006_v37 = vmul.f32 %v21493_v17, %v21492_v36  ;;  %v5010_v36 = vmul.f32 %v21501_v5, %v21500_v62  ;;  %v21509_v62 = vld [vmem:[#allocation29_spill] sm:$0xff]  ;;  %v18487_v5 = vld [vmem:[#allocation2 + $0x12e] sm:$0xff] }
 0x411   : > { %21510 = vst [vmem:[#allocation33_spill] sm:$0xff] %v18487_v5 }
 0x413   : > { %13490 = vmatmul.mubr.msk.f32.gmra.mrb[10].mxu0 %vm3246_vm2, %v4997_v55  ;;  %v21494_v55 = vld [vmem:[#allocation16_spill] sm:$0xff] }
 0x414   : > { %13492 = vmatprep.mubr.msk.f32.mxu0 %vm3246_vm2, %v4998_v59  ;;  %v21495_v59 = vld [vmem:[#allocation19_spill] sm:$0xff] }
 0x417   : > { %13493 = vmatmul.mubr.msk.f32.gmra.mrb[12].mxu0 %vm3246_vm2, %v4999_v63  ;;  %v5007_v63 = vmul.f32 %v21495_v59, %v21494_v55  ;;  %v21504_v59 = vld [vmem:[#allocation4_spill] sm:$0xff] }
 0x418   : > { %13495 = vmatprep.mubr.msk.f32.mxu0 %vm3246_vm2, %v5000_v4  ;;  %v21496_v4 = vld [vmem:[#allocation6_spill] sm:$0xff] }
 0x41b   : > { %13496 = vmatmul.mubr.msk.f32.gmra.mrb[14].mxu0 %vm3246_vm2, %v5001_v58  ;;  %v21497_v58 = vld [vmem:[#allocation32_spill] sm:$0xff] }
 0x41c   : > { %13498 = vmatprep.mubr.msk.f32.mxu0 %vm3246_vm2, %v5002_v19  ;;  %v5008_v19 = vmul.f32 %v21497_v58, %v21496_v4  ;;  %v5012_v4 = vmul.f32 %v21505_v16, %v21504_v59  ;;  %v21512_v59 = vld [vmem:[#allocation17_spill] sm:$0xff] }
 0x41d   : > { %v18497_v16 = vld [vmem:[#allocation2 + $0x13e] sm:$0xff] }
 0x41e   : > { %21514 = vst [vmem:[#allocation79_spill] sm:$0xff] %v18497_v16 }
 0x41f   : > { %13499 = vmatmul.mubr.msk.f32.gmra.mrb[16].mxu0 %vm3246_vm2, %v5003_v61  ;;  %v21498_v61 = vld [vmem:[#allocation9_spill] sm:$0xff] }
 0x420   : > { %13501 = vmatprep.mubr.msk.f32.mxu0 %vm3246_vm2, %v5004_v28  ;;  %v21499_v28 = vld [vmem:[#allocation11_spill] sm:$0xff] }
 0x421   : > { %v5009_v21 = vmul.f32 %v21499_v28, %v21498_v61  ;;  %v21508_v61 = vld [vmem:[#allocation21_spill] sm:$0xff] }
 0x423   : > { %13502 = vmatmul.mubr.msk.f32.gmra.mrb[18].mxu0 %vm3246_vm2, %v5005_v48  ;;  %v21502_v48 = vld [vmem:[#allocation28_spill] sm:$0xff] }
 0x424   : > { %13504 = vmatprep.mubr.msk.f32.mxu0 %vm3246_vm2, %v5006_v37  ;;  %v21503_v37 = vld [vmem:[#allocation12_spill] sm:$0xff] }
 0x425   : > { %v5011_v55 = vmul.f32 %v21503_v37, %v21502_v48  ;;  %v21513_v48 = vld [vmem:[#allocation18_spill] sm:$0xff] }
 0x427   : > { %13505 = vmatmul.mubr.msk.f32.gmra.mrb[20].mxu0 %vm3246_vm2, %v5007_v63  ;;  %v18480_v63 = vld [vmem:[#allocation2 + $0x126] sm:$0xff] }
 0x428   : > { %13507 = vmatprep.mubr.msk.f32.mxu0 %vm3246_vm2, %v5008_v19  ;;  %21506 = vst [vmem:[#allocation42_spill] sm:$0xff] %v18480_v63  ;;  %v21507_v19 = vld [vmem:[#allocation13_spill] sm:$0xff] }
 0x429   : > { %v5013_v28 = vmul.f32 %v21508_v61, %v21507_v19  ;;  %v21551_v61 = vld [vmem:[#allocation45_spill] sm:$0xff] }
 0x42b   : > { %13508 = vmatmul.mubr.msk.f32.gmra.mrb[22].mxu0 %vm3246_vm2, %v5009_v21  ;;  %v5014_v21 = vmul.f32 %v18480_v63, %v21509_v62  ;;  %v21515_v62 = vld [vmem:[#allocation34_spill] sm:$0xff]  ;;  %v21550_v63 = vld [vmem:[#allocation37_spill] sm:$0xff] }
 0x42c   : > { %13510 = vmatprep.mubr.msk.f32.mxu0 %vm3246_vm2, %v5010_v36  ;;  %v18490_v36 = vld [vmem:[#allocation2 + $0x136] sm:$0xff]  ;;  %v5017_v19 = vmul.f32 %v18497_v16, %v21515_v62  ;;  %v5376_v62 = vld [vmem:[#allocation2 + $0x60] sm:$0xff]  ;;  %v18518_v16 = vld [vmem:[#allocation2 + $0x68] sm:$0xff]  ;;  %v5795_v37 = vmul.f32 %v21551_v61, %v21550_v63 }
 0x42d   : > { %21511 = vst [vmem:[#allocation26_spill] sm:$0xff] %v18490_v36  ;;  %21516 = vst [vmem:[#allocation80_spill] sm:$0xff] %v18518_v16  ;;  %v21559_v61 = vld [vmem:[#allocation50_spill] sm:$0xff] }
 0x42f   : > { %13511 = vmatmul.mubr.msk.f32.gmra.mrb[24].mxu0 %vm3246_vm2, %v5011_v55  ;;  %v5015_v55 = vmul.f32 %v18487_v5, %v21512_v59 }
 0x430   : > { %13513 = vmatprep.mubr.msk.f32.mxu0 %vm3246_vm2, %v5012_v4  ;;  %v5016_v4 = vmul.f32 %v18490_v36, %v21513_v48  ;;  %v5373_v48 = vld [vmem:[#allocation2 + $0x48] sm:$0xff] }
 0x433   : > { %13514 = vmatmul.mubr.msk.f32.gmra.mrb[26].mxu0 %vm3246_vm2, %v5013_v28  ;;  %v6243_v28 = vld [vmem:[%s20800_s4 + $0x60] sm:$0xff] }
 0x434   : > { %13516 = vmatprep.mubr.msk.f32.mxu0 %vm3246_vm2, %v5014_v21  ;;  %v6244_v21 = vld [vmem:[%s20800_s4 + $0x68] sm:$0xff] }
 0x435   : > { %v18511_v59 = vpack.c.bf16 %v6244_v21, %v6243_v28  ;;  %v18538_v28 = vld [vmem:[#allocation2 + $0x90] sm:$0xff]  ;;  %v18542_v21 = vld [vmem:[#allocation2 + $0x98] sm:$0xff] }
 0x436   : > { %21521 = vst [vmem:[#allocation85_spill] sm:$0xff] %v18538_v28  ;;  %21522 = vst [vmem:[#allocation86_spill] sm:$0xff] %v18542_v21 }
 0x437   : > { %13517 = vmatmul.mubr.msk.f32.gmra.mrb[28].mxu0 %vm3246_vm2, %v5015_v55  ;;  %v5374_v55 = vld [vmem:[#allocation2 + $0x50] sm:$0xff] }
 0x438   : > { %13519 = vmatprep.mubr.msk.f32.mxu0 %vm3246_vm2, %v5016_v4  ;;  %v5375_v4 = vld [vmem:[#allocation2 + $0x58] sm:$0xff] }
 0x43b   : > { %13520 = vmatmul.mubr.msk.f32.gmra.mrb[30].mxu0 %vm3246_vm2, %v5017_v19  ;;  %v18526_v19 = vld [vmem:[#allocation2 + $0x78] sm:$0xff] }
 0x43c   : > { %13526 = vmatprep.mubr.msk.f32.mxu0 %vm3246_vm2, %v5373_v48  ;;  %v18522_v48 = vld [vmem:[#allocation2 + $0x70] sm:$0xff]  ;;  %21518 = vst [vmem:[#allocation82_spill] sm:$0xff] %v18526_v19 }
 0x43d   : > { %21517 = vst [vmem:[#allocation81_spill] sm:$0xff] %v18522_v48 }
 0x43f   : > { %13527 = vmatmul.mubr.msk.f32.vlgmr.msra.gmra.mrb[0].mxu0 %vm3246_vm2, %v5374_v55  ;;  %v18546_v55 = vld [vmem:[#allocation2 + $0xa0] sm:$0xff] }
 0x440   : > { %14309 = vmatpush3.bf16.msra.mxu0 %v18401_v39  ;;  %13529 = vmatprep.mubr.msk.f32.mxu0 %vm3246_vm2, %v5375_v4  ;;  %v18530_v39 = vld [vmem:[#allocation2 + $0x80] sm:$0xff]  ;;  %21523 = vst [vmem:[#allocation87_spill] sm:$0xff] %v18546_v55  ;;  %v18550_v4 = vld [vmem:[#allocation2 + $0xa8] sm:$0xff] }
 0x441   : > { %14311 = vmatprep.subr.bf16.mxu0 %v18511_v59  ;;  %21519 = vst [vmem:[#allocation83_spill] sm:$0xff] %v18530_v39  ;;  %21524 = vst [vmem:[#allocation88_spill] sm:$0xff] %v18550_v4 }
 0x443   : > { %13530 = vmatmul.mubr.msk.f32.gmra.mrb[2].mxu0 %vm3246_vm2, %v5376_v62  ;;  %v18534_v62 = vld [vmem:[#allocation2 + $0x88] sm:$0xff] }
 0x444   : > { %13532 = vmatprep.mubr.msk.f32.mxu0 %vm3246_vm2, %v18518_v16  ;;  %21520 = vst [vmem:[#allocation84_spill] sm:$0xff] %v18534_v62 }
 0x447   : > { %13533 = vmatmul.mubr.msk.f32.gmra.mrb[4].mxu0 %vm3246_vm2, %v18522_v48  ;;  %v18628_v48 = vld [vmem:[#allocation2 + $0x140] sm:$0xff] }
 0x448   : > { %13535 = vmatprep.mubr.msk.f32.mxu0 %vm3246_vm2, %v18526_v19 }
 0x44b   : > { %13536 = vmatmul.mubr.msk.f32.gmra.mrb[6].mxu0 %vm3246_vm2, %v18530_v39  ;;  %v21544_v39 = vld [vmem:[#allocation35_spill] sm:$0xff] }
 0x44c   : > { %13538 = vmatprep.mubr.msk.f32.mxu0 %vm3246_vm2, %v18534_v62  ;;  %v18554_v62 = vld [vmem:[#allocation2 + $0xb0] sm:$0xff]  ;;  %21545 = vst [vmem:[#allocation35_spill] sm:$0xff] %v18628_v48 }
 0x44d   : > { %21525 = vst [vmem:[#allocation89_spill] sm:$0xff] %v18554_v62 }
 0x44f   : > { %13539 = vmatmul.mubr.msk.f32.gmra.mrb[8].mxu0 %vm3246_vm2, %v18538_v28  ;;  %v18558_v28 = vld [vmem:[#allocation2 + $0xb8] sm:$0xff] }
 0x450   : > { %13541 = vmatprep.mubr.msk.f32.mxu0 %vm3246_vm2, %v18542_v21  ;;  %21526 = vst [vmem:[#allocation90_spill] sm:$0xff] %v18558_v28  ;;  %v18562_v21 = vld [vmem:[#allocation2 + $0xc0] sm:$0xff] }
 0x451   : > { %21527 = vst [vmem:[#allocation91_spill] sm:$0xff] %v18562_v21 }
 0x453   : > { %13542 = vmatmul.mubr.msk.f32.gmra.mrb[10].mxu0 %vm3246_vm2, %v18546_v55  ;;  %v18566_v55 = vld [vmem:[#allocation2 + $0xc8] sm:$0xff] }
 0x454   : > { %13544 = vmatprep.mubr.msk.f32.mxu0 %vm3246_vm2, %v18550_v4  ;;  %21528 = vst [vmem:[#allocation92_spill] sm:$0xff] %v18566_v55  ;;  %v18570_v4 = vld [vmem:[#allocation2 + $0xd0] sm:$0xff] }
 0x455   : > { %21529 = vst [vmem:[#allocation93_spill] sm:$0xff] %v18570_v4 }
 0x457   : > { %13545 = vmatmul.mubr.msk.f32.gmra.mrb[12].mxu0 %vm3246_vm2, %v18554_v62  ;;  %v18574_v62 = vld [vmem:[#allocation2 + $0xd8] sm:$0xff] }
 0x458   : > { %13547 = vmatprep.mubr.msk.f32.mxu0 %vm3246_vm2, %v18558_v28  ;;  %21530 = vst [vmem:[#allocation94_spill] sm:$0xff] %v18574_v62  ;;  %v18578_v28 = vld [vmem:[#allocation2 + $0xe0] sm:$0xff] }
 0x459   : > { %21531 = vst [vmem:[#allocation95_spill] sm:$0xff] %v18578_v28 }
 0x45b   : > { %13548 = vmatmul.mubr.msk.f32.gmra.mrb[14].mxu0 %vm3246_vm2, %v18562_v21  ;;  %v18582_v21 = vld [vmem:[#allocation2 + $0xe8] sm:$0xff] }
 0x45c   : > { %13550 = vmatprep.mubr.msk.f32.mxu0 %vm3246_vm2, %v18566_v55  ;;  %21532 = vst [vmem:[#allocation96_spill] sm:$0xff] %v18582_v21  ;;  %v18586_v55 = vld [vmem:[#allocation2 + $0xf0] sm:$0xff] }
 0x45d   : > { %21533 = vst [vmem:[#allocation97_spill] sm:$0xff] %v18586_v55 }
 0x45f   : > { %13551 = vmatmul.mubr.msk.f32.gmra.mrb[16].mxu0 %vm3246_vm2, %v18570_v4  ;;  %v18590_v4 = vld [vmem:[#allocation2 + $0xf8] sm:$0xff] }
 0x460   : > { %13553 = vmatprep.mubr.msk.f32.mxu0 %vm3246_vm2, %v18574_v62  ;;  %21534 = vst [vmem:[#allocation98_spill] sm:$0xff] %v18590_v4  ;;  %v18594_v62 = vld [vmem:[#allocation2 + $0x100] sm:$0xff] }
 0x461   : > { %21535 = vst [vmem:[#allocation99_spill] sm:$0xff] %v18594_v62 }
 0x463   : > { %13554 = vmatmul.mubr.msk.f32.gmra.mrb[18].mxu0 %vm3246_vm2, %v18578_v28  ;;  %v18598_v28 = vld [vmem:[#allocation2 + $0x108] sm:$0xff] }
 0x464   : > { %13556 = vmatprep.mubr.msk.f32.mxu0 %vm3246_vm2, %v18582_v21  ;;  %21536 = vst [vmem:[#allocation100_spill] sm:$0xff] %v18598_v28  ;;  %v18602_v21 = vld [vmem:[#allocation2 + $0x110] sm:$0xff] }
 0x465   : > { %21537 = vst [vmem:[#allocation101_spill] sm:$0xff] %v18602_v21 }
 0x467   : > { %13557 = vmatmul.mubr.msk.f32.gmra.mrb[20].mxu0 %vm3246_vm2, %v18586_v55  ;;  %v18606_v55 = vld [vmem:[#allocation2 + $0x118] sm:$0xff] }
 0x468   : > { %13559 = vmatprep.mubr.msk.f32.mxu0 %vm3246_vm2, %v18590_v4  ;;  %21538 = vst [vmem:[#allocation102_spill] sm:$0xff] %v18606_v55  ;;  %v18610_v4 = vld [vmem:[#allocation2 + $0x120] sm:$0xff] }
 0x469   : > { %21539 = vst [vmem:[#allocation103_spill] sm:$0xff] %v18610_v4 }
 0x46b   : > { %13560 = vmatmul.mubr.msk.f32.gmra.mrb[22].mxu0 %vm3246_vm2, %v18594_v62  ;;  %v18614_v62 = vld [vmem:[#allocation2 + $0x128] sm:$0xff] }
 0x46c   : > { %13562 = vmatprep.mubr.msk.f32.mxu0 %vm3246_vm2, %v18598_v28  ;;  %21540 = vst [vmem:[#allocation104_spill] sm:$0xff] %v18614_v62  ;;  %v18618_v28 = vld [vmem:[#allocation2 + $0x130] sm:$0xff] }
 0x46d   : > { %21541 = vst [vmem:[#allocation105_spill] sm:$0xff] %v18618_v28 }
 0x46f   : > { %13563 = vmatmul.mubr.msk.f32.gmra.mrb[24].mxu0 %vm3246_vm2, %v18602_v21  ;;  %v18622_v21 = vld [vmem:[#allocation2 + $0x138] sm:$0xff] }
 0x470   : > { %13565 = vmatprep.mubr.msk.f32.mxu0 %vm3246_vm2, %v18606_v55  ;;  %21542 = vst [vmem:[#allocation106_spill] sm:$0xff] %v18622_v21  ;;  %v21543_v55 = vld [vmem:[#allocation39_spill] sm:$0xff] }
 0x471   : > { %v5792_v19 = vmul.f32 %v21544_v39, %v21543_v55  ;;  %v21548_v39 = vld [vmem:[#allocation40_spill] sm:$0xff]  ;;  %v21549_v55 = vld [vmem:[#allocation14_spill] sm:$0xff] }
 0x472   : > { %v5794_v5 = vmul.f32 %v21549_v55, %v21548_v39  ;;  %v21560_v39 = vld [vmem:[#allocation7_spill] sm:$0xff] }
 0x473   : > { %13566 = vmatmul.mubr.msk.f32.gmra.mrb[26].mxu0 %vm3246_vm2, %v18610_v4  ;;  %v6630_v4 = vld [vmem:[%s20800_s4 + $0x70] sm:$0xff] }
 0x474   : > { %13568 = vmatprep.mubr.msk.f32.mxu0 %vm3246_vm2, %v18614_v62  ;;  %v6631_v62 = vld [vmem:[%s20800_s4 + $0x78] sm:$0xff] }
 0x475   : > { %v18641_v36 = vpack.c.bf16 %v6631_v62, %v6630_v4  ;;  %v21554_v62 = vld [vmem:[#allocation22_spill] sm:$0xff]  ;;  %v21557_v4 = vld [vmem:[#allocation48_spill] sm:$0xff] }
 0x477   : > { %13569 = vmatmul.mubr.msk.f32.gmra.mrb[28].mxu0 %vm3246_vm2, %v18618_v28  ;;  %v21546_v28 = vld [vmem:[#allocation38_spill] sm:$0xff] }
 0x478   : > { %13571 = vmatprep.mubr.msk.f32.mxu0 %vm3246_vm2, %v18622_v21  ;;  %v21547_v21 = vld [vmem:[#allocation41_spill] sm:$0xff] }
 0x479   : > { %v5793_v16 = vmul.f32 %v21547_v21, %v21546_v28  ;;  %v21555_v21 = vld [vmem:[#allocation47_spill] sm:$0xff] }
 0x47a   : > { %v5797_v55 = vmul.f32 %v21555_v21, %v21554_v62  ;;  %v21561_v28 = vld [vmem:[#allocation51_spill] sm:$0xff]  ;;  %v21564_v62 = vld [vmem:[#allocation44_spill] sm:$0xff] }
 0x47b   : > { %13572 = vmatmul.mubr.msk.f32.gmra.mrb[30].mxu0 %vm3246_vm2, %v18628_v48  ;;  %v21553_v48 = vld [vmem:[#allocation43_spill] sm:$0xff] }
 0x47c   : > { %13578 = vmatprep.mubr.msk.f32.mxu0 %vm3246_vm2, %v5792_v19  ;;  %v21552_v19 = vld [vmem:[#allocation27_spill] sm:$0xff] }
 0x47d   : > { %v5796_v58 = vmul.f32 %v21553_v48, %v21552_v19  ;;  %v5800_v48 = vmul.f32 %v21561_v28, %v21560_v39  ;;  %v21565_v19 = vld [vmem:[#allocation54_spill] sm:$0xff]  ;;  %v21573_v39 = vld [vmem:[#allocation61_spill] sm:$0xff] }
 0x47f   : > { %13579 = vmatmul.mubr.msk.f32.vlgmr.msra.gmra.mrb[0].mxu0 %vm3246_vm2, %v5793_v16  ;;  %v21556_v16 = vld [vmem:[#allocation20_spill] sm:$0xff] }
 0x480   : > { %14313 = vmatpush3.bf16.msra.mxu0 %v18511_v59  ;;  %13581 = vmatprep.mubr.msk.f32.mxu0 %vm3246_vm2, %v5794_v5  ;;  %v5798_v59 = vmul.f32 %v21557_v4, %v21556_v16  ;;  %v21558_v5 = vld [vmem:[#allocation31_spill] sm:$0xff]  ;;  %v5802_v4 = vmul.f32 %v21565_v19, %v21564_v62  ;;  %v21569_v16 = vld [vmem:[#allocation57_spill] sm:$0xff]  ;;  %v21577_v62 = vld [vmem:[#allocation68_spill] sm:$0xff] }
 0x481   : > { %14315 = vmatprep.subr.bf16.mxu0 %v18641_v36  ;;  %v5799_v63 = vmul.f32 %v21559_v61, %v21558_v5  ;;  %v21568_v5 = vld [vmem:[#allocation46_spill] sm:$0xff] }
 0x482   : > { %v5804_v28 = vmul.f32 %v21569_v16, %v21568_v5  ;;  %v21581_v5 = vld [vmem:[#allocation70_spill] sm:$0xff] }
 0x483   : > { %13582 = vmatmul.mubr.msk.f32.gmra.mrb[2].mxu0 %vm3246_vm2, %v5795_v37  ;;  %v21563_v37 = vld [vmem:[#allocation53_spill] sm:$0xff] }
 0x484   : > { %13584 = vmatprep.mubr.msk.f32.mxu0 %vm3246_vm2, %v5796_v58  ;;  %v21562_v58 = vld [vmem:[#allocation23_spill] sm:$0xff] }
 0x485   : > { %v5801_v21 = vmul.f32 %v21563_v37, %v21562_v58  ;;  %v21572_v58 = vld [vmem:[#allocation52_spill] sm:$0xff] }
 0x486   : > { %v5806_v19 = vmul.f32 %v21573_v39, %v21572_v58  ;;  %v21585_v58 = vld [vmem:[#allocation73_spill] sm:$0xff] }
 0x487   : > { %13585 = vmatmul.mubr.msk.f32.gmra.mrb[4].mxu0 %vm3246_vm2, %v5797_v55  ;;  %v21566_v55 = vld [vmem:[#allocation36_spill] sm:$0xff] }
 0x488   : > { %13587 = vmatprep.mubr.msk.f32.mxu0 %vm3246_vm2, %v5798_v59  ;;  %v21567_v59 = vld [vmem:[#allocation56_spill] sm:$0xff] }
 0x489   : > { %v5803_v61 = vmul.f32 %v21567_v59, %v21566_v55  ;;  %v21576_v55 = vld [vmem:[#allocation58_spill] sm:$0xff] }
 0x48a   : > { %v5808_v16 = vmul.f32 %v21577_v62, %v21576_v55 }
 0x48b   : > { %13588 = vmatmul.mubr.msk.f32.gmra.mrb[6].mxu0 %vm3246_vm2, %v5799_v63  ;;  %v21570_v63 = vld [vmem:[#allocation49_spill] sm:$0xff] }
 0x48c   : > { %13590 = vmatprep.mubr.msk.f32.mxu0 %vm3246_vm2, %v5800_v48  ;;  %v21571_v48 = vld [vmem:[#allocation59_spill] sm:$0xff] }
 0x48d   : > { %v5805_v37 = vmul.f32 %v21571_v48, %v21570_v63  ;;  %v21580_v63 = vld [vmem:[#allocation62_spill] sm:$0xff] }
 0x48e   : > { %v5810_v39 = vmul.f32 %v21581_v5, %v21580_v63 }
 0x48f   : > { %13591 = vmatmul.mubr.msk.f32.gmra.mrb[8].mxu0 %vm3246_vm2, %v5801_v21  ;;  %v21574_v21 = vld [vmem:[#allocation55_spill] sm:$0xff] }
 0x490   : > { %13593 = vmatprep.mubr.msk.f32.mxu0 %vm3246_vm2, %v5802_v4  ;;  %v21575_v4 = vld [vmem:[#allocation65_spill] sm:$0xff] }
 0x491   : > { %v5807_v59 = vmul.f32 %v21575_v4, %v21574_v21  ;;  %v21584_v21 = vld [vmem:[#allocation63_spill] sm:$0xff] }
 0x492   : > { %v5812_v55 = vmul.f32 %v21585_v58, %v21584_v21 }
 0x493   : > { %13594 = vmatmul.mubr.msk.f32.gmra.mrb[10].mxu0 %vm3246_vm2, %v5803_v61  ;;  %v21578_v61 = vld [vmem:[#allocation60_spill] sm:$0xff] }
 0x494   : > { %13596 = vmatprep.mubr.msk.f32.mxu0 %vm3246_vm2, %v5804_v28  ;;  %v21579_v28 = vld [vmem:[#allocation69_spill] sm:$0xff] }
 0x495   : > { %v5809_v48 = vmul.f32 %v21579_v28, %v21578_v61  ;;  %v21587_v61 = vld [vmem:[#allocation71_spill] sm:$0xff] }
 0x496   : > { %v5814_v63 = vmul.f32 %v18335_v10, %v21587_v61  ;;  %v18719_v61 = vld [vmem:[#allocation2 + $0x12a] sm:$0xff] }
 0x497   : > { %13597 = vmatmul.mubr.msk.f32.gmra.mrb[12].mxu0 %vm3246_vm2, %v5805_v37  ;;  %v21582_v37 = vld [vmem:[#allocation67_spill] sm:$0xff] }
 0x498   : > { %13599 = vmatprep.mubr.msk.f32.mxu0 %vm3246_vm2, %v5806_v19  ;;  %v21583_v19 = vld [vmem:[#allocation72_spill] sm:$0xff] }
 0x499   : > { %v5811_v4 = vmul.f32 %v21583_v19, %v21582_v37  ;;  %v21589_v37 = vld [vmem:[#allocation74_spill] sm:$0xff] }
 0x49a   : > { %v5816_v21 = vmul.f32 %v18352_v38, %v21589_v37 }
 0x49b   : > { %13600 = vmatmul.mubr.msk.f32.gmra.mrb[14].mxu0 %vm3246_vm2, %v5807_v59  ;;  %v21586_v59 = vld [vmem:[#allocation64_spill] sm:$0xff] }
 0x49c   : > { %13602 = vmatprep.mubr.msk.f32.mxu0 %vm3246_vm2, %v5808_v16  ;;  %v5813_v16 = vmul.f32 %v18333_v18, %v21586_v59 }
 0x49f   : > { %13603 = vmatmul.mubr.msk.f32.gmra.mrb[16].mxu0 %vm3246_vm2, %v5809_v48  ;;  %v21588_v48 = vld [vmem:[#allocation66_spill] sm:$0xff] }
 0x4a0   : > { %13605 = vmatprep.mubr.msk.f32.mxu0 %vm3246_vm2, %v5810_v39  ;;  %v5815_v39 = vmul.f32 %v18354_v54, %v21588_v48 }
 0x4a3   : > { %13606 = vmatmul.mubr.msk.f32.gmra.mrb[18].mxu0 %vm3246_vm2, %v5811_v4  ;;  %v5818_v4 = vmul.f32 %v18372_v12, %v18341_v13 }
 0x4a4   : > { %13608 = vmatprep.mubr.msk.f32.mxu0 %vm3246_vm2, %v5812_v55  ;;  %v5817_v55 = vmul.f32 %v18370_v31, %v18310_v40 }
 0x4a7   : > { %13609 = vmatmul.mubr.msk.f32.gmra.mrb[20].mxu0 %vm3246_vm2, %v5813_v16  ;;  %v5820_v16 = vmul.f32 %v18719_v61, %v18358_v29 }
 0x4a8   : > { %13611 = vmatprep.mubr.msk.f32.mxu0 %vm3246_vm2, %v5814_v63  ;;  %v5819_v63 = vmul.f32 %v18337_v30, %v18381_v1 }
 0x4ab   : > { %13612 = vmatmul.mubr.msk.f32.gmra.mrb[22].mxu0 %vm3246_vm2, %v5815_v39  ;;  %v18727_v39 = vld [vmem:[#allocation2 + $0x132] sm:$0xff] }
 0x4ac   : > { %13614 = vmatprep.mubr.msk.f32.mxu0 %vm3246_vm2, %v5816_v21  ;;  %v18729_v21 = vld [vmem:[#allocation2 + $0x13a] sm:$0xff]  ;;  %v5821_v13 = vmul.f32 %v18727_v39, %v18365_v32 }
 0x4af   : > { %13615 = vmatmul.mubr.msk.f32.gmra.mrb[24].mxu0 %vm3246_vm2, %v5817_v55  ;;  %v5822_v55 = vmul.f32 %v18729_v21, %v18374_v53  ;;  %v7050_v53 = vld [vmem:[%s20800_s4 + $0x88] sm:$0xff] }
 0x4b0   : > { %13617 = vmatprep.mubr.msk.f32.mxu0 %vm3246_vm2, %v5818_v4  ;;  %v18737_v4 = vld [vmem:[#allocation2 + $0x142] sm:$0xff] }
 0x4b1   : > { %v5823_v29 = vmul.f32 %v18737_v4, %v18384_v49 }
 0x4b3   : > { %13618 = vmatmul.mubr.msk.f32.gmra.mrb[26].mxu0 %vm3246_vm2, %v5819_v63  ;;  %v6211_v63 = vmul.f32 %v17955_v35, %v17834_v7  ;;  %v6213_v7 = vmul.f32 %v17967_v56, %v17858_v27  ;;  %v6214_v35 = vmul.f32 %v17978_v0, %v17852_v50  ;;  %v6217_v27 = vmul.f32 %v17999_v43, %v17880_v25  ;;  %v21591_v56 = vld [vmem:[#allocation19_spill] sm:$0xff] }
 0x4b4   : > { %13620 = vmatprep.mubr.msk.f32.mxu0 %vm3246_vm2, %v5820_v16  ;;  %v7049_v16 = vld [vmem:[%s20800_s4 + $0x80] sm:$0xff]  ;;  %v6218_v50 = vmul.f32 %v18009_v33, %v17873_v14  ;;  %v6221_v25 = vmul.f32 %v18030_v24, %v17895_v3  ;;  %v6222_v14 = vmul.f32 %v18038_v51, %v17891_v26  ;;  %v6225_v3 = vmul.f32 %v21489_v60, %v17916_v45  ;;  %v21592_v0 = vld [vmem:[#allocation15_spill] sm:$0xff] }
 0x4b5   : > { %v6226_v26 = vmul.f32 %v21491_v8, %v17938_v46  ;;  %v18814_v46 = vld [vmem:[%s20797_s1 + $0x8] sm:$0xff]  ;;  %v15022_v33 = vmov 4   ;;  %v18826_v51 = vld [vmem:[%s20797_s1 + $0x10] sm:$0xff] }
 0x4b6   : > { %14933 = vset.pattern.permute.xlu1 %v15022_v33  ;;  %14932 = vset.pattern.permute.xlu0 %v15022_v33  ;;  %v21600_v60 = vld [vmem:[#allocation6_spill] sm:$0xff]  ;;  %v21613_v33 = vld [vmem:[#allocation17_spill] sm:$0xff] }
 0x4b7   : > { %13621 = vmatmul.mubr.msk.f32.gmra.mrb[28].mxu0 %vm3246_vm2, %v5821_v13  ;;  %v6212_v13 = vmul.f32 %v17962_v11, %v17840_v57  ;;  %v6216_v57 = vmul.f32 %v17990_v42, %v17861_v34  ;;  %v6220_v34 = vmul.f32 %v18025_v23, %v17885_v20  ;;  %v6224_v20 = vmul.f32 %v18053_v44, %v17898_v52  ;;  %v21590_v11 = vld [vmem:[#allocation30_spill] sm:$0xff]  ;;  %v21595_v42 = vld [vmem:[#allocation11_spill] sm:$0xff]  ;;  %v21597_v23 = vld [vmem:[#allocation25_spill] sm:$0xff] }
 0x4b8   : > { %13623 = vmatprep.mubr.msk.f32.mxu0 %vm3246_vm2, %v5822_v55  ;;  %v18755_v55 = vpack.c.bf16 %v7050_v53, %v7049_v16  ;;  %v6228_v52 = vmul.f32 %v21591_v56, %v21590_v11  ;;  %7774 = vperm.xlu1 %14933, %v18814_v46   ;;  %v21599_v44 = vld [vmem:[#allocation12_spill] sm:$0xff]  ;;  %v21601_v8 = vld [vmem:[#allocation10_spill] sm:$0xff]  ;;  %v21602_v16 = vld [vmem:[#allocation9_spill] sm:$0xff] }
 0x4b9   : > { %v21610_v11 = vld [vmem:[#allocation13_spill] sm:$0xff]  ;;  %v21611_v56 = vld [vmem:[#allocation79_spill] sm:$0xff] }
 0x4bb   : > { %13624 = vmatmul.mubr.msk.f32.gmra.mrb[30].mxu0 %vm3246_vm2, %v5823_v29  ;;  %v6215_v29 = vmul.f32 %v17983_v6, %v17866_v2  ;;  %v6219_v2 = vmul.f32 %v18014_v9, %v17888_v22  ;;  %v6223_v22 = vmul.f32 %v18046_v15, %v17902_v41  ;;  %v6227_v41 = vmul.f32 %v21493_v17, %v17931_v47  ;;  %v21593_v6 = vld [vmem:[#allocation32_spill] sm:$0xff]  ;;  %v21596_v9 = vld [vmem:[#allocation5_spill] sm:$0xff] }
 0x4bc   : > { %13630 = vmatprep.mubr.msk.f32.mxu0 %vm3246_vm2, %v6211_v63  ;;  %v6229_v45 = vmul.f32 %v21593_v6, %v21592_v0  ;;  %v21594_v47 = vld [vmem:[#allocation8_spill] sm:$0xff]  ;;  %v6231_v24 = vmul.f32 %v21597_v23, %v21596_v9  ;;  %v6233_v17 = vmul.f32 %v21601_v8, %v21600_v60  ;;  %7779 = vperm.xlu1 %14933, %v18826_v51   ;;  %v18843_v63 = vld [vmem:[%s20797_s1 + $0x20] sm:$0xff] }
 0x4bd   : > { %v6230_v43 = vmul.f32 %v21595_v42, %v21594_v47  ;;  %v21598_v15 = vld [vmem:[#allocation16_spill] sm:$0xff]  ;;  %v21612_v6 = vld [vmem:[#allocation29_spill] sm:$0xff]  ;;  %v21614_v23 = vld [vmem:[#allocation18_spill] sm:$0xff] }
 0x4be   : > { %v6232_v53 = vmul.f32 %v21599_v44, %v21598_v15  ;;  %v6208_v0 = vld [vmem:[#allocation2 + $0x14e] sm:$0xff]  ;;  %v6209_v47 = vld [vmem:[#allocation2 + $0x156] sm:$0xff]  ;;  %v6210_v15 = vld [vmem:[#allocation2 + $0x15e] sm:$0xff] }
 0x4bf   : > { %13631 = vmatmul.mubr.msk.f32.vlgmr.msra.gmra.mrb[0].mxu0 %vm3246_vm2, %v6212_v13  ;;  %v21603_v13 = vld [vmem:[#allocation21_spill] sm:$0xff]  ;;  %v6240_v9 = vmul.f32 %v6208_v0, %v21613_v33  ;;  %v18907_v44 = vld [vmem:[%s20797_s1 + $0x48] sm:$0xff]  ;;  %v21624_v0 = vld [vmem:[#allocation88_spill] sm:$0xff] }
 0x4c0   : > { %14317 = vmatpush3.bf16.msra.mxu0 %v18641_v36  ;;  %13633 = vmatprep.mubr.msk.f32.mxu0 %vm3246_vm2, %v6213_v7  ;;  %v18838_v36 = vld [vmem:[%s20797_s1] sm:$0xff]  ;;  %v6234_v7 = vmul.f32 %v21603_v13, %v21602_v16  ;;  %v18891_v42 = vld [vmem:[%s20797_s1 + $0x38] sm:$0xff]  ;;  %v18926_v16 = vld [vmem:[%s20797_s1 + $0x70] sm:$0xff] }
 0x4c1   : > { %14319 = vmatprep.subr.bf16.mxu0 %v18755_v55  ;;  %7769 = vperm.xlu0 %14932, %v18838_v36   ;;  %v21615_v60 = vld [vmem:[#allocation34_spill] sm:$0xff]  ;;  %v21616_v13 = vld [vmem:[#allocation80_spill] sm:$0xff] }
 0x4c2   : > { %7789 = vperm.xlu1 %14933, %v18843_v63   ;;  %v6242_v8 = vmul.f32 %v6210_v15, %v21615_v60  ;;  %v21626_v33 = vld [vmem:[#allocation90_spill] sm:$0xff]  ;;  %v21628_v15 = vld [vmem:[#allocation92_spill] sm:$0xff] }
 0x4c3   : > { %13634 = vmatmul.mubr.msk.f32.gmra.mrb[2].mxu0 %vm3246_vm2, %v6214_v35  ;;  %v21604_v35 = vld [vmem:[#allocation24_spill] sm:$0xff]  ;;  %v19032_v60 = vld [vmem:[%s20797_s1 + $0xc8] sm:$0xff] }
 0x4c4   : > { %13636 = vmatprep.mubr.msk.f32.mxu0 %vm3246_vm2, %v6215_v29  ;;  %v21605_v29 = vld [vmem:[#allocation42_spill] sm:$0xff] }
 0x4c7   : > { %13637 = vmatmul.mubr.msk.f32.gmra.mrb[4].mxu0 %vm3246_vm2, %v6216_v57  ;;  %v6235_v57 = vmul.f32 %v21605_v29, %v21604_v35  ;;  %v21617_v35 = vld [vmem:[#allocation81_spill] sm:$0xff] }
 0x4c8   : > { %13639 = vmatprep.mubr.msk.f32.mxu0 %vm3246_vm2, %v6217_v27  ;;  %v18856_v27 = vld [vmem:[%s20797_s1 + $0x18] sm:$0xff]  ;;  %v18942_v29 = vld [vmem:[%s20797_s1 + $0x80] sm:$0xff] }
 0x4c9   : > { %7784 = vperm.xlu0 %14932, %v18856_v27  }
 0x4cb   : > { %13640 = vmatmul.mubr.msk.f32.gmra.mrb[6].mxu0 %vm3246_vm2, %v6218_v50  ;;  %v18861_v50 = vld [vmem:[%s20797_s1 + $0x30] sm:$0xff] }
 0x4cc   : > { %13642 = vmatprep.mubr.msk.f32.mxu0 %vm3246_vm2, %v6219_v2  ;;  %v21606_v2 = vld [vmem:[#allocation28_spill] sm:$0xff]  ;;  %7799 = vperm.xlu1 %14933, %v18861_v50  }
 0x4cf   : > { %13643 = vmatmul.mubr.msk.f32.gmra.mrb[8].mxu0 %vm3246_vm2, %v6220_v34  ;;  %v21607_v34 = vld [vmem:[#allocation33_spill] sm:$0xff] }
 0x4d0   : > { %13645 = vmatprep.mubr.msk.f32.mxu0 %vm3246_vm2, %v6221_v25  ;;  %v6236_v25 = vmul.f32 %v21607_v34, %v21606_v2  ;;  %v18952_v2 = vld [vmem:[%s20797_s1 + $0x78] sm:$0xff]  ;;  %v21619_v34 = vld [vmem:[#allocation83_spill] sm:$0xff] }
 0x4d3   : > { %13646 = vmatmul.mubr.msk.f32.gmra.mrb[10].mxu0 %vm3246_vm2, %v6222_v14  ;;  %v21608_v14 = vld [vmem:[#allocation4_spill] sm:$0xff] }
 0x4d4   : > { %13648 = vmatprep.mubr.msk.f32.mxu0 %vm3246_vm2, %v6223_v22  ;;  %v21609_v22 = vld [vmem:[#allocation26_spill] sm:$0xff] }
 0x4d7   : > { %13649 = vmatmul.mubr.msk.f32.gmra.mrb[12].mxu0 %vm3246_vm2, %v6224_v20  ;;  %v6237_v20 = vmul.f32 %v21609_v22, %v21608_v14  ;;  %v18968_v14 = vld [vmem:[%s20797_s1 + $0x88] sm:$0xff]  ;;  %v21621_v22 = vld [vmem:[#allocation85_spill] sm:$0xff] }
 0x4d8   : > { %13651 = vmatprep.mubr.msk.f32.mxu0 %vm3246_vm2, %v6225_v3  ;;  %v6207_v3 = vld [vmem:[#allocation2 + $0x146] sm:$0xff] }
 0x4db   : > { %13652 = vmatmul.mubr.msk.f32.gmra.mrb[14].mxu0 %vm3246_vm2, %v6226_v26  ;;  %v18874_v26 = vld [vmem:[%s20797_s1 + $0x28] sm:$0xff] }
 0x4dc   : > { %13654 = vmatprep.mubr.msk.f32.mxu0 %vm3246_vm2, %v6227_v41  ;;  %v18879_v41 = vld [vmem:[%s20797_s1 + $0x40] sm:$0xff]  ;;  %7794 = vperm.xlu0 %14932, %v18874_v26  }
 0x4dd   : > { %7809 = vperm.xlu1 %14933, %v18879_v41  }
 0x4df   : > { %13655 = vmatmul.mubr.msk.f32.gmra.mrb[16].mxu0 %vm3246_vm2, %v6228_v52  ;;  %v6238_v52 = vmul.f32 %v21611_v56, %v21610_v11  ;;  %v18984_v11 = vld [vmem:[%s20797_s1 + $0x98] sm:$0xff]  ;;  %v21623_v56 = vld [vmem:[#allocation87_spill] sm:$0xff] }
 0x4e0   : > { %13657 = vmatprep.mubr.msk.f32.mxu0 %vm3246_vm2, %v6229_v45  ;;  %v6239_v45 = vmul.f32 %v6207_v3, %v21612_v6  ;;  %7804 = vperm.xlu0 %14932, %v18891_v42   ;;  %v21622_v3 = vld [vmem:[#allocation86_spill] sm:$0xff] }
 0x4e1   : > { %v19000_v6 = vld [vmem:[%s20797_s1 + $0xa8] sm:$0xff] }
 0x4e3   : > { %13658 = vmatmul.mubr.msk.f32.gmra.mrb[18].mxu0 %vm3246_vm2, %v6230_v43  ;;  %v18896_v43 = vld [vmem:[%s20797_s1 + $0x50] sm:$0xff] }
 0x4e4   : > { %13660 = vmatprep.mubr.msk.f32.mxu0 %vm3246_vm2, %v6231_v24  ;;  %v6241_v24 = vmul.f32 %v6209_v47, %v21614_v23  ;;  %7819 = vperm.xlu1 %14933, %v18896_v43   ;;  %v19007_v47 = vld [vmem:[%s20797_s1 + $0xc0] sm:$0xff]  ;;  %v21627_v23 = vld [vmem:[#allocation91_spill] sm:$0xff] }
 0x4e5   : > { %7814 = vperm.xlu0 %14932, %v18907_v44  }
 0x4e7   : > { %13661 = vmatmul.mubr.msk.f32.gmra.mrb[20].mxu0 %vm3246_vm2, %v6232_v53  ;;  %v18912_v53 = vld [vmem:[%s20797_s1 + $0x60] sm:$0xff] }
 0x4e8   : > { %13663 = vmatprep.mubr.msk.f32.mxu0 %vm3246_vm2, %v6233_v17  ;;  %7829 = vperm.xlu1 %14933, %v18912_v53   ;;  %v18921_v17 = vld [vmem:[%s20797_s1 + $0x58] sm:$0xff] }
 0x4e9   : > { %7824 = vperm.xlu0 %14932, %v18921_v17  }
 0x4eb   : > { %13664 = vmatmul.mubr.msk.f32.gmra.mrb[22].mxu0 %vm3246_vm2, %v6234_v7  ;;  %v18935_v7 = vld [vmem:[%s20797_s1 + $0x68] sm:$0xff] }
 0x4ec   : > { %13666 = vmatprep.mubr.msk.f32.mxu0 %vm3246_vm2, %v6235_v57  ;;  %7839 = vperm.xlu1 %14933, %v18926_v16   ;;  %v21618_v57 = vld [vmem:[#allocation82_spill] sm:$0xff] }
 0x4ed   : > { %7834 = vperm.xlu0 %14932, %v18935_v7  }
 0x4ef   : > { %13667 = vmatmul.mubr.msk.f32.gmra.mrb[24].mxu0 %vm3246_vm2, %v6236_v25  ;;  %v18959_v25 = vld [vmem:[%s20797_s1 + $0x90] sm:$0xff] }
 0x4f0   : > { %13669 = vmatprep.mubr.msk.f32.mxu0 %vm3246_vm2, %v6237_v20  ;;  %7849 = vperm.xlu1 %14933, %v18942_v29   ;;  %v18975_v20 = vld [vmem:[%s20797_s1 + $0xa0] sm:$0xff] }
 0x4f1   : > { %7844 = vperm.xlu0 %14932, %v18952_v2  }
 0x4f3   : > { %13670 = vmatmul.mubr.msk.f32.gmra.mrb[26].mxu0 %vm3246_vm2, %v6238_v52  ;;  %v18991_v52 = vld [vmem:[%s20797_s1 + $0xb0] sm:$0xff] }
 0x4f4   : > { %13672 = vmatprep.mubr.msk.f32.mxu0 %vm3246_vm2, %v6239_v45  ;;  %7859 = vperm.xlu1 %14933, %v18959_v25   ;;  %v21625_v45 = vld [vmem:[#allocation89_spill] sm:$0xff] }
 0x4f5   : > { %7854 = vperm.xlu0 %14932, %v18968_v14  }
 0x4f7   : > { %13673 = vmatmul.mubr.msk.f32.gmra.mrb[28].mxu0 %vm3246_vm2, %v6240_v9  ;;  %v19016_v9 = vld [vmem:[%s20797_s1 + $0xb8] sm:$0xff] }
 0x4f8   : > { %13675 = vmatprep.mubr.msk.f32.mxu0 %vm3246_vm2, %v6241_v24  ;;  %7869 = vperm.xlu1 %14933, %v18975_v20   ;;  %v19023_v24 = vld [vmem:[%s20797_s1 + $0xd0] sm:$0xff] }
 0x4f9   : > { %7864 = vperm.xlu0 %14932, %v18984_v11  }
 0x4fb   : > { %13676 = vmatmul.mubr.msk.f32.gmra.mrb[30].mxu0 %vm3246_vm2, %v6242_v8  ;;  %v21629_v8 = vld [vmem:[#allocation93_spill] sm:$0xff] }
 0x4fc   : > { %13682 = vmatprep.mubr.msk.f32.mxu0 %vm3246_vm2, %v21616_v13  ;;  %7879 = vperm.xlu1 %14933, %v18991_v52   ;;  %v19039_v13 = vld [vmem:[%s20797_s1 + $0xe0] sm:$0xff] }
 0x4fd   : > { %7874 = vperm.xlu0 %14932, %v19000_v6  }
 0x4ff   : > { %13683 = vmatmul.mubr.msk.f32.vlgmr.msra.gmra.mrb[0].mxu0 %vm3246_vm2, %v21617_v35  ;;  %v21630_v35 = vld [vmem:[#allocation94_spill] sm:$0xff] }
 0x500   : > { %14321 = vmatpush3.bf16.msra.mxu0 %v18755_v55  ;;  %13685 = vmatprep.mubr.msk.f32.mxu0 %vm3246_vm2, %v21618_v57  ;;  %v21620_v55 = vld [vmem:[#allocation84_spill] sm:$0xff] }
 0x501   : > { %7889 = vperm.xlu1 %14933, %v19007_v47   ;;  %7884 = vperm.xlu0 %14932, %v19016_v9   ;;  %v19048_v57 = vld [vmem:[%s20797_s1 + $0xd8] sm:$0xff] }
 0x503   : > { %13686 = vmatmul.mubr.msk.f32.gmra.mrb[2].mxu0 %vm3246_vm2, %v21619_v34  ;;  %v21631_v34 = vld [vmem:[#allocation95_spill] sm:$0xff] }
 0x504   : > { %13688 = vmatprep.mubr.msk.f32.mxu0 %vm3246_vm2, %v21620_v55  ;;  %v19055_v55 = vld [vmem:[%s20797_s1 + $0xf0] sm:$0xff] }
 0x505   : > { %7899 = vperm.xlu1 %14933, %v19023_v24   ;;  %7894 = vperm.xlu0 %14932, %v19032_v60  }
 0x507   : > { %13689 = vmatmul.mubr.msk.f32.gmra.mrb[4].mxu0 %vm3246_vm2, %v21621_v22  ;;  %v21632_v22 = vld [vmem:[#allocation96_spill] sm:$0xff] }
 0x508   : > { %13691 = vmatprep.mubr.msk.f32.mxu0 %vm3246_vm2, %v21622_v3  ;;  %v19064_v3 = vld [vmem:[%s20797_s1 + $0xe8] sm:$0xff] }
 0x509   : > { %7909 = vperm.xlu1 %14933, %v19039_v13   ;;  %7904 = vperm.xlu0 %14932, %v19048_v57  }
 0x50b   : > { %13692 = vmatmul.mubr.msk.f32.gmra.mrb[6].mxu0 %vm3246_vm2, %v21623_v56  ;;  %v21633_v56 = vld [vmem:[#allocation97_spill] sm:$0xff] }
 0x50c   : > { %13694 = vmatprep.mubr.msk.f32.mxu0 %vm3246_vm2, %v21624_v0  ;;  %v21634_v0 = vld [vmem:[#allocation98_spill] sm:$0xff] }
 0x50d   : > { %7919 = vperm.xlu1 %14933, %v19055_v55   ;;  %7914 = vperm.xlu0 %14932, %v19064_v3  }
 0x50f   : > { %13695 = vmatmul.mubr.msk.f32.gmra.mrb[8].mxu0 %vm3246_vm2, %v21625_v45  ;;  %v15023_v45 = vmov 5  }
 0x510   : > { %13697 = vmatprep.mubr.msk.f32.mxu0 %vm3246_vm2, %v21626_v33  ;;  %v19074_v33 = vld [vmem:[%s20797_s1 + $0xf8] sm:$0xff] }
 0x511   : > { %14934 = vset.pattern.permute.xlu1 %v15023_v45  ;;  %7924 = vperm.xlu0 %14932, %v19074_v33  }
 0x512   : > { %8674 = vperm.xlu1 %14934, %v18838_v36   ;;  %v21640_v36 = vld [vmem:[#allocation104_spill] sm:$0xff] }
 0x513   : > { %13698 = vmatmul.mubr.msk.f32.gmra.mrb[10].mxu0 %vm3246_vm2, %v21627_v23  ;;  %v21635_v23 = vld [vmem:[#allocation99_spill] sm:$0xff] }
 0x514   : > { %13700 = vmatprep.mubr.msk.f32.mxu0 %vm3246_vm2, %v21628_v15  ;;  %v21636_v15 = vld [vmem:[#allocation100_spill] sm:$0xff] }
 0x515   : > { %14935 = vset.pattern.permute.xlu0 %v15023_v45 }
 0x516   : > { %8682 = vperm.xlu1 %14934, %v18826_v51   ;;  %8678 = vperm.xlu0 %14935, %v18814_v46   ;;  %v21642_v51 = vld [vmem:[#allocation106_spill] sm:$0xff]  ;;  %v21643_v46 = vld [vmem:[#allocation35_spill] sm:$0xff] }
 0x517   : > { %13701 = vmatmul.mubr.msk.f32.gmra.mrb[12].mxu0 %vm3246_vm2, %v21629_v8  ;;  %v21637_v8 = vld [vmem:[#allocation101_spill] sm:$0xff] }
 0x518   : > { %13703 = vmatprep.mubr.msk.f32.mxu0 %vm3246_vm2, %v21630_v35  ;;  %v21638_v35 = vld [vmem:[#allocation102_spill] sm:$0xff] }
 0x51a   : > { %8686 = vperm.xlu1 %14934, %v18856_v27   ;;  %8690 = vperm.xlu0 %14935, %v18843_v63   ;;  %v21644_v27 = vld [vmem:[#allocation75_spill] sm:$0xff]  ;;  %v6628_v63 = vld [vmem:[#allocation2 + $0x158] sm:$0xff] }
 0x51b   : > { %13704 = vmatmul.mubr.msk.f32.gmra.mrb[14].mxu0 %vm3246_vm2, %v21631_v34  ;;  %v21639_v34 = vld [vmem:[#allocation103_spill] sm:$0xff] }
 0x51c   : > { %13706 = vmatprep.mubr.msk.f32.mxu0 %vm3246_vm2, %v21632_v22  ;;  %v21641_v22 = vld [vmem:[#allocation105_spill] sm:$0xff] }
 0x51e   : > { %8694 = vperm.xlu1 %14934, %v18874_v26   ;;  %8698 = vperm.xlu0 %14935, %v18861_v50   ;;  %v6629_v26 = vld [vmem:[#allocation2 + $0x160] sm:$0xff]  ;;  %v14992_v50 = vld [vmem:[#allocation2 + $0x6a] sm:$0xff] }
 0x51f   : > { %13707 = vmatmul.mubr.msk.f32.gmra.mrb[16].mxu0 %vm3246_vm2, %v21633_v56  ;;  %v6627_v56 = vld [vmem:[#allocation2 + $0x150] sm:$0xff] }
 0x520   : > { %13709 = vmatprep.mubr.msk.f32.mxu0 %vm3246_vm2, %v21634_v0  ;;  %v21645_v0 = vld [vmem:[#allocation39_spill] sm:$0xff] }
 0x521   : > { %v7017_v45 = vmul.f32 %v14992_v50, %v21645_v0  ;;  %v21653_v50 = vld [vmem:[#allocation7_spill] sm:$0xff] }
 0x522   : > { %8702 = vperm.xlu1 %14934, %v18891_v42   ;;  %8706 = vperm.xlu0 %14935, %v18879_v41   ;;  %v14993_v42 = vld [vmem:[#allocation2 + $0x72] sm:$0xff]  ;;  %v21646_v41 = vld [vmem:[#allocation38_spill] sm:$0xff] }
 0x523   : > { %13710 = vmatmul.mubr.msk.f32.gmra.mrb[18].mxu0 %vm3246_vm2, %v21635_v23  ;;  %v7018_v23 = vmul.f32 %v14993_v42, %v21646_v41  ;;  %v21655_v41 = vld [vmem:[#allocation44_spill] sm:$0xff] }
 0x524   : > { %13712 = vmatprep.mubr.msk.f32.mxu0 %vm3246_vm2, %v21636_v15  ;;  %v14994_v15 = vld [vmem:[#allocation2 + $0x7a] sm:$0xff] }
 0x526   : > { %8710 = vperm.xlu1 %14934, %v18907_v44   ;;  %8714 = vperm.xlu0 %14935, %v18896_v43   ;;  %v14995_v43 = vld [vmem:[#allocation2 + $0x82] sm:$0xff] }
 0x527   : > { %13713 = vmatmul.mubr.msk.f32.gmra.mrb[20].mxu0 %vm3246_vm2, %v21637_v8  ;;  %v21647_v8 = vld [vmem:[#allocation40_spill] sm:$0xff] }
 0x528   : > { %13715 = vmatprep.mubr.msk.f32.mxu0 %vm3246_vm2, %v21638_v35  ;;  %v7019_v44 = vmul.f32 %v14994_v15, %v21647_v8  ;;  %v21648_v35 = vld [vmem:[#allocation37_spill] sm:$0xff]  ;;  %v21656_v15 = vld [vmem:[#allocation36_spill] sm:$0xff] }
 0x52a   : > { %8718 = vperm.xlu1 %14934, %v18921_v17   ;;  %8722 = vperm.xlu0 %14935, %v18912_v53   ;;  %v14996_v17 = vld [vmem:[#allocation2 + $0x8a] sm:$0xff]  ;;  %v14997_v53 = vld [vmem:[#allocation2 + $0x92] sm:$0xff] }
 0x52b   : > { %13716 = vmatmul.mubr.msk.f32.gmra.mrb[22].mxu0 %vm3246_vm2, %v21639_v34  ;;  %v7020_v34 = vmul.f32 %v14995_v43, %v21648_v35 }
 0x52c   : > { %13718 = vmatprep.mubr.msk.f32.mxu0 %vm3246_vm2, %v21640_v36  ;;  %v21649_v36 = vld [vmem:[#allocation27_spill] sm:$0xff] }
 0x52e   : > { %8726 = vperm.xlu1 %14934, %v18935_v7   ;;  %8730 = vperm.xlu0 %14935, %v18926_v16   ;;  %v14998_v7 = vld [vmem:[#allocation2 + $0x9a] sm:$0xff]  ;;  %v14999_v16 = vld [vmem:[#allocation2 + $0xa2] sm:$0xff] }
 0x52f   : > { %13719 = vmatmul.mubr.msk.f32.gmra.mrb[24].mxu0 %vm3246_vm2, %v21641_v22  ;;  %v7021_v22 = vmul.f32 %v14996_v17, %v21649_v36  ;;  %v7997_v36 = vld [vmem:[%s20802_s6 + $0x30] sm:$0xff] }
 0x530   : > { %13721 = vmatprep.mubr.msk.f32.mxu0 %vm3246_vm2, %v21642_v51  ;;  %v21650_v51 = vld [vmem:[#allocation22_spill] sm:$0xff] }
 0x532   : > { %8734 = vperm.xlu1 %14934, %v18952_v2   ;;  %8738 = vperm.xlu0 %14935, %v18942_v29   ;;  %v15000_v2 = vld [vmem:[#allocation2 + $0xaa] sm:$0xff]  ;;  %v15001_v29 = vld [vmem:[#allocation2 + $0xb2] sm:$0xff] }
 0x533   : > { %13722 = vmatmul.mubr.msk.f32.gmra.mrb[26].mxu0 %vm3246_vm2, %v21643_v46  ;;  %v7022_v46 = vmul.f32 %v14997_v53, %v21650_v51  ;;  %v7025_v0 = vmul.f32 %v15000_v2, %v21653_v50  ;;  %v7963_v53 = vld [vmem:[#allocation2 + $0x8] sm:$0xff]  ;;  %v7964_v51 = vld [vmem:[#allocation2 + $0x10] sm:$0xff] }
 0x534   : > { %13724 = vmatprep.mubr.msk.f32.mxu0 %vm3246_vm2, %v21644_v27  ;;  %v21651_v27 = vld [vmem:[#allocation20_spill] sm:$0xff]  ;;  %13790 = vmatprep.mubr.msk.f32.mxu1 %vm358_vm0, %v7963_v53  ;;  %v7960_v2 = vld [vmem:[%s20802_s6 + $0x8] sm:$0xff] }
 0x536   : > { %8742 = vperm.xlu1 %14934, %v18968_v14   ;;  %8746 = vperm.xlu0 %14935, %v18959_v25   ;;  %v15002_v14 = vld [vmem:[#allocation2 + $0xba] sm:$0xff]  ;;  %v15003_v25 = vld [vmem:[#allocation2 + $0xc2] sm:$0xff] }
 0x537   : > { %13725 = vmatmul.mubr.msk.f32.gmra.mrb[28].mxu0 %vm3246_vm2, %v6627_v56  ;;  %v7023_v56 = vmul.f32 %v14998_v7, %v21651_v27  ;;  %v7028_v8 = vmul.f32 %v15003_v25, %v21656_v15  ;;  %v7966_v7 = vld [vmem:[#allocation2 + $0x20] sm:$0xff]  ;;  %v7967_v27 = vld [vmem:[#allocation2 + $0x28] sm:$0xff] }
 0x538   : > { %13727 = vmatprep.mubr.msk.f32.mxu0 %vm3246_vm2, %v6628_v63  ;;  %v21652_v63 = vld [vmem:[#allocation31_spill] sm:$0xff] }
 0x53a   : > { %8750 = vperm.xlu1 %14934, %v18984_v11   ;;  %8754 = vperm.xlu0 %14935, %v18975_v20   ;;  %v21657_v11 = vld [vmem:[#allocation46_spill] sm:$0xff]  ;;  %v21658_v20 = vld [vmem:[#allocation49_spill] sm:$0xff] }
 0x53b   : > { %13728 = vmatmul.mubr.msk.f32.gmra.mrb[30].mxu0 %vm3246_vm2, %v6629_v26  ;;  %v7024_v26 = vmul.f32 %v14999_v16, %v21652_v63  ;;  %v7030_v43 = vmul.f32 %v21579_v28, %v21658_v20  ;;  %v7969_v16 = vld [vmem:[#allocation2 + $0x38] sm:$0xff]  ;;  %v7970_v63 = vld [vmem:[#allocation2 + $0x40] sm:$0xff] }
 0x53c   : > { %13734 = vmatprep.mubr.msk.f32.mxu0 %vm3246_vm2, %v7017_v45  ;;  %v21654_v45 = vld [vmem:[#allocation23_spill] sm:$0xff] }
 0x53d   : > { %v7026_v42 = vmul.f32 %v15001_v29, %v21654_v45  ;;  %v7962_v29 = vld [vmem:[%s20802_s6 + $0x18] sm:$0xff] }
 0x53e   : > { %8758 = vperm.xlu1 %14934, %v19000_v6   ;;  %8762 = vperm.xlu0 %14935, %v18991_v52   ;;  %v21659_v6 = vld [vmem:[#allocation52_spill] sm:$0xff] }
 0x53f   : > { %13735 = vmatmul.mubr.msk.f32.vlgmr.msra.gmra.mrb[0].mxu0 %vm3246_vm2, %v7018_v23  ;;  %v7027_v23 = vmul.f32 %v15002_v14, %v21655_v41  ;;  %v7031_v35 = vmul.f32 %v21581_v5, %v21659_v6  ;;  %v21662_v5 = vld [vmem:[#allocation60_spill] sm:$0xff]  ;;  %v8834_v14 = vld [vmem:[%s20802_s6 + $0x48] sm:$0xff] }
 0x540   : > { %13737 = vmatprep.mubr.msk.f32.mxu0 %vm3246_vm2, %v7019_v44  ;;  %v7029_v44 = vmul.f32 %v21577_v62, %v21657_v11  ;;  %v21660_v62 = vld [vmem:[#allocation55_spill] sm:$0xff]  ;;  %v7034_v28 = vmul.f32 %v18333_v18, %v21662_v5 }
 0x541   : > { %v7032_v52 = vmul.f32 %v21583_v19, %v21660_v62  ;;  %v21666_v18 = vld [vmem:[#allocation71_spill] sm:$0xff] }
 0x542   : > { %8766 = vperm.xlu1 %14934, %v19016_v9   ;;  %8770 = vperm.xlu0 %14935, %v19007_v47   ;;  %v21661_v9 = vld [vmem:[#allocation58_spill] sm:$0xff] }
 0x543   : > { %13738 = vmatmul.mubr.msk.f32.gmra.mrb[2].mxu0 %vm3246_vm2, %v7020_v34  ;;  %v7033_v34 = vmul.f32 %v21585_v58, %v21661_v9  ;;  %v21663_v47 = vld [vmem:[#allocation62_spill] sm:$0xff]  ;;  %v21664_v58 = vld [vmem:[#allocation67_spill] sm:$0xff] }
 0x544   : > { %13740 = vmatprep.mubr.msk.f32.mxu0 %vm3246_vm2, %v7021_v22  ;;  %v7036_v19 = vmul.f32 %v18354_v54, %v21664_v58  ;;  %v7041_v54 = vmul.f32 %v18719_v61, %v21589_v37  ;;  %v21668_v61 = vld [vmem:[#allocation77_spill] sm:$0xff] }
 0x546   : > { %8774 = vperm.xlu1 %14934, %v19032_v60   ;;  %8778 = vperm.xlu0 %14935, %v19023_v24   ;;  %v7035_v60 = vmul.f32 %v18335_v10, %v21663_v47  ;;  %v21665_v24 = vld [vmem:[#allocation63_spill] sm:$0xff]  ;;  %v7038_v10 = vmul.f32 %v18370_v31, %v21586_v59  ;;  %v7042_v31 = vmul.f32 %v18727_v39, %v18310_v40  ;;  %v21667_v59 = vld [vmem:[#allocation76_spill] sm:$0xff] }
 0x547   : > { %13741 = vmatmul.mubr.msk.f32.gmra.mrb[4].mxu0 %vm3246_vm2, %v7022_v46  ;;  %v7016_v39 = vld [vmem:[#allocation2 + $0x162] sm:$0xff]  ;;  %v7965_v46 = vld [vmem:[#allocation2 + $0x18] sm:$0xff] }
 0x548   : > { %13743 = vmatprep.mubr.msk.f32.mxu0 %vm3246_vm2, %v7023_v56  ;;  %v7048_v17 = vmul.f32 %v7016_v39, %v18384_v49  ;;  %v7998_v49 = vld [vmem:[%s20802_s6 + $0x38] sm:$0xff]  ;;  %v7968_v56 = vld [vmem:[#allocation2 + $0x30] sm:$0xff] }
 0x549   : > { %v14326_v22 = vpack.c.bf16 %v7998_v49, %v7997_v36  ;;  %v19305_v36 = vpop.permute.xlu0 %7769 }
 0x54a   : > { %8782 = vperm.xlu1 %14934, %v19048_v57   ;;  %8786 = vperm.xlu0 %14935, %v19039_v13   ;;  %v7037_v57 = vmul.f32 %v18352_v38, %v21665_v24  ;;  %v7039_v13 = vmul.f32 %v18372_v12, %v21666_v18  ;;  %v7040_v38 = vmul.f32 %v21588_v48, %v18381_v1  ;;  %v7014_v48 = vld [vmem:[#allocation2 + $0x152] sm:$0xff]  ;;  %v19271_v24 = vpop.permute.xlu1 %7774 }
 0x54b   : > { %13744 = vmatmul.mubr.msk.f32.gmra.mrb[6].mxu0 %vm3246_vm2, %v7024_v26  ;;  %v7043_v12 = vmul.f32 %v18729_v21, %v21667_v59  ;;  %v7044_v1 = vmul.f32 %v18737_v4, %v18337_v30  ;;  %v7046_v40 = vmul.f32 %v7014_v48, %v18365_v32  ;;  %v21669_v21 = vld [vmem:[#allocation78_spill] sm:$0xff]  ;;  %21670 = vst [vmem:[#allocation41_spill] sm:$0xff] %v19305_v36 }
 0x54c   : > { %13746 = vmatprep.mubr.msk.f32.mxu0 %vm3246_vm2, %v7025_v0  ;;  %v7995_v30 = vld [vmem:[%s20802_s6 + $0x20] sm:$0xff]  ;;  %v7996_v4 = vld [vmem:[%s20802_s6 + $0x28] sm:$0xff]  ;;  %v7961_v0 = vld [vmem:[%s20802_s6 + $0x10] sm:$0xff] }
 0x54d   : > { %v14322_v32 = vpack.c.bf16 %v7996_v4, %v7995_v30  ;;  %v7959_v26 = vld [vmem:[%s20802_s6] sm:$0xff]  ;;  %v14334_v45 = vpack.c.bf16 %v7962_v29, %v7961_v0 }
 0x54e   : > { %8790 = vperm.xlu1 %14934, %v19064_v3   ;;  %8794 = vperm.xlu0 %14935, %v19055_v55   ;;  %v7013_v55 = vld [vmem:[#allocation2 + $0x14a] sm:$0xff]  ;;  %v7015_v3 = vld [vmem:[#allocation2 + $0x15a] sm:$0xff]  ;;  %v14330_v50 = vpack.c.bf16 %v7960_v2, %v7959_v26  ;;  %v19295_v48 = vpop.permute.xlu1 %7779 }
 0x54f   : > { %13747 = vmatmul.mubr.msk.f32.gmra.mrb[8].mxu0 %vm3246_vm2, %v7026_v42  ;;  %v7045_v37 = vmul.f32 %v7013_v55, %v21668_v61  ;;  %14323 = vmatprep.subr.bf16.mxu1 %v14322_v32  ;;  %v8833_v42 = vld [vmem:[%s20802_s6 + $0x40] sm:$0xff] }
 0x550   : > { %13749 = vmatprep.mubr.msk.f32.mxu0 %vm3246_vm2, %v7027_v23  ;;  %14325 = vmatpush3.bf16.msra.mxu1 %v14322_v32  ;;  %v19250_v41 = vpack.c.bf16 %v8834_v14, %v8833_v42  ;;  %v19256_v23 = vld [vmem:[%s20801_s5] ss:$0 sm:$0xff] }
 0x551   : > { %14327 = vmatprep.subr.bf16.mxu1 %v14326_v22 }
 0x552   : > { %8798 = vperm.xlu1 %14934, %v19074_v33   ;;  %v7047_v33 = vmul.f32 %v7015_v3, %v21669_v21  ;;  %v19315_v26 = vpop.permute.xlu1 %7789 }
 0x553   : > { %13750 = vmatmul.mubr.msk.f32.gmra.mrb[10].mxu0 %vm3246_vm2, %v7028_v8 }
 0x554   : > { %13752 = vmatprep.mubr.msk.f32.mxu0 %vm3246_vm2, %v7029_v44  ;;  %14329 = vmatpush3.bf16.msra.mxu1 %v14326_v22 }
 0x555   : > { %14331 = vmatprep.subr.bf16.mxu1 %v14330_v50 }
 0x557   : > { %13753 = vmatmul.mubr.msk.f32.gmra.mrb[12].mxu0 %vm3246_vm2, %v7030_v43  ;;  %13791 = vmatmul.mubr.msk.f32.vlgmr.msra.gmra.mrb[0].mxu1 %vm358_vm0, %v7964_v51 }
 0x558   : > { %13755 = vmatprep.mubr.msk.f32.mxu0 %vm3246_vm2, %v7031_v35  ;;  %13793 = vmatprep.mubr.msk.f32.mxu1 %vm358_vm0, %v7965_v46 }
 0x559   : > { %14333 = vmatpush3.bf16.msra.mxu1 %v14330_v50 }
 0x55a   : > { %14335 = vmatprep.subr.bf16.mxu1 %v14334_v45 }
 0x55b   : > { %13756 = vmatmul.mubr.msk.f32.gmra.mrb[14].mxu0 %vm3246_vm2, %v7032_v52  ;;  %13794 = vmatmul.mubr.msk.f32.gmra.mrb[2].mxu1 %vm358_vm0, %v7966_v7 }
 0x55c   : > { %13758 = vmatprep.mubr.msk.f32.mxu0 %vm3246_vm2, %v7033_v34  ;;  %13796 = vmatprep.mubr.msk.f32.mxu1 %vm358_vm0, %v7967_v27 }
 0x55d   : > { %14337 = vmatpush3.bf16.msra.mxu1 %v14334_v45 }
 0x55e   : > { %14339 = vmatprep.subr.bf16.mxu1 %v19250_v41 }
 0x55f   : > { %13759 = vmatmul.mubr.msk.f32.gmra.mrb[16].mxu0 %vm3246_vm2, %v7034_v28  ;;  %13797 = vmatmul.mubr.msk.f32.gmra.mrb[4].mxu1 %vm358_vm0, %v7968_v56 }
 0x560   : > { %13761 = vmatprep.mubr.msk.f32.mxu0 %vm3246_vm2, %v7035_v60  ;;  %13799 = vmatprep.mubr.msk.f32.mxu1 %vm358_vm0, %v7969_v16 }
 0x563   : > { %13762 = vmatmul.mubr.msk.f32.gmra.mrb[18].mxu0 %vm3246_vm2, %v7036_v19  ;;  %13800 = vmatmul.mubr.msk.f32.gmra.mrb[6].mxu1 %vm358_vm0, %v7970_v63 }
 0x564   : > { %13764 = vmatprep.mubr.msk.f32.mxu0 %vm3246_vm2, %v7037_v57 }
 0x567   : > { %13765 = vmatmul.mubr.msk.f32.gmra.mrb[20].mxu0 %vm3246_vm2, %v7038_v10 }
 0x568   : > { %13767 = vmatprep.mubr.msk.f32.mxu0 %vm3246_vm2, %v7039_v13 }
 0x56b   : > { %13768 = vmatmul.mubr.msk.f32.gmra.mrb[22].mxu0 %vm3246_vm2, %v7040_v38 }
 0x56c   : > { %13770 = vmatprep.mubr.msk.f32.mxu0 %vm3246_vm2, %v7041_v54 }
 0x56f   : > { %13771 = vmatmul.mubr.msk.f32.gmra.mrb[24].mxu0 %vm3246_vm2, %v7042_v31 }
 0x570   : > { %13773 = vmatprep.mubr.msk.f32.mxu0 %vm3246_vm2, %v7043_v12 }
 0x573   : > { %13774 = vmatmul.mubr.msk.f32.gmra.mrb[26].mxu0 %vm3246_vm2, %v7044_v1 }
 0x574   : > { %13776 = vmatprep.mubr.msk.f32.mxu0 %vm3246_vm2, %v7045_v37 }
 0x577   : > { %13777 = vmatmul.mubr.msk.f32.gmra.mrb[28].mxu0 %vm3246_vm2, %v7046_v40 }
 0x578   : > { %13779 = vmatprep.mubr.msk.f32.mxu0 %vm3246_vm2, %v7047_v33 }
 0x57b   : > { %13780 = vmatmul.mubr.msk.f32.gmra.mrb[30].mxu0 %vm3246_vm2, %v7048_v17 }
 0x612   : > { %v13736_v25 = vpop.f32.mrb[0].mxu0 }
 0x613   : > { %v7412_v15 = vadd.f32 %v13736_v25, %v19256_v23  ;;  %v7213_v8 = vpop.f32.mrb[1].mxu0 }
 0x614   : > { %v7411_v11 = vadd.f32 %v19256_v23, %v7213_v8 }
 0x615   : > { %v7444_v44 = vmax.f32 %v7412_v15, 0.0 }
 0x616   : > { %v7443_v20 = vmax.f32 %v7411_v11, 0.0  ;;  %v13739_v43 = vpop.f32.mrb[2].mxu0  ;;  %v19331_v11 = vpop.permute.xlu0 %7784 }
 0x617   : > { %7476 = vst.msk [vmem:[#allocation2 + $0x50] sm:$0xff] %vm358_vm0, %v7444_v44  ;;  %v7414_v6 = vadd.f32 %v13739_v43, %v19256_v23  ;;  %v7223_v35 = vpop.f32.mrb[3].mxu0 }
 0x618   : > { %7475 = vst.msk [vmem:[#allocation2 + $0x48] sm:$0xff] %vm358_vm0, %v7443_v20  ;;  %v7413_v62 = vadd.f32 %v19256_v23, %v7223_v35 }
 0x619   : > { %v7446_v52 = vmax.f32 %v7414_v6, 0.0 }
 0x61a   : > { %v7445_v9 = vmax.f32 %v7413_v62, 0.0  ;;  %v13742_v34 = vpop.f32.mrb[4].mxu0 }
 0x61b   : > { %7478 = vst.msk [vmem:[#allocation2 + $0x60] sm:$0xff] %vm358_vm0, %v7446_v52  ;;  %v19266_v5 = vadd.f32 %v13742_v34, %v19256_v23  ;;  %v7233_v28 = vpop.f32.mrb[5].mxu0 }
 0x61c   : > { %7477 = vst.msk [vmem:[#allocation2 + $0x58] sm:$0xff] %vm358_vm0, %v7445_v9  ;;  %v7415_v47 = vadd.f32 %v19256_v23, %v7233_v28 }
 0x61d   : > { %v7448_v60 = vmax.f32 %v19266_v5, 0.0 }
 0x61e   : > { %v7447_v58 = vmax.f32 %v7415_v47, 0.0  ;;  %v13745_v19 = vpop.f32.mrb[6].mxu0 }
 0x61f   : > { %7480 = vst.msk [vmem:[#allocation2 + $0x70] sm:$0xff] %vm358_vm0, %v7448_v60  ;;  %v19275_v57 = vadd.f32 %v13745_v19, %v19256_v23  ;;  %v7243_v10 = vpop.f32.mrb[7].mxu0  ;;  %v7507_v31 = vld [vmem:[#allocation2 + $0x4a] sm:$0xff] }
 0x620   : > { %7479 = vst.msk [vmem:[#allocation2 + $0x68] sm:$0xff] %vm358_vm0, %v7447_v58  ;;  %v19279_v18 = vadd.f32 %v19256_v23, %v7243_v10  ;;  %v7539_v37 = vmax.f32 %v7443_v20, %v7507_v31 }
 0x621   : > { %v7450_v13 = vmax.f32 %v19275_v57, 0.0 }
 0x622   : > { %v7449_v38 = vmax.f32 %v19279_v18, 0.0  ;;  %v13748_v54 = vpop.f32.mrb[8].mxu0 }
 0x623   : > { %7482 = vst.msk [vmem:[#allocation2 + $0x80] sm:$0xff] %vm358_vm0, %v7450_v13  ;;  %v19287_v59 = vadd.f32 %v13748_v54, %v19256_v23  ;;  %v7253_v12 = vpop.f32.mrb[9].mxu0  ;;  %v7508_v55 = vld [vmem:[#allocation2 + $0x52] sm:$0xff]  ;;  %v7509_v3 = vld [vmem:[#allocation2 + $0x5a] sm:$0xff] }
 0x624   : > { %7481 = vst.msk [vmem:[#allocation2 + $0x78] sm:$0xff] %vm358_vm0, %v7449_v38  ;;  %v19293_v1 = vadd.f32 %v19256_v23, %v7253_v12  ;;  %v7540_v39 = vmax.f32 %v7444_v44, %v7508_v55  ;;  %v7541_v53 = vmax.f32 %v7445_v9, %v7509_v3 }
 0x625   : > { %v7452_v61 = vmax.f32 %v19287_v59, 0.0 }
 0x626   : > { %v7451_v40 = vmax.f32 %v19293_v1, 0.0  ;;  %v13751_v21 = vpop.f32.mrb[10].mxu0  ;;  %v7572_v17 = vld [vmem:[#allocation2 + $0x70] sm:$0xff] }
 0x627   : > { %v7571_v33 = vld [vmem:[#allocation2 + $0x68] sm:$0xff]  ;;  %7484 = vst.msk [vmem:[#allocation2 + $0x90] sm:$0xff] %vm358_vm0, %v7452_v61  ;;  %v19303_v30 = vadd.f32 %v13751_v21, %v19256_v23  ;;  %v7263_v4 = vpop.f32.mrb[11].mxu0  ;;  %v7604_v27 = vmax.f32 %v7540_v39, %v7572_v17 }
 0x628   : > { %v7510_v32 = vld [vmem:[#allocation2 + $0x62] sm:$0xff]  ;;  %v7603_v49 = vmax.f32 %v7539_v37, %v7571_v33  ;;  %7483 = vst.msk [vmem:[#allocation2 + $0x88] sm:$0xff] %vm358_vm0, %v7451_v40  ;;  %v19311_v22 = vadd.f32 %v19256_v23, %v7263_v4  ;;  %v7511_v51 = vld [vmem:[#allocation2 + $0x6a] sm:$0xff] }
 0x629   : > { %v7454_v46 = vmax.f32 %v19303_v30, 0.0  ;;  %v7542_v16 = vmax.f32 %v7446_v52, %v7510_v32  ;;  %v7543_v44 = vmax.f32 %v7447_v58, %v7511_v51  ;;  %v19342_v58 = vpop.permute.xlu1 %7799 }
 0x62a   : > { %v7639_v7 = vmax.f32 %v7603_v49, %v7511_v51  ;;  %v7453_v56 = vmax.f32 %v19311_v22, 0.0  ;;  %v13754_v63 = vpop.f32.mrb[12].mxu0  ;;  %v7574_v0 = vld [vmem:[#allocation2 + $0x80] sm:$0xff]  ;;  %21671 = vst [vmem:[#allocation14_spill] sm:$0xff] %v19342_v58 }
 0x62b   : > { %v7573_v2 = vld [vmem:[#allocation2 + $0x78] sm:$0xff]  ;;  %7486 = vst.msk [vmem:[#allocation2 + $0xa0] sm:$0xff] %vm358_vm0, %v7454_v46  ;;  %v19321_v29 = vadd.f32 %v13754_v63, %v19256_v23  ;;  %v7273_v45 = vpop.f32.mrb[13].mxu0  ;;  %v7606_v6 = vmax.f32 %v7542_v16, %v7574_v0 }
 0x62c   : > { %v7512_v50 = vld [vmem:[#allocation2 + $0x72] sm:$0xff]  ;;  %7703 = vst.msk [vmem:[#allocation2 + $0x48] sm:$0xff] %vm358_vm0, %v7639_v7  ;;  %v7605_v42 = vmax.f32 %v7541_v53, %v7573_v2  ;;  %7485 = vst.msk [vmem:[#allocation2 + $0x98] sm:$0xff] %vm358_vm0, %v7453_v56  ;;  %v7513_v25 = vld [vmem:[#allocation2 + $0x7a] sm:$0xff]  ;;  %v19329_v8 = vadd.f32 %v19256_v23, %v7273_v45 }
 0x62d   : > { %v7640_v14 = vmax.f32 %v7604_v27, %v7512_v50  ;;  %v7456_v15 = vmax.f32 %v19321_v29, 0.0  ;;  %v7544_v43 = vmax.f32 %v7448_v60, %v7512_v50  ;;  %v7545_v31 = vmax.f32 %v7449_v38, %v7513_v25  ;;  %v19363_v38 = vpop.permute.xlu0 %7794  ;;  %v19378_v2 = vpop.permute.xlu1 %7809 }
 0x62e   : > { %v7641_v20 = vmax.f32 %v7605_v42, %v7513_v25  ;;  %v13757_v35 = vpop.f32.mrb[14].mxu0  ;;  %v7576_v52 = vld [vmem:[#allocation2 + $0x90] sm:$0xff]  ;;  %v7455_v34 = vmax.f32 %v19329_v8, 0.0  ;;  %21672 = vst [vmem:[#allocation45_spill] sm:$0xff] %v19363_v38  ;;  %21673 = vst [vmem:[#allocation43_spill] sm:$0xff] %v19378_v2 }
 0x62f   : > { %7704 = vst.msk [vmem:[#allocation2 + $0x50] sm:$0xff] %vm358_vm0, %v7640_v14  ;;  %v7575_v62 = vld [vmem:[#allocation2 + $0x88] sm:$0xff]  ;;  %7488 = vst.msk [vmem:[#allocation2 + $0xb0] sm:$0xff] %vm358_vm0, %v7456_v15  ;;  %v19339_v5 = vadd.f32 %v13757_v35, %v19256_v23  ;;  %v7283_v28 = vpop.f32.mrb[15].mxu0  ;;  %v7608_v55 = vmax.f32 %v7544_v43, %v7576_v52 }
 0x630   : > { %v7514_v9 = vld [vmem:[#allocation2 + $0x82] sm:$0xff]  ;;  %v7607_v47 = vmax.f32 %v7543_v44, %v7575_v62  ;;  %7705 = vst.msk [vmem:[#allocation2 + $0x58] sm:$0xff] %vm358_vm0, %v7641_v20  ;;  %v7515_v19 = vld [vmem:[#allocation2 + $0x8a] sm:$0xff]  ;;  %7487 = vst.msk [vmem:[#allocation2 + $0xa8] sm:$0xff] %vm358_vm0, %v7455_v34  ;;  %v19349_v54 = vadd.f32 %v19256_v23, %v7283_v28 }
 0x631   : > { %v7642_v60 = vmax.f32 %v7606_v6, %v7514_v9  ;;  %v7458_v10 = vmax.f32 %v19339_v5, 0.0  ;;  %v7546_v21 = vmax.f32 %v7450_v13, %v7514_v9  ;;  %v7547_v27 = vmax.f32 %v7451_v40, %v7515_v19  ;;  %v19397_v6 = vpop.permute.xlu0 %7804 }
 0x632   : > { %v7643_v12 = vmax.f32 %v7607_v47, %v7515_v19  ;;  %v13760_v37 = vpop.f32.mrb[16].mxu0  ;;  %v7457_v33 = vmax.f32 %v19349_v54, 0.0  ;;  %v7578_v32 = vld [vmem:[#allocation2 + $0xa0] sm:$0xff]  ;;  %21674 = vst [vmem:[#allocation47_spill] sm:$0xff] %v19397_v6 }
 0x633   : > { %7706 = vst.msk [vmem:[#allocation2 + $0x60] sm:$0xff] %vm358_vm0, %v7642_v60  ;;  %v7516_v3 = vld [vmem:[#allocation2 + $0x92] sm:$0xff]  ;;  %7490 = vst.msk [vmem:[#allocation2 + $0xc0] sm:$0xff] %vm358_vm0, %v7458_v10  ;;  %v19361_v17 = vadd.f32 %v13760_v37, %v19256_v23  ;;  %v7293_v18 = vpop.f32.mrb[17].mxu0  ;;  %v7971_v53 = vld [vmem:[#allocation2 + $0x48] sm:$0xff]  ;;  %v7610_v50 = vmax.f32 %v7546_v21, %v7578_v32 }
 0x634   : > { %v7577_v39 = vld [vmem:[#allocation2 + $0x98] sm:$0xff]  ;;  %7707 = vst.msk [vmem:[#allocation2 + $0x68] sm:$0xff] %vm358_vm0, %v7643_v12  ;;  %v7644_v49 = vmax.f32 %v7608_v55, %v7516_v3  ;;  %7489 = vst.msk [vmem:[#allocation2 + $0xb8] sm:$0xff] %vm358_vm0, %v7457_v33  ;;  %v19371_v51 = vadd.f32 %v19256_v23, %v7293_v18  ;;  %13802 = vmatprep.mubr.msk.f32.mxu1 %vm358_vm0, %v7971_v53  ;;  %v7548_v0 = vmax.f32 %v7452_v61, %v7516_v3 }
 0x635   : > { %v7609_v4 = vmax.f32 %v7545_v31, %v7577_v39  ;;  %v7517_v57 = vld [vmem:[#allocation2 + $0x9a] sm:$0xff]  ;;  %v7460_v13 = vmax.f32 %v19361_v17, 0.0 }
 0x636   : > { %v7972_v7 = vld [vmem:[#allocation2 + $0x50] sm:$0xff]  ;;  %7708 = vst.msk [vmem:[#allocation2 + $0x70] sm:$0xff] %vm358_vm0, %v7644_v49  ;;  %v13763_v63 = vpop.f32.mrb[18].mxu0  ;;  %v7459_v45 = vmax.f32 %v19371_v51, 0.0  ;;  %v7549_v35 = vmax.f32 %v7453_v56, %v7517_v57 }
 0x637   : > { %v7645_v16 = vmax.f32 %v7609_v4, %v7517_v57  ;;  %13803 = vmatmul.mubr.msk.f32.gmra.mrb[8].mxu1 %vm358_vm0, %v7972_v7  ;;  %7492 = vst.msk [vmem:[#allocation2 + $0xd0] sm:$0xff] %vm358_vm0, %v7460_v13  ;;  %v19387_v1 = vadd.f32 %v13763_v63, %v19256_v23  ;;  %v7303_v40 = vpop.f32.mrb[19].mxu0  ;;  %v7973_v42 = vld [vmem:[#allocation2 + $0x58] sm:$0xff]  ;;  %v7580_v14 = vld [vmem:[#allocation2 + $0xb0] sm:$0xff]  ;;  %v7518_v25 = vld [vmem:[#allocation2 + $0xa2] sm:$0xff] }
 0x638   : > { %v7579_v44 = vld [vmem:[#allocation2 + $0xa8] sm:$0xff]  ;;  %v19391_v20 = vadd.f32 %v19256_v23, %v7303_v40  ;;  %13805 = vmatprep.mubr.msk.f32.mxu1 %vm358_vm0, %v7973_v42  ;;  %v7646_v61 = vmax.f32 %v7610_v50, %v7518_v25  ;;  %7491 = vst.msk [vmem:[#allocation2 + $0xc8] sm:$0xff] %vm358_vm0, %v7459_v45  ;;  %v7612_v47 = vmax.f32 %v7548_v0, %v7580_v14  ;;  %v19434_v50 = vpop.permute.xlu0 %7814 }
 0x639   : > { %7709 = vst.msk [vmem:[#allocation2 + $0x78] sm:$0xff] %vm358_vm0, %v7645_v16  ;;  %v7611_v59 = vmax.f32 %v7547_v27, %v7579_v44  ;;  %v7519_v62 = vld [vmem:[#allocation2 + $0xaa] sm:$0xff]  ;;  %v7462_v52 = vmax.f32 %v19387_v1, 0.0  ;;  %v7550_v19 = vmax.f32 %v7454_v46, %v7518_v25  ;;  %v19420_v46 = vpop.permute.xlu1 %7819  ;;  %21676 = vst [vmem:[#allocation50_spill] sm:$0xff] %v19434_v50 }
 0x63a   : > { %v7974_v43 = vld [vmem:[#allocation2 + $0x60] sm:$0xff]  ;;  %v7461_v9 = vmax.f32 %v19391_v20, 0.0  ;;  %v13766_v28 = vpop.f32.mrb[20].mxu0  ;;  %7710 = vst.msk [vmem:[#allocation2 + $0x80] sm:$0xff] %vm358_vm0, %v7646_v61  ;;  %21675 = vst [vmem:[#allocation48_spill] sm:$0xff] %v19420_v46  ;;  %v7551_v57 = vmax.f32 %v7455_v34, %v7519_v62 }
 0x63b   : > { %13806 = vmatmul.mubr.msk.f32.gmra.mrb[10].mxu1 %vm358_vm0, %v7974_v43  ;;  %v7647_v60 = vmax.f32 %v7611_v59, %v7519_v62  ;;  %v19408_v31 = vadd.f32 %v13766_v28, %v19256_v23  ;;  %v7313_v22 = vpop.f32.mrb[21].mxu0  ;;  %v7975_v56 = vld [vmem:[#allocation2 + $0x68] sm:$0xff]  ;;  %v7582_v12 = vld [vmem:[#allocation2 + $0xc0] sm:$0xff]  ;;  %v7520_v55 = vld [vmem:[#allocation2 + $0xb2] sm:$0xff]  ;;  %7494 = vst.msk [vmem:[#allocation2 + $0xe0] sm:$0xff] %vm358_vm0, %v7462_v52 }
 0x63c   : > { %v7581_v37 = vld [vmem:[#allocation2 + $0xb8] sm:$0xff]  ;;  %7493 = vst.msk [vmem:[#allocation2 + $0xd8] sm:$0xff] %vm358_vm0, %v7461_v9  ;;  %v19417_v30 = vadd.f32 %v19256_v23, %v7313_v22  ;;  %13808 = vmatprep.mubr.msk.f32.mxu1 %vm358_vm0, %v7975_v56  ;;  %v7648_v39 = vmax.f32 %v7612_v47, %v7520_v55  ;;  %v7552_v4 = vmax.f32 %v7456_v15, %v7520_v55 }
 0x63d   : > { %7711 = vst.msk [vmem:[#allocation2 + $0x88] sm:$0xff] %vm358_vm0, %v7647_v60  ;;  %v7613_v3 = vmax.f32 %v7549_v35, %v7581_v37  ;;  %v7976_v21 = vld [vmem:[#allocation2 + $0x70] sm:$0xff]  ;;  %v7521_v18 = vld [vmem:[#allocation2 + $0xba] sm:$0xff]  ;;  %v7464_v32 = vmax.f32 %v19408_v31, 0.0  ;;  %v7614_v7 = vmax.f32 %v7550_v19, %v7582_v12  ;;  %v19453_v28 = vpop.permute.xlu1 %7829 }
 0x63e   : > { %v7463_v49 = vmax.f32 %v19417_v30, 0.0  ;;  %v13769_v53 = vpop.f32.mrb[22].mxu0  ;;  %v7584_v16 = vld [vmem:[#allocation2 + $0xd0] sm:$0xff]  ;;  %7712 = vst.msk [vmem:[#allocation2 + $0x90] sm:$0xff] %vm358_vm0, %v7648_v39  ;;  %v7553_v25 = vmax.f32 %v7457_v33, %v7521_v18  ;;  %21677 = vst [vmem:[#allocation51_spill] sm:$0xff] %v19453_v28  ;;  %v19474_v39 = vpop.permute.xlu0 %7824 }
 0x63f   : > { %13809 = vmatmul.mubr.msk.f32.gmra.mrb[12].mxu1 %vm358_vm0, %v7976_v21  ;;  %v7649_v27 = vmax.f32 %v7613_v3, %v7521_v18  ;;  %v19432_v63 = vadd.f32 %v13769_v53, %v19256_v23  ;;  %v7323_v29 = vpop.f32.mrb[23].mxu0  ;;  %v7522_v0 = vld [vmem:[#allocation2 + $0xc2] sm:$0xff]  ;;  %7496 = vst.msk [vmem:[#allocation2 + $0xf0] sm:$0xff] %vm358_vm0, %v7464_v32  ;;  %v7616_v44 = vmax.f32 %v7552_v4, %v7584_v16  ;;  %v7523_v59 = vld [vmem:[#allocation2 + $0xca] sm:$0xff]  ;;  %21678 = vst [vmem:[#allocation53_spill] sm:$0xff] %v19474_v39 }
 0x640   : > { %v7977_v15 = vld [vmem:[#allocation2 + $0x78] sm:$0xff]  ;;  %v7583_v40 = vld [vmem:[#allocation2 + $0xc8] sm:$0xff]  ;;  %7495 = vst.msk [vmem:[#allocation2 + $0xe8] sm:$0xff] %vm358_vm0, %v7463_v49  ;;  %v19443_v8 = vadd.f32 %v19256_v23, %v7323_v29  ;;  %v7650_v42 = vmax.f32 %v7614_v7, %v7522_v0  ;;  %v7554_v43 = vmax.f32 %v7458_v10, %v7522_v0  ;;  %v7555_v55 = vmax.f32 %v7459_v45, %v7523_v59 }
 0x641   : > { %13811 = vmatprep.mubr.msk.f32.mxu1 %vm358_vm0, %v7977_v15  ;;  %7713 = vst.msk [vmem:[#allocation2 + $0x98] sm:$0xff] %vm358_vm0, %v7649_v27  ;;  %v7615_v34 = vmax.f32 %v7551_v57, %v7583_v40  ;;  %v7466_v14 = vmax.f32 %v19432_v63, 0.0  ;;  %v7978_v62 = vld [vmem:[#allocation2 + $0x80] sm:$0xff]  ;;  %v19499_v40 = vpop.permute.xlu1 %7839 }
 0x642   : > { %v7465_v61 = vmax.f32 %v19443_v8, 0.0  ;;  %v13772_v35 = vpop.f32.mrb[24].mxu0  ;;  %7714 = vst.msk [vmem:[#allocation2 + $0xa0] sm:$0xff] %vm358_vm0, %v7650_v42  ;;  %v7586_v22 = vld [vmem:[#allocation2 + $0xe0] sm:$0xff]  ;;  %21681 = vst [vmem:[#allocation57_spill] sm:$0xff] %v19499_v40 }
 0x643   : > { %v7651_v47 = vmax.f32 %v7615_v34, %v7523_v59  ;;  %v7524_v60 = vld [vmem:[#allocation2 + $0xd2] sm:$0xff]  ;;  %7498 = vst.msk [vmem:[#allocation2 + $0x100] sm:$0xff] %vm358_vm0, %v7466_v14  ;;  %v19460_v54 = vadd.f32 %v13772_v35, %v19256_v23  ;;  %13812 = vmatmul.mubr.msk.f32.gmra.mrb[14].mxu1 %vm358_vm0, %v7978_v62  ;;  %v7333_v5 = vpop.f32.mrb[25].mxu0  ;;  %v7525_v37 = vld [vmem:[#allocation2 + $0xda] sm:$0xff]  ;;  %v7618_v18 = vmax.f32 %v7554_v43, %v7586_v22 }
 0x644   : > { %v7585_v19 = vld [vmem:[#allocation2 + $0xd8] sm:$0xff]  ;;  %v7652_v33 = vmax.f32 %v7616_v44, %v7524_v60  ;;  %7497 = vst.msk [vmem:[#allocation2 + $0xf8] sm:$0xff] %vm358_vm0, %v7465_v61  ;;  %v19467_v56 = vadd.f32 %v19256_v23, %v7333_v5  ;;  %v7979_v12 = vld [vmem:[#allocation2 + $0x88] sm:$0xff]  ;;  %v7556_v53 = vmax.f32 %v7460_v13, %v7524_v60  ;;  %v19520_v5 = vpop.permute.xlu0 %7834 }
 0x645   : > { %v7617_v10 = vmax.f32 %v7553_v25, %v7585_v19  ;;  %7715 = vst.msk [vmem:[#allocation2 + $0xa8] sm:$0xff] %vm358_vm0, %v7651_v47  ;;  %v7468_v3 = vmax.f32 %v19460_v54, 0.0  ;;  %13814 = vmatprep.mubr.msk.f32.mxu1 %vm358_vm0, %v7979_v12  ;;  %v19480_v45 = vld [vmem:[#allocation2 + $0x90] sm:$0xff]  ;;  %v7557_v25 = vmax.f32 %v7461_v9, %v7525_v37  ;;  %21683 = vst [vmem:[#allocation61_spill] sm:$0xff] %v19520_v5 }
 0x646   : > { %7716 = vst.msk [vmem:[#allocation2 + $0xb0] sm:$0xff] %vm358_vm0, %v7652_v33  ;;  %v7467_v4 = vmax.f32 %v19467_v56, 0.0  ;;  %v13775_v51 = vpop.f32.mrb[26].mxu0  ;;  %21679 = vst [vmem:[#allocation54_spill] sm:$0xff] %v19480_v45  ;;  %v7588_v29 = vld [vmem:[#allocation2 + $0xf0] sm:$0xff] }
 0x647   : > { %v7653_v21 = vmax.f32 %v7617_v10, %v7525_v37  ;;  %v7587_v57 = vld [vmem:[#allocation2 + $0xe8] sm:$0xff]  ;;  %7500 = vst.msk [vmem:[#allocation2 + $0x110] sm:$0xff] %vm358_vm0, %v7468_v3  ;;  %v19486_v27 = vadd.f32 %v13775_v51, %v19256_v23  ;;  %13815 = vmatmul.mubr.msk.f32.gmra.mrb[16].mxu1 %vm358_vm0, %v19480_v45  ;;  %v7343_v16 = vpop.f32.mrb[27].mxu0  ;;  %v7620_v59 = vmax.f32 %v7556_v53, %v7588_v29  ;;  %v19539_v51 = vpop.permute.xlu1 %7849 }
 0x648   : > { %v7526_v7 = vld [vmem:[#allocation2 + $0xe2] sm:$0xff]  ;;  %v7619_v17 = vmax.f32 %v7555_v55, %v7587_v57  ;;  %7499 = vst.msk [vmem:[#allocation2 + $0x108] sm:$0xff] %vm358_vm0, %v7467_v4  ;;  %v19495_v15 = vadd.f32 %v19256_v23, %v7343_v16  ;;  %v19497_v0 = vld [vmem:[#allocation2 + $0x98] sm:$0xff]  ;;  %v7527_v34 = vld [vmem:[#allocation2 + $0xea] sm:$0xff] }
 0x649   : > { %7717 = vst.msk [vmem:[#allocation2 + $0xb8] sm:$0xff] %vm358_vm0, %v7653_v21  ;;  %v7654_v13 = vmax.f32 %v7618_v18, %v7526_v7  ;;  %21680 = vst [vmem:[#allocation56_spill] sm:$0xff] %v19497_v0  ;;  %v7470_v42 = vmax.f32 %v19486_v27, 0.0  ;;  %13817 = vmatprep.mubr.msk.f32.mxu1 %vm358_vm0, %v19497_v0  ;;  %v19508_v62 = vld [vmem:[#allocation2 + $0xa0] sm:$0xff]  ;;  %v7558_v19 = vmax.f32 %v7462_v52, %v7526_v7 }
 0x64a   : > { %v7655_v44 = vmax.f32 %v7619_v17, %v7527_v34  ;;  %v7469_v43 = vmax.f32 %v19495_v15, 0.0  ;;  %v13778_v35 = vpop.f32.mrb[28].mxu0  ;;  %21682 = vst [vmem:[#allocation59_spill] sm:$0xff] %v19508_v62  ;;  %v7590_v22 = vld [vmem:[#allocation2 + $0x100] sm:$0xff]  ;;  %v7559_v21 = vmax.f32 %v7463_v49, %v7527_v34  ;;  %21686 = vst [vmem:[#allocation69_spill] sm:$0xff] %v19539_v51 }
 0x64b   : > { %7718 = vst.msk [vmem:[#allocation2 + $0xc0] sm:$0xff] %vm358_vm0, %v7654_v13  ;;  %v7589_v47 = vld [vmem:[#allocation2 + $0xf8] sm:$0xff]  ;;  %7502 = vst.msk [vmem:[#allocation2 + $0x120] sm:$0xff] %vm358_vm0, %v7470_v42  ;;  %v19516_v20 = vadd.f32 %v13778_v35, %v19256_v23  ;;  %13818 = vmatmul.mubr.msk.f32.gmra.mrb[18].mxu1 %vm358_vm0, %v19508_v62  ;;  %v7353_v9 = vpop.f32.mrb[29].mxu0  ;;  %v7622_v7 = vmax.f32 %v7558_v19, %v7590_v22 }
 0x64c   : > { %v7528_v60 = vld [vmem:[#allocation2 + $0xf2] sm:$0xff]  ;;  %7719 = vst.msk [vmem:[#allocation2 + $0xc8] sm:$0xff] %vm358_vm0, %v7655_v44  ;;  %v7621_v10 = vmax.f32 %v7557_v25, %v7589_v47  ;;  %7501 = vst.msk [vmem:[#allocation2 + $0x118] sm:$0xff] %vm358_vm0, %v7469_v43  ;;  %v19526_v1 = vld [vmem:[#allocation2 + $0xa8] sm:$0xff]  ;;  %v19530_v55 = vadd.f32 %v19256_v23, %v7353_v9  ;;  %v19564_v47 = vpop.permute.xlu0 %7844 }
 0x64d   : > { %v7656_v33 = vmax.f32 %v7620_v59, %v7528_v60  ;;  %21684 = vst [vmem:[#allocation65_spill] sm:$0xff] %v19526_v1  ;;  %v7529_v52 = vld [vmem:[#allocation2 + $0xfa] sm:$0xff]  ;;  %v7472_v12 = vmax.f32 %v19516_v20, 0.0  ;;  %13820 = vmatprep.mubr.msk.f32.mxu1 %vm358_vm0, %v19526_v1  ;;  %v19534_v37 = vld [vmem:[#allocation2 + $0xb0] sm:$0xff]  ;;  %v7560_v17 = vmax.f32 %v7464_v32, %v7528_v60  ;;  %21689 = vst [vmem:[#allocation73_spill] sm:$0xff] %v19564_v47 }
 0x64e   : > { %21685 = vst [vmem:[#allocation68_spill] sm:$0xff] %v19534_v37  ;;  %v7657_v18 = vmax.f32 %v7621_v10, %v7529_v52  ;;  %v13781_v53 = vpop.f32.mrb[30].mxu0  ;;  %v7471_v16 = vmax.f32 %v19530_v55, 0.0  ;;  %v7592_v34 = vld [vmem:[#allocation2 + $0x110] sm:$0xff]  ;;  %v7561_v60 = vmax.f32 %v7465_v61, %v7529_v52  ;;  %v19578_v55 = vpop.permute.xlu1 %7859 }
 0x64f   : > { %7720 = vst.msk [vmem:[#allocation2 + $0xd0] sm:$0xff] %vm358_vm0, %v7656_v33  ;;  %v7591_v57 = vld [vmem:[#allocation2 + $0x108] sm:$0xff]  ;;  %7504 = vst.msk [vmem:[#allocation2 + $0x130] sm:$0xff] %vm358_vm0, %v7472_v12  ;;  %v19548_v30 = vadd.f32 %v13781_v53, %v19256_v23  ;;  %13821 = vmatmul.mubr.msk.f32.gmra.mrb[20].mxu1 %vm358_vm0, %v19534_v37  ;;  %v7363_v49 = vpop.f32.mrb[31].mxu0  ;;  %v7624_v10 = vmax.f32 %v7560_v17, %v7592_v34 }
 0x650   : > { %7721 = vst.msk [vmem:[#allocation2 + $0xd8] sm:$0xff] %vm358_vm0, %v7657_v18  ;;  %v7623_v13 = vmax.f32 %v7559_v21, %v7591_v57  ;;  %v7530_v29 = vld [vmem:[#allocation2 + $0x102] sm:$0xff]  ;;  %v19553_v25 = vld [vmem:[#allocation2 + $0xb8] sm:$0xff]  ;;  %v7531_v44 = vld [vmem:[#allocation2 + $0x10a] sm:$0xff]  ;;  %v19558_v32 = vadd.f32 %v19256_v23, %v7363_v49 }
 0x651   : > { %21687 = vst [vmem:[#allocation70_spill] sm:$0xff] %v19553_v25  ;;  %v7658_v59 = vmax.f32 %v7622_v7, %v7530_v29  ;;  %7503 = vst.msk [vmem:[#allocation2 + $0x128] sm:$0xff] %vm358_vm0, %v7471_v16  ;;  %v7474_v31 = vmax.f32 %v19548_v30, 0.0  ;;  %13823 = vmatprep.mubr.msk.f32.mxu1 %vm358_vm0, %v19553_v25  ;;  %v7562_v23 = vmax.f32 %v7466_v14, %v7530_v29  ;;  %v7599_v57 = vld [vmem:[#allocation2 + $0x148] sm:$0xff]  ;;  %v19592_v30 = vpop.permute.xlu0 %7854  ;;  %v19786_v0 = vld [vmem:[#allocation2 + $0xb4] sm:$0xff] }
 0x652   : > { %v19562_v35 = vld [vmem:[#allocation2 + $0xc0] sm:$0xff]  ;;  %v7659_v19 = vmax.f32 %v7623_v13, %v7531_v44  ;;  %v7473_v33 = vmax.f32 %v19558_v32, 0.0  ;;  %21691 = vst [vmem:[#allocation66_spill] sm:$0xff] %v19578_v55  ;;  %v7563_v53 = vmax.f32 %v7467_v4, %v7531_v44  ;;  %21694 = vst [vmem:[#allocation19_spill] sm:$0xff] %v19592_v30  ;;  %v7635_v44 = vld [vmem:[#allocation2 + $0x14a] sm:$0xff] }
 0x653   : > { %21688 = vst [vmem:[#allocation72_spill] sm:$0xff] %v19562_v35  ;;  %v7593_v9 = vld [vmem:[#allocation2 + $0x118] sm:$0xff]  ;;  %7722 = vst.msk [vmem:[#allocation2 + $0xe0] sm:$0xff] %vm358_vm0, %v7658_v59  ;;  %13824 = vmatmul.mubr.msk.f32.gmra.mrb[22].mxu1 %vm358_vm0, %v19562_v35  ;;  %v7594_v61 = vld [vmem:[#allocation2 + $0x120] sm:$0xff] }
 0x654   : > { %7506 = vst.msk [vmem:[#allocation2 + $0x140] sm:$0xff] %vm358_vm0, %v7474_v31  ;;  %7723 = vst.msk [vmem:[#allocation2 + $0xe8] sm:$0xff] %vm358_vm0, %v7659_v19  ;;  %v7625_v22 = vmax.f32 %v7561_v60, %v7593_v9  ;;  %v7532_v8 = vld [vmem:[#allocation2 + $0x112] sm:$0xff]  ;;  %v19576_v52 = vld [vmem:[#allocation2 + $0xc8] sm:$0xff]  ;;  %v7626_v7 = vmax.f32 %v7562_v23, %v7594_v61 }
 0x655   : > { %21690 = vst [vmem:[#allocation64_spill] sm:$0xff] %v19576_v52  ;;  %v7533_v21 = vld [vmem:[#allocation2 + $0x11a] sm:$0xff]  ;;  %v7660_v18 = vmax.f32 %v7624_v10, %v7532_v8  ;;  %7505 = vst.msk [vmem:[#allocation2 + $0x138] sm:$0xff] %vm358_vm0, %v7473_v33  ;;  %13826 = vmatprep.mubr.msk.f32.mxu1 %vm358_vm0, %v19576_v52  ;;  %v7564_v56 = vmax.f32 %v7468_v3, %v7532_v8  ;;  %v7638_v23 = vld [vmem:[#allocation2 + $0x162] sm:$0xff] }
 0x656   : > { %v19583_v63 = vld [vmem:[#allocation2 + $0xd0] sm:$0xff]  ;;  %v7661_v14 = vmax.f32 %v7625_v22, %v7533_v21  ;;  %v7602_v32 = vld [vmem:[#allocation2 + $0x160] sm:$0xff]  ;;  %v19601_v22 = vpop.permute.xlu1 %7869  ;;  %v7565_v54 = vmax.f32 %v7469_v43, %v7533_v21 }
 0x657   : > { %21692 = vst [vmem:[#allocation74_spill] sm:$0xff] %v19583_v63  ;;  %7724 = vst.msk [vmem:[#allocation2 + $0xf0] sm:$0xff] %vm358_vm0, %v7660_v18  ;;  %13827 = vmatmul.mubr.msk.f32.gmra.mrb[24].mxu1 %vm358_vm0, %v19583_v63  ;;  %v19590_v17 = vld [vmem:[#allocation2 + $0xd8] sm:$0xff]  ;;  %v7596_v19 = vld [vmem:[#allocation2 + $0x130] sm:$0xff] }
 0x658   : > { %21693 = vst [vmem:[#allocation30_spill] sm:$0xff] %v19590_v17  ;;  %7725 = vst.msk [vmem:[#allocation2 + $0xf8] sm:$0xff] %vm358_vm0, %v7661_v14  ;;  %v7535_v49 = vld [vmem:[#allocation2 + $0x12a] sm:$0xff]  ;;  %v7534_v29 = vld [vmem:[#allocation2 + $0x122] sm:$0xff]  ;;  %13829 = vmatprep.mubr.msk.f32.mxu1 %vm358_vm0, %v19590_v17 }
 0x659   : > { %v7595_v13 = vld [vmem:[#allocation2 + $0x128] sm:$0xff]  ;;  %v7567_v4 = vmax.f32 %v7471_v16, %v7535_v49  ;;  %v7566_v59 = vmax.f32 %v7470_v42, %v7534_v29  ;;  %v7662_v60 = vmax.f32 %v7626_v7, %v7534_v29  ;;  %21695 = vst [vmem:[#allocation15_spill] sm:$0xff] %v19601_v22  ;;  %v7601_v16 = vld [vmem:[#allocation2 + $0x158] sm:$0xff]  ;;  %v19615_v29 = vpop.permute.xlu0 %7864 }
 0x65a   : > { %v7627_v34 = vmax.f32 %v7563_v53, %v7595_v13  ;;  %v19606_v18 = vld [vmem:[#allocation2 + $0xe0] sm:$0xff]  ;;  %v7628_v13 = vmax.f32 %v7564_v56, %v7596_v19  ;;  %21698 = vst [vmem:[#allocation11_spill] sm:$0xff] %v19615_v29  ;;  %v7636_v19 = vld [vmem:[#allocation2 + $0x152] sm:$0xff] }
 0x65b   : > { %v7538_v9 = vld [vmem:[#allocation2 + $0x142] sm:$0xff]  ;;  %v7631_v3 = vmax.f32 %v7567_v4, %v7599_v57  ;;  %7726 = vst.msk [vmem:[#allocation2 + $0x100] sm:$0xff] %vm358_vm0, %v7662_v60  ;;  %21696 = vst [vmem:[#allocation32_spill] sm:$0xff] %v19606_v18  ;;  %13830 = vmatmul.mubr.msk.f32.gmra.mrb[26].mxu1 %vm358_vm0, %v19606_v18  ;;  %v7600_v57 = vld [vmem:[#allocation2 + $0x150] sm:$0xff] }
 0x65c   : > { %v7598_v10 = vld [vmem:[#allocation2 + $0x140] sm:$0xff]  ;;  %v7663_v8 = vmax.f32 %v7627_v34, %v7535_v49  ;;  %v7570_v61 = vmax.f32 %v7474_v31, %v7538_v9  ;;  %v19608_v27 = vld [vmem:[#allocation2 + $0xe8] sm:$0xff]  ;;  %v7597_v53 = vld [vmem:[#allocation2 + $0x138] sm:$0xff] }
 0x65d   : > { %21697 = vst [vmem:[#allocation8_spill] sm:$0xff] %v19608_v27  ;;  %v7630_v42 = vmax.f32 %v7566_v59, %v7598_v10  ;;  %v7537_v14 = vld [vmem:[#allocation2 + $0x13a] sm:$0xff]  ;;  %v7536_v7 = vld [vmem:[#allocation2 + $0x132] sm:$0xff]  ;;  %v7667_v15 = vmax.f32 %v7631_v3, %v7635_v44  ;;  %v7629_v21 = vmax.f32 %v7565_v54, %v7597_v53  ;;  %13832 = vmatprep.mubr.msk.f32.mxu1 %vm358_vm0, %v19608_v27  ;;  %v7735_v49 = vld [vmem:[#allocation2 + $0x4] sm:$0xff] }
 0x65e   : > { %7727 = vst.msk [vmem:[#allocation2 + $0x108] sm:$0xff] %vm358_vm0, %v7663_v8  ;;  %v7634_v43 = vmax.f32 %v7570_v61, %v7602_v32  ;;  %v7569_v31 = vmax.f32 %v7473_v33, %v7537_v14  ;;  %v7637_v34 = vld [vmem:[#allocation2 + $0x15a] sm:$0xff]  ;;  %v7568_v56 = vmax.f32 %v7472_v12, %v7536_v7  ;;  %v7664_v59 = vmax.f32 %v7628_v13, %v7536_v7  ;;  %v19619_v60 = vld [vmem:[#allocation2 + $0xf0] sm:$0xff]  ;;  %v19629_v12 = vpop.permute.xlu1 %7879  ;;  %v19748_v27 = vld [vmem:[#allocation2 + $0x84] sm:$0xff] }
 0x65f   : > { %v7666_v4 = vmax.f32 %v7630_v42, %v7538_v9  ;;  %21699 = vst [vmem:[#allocation5_spill] sm:$0xff] %v19619_v60  ;;  %7731 = vst.msk [vmem:[#allocation2 + $0x128] sm:$0xff] %vm358_vm0, %v7667_v15  ;;  %v7665_v32 = vmax.f32 %v7629_v21, %v7537_v14  ;;  %v19622_v10 = vld [vmem:[#allocation2 + $0xf8] sm:$0xff]  ;;  %13833 = vmatmul.mubr.msk.f32.gmra.mrb[28].mxu1 %vm358_vm0, %v19619_v60  ;;  %v7927_v20 = vmul.f32 %v19305_v36, %v7735_v49  ;;  %v19637_v8 = vld [vmem:[#allocation2 + $0xc] sm:$0xff]  ;;  %v19646_v42 = vpop.permute.xlu0 %7874 }
 0x660   : > { %v7670_v44 = vmax.f32 %v7634_v43, %v7638_v23  ;;  %v7633_v33 = vmax.f32 %v7569_v31, %v7601_v16  ;;  %21700 = vst [vmem:[#allocation25_spill] sm:$0xff] %v19622_v10  ;;  %v7632_v54 = vmax.f32 %v7568_v56, %v7600_v57  ;;  %7728 = vst.msk [vmem:[#allocation2 + $0x110] sm:$0xff] %vm358_vm0, %v7664_v59  ;;  %13835 = vmatprep.mubr.msk.f32.mxu1 %vm358_vm0, %v19622_v10  ;;  %v8835_v61 = vld [vmem:[%s20802_s6 + $0x50] sm:$0xff]  ;;  %v8836_v16 = vld [vmem:[%s20802_s6 + $0x58] sm:$0xff] }
 0x661   : > { %7730 = vst.msk [vmem:[#allocation2 + $0x120] sm:$0xff] %vm358_vm0, %v7666_v4  ;;  %21701 = vst [vmem:[#allocation16_spill] sm:$0xff] %v19629_v12  ;;  %v19651_v14 = vld [vmem:[#allocation2 + $0x14] sm:$0xff]  ;;  %v7928_v53 = vmul.f32 %v19271_v24, %v19637_v8  ;;  %v14342_v7 = vpack.c.bf16 %v8836_v16, %v8835_v61  ;;  %v19656_v13 = vld [vmem:[#allocation2 + $0x1c] sm:$0xff]  ;;  %v7943_v17 = vmul.f32 %v19748_v27, %v19539_v51 }
 0x662   : > { %v7669_v9 = vmax.f32 %v7633_v33, %v7637_v34  ;;  %7729 = vst.msk [vmem:[#allocation2 + $0x118] sm:$0xff] %vm358_vm0, %v7665_v32  ;;  %7734 = vst.msk [vmem:[#allocation2 + $0x140] sm:$0xff] %vm358_vm0, %v7670_v44  ;;  %v7668_v23 = vmax.f32 %v7632_v54, %v7636_v19  ;;  %v19635_v3 = vld [vmem:[#allocation2 + $0x100] sm:$0xff]  ;;  %v19658_v15 = vpop.permute.xlu1 %7889  ;;  %v9255_v31 = vld [vmem:[%s20802_s6 + $0x68] sm:$0xff]  ;;  %v7929_v21 = vmul.f32 %v19295_v48, %v19651_v14 }
 0x663   : > { %21702 = vst [vmem:[#allocation12_spill] sm:$0xff] %v19635_v3  ;;  %21703 = vst [vmem:[#allocation6_spill] sm:$0xff] %v19646_v42  ;;  %13836 = vmatmul.mubr.msk.f32.gmra.mrb[30].mxu1 %vm358_vm0, %v19635_v3  ;;  %v9254_v43 = vld [vmem:[%s20802_s6 + $0x60] sm:$0xff]  ;;  %v7930_v49 = vmul.f32 %v19331_v11, %v19656_v13  ;;  %v19674_v4 = vpop.permute.xlu0 %7884  ;;  %v19681_v59 = vld [vmem:[#allocation2 + $0x2c] sm:$0xff] }
 0x664   : > { %7733 = vst.msk [vmem:[#allocation2 + $0x138] sm:$0xff] %vm358_vm0, %v7669_v9  ;;  %7732 = vst.msk [vmem:[#allocation2 + $0x130] sm:$0xff] %vm358_vm0, %v7668_v23  ;;  %13846 = vmatprep.mubr.msk.f32.mxu1 %vm358_vm0, %v7927_v20  ;;  %v19668_v57 = vld [vmem:[#allocation2 + $0x24] sm:$0xff]  ;;  %v19677_v34 = vpack.c.bf16 %v9255_v31, %v9254_v43  ;;  %v19683_v44 = vld [vmem:[#allocation2 + $0x34] sm:$0xff]  ;;  %v7932_v33 = vmul.f32 %v19363_v38, %v19681_v59 }
 0x665   : > { %21704 = vst [vmem:[#allocation10_spill] sm:$0xff] %v19658_v15  ;;  %21705 = vst [vmem:[#allocation9_spill] sm:$0xff] %v19674_v4  ;;  %v7931_v56 = vmul.f32 %v19315_v26, %v19668_v57  ;;  %v7933_v32 = vmul.f32 %v19342_v58, %v19683_v44  ;;  %v19694_v19 = vld [vmem:[#allocation2 + $0x3c] sm:$0xff]  ;;  %v19698_v20 = vld [vmem:[#allocation2 + $0x44] sm:$0xff] }
 0x666   : > { %v7934_v9 = vmul.f32 %v19397_v6, %v19694_v19  ;;  %v7935_v61 = vmul.f32 %v19698_v20, %v19378_v2  ;;  %v19708_v16 = vld [vmem:[#allocation2 + $0x4c] sm:$0xff]  ;;  %v19718_v31 = vld [vmem:[#allocation2 + $0x5c] sm:$0xff]  ;;  %v19736_v3 = vld [vmem:[#allocation2 + $0x74] sm:$0xff] }
 0x667   : > { %13847 = vmatmul.mubr.msk.f32.vlgmr.msra.gmra.mrb[0].mxu1 %vm358_vm0, %v7928_v53  ;;  %v19696_v54 = vpop.permute.xlu0 %7894  ;;  %v19710_v53 = vld [vmem:[#allocation2 + $0x54] sm:$0xff]  ;;  %v7936_v43 = vmul.f32 %v19434_v50, %v19708_v16  ;;  %v19744_v10 = vld [vmem:[#allocation2 + $0x7c] sm:$0xff]  ;;  %v7941_v60 = vmul.f32 %v19736_v3, %v19499_v40  ;;  %v19774_v37 = vld [vmem:[#allocation2 + $0xa4] sm:$0xff] }
 0x668   : > { %14341 = vmatpush3.bf16.msra.mxu1 %v19250_v41  ;;  %13849 = vmatprep.mubr.msk.f32.mxu1 %vm358_vm0, %v7929_v21  ;;  %v19686_v41 = vpop.permute.xlu1 %7899  ;;  %21707 = vst [vmem:[#allocation24_spill] sm:$0xff] %v19696_v54  ;;  %v7937_v21 = vmul.f32 %v19710_v53, %v19420_v46  ;;  %v19760_v63 = vld [vmem:[#allocation2 + $0x94] sm:$0xff]  ;;  %v19782_v1 = vld [vmem:[#allocation2 + $0xac] sm:$0xff]  ;;  %v7947_v62 = vmul.f32 %v19774_v37, %v19601_v22 }
 0x669   : > { %14343 = vmatprep.subr.bf16.mxu1 %v14342_v7  ;;  %21706 = vst [vmem:[#allocation21_spill] sm:$0xff] %v19686_v41  ;;  %v7945_v35 = vmul.f32 %v19760_v63, %v19578_v55  ;;  %v19798_v55 = vld [vmem:[#allocation2 + $0xc4] sm:$0xff]  ;;  %v19812_v51 = vld [vmem:[#allocation2 + $0xd4] sm:$0xff] }
 0x66a   : > { %v19836_v40 = vld [vmem:[#allocation2 + $0xf4] sm:$0xff] }
 0x66b   : > { %13850 = vmatmul.mubr.msk.f32.gmra.mrb[2].mxu1 %vm358_vm0, %v7930_v49  ;;  %v19722_v49 = vld [vmem:[#allocation2 + $0x64] sm:$0xff] }
 0x66c   : > { %13852 = vmatprep.mubr.msk.f32.mxu1 %vm358_vm0, %v7931_v56  ;;  %14345 = vmatpush3.bf16.msra.mxu1 %v14342_v7  ;;  %v19704_v23 = vpop.permute.xlu1 %7909  ;;  %v19714_v7 = vpop.permute.xlu0 %7904 }
 0x66d   : > { %14347 = vmatprep.subr.bf16.mxu1 %v19677_v34  ;;  %21708 = vst [vmem:[#allocation42_spill] sm:$0xff] %v19704_v23  ;;  %21709 = vst [vmem:[#allocation28_spill] sm:$0xff] %v19714_v7 }
 0x66f   : > { %13853 = vmatmul.mubr.msk.f32.gmra.mrb[4].mxu1 %vm358_vm0, %v7932_v33  ;;  %v7938_v33 = vmul.f32 %v19718_v31, %v19474_v39 }
 0x670   : > { %13855 = vmatprep.mubr.msk.f32.mxu1 %vm358_vm0, %v7933_v32  ;;  %v19725_v56 = vpop.permute.xlu1 %7919  ;;  %v19730_v32 = vld [vmem:[#allocation2 + $0x6c] sm:$0xff] }
 0x671   : > { %21710 = vst [vmem:[#allocation33_spill] sm:$0xff] %v19725_v56 }
 0x673   : > { %13856 = vmatmul.mubr.msk.f32.gmra.mrb[6].mxu1 %vm358_vm0, %v7934_v9  ;;  %v7939_v9 = vmul.f32 %v19722_v49, %v19453_v28  ;;  %v9644_v28 = vld [vmem:[%s20802_s6 + $0x88] sm:$0xff] }
 0x674   : > { %13858 = vmatprep.mubr.msk.f32.mxu1 %vm358_vm0, %v7935_v61  ;;  %v19734_v61 = vpop.permute.xlu0 %7914 }
 0x675   : > { %21711 = vst [vmem:[#allocation4_spill] sm:$0xff] %v19734_v61 }
 0x677   : > { %13859 = vmatmul.mubr.msk.f32.gmra.mrb[8].mxu1 %vm358_vm0, %v7936_v43  ;;  %v7940_v43 = vmul.f32 %v19730_v32, %v19520_v5 }
 0x678   : > { %13861 = vmatprep.mubr.msk.f32.mxu1 %vm358_vm0, %v7937_v21  ;;  %v19742_v21 = vpop.permute.xlu1 %8674  ;;  %v19752_v18 = vpop.permute.xlu0 %7924 }
 0x679   : > { %21712 = vst [vmem:[#allocation26_spill] sm:$0xff] %v19742_v21  ;;  %21713 = vst [vmem:[#allocation13_spill] sm:$0xff] %v19752_v18 }
 0x67b   : > { %13862 = vmatmul.mubr.msk.f32.gmra.mrb[10].mxu1 %vm358_vm0, %v7938_v33  ;;  %v7942_v33 = vmul.f32 %v19744_v10, %v19564_v47  ;;  %v19824_v47 = vld [vmem:[#allocation2 + $0xe4] sm:$0xff] }
 0x67c   : > { %13864 = vmatprep.mubr.msk.f32.mxu1 %vm358_vm0, %v7939_v9  ;;  %v19756_v9 = vld [vmem:[#allocation2 + $0x8c] sm:$0xff]  ;;  %v19763_v52 = vpop.permute.xlu1 %8682  ;;  %v19772_v25 = vpop.permute.xlu0 %8678 }
 0x67f   : > { %13865 = vmatmul.mubr.msk.f32.gmra.mrb[12].mxu1 %vm358_vm0, %v7940_v43  ;;  %v19768_v43 = vld [vmem:[#allocation2 + $0x9c] sm:$0xff] }
 0x680   : > { %13867 = vmatprep.mubr.msk.f32.mxu1 %vm358_vm0, %v7941_v60  ;;  %v7944_v60 = vmul.f32 %v19756_v9, %v19592_v30  ;;  %v19790_v45 = vpop.permute.xlu0 %8690 }
 0x683   : > { %13868 = vmatmul.mubr.msk.f32.gmra.mrb[14].mxu1 %vm358_vm0, %v7942_v33  ;;  %v7946_v33 = vmul.f32 %v19768_v43, %v19615_v29  ;;  %v7949_v29 = vmul.f32 %v19786_v0, %v19629_v12  ;;  %v19820_v12 = vld [vmem:[#allocation2 + $0xdc] sm:$0xff] }
 0x684   : > { %13870 = vmatprep.mubr.msk.f32.mxu1 %vm358_vm0, %v7943_v17  ;;  %v19780_v17 = vpop.permute.xlu1 %8686  ;;  %v19810_v30 = vpop.permute.xlu0 %8698 }
 0x687   : > { %13871 = vmatmul.mubr.msk.f32.gmra.mrb[16].mxu1 %vm358_vm0, %v7944_v60  ;;  %v19794_v60 = vld [vmem:[#allocation2 + $0xbc] sm:$0xff] }
 0x688   : > { %13873 = vmatprep.mubr.msk.f32.mxu1 %vm358_vm0, %v7945_v35  ;;  %v7948_v35 = vmul.f32 %v19782_v1, %v19646_v42  ;;  %v19801_v22 = vpop.permute.xlu1 %8694  ;;  %v7951_v42 = vmul.f32 %v19798_v55, %v19658_v15  ;;  %v19828_v15 = vpop.permute.xlu0 %8706 }
 0x68b   : > { %13874 = vmatmul.mubr.msk.f32.gmra.mrb[18].mxu1 %vm358_vm0, %v7946_v33  ;;  %v19806_v33 = vld [vmem:[#allocation2 + $0xcc] sm:$0xff] }
 0x68c   : > { %13876 = vmatprep.mubr.msk.f32.mxu1 %vm358_vm0, %v7947_v62  ;;  %v7950_v62 = vmul.f32 %v19794_v60, %v19674_v4  ;;  %v7953_v4 = vmul.f32 %v19812_v51, %v19686_v41  ;;  %v19848_v5 = vpop.permute.xlu0 %8714 }
 0x68f   : > { %13877 = vmatmul.mubr.msk.f32.gmra.mrb[20].mxu1 %vm358_vm0, %v7948_v35  ;;  %v7952_v35 = vmul.f32 %v19806_v33, %v19696_v54  ;;  %v7955_v54 = vmul.f32 %v19824_v47, %v19704_v23  ;;  %v8801_v23 = vmul.f32 %v19742_v21, %v19637_v8  ;;  %v8803_v21 = vmul.f32 %v19763_v52, %v19656_v13 }
 0x690   : > { %13879 = vmatprep.mubr.msk.f32.mxu1 %vm358_vm0, %v7949_v29  ;;  %v19818_v29 = vpop.permute.xlu1 %8702  ;;  %v19868_v8 = vpop.permute.xlu0 %8722 }
 0x693   : > { %13880 = vmatmul.mubr.msk.f32.gmra.mrb[22].mxu1 %vm358_vm0, %v7950_v62  ;;  %v19832_v62 = vld [vmem:[#allocation2 + $0xec] sm:$0xff] }
 0x694   : > { %13882 = vmatprep.mubr.msk.f32.mxu1 %vm358_vm0, %v7951_v42  ;;  %v7954_v42 = vmul.f32 %v19820_v12, %v19714_v7  ;;  %v19839_v41 = vpop.permute.xlu1 %8710  ;;  %v7957_v7 = vmul.f32 %v19836_v40, %v19725_v56  ;;  %v9257_v56 = vld [vmem:[%s20802_s6 + $0x78] sm:$0xff] }
 0x697   : > { %13883 = vmatmul.mubr.msk.f32.gmra.mrb[24].mxu1 %vm358_vm0, %v7952_v35  ;;  %v19844_v35 = vld [vmem:[#allocation2 + $0xfc] sm:$0xff] }
 0x698   : > { %13885 = vmatprep.mubr.msk.f32.mxu1 %vm358_vm0, %v7953_v4  ;;  %v7956_v4 = vmul.f32 %v19832_v62, %v19734_v61  ;;  %v9256_v61 = vld [vmem:[%s20802_s6 + $0x70] sm:$0xff] }
 0x69b   : > { %13886 = vmatmul.mubr.msk.f32.gmra.mrb[26].mxu1 %vm358_vm0, %v7954_v42  ;;  %v19856_v42 = vpop.permute.xlu1 %8718 }
 0x69c   : > { %13888 = vmatprep.mubr.msk.f32.mxu1 %vm358_vm0, %v7955_v54  ;;  %v7958_v54 = vmul.f32 %v19844_v35, %v19752_v18  ;;  %v9643_v18 = vld [vmem:[%s20802_s6 + $0x80] sm:$0xff] }
 0x69d   : > { %v19885_v13 = vpack.c.bf16 %v9644_v28, %v9643_v18  ;;  %v19900_v18 = vld [vmem:[#allocation2 + $0x4c] sm:$0xff] }
 0x69f   : > { %13889 = vmatmul.mubr.msk.f32.gmra.mrb[28].mxu1 %vm358_vm0, %v7956_v4  ;;  %v8802_v4 = vmul.f32 %v19772_v25, %v19651_v14  ;;  %v19879_v14 = vpop.permute.xlu1 %8726 }
 0x6a0   : > { %13891 = vmatprep.mubr.msk.f32.mxu1 %vm358_vm0, %v7957_v7  ;;  %v14350_v7 = vpack.c.bf16 %v9257_v56, %v9256_v61  ;;  %21714 = vst [vmem:[#allocation79_spill] sm:$0xff] %v19879_v14  ;;  %v8805_v56 = vmul.f32 %v19790_v45, %v19681_v59  ;;  %v19889_v61 = vpop.permute.xlu0 %8730  ;;  %v8808_v59 = vmul.f32 %v19818_v29, %v19698_v20 }
 0x6a1   : > { %21715 = vst [vmem:[#allocation29_spill] sm:$0xff] %v19889_v61 }
 0x6a3   : > { %13892 = vmatmul.mubr.msk.f32.gmra.mrb[30].mxu1 %vm358_vm0, %v7958_v54  ;;  %v19898_v28 = vpop.permute.xlu1 %8734 }
 0x6a4   : > { %13902 = vmatprep.mubr.msk.f32.mxu1 %vm358_vm0, %v8801_v23  ;;  %v8804_v23 = vmul.f32 %v19780_v17, %v19668_v57  ;;  %v8807_v57 = vmul.f32 %v19810_v30, %v19694_v19  ;;  %v8810_v19 = vmul.f32 %v19710_v53, %v19839_v41 }
 0x6a7   : > { %13903 = vmatmul.mubr.msk.f32.vlgmr.msra.gmra.mrb[0].mxu1 %vm358_vm0, %v8802_v4  ;;  %v19911_v54 = vpop.permute.xlu1 %8742  ;;  %v8811_v4 = vmul.f32 %v19718_v31, %v19848_v5 }
 0x6a8   : > { %14349 = vmatpush3.bf16.msra.mxu1 %v19677_v34  ;;  %13905 = vmatprep.mubr.msk.f32.mxu1 %vm358_vm0, %v8803_v21  ;;  %v8806_v34 = vmul.f32 %v19801_v22, %v19683_v44  ;;  %v19906_v21 = vpop.permute.xlu0 %8738  ;;  %v8809_v44 = vmul.f32 %v19900_v18, %v19828_v15 }
 0x6a9   : > { %14351 = vmatprep.subr.bf16.mxu1 %v14350_v7  ;;  %21716 = vst [vmem:[#allocation17_spill] sm:$0xff] %v19906_v21 }
 0x6ab   : > { %13906 = vmatmul.mubr.msk.f32.gmra.mrb[2].mxu1 %vm358_vm0, %v8804_v23  ;;  %v8812_v23 = vmul.f32 %v19722_v49, %v19856_v42 }
 0x6ac   : > { %13908 = vmatprep.mubr.msk.f32.mxu1 %vm358_vm0, %v8805_v56  ;;  %14353 = vmatpush3.bf16.msra.mxu1 %v14350_v7  ;;  %v19918_v7 = vpop.permute.xlu0 %8746  ;;  %v8813_v56 = vmul.f32 %v19730_v32, %v19868_v8 }
 0x6ad   : > { %14355 = vmatprep.subr.bf16.mxu1 %v19885_v13  ;;  %21717 = vst [vmem:[#allocation18_spill] sm:$0xff] %v19918_v7 }
 0x6af   : > { %13909 = vmatmul.mubr.msk.f32.gmra.mrb[4].mxu1 %vm358_vm0, %v8806_v34  ;;  %v19926_v34 = vpop.permute.xlu1 %8750 }
 0x6b0   : > { %13911 = vmatprep.mubr.msk.f32.mxu1 %vm358_vm0, %v8807_v57  ;;  %21718 = vst [vmem:[#allocation34_spill] sm:$0xff] %v19926_v34  ;;  %v8814_v57 = vmul.f32 %v19736_v3, %v19879_v14 }
 0x6b3   : > { %13912 = vmatmul.mubr.msk.f32.gmra.mrb[6].mxu1 %vm358_vm0, %v8808_v59  ;;  %v19932_v59 = vpop.permute.xlu0 %8754 }
 0x6b4   : > { %13914 = vmatprep.mubr.msk.f32.mxu1 %vm358_vm0, %v8809_v44  ;;  %21719 = vst [vmem:[#allocation80_spill] sm:$0xff] %v19932_v59  ;;  %v8815_v44 = vmul.f32 %v19744_v10, %v19889_v61  ;;  %v8818_v61 = vmul.f32 %v19760_v63, %v19911_v54 }
 0x6b7   : > { %13915 = vmatmul.mubr.msk.f32.gmra.mrb[8].mxu1 %vm358_vm0, %v8810_v19  ;;  %v19937_v19 = vpop.permute.xlu1 %8758 }
 0x6b8   : > { %13917 = vmatprep.mubr.msk.f32.mxu1 %vm358_vm0, %v8811_v4  ;;  %v8816_v4 = vmul.f32 %v19748_v27, %v19898_v28 }
 0x6bb   : > { %13918 = vmatmul.mubr.msk.f32.gmra.mrb[10].mxu1 %vm358_vm0, %v8812_v23  ;;  %v8817_v23 = vmul.f32 %v19756_v9, %v19906_v21  ;;  %v19952_v14 = vpop.permute.xlu1 %8766 }
 0x6bc   : > { %13920 = vmatprep.mubr.msk.f32.mxu1 %vm358_vm0, %v8813_v56  ;;  %v19944_v56 = vpop.permute.xlu0 %8762 }
 0x6bd   : > { %21720 = vst [vmem:[#allocation81_spill] sm:$0xff] %v19944_v56 }
 0x6bf   : > { %13921 = vmatmul.mubr.msk.f32.gmra.mrb[12].mxu1 %vm358_vm0, %v8814_v57  ;;  %v8819_v57 = vmul.f32 %v19768_v43, %v19918_v7  ;;  %v8822_v7 = vmul.f32 %v19786_v0, %v19937_v19 }
 0x6c0   : > { %13923 = vmatprep.mubr.msk.f32.mxu1 %vm358_vm0, %v8815_v44  ;;  %v8820_v44 = vmul.f32 %v19774_v37, %v19926_v34  ;;  %v19958_v21 = vpop.permute.xlu0 %8770 }
 0x6c1   : > { %21721 = vst [vmem:[#allocation82_spill] sm:$0xff] %v19958_v21 }
 0x6c3   : > { %13924 = vmatmul.mubr.msk.f32.gmra.mrb[14].mxu1 %vm358_vm0, %v8816_v4  ;;  %v8821_v4 = vmul.f32 %v19782_v1, %v19932_v59  ;;  %v8824_v59 = vmul.f32 %v19798_v55, %v19952_v14 }
 0x6c4   : > { %13926 = vmatprep.mubr.msk.f32.mxu1 %vm358_vm0, %v8817_v23  ;;  %v19963_v23 = vpop.permute.xlu1 %8774 }
 0x6c5   : > { %21722 = vst [vmem:[#allocation83_spill] sm:$0xff] %v19963_v23 }
 0x6c7   : > { %13927 = vmatmul.mubr.msk.f32.gmra.mrb[16].mxu1 %vm358_vm0, %v8818_v61  ;;  %v8823_v61 = vmul.f32 %v19794_v60, %v19944_v56 }
 0x6c8   : > { %13929 = vmatprep.mubr.msk.f32.mxu1 %vm358_vm0, %v8819_v57  ;;  %v19970_v57 = vpop.permute.xlu0 %8778  ;;  %v19978_v34 = vpop.permute.xlu1 %8782 }
 0x6c9   : > { %21723 = vst [vmem:[#allocation84_spill] sm:$0xff] %v19970_v57  ;;  %21724 = vst [vmem:[#allocation85_spill] sm:$0xff] %v19978_v34 }
 0x6cb   : > { %13930 = vmatmul.mubr.msk.f32.gmra.mrb[18].mxu1 %vm358_vm0, %v8820_v44  ;;  %v8825_v44 = vmul.f32 %v19806_v33, %v19958_v21  ;;  %v8828_v21 = vmul.f32 %v19824_v47, %v19978_v34  ;;  %v10065_v34 = vld [vmem:[%s20802_s6 + $0xa8] sm:$0xff] }
 0x6cc   : > { %13932 = vmatprep.mubr.msk.f32.mxu1 %vm358_vm0, %v8821_v4  ;;  %v8826_v4 = vmul.f32 %v19812_v51, %v19963_v23  ;;  %v19984_v56 = vpop.permute.xlu0 %8786 }
 0x6cd   : > { %21725 = vst [vmem:[#allocation86_spill] sm:$0xff] %v19984_v56 }
 0x6cf   : > { %13933 = vmatmul.mubr.msk.f32.gmra.mrb[20].mxu1 %vm358_vm0, %v8822_v7  ;;  %v8827_v7 = vmul.f32 %v19820_v12, %v19970_v57 }
 0x6d0   : > { %13935 = vmatprep.mubr.msk.f32.mxu1 %vm358_vm0, %v8823_v61  ;;  %v19989_v61 = vpop.permute.xlu1 %8790 }
 0x6d1   : > { %21726 = vst [vmem:[#allocation87_spill] sm:$0xff] %v19989_v61  ;;  %v8830_v57 = vmul.f32 %v19836_v40, %v19989_v61  ;;  %v9192_v61 = vld [vmem:[#allocation2 + $0x54] sm:$0xff] }
 0x6d3   : > { %13936 = vmatmul.mubr.msk.f32.gmra.mrb[22].mxu1 %vm358_vm0, %v8824_v59  ;;  %v8829_v59 = vmul.f32 %v19832_v62, %v19984_v56 }
 0x6d4   : > { %13938 = vmatprep.mubr.msk.f32.mxu1 %vm358_vm0, %v8825_v44  ;;  %v19996_v44 = vpop.permute.xlu0 %8794  ;;  %v20006_v23 = vpop.permute.xlu1 %8798 }
 0x6d5   : > { %21727 = vst [vmem:[#allocation88_spill] sm:$0xff] %v19996_v44  ;;  %21728 = vst [vmem:[#allocation89_spill] sm:$0xff] %v20006_v23 }
 0x6d7   : > { %13939 = vmatmul.mubr.msk.f32.gmra.mrb[24].mxu1 %vm358_vm0, %v8826_v4  ;;  %v20002_v4 = vld [vmem:[#allocation2 + $0x104] sm:$0xff] }
 0x6d8   : > { %13941 = vmatprep.mubr.msk.f32.mxu1 %vm358_vm0, %v8827_v7  ;;  %v8831_v7 = vmul.f32 %v19844_v35, %v19996_v44  ;;  %v8832_v56 = vmul.f32 %v20002_v4, %v20006_v23  ;;  %v9646_v44 = vld [vmem:[%s20802_s6 + $0x98] sm:$0xff]  ;;  %v9224_v23 = vmul.f32 %v9192_v61, %v19295_v48 }
 0x6db   : > { %13942 = vmatmul.mubr.msk.f32.gmra.mrb[26].mxu1 %vm358_vm0, %v8828_v21  ;;  %v9222_v21 = vmul.f32 %v19698_v20, %v19305_v36  ;;  %v9193_v20 = vld [vmem:[#allocation2 + $0x5c] sm:$0xff] }
 0x6dc   : > { %13944 = vmatprep.mubr.msk.f32.mxu1 %vm358_vm0, %v8829_v59  ;;  %v9645_v59 = vld [vmem:[%s20802_s6 + $0x90] sm:$0xff]  ;;  %v10064_v36 = vld [vmem:[%s20802_s6 + $0xa0] sm:$0xff] }
 0x6dd   : > { %v20035_v61 = vpack.c.bf16 %v10065_v34, %v10064_v36  ;;  %v20044_v36 = vld [vmem:[#allocation2 + $0x84] sm:$0xff] }
 0x6df   : > { %13945 = vmatmul.mubr.msk.f32.gmra.mrb[28].mxu1 %vm358_vm0, %v8830_v57  ;;  %v9223_v57 = vmul.f32 %v19271_v24, %v19708_v16  ;;  %v9225_v16 = vmul.f32 %v9193_v20, %v19331_v11  ;;  %v9230_v20 = vmul.f32 %v20044_v36, %v19378_v2 }
 0x6e0   : > { %13947 = vmatprep.mubr.msk.f32.mxu1 %vm358_vm0, %v8831_v7  ;;  %v14358_v7 = vpack.c.bf16 %v9646_v44, %v9645_v59  ;;  %v9196_v59 = vld [vmem:[#allocation2 + $0x74] sm:$0xff] }
 0x6e3   : > { %13948 = vmatmul.mubr.msk.f32.gmra.mrb[30].mxu1 %vm358_vm0, %v8832_v56  ;;  %v9194_v56 = vld [vmem:[#allocation2 + $0x64] sm:$0xff] }
 0x6e4   : > { %13958 = vmatprep.mubr.msk.f32.mxu1 %vm358_vm0, %v9222_v21  ;;  %v9226_v44 = vmul.f32 %v9194_v56, %v19315_v26  ;;  %v9195_v21 = vld [vmem:[#allocation2 + $0x6c] sm:$0xff] }
 0x6e5   : > { %v20050_v56 = vld [vmem:[#allocation2 + $0x8c] sm:$0xff] }
 0x6e7   : > { %13959 = vmatmul.mubr.msk.f32.vlgmr.msra.gmra.mrb[0].mxu1 %vm358_vm0, %v9223_v57  ;;  %v9227_v57 = vmul.f32 %v9195_v21, %v19363_v38  ;;  %v21729_v21 = vld [vmem:[#allocation51_spill] sm:$0xff]  ;;  %v9617_v38 = vld [vmem:[#allocation2 + $0x78] sm:$0xff] }
 0x6e8   : > { %14357 = vmatpush3.bf16.msra.mxu1 %v19885_v13  ;;  %13961 = vmatprep.mubr.msk.f32.mxu1 %vm358_vm0, %v9224_v23  ;;  %v9228_v13 = vmul.f32 %v9196_v59, %v19342_v58  ;;  %v9197_v23 = vld [vmem:[#allocation2 + $0x7c] sm:$0xff]  ;;  %v9234_v59 = vmul.f32 %v19774_v37, %v21729_v21 }
 0x6e9   : > { %14359 = vmatprep.subr.bf16.mxu1 %v14358_v7  ;;  %v9229_v34 = vmul.f32 %v9197_v23, %v19397_v6  ;;  %v21731_v23 = vld [vmem:[#allocation57_spill] sm:$0xff] }
 0x6ea   : > { %v9613_v58 = vld [vmem:[#allocation2 + $0x58] sm:$0xff] }
 0x6eb   : > { %13962 = vmatmul.mubr.msk.f32.gmra.mrb[2].mxu1 %vm358_vm0, %v9225_v16  ;;  %v9232_v16 = vmul.f32 %v19760_v63, %v19420_v46 }
 0x6ec   : > { %13964 = vmatprep.mubr.msk.f32.mxu1 %vm358_vm0, %v9226_v44  ;;  %14361 = vmatpush3.bf16.msra.mxu1 %v14358_v7  ;;  %v9231_v7 = vmul.f32 %v20050_v56, %v19434_v50  ;;  %v9233_v44 = vmul.f32 %v19768_v43, %v19474_v39  ;;  %v20102_v39 = vld [vmem:[#allocation2 + $0x114] sm:$0xff] }
 0x6ed   : > { %14363 = vmatprep.subr.bf16.mxu1 %v20035_v61 }
 0x6ef   : > { %13965 = vmatmul.mubr.msk.f32.gmra.mrb[4].mxu1 %vm358_vm0, %v9227_v57  ;;  %v21730_v57 = vld [vmem:[#allocation61_spill] sm:$0xff] }
 0x6f0   : > { %13967 = vmatprep.mubr.msk.f32.mxu1 %vm358_vm0, %v9228_v13  ;;  %v9235_v13 = vmul.f32 %v19782_v1, %v21730_v57  ;;  %v21735_v57 = vld [vmem:[#allocation66_spill] sm:$0xff] }
 0x6f3   : > { %13968 = vmatmul.mubr.msk.f32.gmra.mrb[6].mxu1 %vm358_vm0, %v9229_v34  ;;  %v9236_v34 = vmul.f32 %v19786_v0, %v21731_v23  ;;  %v9240_v23 = vmul.f32 %v19812_v51, %v21735_v57 }
 0x6f4   : > { %13970 = vmatprep.mubr.msk.f32.mxu1 %vm358_vm0, %v9230_v20  ;;  %v21732_v20 = vld [vmem:[#allocation73_spill] sm:$0xff] }
 0x6f7   : > { %13971 = vmatmul.mubr.msk.f32.gmra.mrb[8].mxu1 %vm358_vm0, %v9231_v7  ;;  %v9237_v7 = vmul.f32 %v19794_v60, %v21732_v20  ;;  %v21737_v20 = vld [vmem:[#allocation15_spill] sm:$0xff] }
 0x6f8   : > { %13973 = vmatprep.mubr.msk.f32.mxu1 %vm358_vm0, %v9232_v16  ;;  %v21733_v16 = vld [vmem:[#allocation69_spill] sm:$0xff] }
 0x6f9   : > { %v9238_v21 = vmul.f32 %v19798_v55, %v21733_v16  ;;  %v9242_v16 = vmul.f32 %v19824_v47, %v21737_v20  ;;  %v21741_v20 = vld [vmem:[#allocation10_spill] sm:$0xff] }
 0x6fb   : > { %13974 = vmatmul.mubr.msk.f32.gmra.mrb[10].mxu1 %vm358_vm0, %v9233_v44  ;;  %v21734_v44 = vld [vmem:[#allocation19_spill] sm:$0xff] }
 0x6fc   : > { %13976 = vmatprep.mubr.msk.f32.mxu1 %vm358_vm0, %v9234_v59  ;;  %v9239_v59 = vmul.f32 %v19806_v33, %v21734_v44  ;;  %v21739_v44 = vld [vmem:[#allocation16_spill] sm:$0xff] }
 0x6fd   : > { %v9244_v57 = vmul.f32 %v19836_v40, %v21739_v44 }
 0x6ff   : > { %13977 = vmatmul.mubr.msk.f32.gmra.mrb[12].mxu1 %vm358_vm0, %v9235_v13  ;;  %v21736_v13 = vld [vmem:[#allocation11_spill] sm:$0xff] }
 0x700   : > { %13979 = vmatprep.mubr.msk.f32.mxu1 %vm358_vm0, %v9236_v34  ;;  %v9241_v34 = vmul.f32 %v19820_v12, %v21736_v13  ;;  %v20098_v13 = vld [vmem:[#allocation2 + $0x10c] sm:$0xff] }
 0x703   : > { %13980 = vmatmul.mubr.msk.f32.gmra.mrb[14].mxu1 %vm358_vm0, %v9237_v7 }
 0x704   : > { %13982 = vmatprep.mubr.msk.f32.mxu1 %vm358_vm0, %v9238_v21  ;;  %v21738_v21 = vld [vmem:[#allocation6_spill] sm:$0xff] }
 0x705   : > { %v9243_v7 = vmul.f32 %v19832_v62, %v21738_v21 }
 0x707   : > { %13983 = vmatmul.mubr.msk.f32.gmra.mrb[16].mxu1 %vm358_vm0, %v9239_v59 }
 0x708   : > { %13985 = vmatprep.mubr.msk.f32.mxu1 %vm358_vm0, %v9240_v23  ;;  %v21740_v23 = vld [vmem:[#allocation9_spill] sm:$0xff] }
 0x709   : > { %v9245_v59 = vmul.f32 %v19844_v35, %v21740_v23  ;;  %v20112_v23 = vld [vmem:[#allocation2 + $0x124] sm:$0xff] }
 0x70b   : > { %13986 = vmatmul.mubr.msk.f32.gmra.mrb[18].mxu1 %vm358_vm0, %v9241_v34  ;;  %v9246_v34 = vmul.f32 %v20002_v4, %v21741_v20  ;;  %v21744_v20 = vld [vmem:[#allocation28_spill] sm:$0xff] }
 0x70c   : > { %13988 = vmatprep.mubr.msk.f32.mxu1 %vm358_vm0, %v9242_v16  ;;  %v21742_v16 = vld [vmem:[#allocation24_spill] sm:$0xff] }
 0x70d   : > { %v9247_v44 = vmul.f32 %v20098_v13, %v21742_v16  ;;  %v20122_v16 = vld [vmem:[#allocation2 + $0x134] sm:$0xff] }
 0x70f   : > { %13989 = vmatmul.mubr.msk.f32.gmra.mrb[20].mxu1 %vm358_vm0, %v9243_v7  ;;  %v20108_v7 = vld [vmem:[#allocation2 + $0x11c] sm:$0xff] }
 0x710   : > { %13991 = vmatprep.mubr.msk.f32.mxu1 %vm358_vm0, %v9244_v57  ;;  %v21743_v57 = vld [vmem:[#allocation21_spill] sm:$0xff]  ;;  %v9249_v46 = vmul.f32 %v20108_v7, %v21744_v20 }
 0x711   : > { %v9248_v21 = vmul.f32 %v20102_v39, %v21743_v57  ;;  %v21746_v57 = vld [vmem:[#allocation4_spill] sm:$0xff]  ;;  %v21748_v20 = vld [vmem:[#allocation13_spill] sm:$0xff] }
 0x713   : > { %13992 = vmatmul.mubr.msk.f32.gmra.mrb[22].mxu1 %vm358_vm0, %v9245_v59  ;;  %v20118_v59 = vld [vmem:[#allocation2 + $0x12c] sm:$0xff] }
 0x714   : > { %13994 = vmatprep.mubr.msk.f32.mxu1 %vm358_vm0, %v9246_v34  ;;  %v21745_v34 = vld [vmem:[#allocation42_spill] sm:$0xff]  ;;  %v9251_v2 = vmul.f32 %v20118_v59, %v21746_v57 }
 0x715   : > { %v9250_v50 = vmul.f32 %v20112_v23, %v21745_v34  ;;  %v9611_v57 = vld [vmem:[#allocation2 + $0x48] sm:$0xff] }
 0x717   : > { %13995 = vmatmul.mubr.msk.f32.gmra.mrb[24].mxu1 %vm358_vm0, %v9247_v44  ;;  %v20128_v44 = vld [vmem:[#allocation2 + $0x13c] sm:$0xff] }
 0x718   : > { %13997 = vmatprep.mubr.msk.f32.mxu1 %vm358_vm0, %v9248_v21  ;;  %v21747_v21 = vld [vmem:[#allocation33_spill] sm:$0xff]  ;;  %v9253_v34 = vmul.f32 %v20128_v44, %v21748_v20  ;;  %v10486_v20 = vld [vmem:[%s20802_s6 + $0xc8] sm:$0xff] }
 0x719   : > { %v9252_v6 = vmul.f32 %v20122_v16, %v21747_v21 }
 0x71b   : > { %13998 = vmatmul.mubr.msk.f32.gmra.mrb[26].mxu1 %vm358_vm0, %v9249_v46  ;;  %v10066_v46 = vld [vmem:[%s20802_s6 + $0xb0] sm:$0xff] }
 0x71c   : > { %14000 = vmatprep.mubr.msk.f32.mxu1 %vm358_vm0, %v9250_v50  ;;  %v10067_v50 = vld [vmem:[%s20802_s6 + $0xb8] sm:$0xff] }
 0x71d   : > { %v14366_v21 = vpack.c.bf16 %v10067_v50, %v10066_v46  ;;  %v9615_v46 = vld [vmem:[#allocation2 + $0x68] sm:$0xff]  ;;  %v9616_v50 = vld [vmem:[#allocation2 + $0x70] sm:$0xff] }
 0x71f   : > { %14001 = vmatmul.mubr.msk.f32.gmra.mrb[28].mxu1 %vm358_vm0, %v9251_v2  ;;  %v9612_v2 = vld [vmem:[#allocation2 + $0x50] sm:$0xff] }
 0x720   : > { %14003 = vmatprep.mubr.msk.f32.mxu1 %vm358_vm0, %v9252_v6  ;;  %v10485_v6 = vld [vmem:[%s20802_s6 + $0xc0] sm:$0xff] }
 0x723   : > { %14004 = vmatmul.mubr.msk.f32.gmra.mrb[30].mxu1 %vm358_vm0, %v9253_v34  ;;  %v14370_v34 = vpack.c.bf16 %v10486_v20, %v10485_v6  ;;  %v21750_v20 = vld [vmem:[#allocation56_spill] sm:$0xff]  ;;  %v21752_v6 = vld [vmem:[#allocation65_spill] sm:$0xff] }
 0x724   : > { %14014 = vmatprep.mubr.msk.f32.mxu1 %vm358_vm0, %v9611_v57  ;;  %v9614_v57 = vld [vmem:[#allocation2 + $0x60] sm:$0xff] }
 0x727   : > { %14015 = vmatmul.mubr.msk.f32.vlgmr.msra.gmra.mrb[0].mxu1 %vm358_vm0, %v9612_v2  ;;  %v9618_v2 = vld [vmem:[#allocation2 + $0x80] sm:$0xff] }
 0x728   : > { %14365 = vmatpush3.bf16.msra.mxu1 %v20035_v61  ;;  %14017 = vmatprep.mubr.msk.f32.mxu1 %vm358_vm0, %v9613_v58  ;;  %v15004_v58 = vld [vmem:[#allocation2 + $0x88] sm:$0xff] }
 0x729   : > { %14367 = vmatprep.subr.bf16.mxu1 %v14366_v21  ;;  %v21749_v61 = vld [vmem:[#allocation54_spill] sm:$0xff] }
 0x72b   : > { %14018 = vmatmul.mubr.msk.f32.gmra.mrb[2].mxu1 %vm358_vm0, %v9614_v57  ;;  %v21753_v57 = vld [vmem:[#allocation68_spill] sm:$0xff] }
 0x72c   : > { %14020 = vmatprep.mubr.msk.f32.mxu1 %vm358_vm0, %v9615_v46  ;;  %14369 = vmatpush3.bf16.msra.mxu1 %v14366_v21  ;;  %v21751_v21 = vld [vmem:[#allocation59_spill] sm:$0xff]  ;;  %v21755_v46 = vld [vmem:[#allocation72_spill] sm:$0xff] }
 0x72d   : > { %14371 = vmatprep.subr.bf16.mxu1 %v14370_v34 }
 0x72f   : > { %14021 = vmatmul.mubr.msk.f32.gmra.mrb[4].mxu1 %vm358_vm0, %v9616_v50  ;;  %v21756_v50 = vld [vmem:[#allocation64_spill] sm:$0xff] }
 0x730   : > { %14023 = vmatprep.mubr.msk.f32.mxu1 %vm358_vm0, %v9617_v38  ;;  %v21754_v38 = vld [vmem:[#allocation70_spill] sm:$0xff] }
 0x733   : > { %14024 = vmatmul.mubr.msk.f32.gmra.mrb[6].mxu1 %vm358_vm0, %v9618_v2  ;;  %v21757_v2 = vld [vmem:[#allocation74_spill] sm:$0xff] }
 0x734   : > { %14026 = vmatprep.mubr.msk.f32.mxu1 %vm358_vm0, %v15004_v58  ;;  %v21758_v58 = vld [vmem:[#allocation30_spill] sm:$0xff] }
 0x737   : > { %14027 = vmatmul.mubr.msk.f32.gmra.mrb[8].mxu1 %vm358_vm0, %v21749_v61  ;;  %v21759_v61 = vld [vmem:[#allocation32_spill] sm:$0xff] }
 0x738   : > { %14029 = vmatprep.mubr.msk.f32.mxu1 %vm358_vm0, %v21750_v20  ;;  %v21760_v20 = vld [vmem:[#allocation8_spill] sm:$0xff] }
 0x73b   : > { %14030 = vmatmul.mubr.msk.f32.gmra.mrb[10].mxu1 %vm358_vm0, %v21751_v21  ;;  %v21761_v21 = vld [vmem:[#allocation5_spill] sm:$0xff] }
 0x73c   : > { %14032 = vmatprep.mubr.msk.f32.mxu1 %vm358_vm0, %v21752_v6  ;;  %v21762_v6 = vld [vmem:[#allocation25_spill] sm:$0xff] }
 0x73f   : > { %14033 = vmatmul.mubr.msk.f32.gmra.mrb[12].mxu1 %vm358_vm0, %v21753_v57  ;;  %v21763_v57 = vld [vmem:[#allocation12_spill] sm:$0xff] }
 0x740   : > { %14035 = vmatprep.mubr.msk.f32.mxu1 %vm358_vm0, %v21754_v38  ;;  %v20189_v38 = vld [vmem:[#allocation2 + $0x108] sm:$0xff] }
 0x743   : > { %14036 = vmatmul.mubr.msk.f32.gmra.mrb[14].mxu1 %vm358_vm0, %v21755_v46  ;;  %v20193_v46 = vld [vmem:[#allocation2 + $0x110] sm:$0xff] }
 0x744   : > { %14038 = vmatprep.mubr.msk.f32.mxu1 %vm358_vm0, %v21756_v50  ;;  %v20197_v50 = vld [vmem:[#allocation2 + $0x118] sm:$0xff] }
 0x745   : > { %21764 = vst [vmem:[#allocation90_spill] sm:$0xff] %v20197_v50 }
 0x747   : > { %14039 = vmatmul.mubr.msk.f32.gmra.mrb[16].mxu1 %vm358_vm0, %v21757_v2  ;;  %v20201_v2 = vld [vmem:[#allocation2 + $0x120] sm:$0xff] }
 0x748   : > { %14041 = vmatprep.mubr.msk.f32.mxu1 %vm358_vm0, %v21758_v58  ;;  %21765 = vst [vmem:[#allocation91_spill] sm:$0xff] %v20201_v2  ;;  %v20205_v58 = vld [vmem:[#allocation2 + $0x128] sm:$0xff] }
 0x749   : > { %21766 = vst [vmem:[#allocation92_spill] sm:$0xff] %v20205_v58 }
 0x74b   : > { %14042 = vmatmul.mubr.msk.f32.gmra.mrb[18].mxu1 %vm358_vm0, %v21759_v61  ;;  %v20209_v61 = vld [vmem:[#allocation2 + $0x130] sm:$0xff] }
 0x74c   : > { %14044 = vmatprep.mubr.msk.f32.mxu1 %vm358_vm0, %v21760_v20  ;;  %21767 = vst [vmem:[#allocation93_spill] sm:$0xff] %v20209_v61  ;;  %v20213_v20 = vld [vmem:[#allocation2 + $0x138] sm:$0xff] }
 0x74d   : > { %21768 = vst [vmem:[#allocation94_spill] sm:$0xff] %v20213_v20 }
 0x74f   : > { %14045 = vmatmul.mubr.msk.f32.gmra.mrb[20].mxu1 %vm358_vm0, %v21761_v21  ;;  %v21769_v21 = vld [vmem:[#allocation26_spill] sm:$0xff] }
 0x750   : > { %14047 = vmatprep.mubr.msk.f32.mxu1 %vm358_vm0, %v21762_v6  ;;  %v10032_v6 = vmul.f32 %v19900_v18, %v21769_v21  ;;  %v10034_v18 = vmul.f32 %v19718_v31, %v19763_v52  ;;  %v10874_v21 = vld [vmem:[%s20802_s6 + $0xe0] sm:$0xff]  ;;  %v10036_v31 = vmul.f32 %v19730_v32, %v19790_v45  ;;  %v10040_v32 = vmul.f32 %v19756_v9, %v19828_v15 }
 0x751   : > { %v10044_v9 = vmul.f32 %v19782_v1, %v19868_v8 }
 0x753   : > { %14048 = vmatmul.mubr.msk.f32.gmra.mrb[22].mxu1 %vm358_vm0, %v21763_v57  ;;  %v20219_v57 = vld [vmem:[#allocation2 + $0x140] sm:$0xff] }
 0x754   : > { %14050 = vmatprep.mubr.msk.f32.mxu1 %vm358_vm0, %v20189_v38 }
 0x757   : > { %14051 = vmatmul.mubr.msk.f32.gmra.mrb[24].mxu1 %vm358_vm0, %v20193_v46 }
 0x758   : > { %14053 = vmatprep.mubr.msk.f32.mxu1 %vm358_vm0, %v20197_v50  ;;  %v10875_v50 = vld [vmem:[%s20802_s6 + $0xe8] sm:$0xff] }
 0x75b   : > { %14054 = vmatmul.mubr.msk.f32.gmra.mrb[26].mxu1 %vm358_vm0, %v20201_v2  ;;  %v10487_v2 = vld [vmem:[%s20802_s6 + $0xd0] sm:$0xff] }
 0x75c   : > { %14056 = vmatprep.mubr.msk.f32.mxu1 %vm358_vm0, %v20205_v58  ;;  %v10488_v58 = vld [vmem:[%s20802_s6 + $0xd8] sm:$0xff] }
 0x75f   : > { %14057 = vmatmul.mubr.msk.f32.gmra.mrb[28].mxu1 %vm358_vm0, %v20209_v61  ;;  %v14374_v61 = vpack.c.bf16 %v10488_v58, %v10487_v2  ;;  %v20244_v2 = vpack.c.bf16 %v10875_v50, %v10874_v21  ;;  %v10037_v58 = vmul.f32 %v19736_v3, %v19801_v22  ;;  %v10041_v3 = vmul.f32 %v19760_v63, %v19839_v41  ;;  %v21770_v50 = vld [vmem:[#allocation79_spill] sm:$0xff]  ;;  %v21773_v21 = vld [vmem:[#allocation18_spill] sm:$0xff] }
 0x760   : > { %14059 = vmatprep.mubr.msk.f32.mxu1 %vm358_vm0, %v20213_v20  ;;  %v10033_v20 = vmul.f32 %v19710_v53, %v19772_v25  ;;  %v10035_v53 = vmul.f32 %v19722_v49, %v19780_v17  ;;  %v10039_v49 = vmul.f32 %v19748_v27, %v19818_v29  ;;  %v10043_v27 = vmul.f32 %v19774_v37, %v19856_v42 }
 0x761   : > { %v10045_v63 = vmul.f32 %v19786_v0, %v21770_v50  ;;  %v10047_v37 = vmul.f32 %v19798_v55, %v19898_v28  ;;  %v10049_v0 = vmul.f32 %v19812_v51, %v19911_v54  ;;  %v10053_v51 = vmul.f32 %v19836_v40, %v19937_v19 }
 0x763   : > { %14060 = vmatmul.mubr.msk.f32.gmra.mrb[30].mxu1 %vm358_vm0, %v20219_v57 }
 0x764   : > { %14070 = vmatprep.mubr.msk.f32.mxu1 %vm358_vm0, %v10032_v6  ;;  %v21774_v6 = vld [vmem:[#allocation34_spill] sm:$0xff] }
 0x765   : > { %v10051_v55 = vmul.f32 %v19824_v47, %v21774_v6  ;;  %v10055_v47 = vmul.f32 %v20002_v4, %v19952_v14 }
 0x767   : > { %14071 = vmatmul.mubr.msk.f32.vlgmr.msra.gmra.mrb[0].mxu1 %vm358_vm0, %v10033_v20  ;;  %v21772_v20 = vld [vmem:[#allocation17_spill] sm:$0xff] }
 0x768   : > { %14373 = vmatpush3.bf16.msra.mxu1 %v14370_v34  ;;  %14073 = vmatprep.mubr.msk.f32.mxu1 %vm358_vm0, %v10034_v18  ;;  %v10038_v34 = vmul.f32 %v19744_v10, %v19810_v30  ;;  %v10042_v10 = vmul.f32 %v19768_v43, %v19848_v5  ;;  %v10048_v1 = vmul.f32 %v19806_v33, %v21772_v20  ;;  %v21775_v18 = vld [vmem:[#allocation80_spill] sm:$0xff] }
 0x769   : > { %14375 = vmatprep.subr.bf16.mxu1 %v14374_v61  ;;  %v10052_v33 = vmul.f32 %v19832_v62, %v21775_v18 }
 0x76b   : > { %14074 = vmatmul.mubr.msk.f32.gmra.mrb[2].mxu1 %vm358_vm0, %v10035_v53  ;;  %v21776_v53 = vld [vmem:[#allocation81_spill] sm:$0xff] }
 0x76c   : > { %14076 = vmatprep.mubr.msk.f32.mxu1 %vm358_vm0, %v10036_v31  ;;  %14377 = vmatpush3.bf16.msra.mxu1 %v14374_v61  ;;  %v21771_v61 = vld [vmem:[#allocation29_spill] sm:$0xff]  ;;  %v21777_v31 = vld [vmem:[#allocation82_spill] sm:$0xff] }
 0x76d   : > { %14379 = vmatprep.subr.bf16.mxu1 %v20244_v2  ;;  %v10046_v43 = vmul.f32 %v19794_v60, %v21771_v61  ;;  %v10050_v60 = vmul.f32 %v19820_v12, %v21773_v21  ;;  %v10054_v12 = vmul.f32 %v19844_v35, %v21776_v53  ;;  %v10056_v62 = vmul.f32 %v20098_v13, %v21777_v31 }
 0x76f   : > { %14077 = vmatmul.mubr.msk.f32.gmra.mrb[4].mxu1 %vm358_vm0, %v10037_v58  ;;  %v21778_v58 = vld [vmem:[#allocation83_spill] sm:$0xff] }
 0x770   : > { %14079 = vmatprep.mubr.msk.f32.mxu1 %vm358_vm0, %v10038_v34  ;;  %v10057_v34 = vmul.f32 %v20102_v39, %v21778_v58 }
 0x773   : > { %14080 = vmatmul.mubr.msk.f32.gmra.mrb[6].mxu1 %vm358_vm0, %v10039_v49  ;;  %v21779_v49 = vld [vmem:[#allocation84_spill] sm:$0xff] }
 0x774   : > { %14082 = vmatprep.mubr.msk.f32.mxu1 %vm358_vm0, %v10040_v32  ;;  %v10058_v32 = vmul.f32 %v20108_v7, %v21779_v49 }
 0x777   : > { %14083 = vmatmul.mubr.msk.f32.gmra.mrb[8].mxu1 %vm358_vm0, %v10041_v3  ;;  %v21780_v3 = vld [vmem:[#allocation85_spill] sm:$0xff] }
 0x778   : > { %14085 = vmatprep.mubr.msk.f32.mxu1 %vm358_vm0, %v10042_v10  ;;  %v10059_v10 = vmul.f32 %v20112_v23, %v21780_v3  ;;  %v21797_v3 = vld [vmem:[#allocation69_spill] sm:$0xff] }
 0x77b   : > { %14086 = vmatmul.mubr.msk.f32.gmra.mrb[10].mxu1 %vm358_vm0, %v10043_v27  ;;  %v21781_v27 = vld [vmem:[#allocation86_spill] sm:$0xff] }
 0x77c   : > { %14088 = vmatprep.mubr.msk.f32.mxu1 %vm358_vm0, %v10044_v9  ;;  %v10060_v9 = vmul.f32 %v20118_v59, %v21781_v27 }
 0x77f   : > { %14089 = vmatmul.mubr.msk.f32.gmra.mrb[12].mxu1 %vm358_vm0, %v10045_v63  ;;  %v21782_v63 = vld [vmem:[#allocation87_spill] sm:$0xff] }
 0x780   : > { %14091 = vmatprep.mubr.msk.f32.mxu1 %vm358_vm0, %v10046_v43  ;;  %v10061_v43 = vmul.f32 %v20122_v16, %v21782_v63  ;;  %v20409_v63 = vld [vmem:[#allocation2 + $0xec] sm:$0xff] }
 0x783   : > { %14092 = vmatmul.mubr.msk.f32.gmra.mrb[14].mxu1 %vm358_vm0, %v10047_v37  ;;  %v20325_v37 = vld [vmem:[#allocation2 + $0x144] sm:$0xff] }
 0x784   : > { %14094 = vmatprep.mubr.msk.f32.mxu1 %vm358_vm0, %v10048_v1  ;;  %v21783_v1 = vld [vmem:[#allocation88_spill] sm:$0xff] }
 0x787   : > { %14095 = vmatmul.mubr.msk.f32.gmra.mrb[16].mxu1 %vm358_vm0, %v10049_v0  ;;  %v10062_v0 = vmul.f32 %v20128_v44, %v21783_v1  ;;  %v21793_v1 = vld [vmem:[#allocation51_spill] sm:$0xff] }
 0x788   : > { %14097 = vmatprep.mubr.msk.f32.mxu1 %vm358_vm0, %v10050_v60  ;;  %v21784_v60 = vld [vmem:[#allocation89_spill] sm:$0xff] }
 0x78b   : > { %14098 = vmatmul.mubr.msk.f32.gmra.mrb[18].mxu1 %vm358_vm0, %v10051_v55  ;;  %v10063_v55 = vmul.f32 %v20325_v37, %v21784_v60  ;;  %v20399_v60 = vld [vmem:[#allocation2 + $0xdc] sm:$0xff] }
 0x78c   : > { %14100 = vmatprep.mubr.msk.f32.mxu1 %vm358_vm0, %v10052_v33  ;;  %v21785_v33 = vld [vmem:[#allocation41_spill] sm:$0xff] }
 0x78f   : > { %14101 = vmatmul.mubr.msk.f32.gmra.mrb[20].mxu1 %vm358_vm0, %v10053_v51  ;;  %v10453_v51 = vmul.f32 %v20044_v36, %v21785_v33  ;;  %v20368_v33 = vld [vmem:[#allocation2 + $0xac] sm:$0xff] }
 0x790   : > { %14103 = vmatprep.mubr.msk.f32.mxu1 %vm358_vm0, %v10054_v12  ;;  %v10876_v12 = vld [vmem:[%s20802_s6 + $0xf0] sm:$0xff] }
 0x793   : > { %14104 = vmatmul.mubr.msk.f32.gmra.mrb[22].mxu1 %vm358_vm0, %v10055_v47  ;;  %v10877_v47 = vld [vmem:[%s20802_s6 + $0xf8] sm:$0xff] }
 0x794   : > { %14106 = vmatprep.mubr.msk.f32.mxu1 %vm358_vm0, %v10056_v62  ;;  %v20342_v62 = vld [vmem:[#allocation2 + $0x94] sm:$0xff] }
 0x795   : > { %v10455_v36 = vmul.f32 %v20342_v62, %v19295_v48 }
 0x797   : > { %14107 = vmatmul.mubr.msk.f32.gmra.mrb[24].mxu1 %vm358_vm0, %v10057_v34  ;;  %v10454_v34 = vmul.f32 %v20050_v56, %v19271_v24 }
 0x798   : > { %14109 = vmatprep.mubr.msk.f32.mxu1 %vm358_vm0, %v10058_v32  ;;  %v14382_v32 = vpack.c.bf16 %v10877_v47, %v10876_v12 }
 0x79b   : > { %14110 = vmatmul.mubr.msk.f32.gmra.mrb[26].mxu1 %vm358_vm0, %v10059_v10  ;;  %v20349_v10 = vld [vmem:[#allocation2 + $0x9c] sm:$0xff] }
 0x79c   : > { %14112 = vmatprep.mubr.msk.f32.mxu1 %vm358_vm0, %v10060_v9  ;;  %v11295_v9 = vld [vmem:[%s20802_s6 + $0x100] sm:$0xff]  ;;  %v10456_v24 = vmul.f32 %v20349_v10, %v19331_v11 }
 0x79d   : > { %v21787_v11 = vld [vmem:[#allocation14_spill] sm:$0xff] }
 0x79f   : > { %14113 = vmatmul.mubr.msk.f32.gmra.mrb[28].mxu1 %vm358_vm0, %v10061_v43  ;;  %v11296_v43 = vld [vmem:[%s20802_s6 + $0x108] sm:$0xff] }
 0x7a0   : > { %14115 = vmatprep.mubr.msk.f32.mxu1 %vm358_vm0, %v10062_v0  ;;  %v20358_v0 = vld [vmem:[#allocation2 + $0xa4] sm:$0xff]  ;;  %v20364_v48 = vpack.c.bf16 %v11296_v43, %v11295_v9 }
 0x7a3   : > { %14116 = vmatmul.mubr.msk.f32.gmra.mrb[30].mxu1 %vm358_vm0, %v10063_v55  ;;  %v10457_v55 = vmul.f32 %v20358_v0, %v19315_v26  ;;  %v20382_v26 = vld [vmem:[#allocation2 + $0xc4] sm:$0xff] }
 0x7a4   : > { %14126 = vmatprep.mubr.msk.f32.mxu1 %vm358_vm0, %v10453_v51  ;;  %v20371_v51 = vld [vmem:[#allocation2 + $0xb4] sm:$0xff] }
 0x7a5   : > { %v10459_v47 = vmul.f32 %v20371_v51, %v21787_v11  ;;  %v21791_v11 = vld [vmem:[#allocation48_spill] sm:$0xff] }
 0x7a7   : > { %14127 = vmatmul.mubr.msk.f32.vlgmr.msra.gmra.mrb[0].mxu1 %vm358_vm0, %v10454_v34  ;;  %v20379_v34 = vld [vmem:[#allocation2 + $0xbc] sm:$0xff] }
 0x7a8   : > { %14381 = vmatpush3.bf16.msra.mxu1 %v20244_v2  ;;  %14129 = vmatprep.mubr.msk.f32.mxu1 %vm358_vm0, %v10455_v36  ;;  %v21786_v2 = vld [vmem:[#allocation45_spill] sm:$0xff]  ;;  %v21788_v36 = vld [vmem:[#allocation47_spill] sm:$0xff] }
 0x7a9   : > { %14383 = vmatprep.subr.bf16.mxu1 %v14382_v32  ;;  %v10458_v12 = vmul.f32 %v20368_v33, %v21786_v2  ;;  %v10460_v9 = vmul.f32 %v20379_v34, %v21788_v36  ;;  %v21790_v2 = vld [vmem:[#allocation50_spill] sm:$0xff] }
 0x7aa   : > { %v20402_v36 = vld [vmem:[#allocation2 + $0xe4] sm:$0xff] }
 0x7ab   : > { %14130 = vmatmul.mubr.msk.f32.gmra.mrb[2].mxu1 %vm358_vm0, %v10456_v24  ;;  %v20389_v24 = vld [vmem:[#allocation2 + $0xcc] sm:$0xff] }
 0x7ac   : > { %14132 = vmatprep.mubr.msk.f32.mxu1 %vm358_vm0, %v10457_v55  ;;  %14385 = vmatpush3.bf16.msra.mxu1 %v14382_v32  ;;  %v21789_v32 = vld [vmem:[#allocation43_spill] sm:$0xff]  ;;  %v20392_v55 = vld [vmem:[#allocation2 + $0xd4] sm:$0xff] }
 0x7ad   : > { %14387 = vmatprep.subr.bf16.mxu1 %v20364_v48  ;;  %v10461_v43 = vmul.f32 %v20382_v26, %v21789_v32  ;;  %v21792_v32 = vld [vmem:[#allocation53_spill] sm:$0xff] }
 0x7af   : > { %14133 = vmatmul.mubr.msk.f32.gmra.mrb[4].mxu1 %vm358_vm0, %v10458_v12  ;;  %v10462_v12 = vmul.f32 %v20389_v24, %v21790_v2  ;;  %v21794_v2 = vld [vmem:[#allocation61_spill] sm:$0xff] }
 0x7b0   : > { %14135 = vmatprep.mubr.msk.f32.mxu1 %vm358_vm0, %v10459_v47  ;;  %v10463_v47 = vmul.f32 %v20392_v55, %v21791_v11  ;;  %v10466_v11 = vmul.f32 %v20409_v63, %v21794_v2  ;;  %v21799_v2 = vld [vmem:[#allocation66_spill] sm:$0xff] }
 0x7b3   : > { %14136 = vmatmul.mubr.msk.f32.gmra.mrb[6].mxu1 %vm358_vm0, %v10460_v9  ;;  %v10464_v9 = vmul.f32 %v20399_v60, %v21792_v32 }
 0x7b4   : > { %14138 = vmatprep.mubr.msk.f32.mxu1 %vm358_vm0, %v10461_v43  ;;  %v10465_v43 = vmul.f32 %v20402_v36, %v21793_v1  ;;  %v15024_v1 = vmov 6  }
 0x7b5   : > { %14937 = vset.pattern.permute.xlu1 %v15024_v1  ;;  %14936 = vset.pattern.permute.xlu0 %v15024_v1  ;;  %v11727_v1 = vld [vmem:[%s20797_s1 + $0x20] sm:$0xff] }
 0x7b7   : > { %14139 = vmatmul.mubr.msk.f32.gmra.mrb[8].mxu1 %vm358_vm0, %v10462_v12  ;;  %v21795_v12 = vld [vmem:[#allocation57_spill] sm:$0xff] }
 0x7b8   : > { %14141 = vmatprep.mubr.msk.f32.mxu1 %vm358_vm0, %v10463_v47  ;;  %v10467_v27 = vmul.f32 %v19836_v40, %v21795_v12  ;;  %v21796_v47 = vld [vmem:[#allocation73_spill] sm:$0xff]  ;;  %v21800_v12 = vld [vmem:[#allocation11_spill] sm:$0xff] }
 0x7b9   : > { %v10468_v32 = vmul.f32 %v19844_v35, %v21796_v47  ;;  %v11723_v40 = vld [vmem:[%s20797_s1] sm:$0xff]  ;;  %v21798_v35 = vld [vmem:[#allocation19_spill] sm:$0xff] }
 0x7ba   : > { %11757 = vperm.xlu0 %14936, %v11723_v40   ;;  %v21801_v47 = vld [vmem:[#allocation15_spill] sm:$0xff]  ;;  %v21803_v40 = vld [vmem:[#allocation16_spill] sm:$0xff] }
 0x7bb   : > { %14142 = vmatmul.mubr.msk.f32.gmra.mrb[10].mxu1 %vm358_vm0, %v10464_v9  ;;  %v10469_v9 = vmul.f32 %v20002_v4, %v21797_v3  ;;  %v10471_v4 = vmul.f32 %v20102_v39, %v21799_v2  ;;  %v11725_v3 = vld [vmem:[%s20797_s1 + $0x10] sm:$0xff]  ;;  %v10473_v39 = vmul.f32 %v20112_v23, %v21801_v47 }
 0x7bc   : > { %14144 = vmatprep.mubr.msk.f32.mxu1 %vm358_vm0, %v10465_v43  ;;  %v11724_v43 = vld [vmem:[%s20797_s1 + $0x8] sm:$0xff]  ;;  %v11729_v2 = vld [vmem:[%s20797_s1 + $0x30] sm:$0xff] }
 0x7bd   : > { %11762 = vperm.xlu1 %14937, %v11724_v43   ;;  %v21802_v43 = vld [vmem:[#allocation6_spill] sm:$0xff]  ;;  %v10447_v47 = vld [vmem:[#allocation2 + $0x154] sm:$0xff] }
 0x7bf   : > { %14145 = vmatmul.mubr.msk.f32.gmra.mrb[12].mxu1 %vm358_vm0, %v10466_v11  ;;  %v11726_v11 = vld [vmem:[%s20797_s1 + $0x18] sm:$0xff] }
 0x7c0   : > { %14147 = vmatprep.mubr.msk.f32.mxu1 %vm358_vm0, %v10467_v27  ;;  %v10470_v27 = vmul.f32 %v20098_v13, %v21798_v35  ;;  %v10472_v13 = vmul.f32 %v20108_v7, %v21800_v12  ;;  %11772 = vperm.xlu0 %14936, %v11726_v11   ;;  %v10474_v7 = vmul.f32 %v20118_v59, %v21802_v43  ;;  %v10444_v35 = vld [vmem:[#allocation2 + $0x13c] sm:$0xff]  ;;  %v10446_v11 = vld [vmem:[#allocation2 + $0x14c] sm:$0xff] }
 0x7c1   : > { %11767 = vperm.xlu1 %14937, %v11725_v3   ;;  %v21804_v3 = vld [vmem:[#allocation9_spill] sm:$0xff]  ;;  %v21805_v12 = vld [vmem:[#allocation10_spill] sm:$0xff] }
 0x7c2   : > { %v10476_v59 = vmul.f32 %v10444_v35, %v21804_v3  ;;  %v21807_v43 = vld [vmem:[#allocation21_spill] sm:$0xff]  ;;  %v11733_v35 = vld [vmem:[%s20797_s1 + $0x50] sm:$0xff]  ;;  %v21809_v3 = vld [vmem:[#allocation42_spill] sm:$0xff] }
 0x7c3   : > { %14148 = vmatmul.mubr.msk.f32.gmra.mrb[14].mxu1 %vm358_vm0, %v10468_v32  ;;  %v10443_v32 = vld [vmem:[#allocation2 + $0x134] sm:$0xff] }
 0x7c4   : > { %14150 = vmatprep.mubr.msk.f32.mxu1 %vm358_vm0, %v10469_v9  ;;  %v11728_v9 = vld [vmem:[%s20797_s1 + $0x28] sm:$0xff]  ;;  %v10475_v23 = vmul.f32 %v10443_v32, %v21803_v40  ;;  %v20478_v40 = vld [vmem:[#allocation2 + $0x15c] sm:$0xff] }
 0x7c5   : > { %11777 = vperm.xlu1 %14937, %v11727_v1   ;;  %11782 = vperm.xlu0 %14936, %v11728_v9   ;;  %v11732_v32 = vld [vmem:[%s20797_s1 + $0x48] sm:$0xff]  ;;  %v21806_v1 = vld [vmem:[#allocation24_spill] sm:$0xff] }
 0x7c6   : > { %v10478_v9 = vmul.f32 %v10446_v11, %v21806_v1  ;;  %v20491_v11 = vld [vmem:[#allocation2 + $0x16c] sm:$0xff]  ;;  %v21811_v1 = vld [vmem:[#allocation33_spill] sm:$0xff] }
 0x7c7   : > { %14151 = vmatmul.mubr.msk.f32.gmra.mrb[16].mxu1 %vm358_vm0, %v10470_v27  ;;  %v10445_v27 = vld [vmem:[#allocation2 + $0x144] sm:$0xff] }
 0x7c8   : > { %14153 = vmatprep.mubr.msk.f32.mxu1 %vm358_vm0, %v10471_v4  ;;  %v11730_v4 = vld [vmem:[%s20797_s1 + $0x38] sm:$0xff] }
 0x7c9   : > { %11787 = vperm.xlu1 %14937, %v11729_v2   ;;  %11792 = vperm.xlu0 %14936, %v11730_v4   ;;  %v21808_v2 = vld [vmem:[#allocation28_spill] sm:$0xff] }
 0x7ca   : > { %v10480_v4 = vmul.f32 %v20478_v40, %v21808_v2  ;;  %v11297_v2 = vld [vmem:[%s20802_s6 + $0x110] sm:$0xff] }
 0x7cb   : > { %14154 = vmatmul.mubr.msk.f32.gmra.mrb[18].mxu1 %vm358_vm0, %v10472_v13  ;;  %v10477_v13 = vmul.f32 %v10445_v27, %v21805_v12  ;;  %v11734_v27 = vld [vmem:[%s20797_s1 + $0x58] sm:$0xff] }
 0x7cc   : > { %14156 = vmatprep.mubr.msk.f32.mxu1 %vm358_vm0, %v10473_v39  ;;  %v11731_v39 = vld [vmem:[%s20797_s1 + $0x40] sm:$0xff]  ;;  %v10451_v12 = vld [vmem:[#allocation2 + $0x174] sm:$0xff] }
 0x7cd   : > { %11797 = vperm.xlu1 %14937, %v11731_v39   ;;  %11802 = vperm.xlu0 %14936, %v11732_v32   ;;  %v21810_v39 = vld [vmem:[#allocation4_spill] sm:$0xff] }
 0x7ce   : > { %v10482_v32 = vmul.f32 %v20491_v11, %v21810_v39  ;;  %v11741_v39 = vld [vmem:[%s20797_s1 + $0x90] sm:$0xff] }
 0x7cf   : > { %14157 = vmatmul.mubr.msk.f32.gmra.mrb[20].mxu1 %vm358_vm0, %v10474_v7  ;;  %v10479_v7 = vmul.f32 %v10447_v47, %v21807_v43  ;;  %v11736_v47 = vld [vmem:[%s20797_s1 + $0x68] sm:$0xff]  ;;  %v20504_v43 = vld [vmem:[#allocation2 + $0x17c] sm:$0xff] }
 0x7d0   : > { %14159 = vmatprep.mubr.msk.f32.mxu1 %vm358_vm0, %v10475_v23  ;;  %v10449_v23 = vld [vmem:[#allocation2 + $0x164] sm:$0xff] }
 0x7d1   : > { %11807 = vperm.xlu1 %14937, %v11733_v35   ;;  %11812 = vperm.xlu0 %14936, %v11734_v27   ;;  %v21812_v35 = vld [vmem:[#allocation13_spill] sm:$0xff] }
 0x7d2   : > { %v10484_v27 = vmul.f32 %v20504_v43, %v21812_v35  ;;  %v11744_v35 = vld [vmem:[%s20797_s1 + $0xa8] sm:$0xff] }
 0x7d3   : > { %14160 = vmatmul.mubr.msk.f32.gmra.mrb[22].mxu1 %vm358_vm0, %v10476_v59  ;;  %v10481_v59 = vmul.f32 %v10449_v23, %v21809_v3  ;;  %v11738_v23 = vld [vmem:[%s20797_s1 + $0x78] sm:$0xff]  ;;  %v10842_v3 = vld [vmem:[#allocation2 + $0x88] sm:$0xff] }
 0x7d4   : > { %14162 = vmatprep.mubr.msk.f32.mxu1 %vm358_vm0, %v10477_v13  ;;  %v11735_v13 = vld [vmem:[%s20797_s1 + $0x60] sm:$0xff] }
 0x7d5   : > { %11817 = vperm.xlu1 %14937, %v11735_v13   ;;  %11822 = vperm.xlu0 %14936, %v11736_v47   ;;  %v10843_v47 = vld [vmem:[#allocation2 + $0x90] sm:$0xff] }
 0x7d7   : > { %14163 = vmatmul.mubr.msk.f32.gmra.mrb[24].mxu1 %vm358_vm0, %v10478_v9  ;;  %v10483_v9 = vmul.f32 %v10451_v12, %v21811_v1  ;;  %v11740_v12 = vld [vmem:[%s20797_s1 + $0x88] sm:$0xff]  ;;  %v11742_v1 = vld [vmem:[%s20797_s1 + $0x98] sm:$0xff] }
 0x7d8   : > { %14165 = vmatprep.mubr.msk.f32.mxu1 %vm358_vm0, %v10479_v7  ;;  %v11737_v7 = vld [vmem:[%s20797_s1 + $0x70] sm:$0xff] }
 0x7d9   : > { %11827 = vperm.xlu1 %14937, %v11737_v7   ;;  %11832 = vperm.xlu0 %14936, %v11738_v23   ;;  %v11743_v7 = vld [vmem:[%s20797_s1 + $0xa0] sm:$0xff]  ;;  %v10846_v23 = vld [vmem:[#allocation2 + $0xa8] sm:$0xff] }
 0x7db   : > { %14166 = vmatmul.mubr.msk.f32.gmra.mrb[26].mxu1 %vm358_vm0, %v10480_v4  ;;  %v11298_v4 = vld [vmem:[%s20802_s6 + $0x118] sm:$0xff] }
 0x7dc   : > { %14168 = vmatprep.mubr.msk.f32.mxu1 %vm358_vm0, %v10481_v59  ;;  %v11739_v59 = vld [vmem:[%s20797_s1 + $0x80] sm:$0xff]  ;;  %v14390_v13 = vpack.c.bf16 %v11298_v4, %v11297_v2  ;;  %v10848_v2 = vld [vmem:[#allocation2 + $0xb8] sm:$0xff] }
 0x7dd   : > { %11837 = vperm.xlu1 %14937, %v11739_v59   ;;  %11842 = vperm.xlu0 %14936, %v11740_v12   ;;  %v11746_v4 = vld [vmem:[%s20797_s1 + $0xb8] sm:$0xff]  ;;  %v11747_v59 = vld [vmem:[%s20797_s1 + $0xc0] sm:$0xff]  ;;  %v10850_v12 = vld [vmem:[#allocation2 + $0xc8] sm:$0xff] }
 0x7df   : > { %14169 = vmatmul.mubr.msk.f32.gmra.mrb[28].mxu1 %vm358_vm0, %v10482_v32  ;;  %v10844_v32 = vld [vmem:[#allocation2 + $0x98] sm:$0xff] }
 0x7e0   : > { %14171 = vmatprep.mubr.msk.f32.mxu1 %vm358_vm0, %v10483_v9  ;;  %v10845_v9 = vld [vmem:[#allocation2 + $0xa0] sm:$0xff] }
 0x7e1   : > { %11847 = vperm.xlu1 %14937, %v11741_v39   ;;  %11852 = vperm.xlu0 %14936, %v11742_v1   ;;  %v11749_v39 = vld [vmem:[%s20797_s1 + $0xd0] sm:$0xff]  ;;  %v11750_v1 = vld [vmem:[%s20797_s1 + $0xd8] sm:$0xff] }
 0x7e3   : > { %14172 = vmatmul.mubr.msk.f32.gmra.mrb[30].mxu1 %vm358_vm0, %v10484_v27  ;;  %v11745_v27 = vld [vmem:[%s20797_s1 + $0xb0] sm:$0xff] }
 0x7e4   : > { %14182 = vmatprep.mubr.msk.f32.mxu1 %vm358_vm0, %v10842_v3  ;;  %v10849_v3 = vld [vmem:[#allocation2 + $0xc0] sm:$0xff] }
 0x7e5   : > { %11857 = vperm.xlu1 %14937, %v11743_v7   ;;  %11862 = vperm.xlu0 %14936, %v11744_v35   ;;  %v11751_v7 = vld [vmem:[%s20797_s1 + $0xe0] sm:$0xff]  ;;  %v15005_v35 = vld [vmem:[#allocation2 + $0xe8] sm:$0xff] }
 0x7e7   : > { %14183 = vmatmul.mubr.msk.f32.vlgmr.msra.gmra.mrb[0].mxu1 %vm358_vm0, %v10843_v47  ;;  %v10851_v47 = vld [vmem:[#allocation2 + $0xd0] sm:$0xff] }
 0x7e8   : > { %14389 = vmatpush3.bf16.msra.mxu1 %v20364_v48  ;;  %14185 = vmatprep.mubr.msk.f32.mxu1 %vm358_vm0, %v10844_v32  ;;  %v10847_v48 = vld [vmem:[#allocation2 + $0xb0] sm:$0xff]  ;;  %v10852_v32 = vld [vmem:[#allocation2 + $0xd8] sm:$0xff] }
 0x7e9   : > { %14391 = vmatprep.subr.bf16.mxu1 %v14390_v13  ;;  %11867 = vperm.xlu1 %14937, %v11745_v27   ;;  %v15006_v27 = vld [vmem:[#allocation2 + $0xf0] sm:$0xff] }
 0x7ea   : > { %11872 = vperm.xlu0 %14936, %v11746_v4   ;;  %v15007_v4 = vld [vmem:[#allocation2 + $0xf8] sm:$0xff] }
 0x7eb   : > { %14186 = vmatmul.mubr.msk.f32.gmra.mrb[2].mxu1 %vm358_vm0, %v10845_v9  ;;  %v10853_v9 = vld [vmem:[#allocation2 + $0xe0] sm:$0xff] }
 0x7ec   : > { %14188 = vmatprep.mubr.msk.f32.mxu1 %vm358_vm0, %v10846_v23  ;;  %14393 = vmatpush3.bf16.msra.mxu1 %v14390_v13  ;;  %v11748_v13 = vld [vmem:[%s20797_s1 + $0xc8] sm:$0xff] }
 0x7ed   : > { %11877 = vperm.xlu1 %14937, %v11747_v59   ;;  %v11752_v23 = vld [vmem:[%s20797_s1 + $0xe8] sm:$0xff]  ;;  %v21813_v59 = vmov 0  }
 0x7ee   : > { %11882 = vperm.xlu0 %14936, %v11748_v13   ;;  %v21815_v13 = vld [vmem:[#allocation91_spill] sm:$0xff] }
 0x7ef   : > { %14189 = vmatmul.mubr.msk.f32.gmra.mrb[4].mxu1 %vm358_vm0, %v10847_v48  ;;  %v11753_v48 = vld [vmem:[%s20797_s1 + $0xf0] sm:$0xff] }
 0x7f0   : > { %14191 = vmatprep.mubr.msk.f32.mxu1 %vm358_vm0, %v10848_v2  ;;  %v11754_v2 = vld [vmem:[%s20797_s1 + $0xf8] sm:$0xff] }
 0x7f1   : > { %11887 = vperm.xlu1 %14937, %v11749_v39   ;;  %v21817_v39 = vld [vmem:[#allocation93_spill] sm:$0xff] }
 0x7f2   : > { %11892 = vperm.xlu0 %14936, %v11750_v1   ;;  %v10868_v1 = vld [vmem:[#allocation2 + $0x158] sm:$0xff] }
 0x7f3   : > { %14192 = vmatmul.mubr.msk.f32.gmra.mrb[6].mxu1 %vm358_vm0, %v10849_v3  ;;  %v15008_v3 = vld [vmem:[#allocation2 + $0x100] sm:$0xff] }
 0x7f4   : > { %14194 = vmatprep.mubr.msk.f32.mxu1 %vm358_vm0, %v10850_v12  ;;  %v21814_v12 = vld [vmem:[#allocation90_spill] sm:$0xff] }
 0x7f5   : > { %11897 = vperm.xlu1 %14937, %v11751_v7   ;;  %v10870_v7 = vld [vmem:[#allocation2 + $0x168] sm:$0xff] }
 0x7f6   : > { %11902 = vperm.xlu0 %14936, %v11752_v23   ;;  %v10871_v23 = vld [vmem:[#allocation2 + $0x170] sm:$0xff] }
 0x7f7   : > { %14195 = vmatmul.mubr.msk.f32.gmra.mrb[8].mxu1 %vm358_vm0, %v10851_v47  ;;  %v21816_v47 = vld [vmem:[#allocation92_spill] sm:$0xff] }
 0x7f8   : > { %14197 = vmatprep.mubr.msk.f32.mxu1 %vm358_vm0, %v10852_v32  ;;  %v21818_v32 = vld [vmem:[#allocation94_spill] sm:$0xff] }
 0x7f9   : > { %11907 = vperm.xlu1 %14937, %v11753_v48   ;;  %v21819_v48 = vld [vmem:[#allocation26_spill] sm:$0xff] }
 0x7fa   : > { %11912 = vperm.xlu0 %14936, %v11754_v2   ;;  %v11264_v2 = vmul.f32 %v20342_v62, %v19772_v25  ;;  %v11268_v25 = vmul.f32 %v20371_v51, %v19801_v22  ;;  %v11272_v22 = vmul.f32 %v20392_v55, %v19839_v41  ;;  %v11244_v62 = vld [vmem:[#allocation2 + $0xf4] sm:$0xff]  ;;  %v11250_v51 = vld [vmem:[#allocation2 + $0x124] sm:$0xff] }
 0x7fb   : > { %14198 = vmatmul.mubr.msk.f32.gmra.mrb[10].mxu1 %vm358_vm0, %v10853_v9  ;;  %v10869_v9 = vld [vmem:[#allocation2 + $0x160] sm:$0xff]  ;;  %v11276_v41 = vmul.f32 %v11244_v62, %v21770_v50 }
 0x7fc   : > { %14200 = vmatprep.mubr.msk.f32.mxu1 %vm358_vm0, %v15005_v35  ;;  %v10872_v35 = vld [vmem:[#allocation2 + $0x178] sm:$0xff] }
 0x7fe   : > { %14938 = vset.pattern.permute.xlu0 %v21813_v59  ;;  %v21823_v59 = vld [vmem:[#allocation88_spill] sm:$0xff] }
 0x7ff   : > { %14201 = vmatmul.mubr.msk.f32.gmra.mrb[12].mxu1 %vm358_vm0, %v15006_v27  ;;  %v11263_v27 = vmul.f32 %v20050_v56, %v21819_v48  ;;  %v11267_v56 = vmul.f32 %v20368_v33, %v19790_v45  ;;  %v11271_v45 = vmul.f32 %v20389_v24, %v19828_v15  ;;  %v11275_v15 = vmul.f32 %v20409_v63, %v19868_v8  ;;  %v11248_v63 = vld [vmem:[#allocation2 + $0x114] sm:$0xff]  ;;  %v11249_v33 = vld [vmem:[#allocation2 + $0x11c] sm:$0xff] }
 0x800   : > { %14203 = vmatprep.mubr.msk.f32.mxu1 %vm358_vm0, %v15007_v4  ;;  %v11265_v4 = vmul.f32 %v20349_v10, %v19763_v52  ;;  %v11269_v52 = vmul.f32 %v20379_v34, %v19810_v30  ;;  %v11273_v30 = vmul.f32 %v20399_v60, %v19848_v5  ;;  %v11245_v10 = vld [vmem:[#allocation2 + $0xfc] sm:$0xff]  ;;  %v11246_v60 = vld [vmem:[#allocation2 + $0x104] sm:$0xff]  ;;  %v11280_v50 = vmul.f32 %v11248_v63, %v19911_v54  ;;  %v11251_v34 = vld [vmem:[#allocation2 + $0x12c] sm:$0xff] }
 0x801   : > { %v11277_v5 = vmul.f32 %v11245_v10, %v21771_v61  ;;  %v11281_v61 = vmul.f32 %v11249_v33, %v21773_v21  ;;  %v11285_v54 = vmul.f32 %v20128_v44, %v21776_v53  ;;  %v11255_v21 = vld [vmem:[#allocation2 + $0x14c] sm:$0xff]  ;;  %v11256_v24 = vld [vmem:[#allocation2 + $0x154] sm:$0xff]  ;;  %v11258_v44 = vld [vmem:[#allocation2 + $0x164] sm:$0xff] }
 0x802   : > { %v21820_v53 = vld [vmem:[#allocation85_spill] sm:$0xff] }
 0x803   : > { %14204 = vmatmul.mubr.msk.f32.gmra.mrb[14].mxu1 %vm358_vm0, %v15008_v3  ;;  %v11266_v3 = vmul.f32 %v20358_v0, %v19780_v17  ;;  %v11270_v17 = vmul.f32 %v20382_v26, %v19818_v29  ;;  %v11274_v29 = vmul.f32 %v20402_v36, %v19856_v42  ;;  %v11247_v0 = vld [vmem:[#allocation2 + $0x10c] sm:$0xff]  ;;  %v11278_v42 = vmul.f32 %v11246_v60, %v19898_v28 }
 0x804   : > { %14206 = vmatprep.mubr.msk.f32.mxu1 %vm358_vm0, %v20189_v38  ;;  %v10866_v38 = vld [vmem:[#allocation2 + $0x148] sm:$0xff]  ;;  %v11279_v8 = vmul.f32 %v11247_v0, %v21772_v20  ;;  %v11282_v28 = vmul.f32 %v11250_v51, %v21774_v6  ;;  %v11283_v20 = vmul.f32 %v11251_v34, %v21775_v18  ;;  %v11284_v26 = vmul.f32 %v20122_v16, %v19937_v19 }
 0x805   : > { %v11286_v6 = vmul.f32 %v20325_v37, %v19952_v14  ;;  %v11287_v18 = vmul.f32 %v11255_v21, %v21777_v31  ;;  %v11288_v19 = vmul.f32 %v11256_v24, %v21778_v58  ;;  %v11289_v16 = vmul.f32 %v20478_v40, %v21779_v49  ;;  %v21821_v14 = vld [vmem:[#allocation86_spill] sm:$0xff]  ;;  %v11260_v37 = vld [vmem:[#allocation2 + $0x174] sm:$0xff]  ;;  %v21822_v36 = vld [vmem:[#allocation87_spill] sm:$0xff] }
 0x806   : > { %v11290_v55 = vmul.f32 %v11258_v44, %v21820_v53  ;;  %v11291_v31 = vmul.f32 %v20491_v11, %v21821_v14  ;;  %v11292_v58 = vmul.f32 %v11260_v37, %v21822_v36  ;;  %v11293_v49 = vmul.f32 %v20504_v43, %v21823_v59  ;;  %v11262_v40 = vld [vmem:[#allocation2 + $0x184] sm:$0xff]  ;;  %v20701_v43 = vld [vmem:[%s20803_s7] ss:$0 sm:$0xff] }
 0x807   : > { %14207 = vmatmul.mubr.msk.f32.gmra.mrb[16].mxu1 %vm358_vm0, %v20193_v46  ;;  %v10867_v46 = vld [vmem:[#allocation2 + $0x150] sm:$0xff] }
 0x808   : > { %14209 = vmatprep.mubr.msk.f32.mxu1 %vm358_vm0, %v21814_v12  ;;  %v21824_v12 = vld [vmem:[#allocation89_spill] sm:$0xff] }
 0x80b   : > { %14210 = vmatmul.mubr.msk.f32.gmra.mrb[18].mxu1 %vm358_vm0, %v21815_v13  ;;  %v11294_v13 = vmul.f32 %v11262_v40, %v21824_v12 }
 0x80c   : > { %14212 = vmatprep.mubr.msk.f32.mxu1 %vm358_vm0, %v21816_v47 }
 0x80f   : > { %14213 = vmatmul.mubr.msk.f32.gmra.mrb[20].mxu1 %vm358_vm0, %v21817_v39 }
 0x810   : > { %14215 = vmatprep.mubr.msk.f32.mxu1 %vm358_vm0, %v21818_v32 }
 0x813   : > { %14216 = vmatmul.mubr.msk.f32.gmra.mrb[22].mxu1 %vm358_vm0, %v20219_v57  ;;  %v10873_v57 = vld [vmem:[#allocation2 + $0x180] sm:$0xff] }
 0x814   : > { %14218 = vmatprep.mubr.msk.f32.mxu1 %vm358_vm0, %v10866_v38 }
 0x817   : > { %14219 = vmatmul.mubr.msk.f32.gmra.mrb[24].mxu1 %vm358_vm0, %v10867_v46 }
 0x818   : > { %14221 = vmatprep.mubr.msk.f32.mxu1 %vm358_vm0, %v10868_v1 }
 0x81b   : > { %14222 = vmatmul.mubr.msk.f32.gmra.mrb[26].mxu1 %vm358_vm0, %v10869_v9 }
 0x81c   : > { %14224 = vmatprep.mubr.msk.f32.mxu1 %vm358_vm0, %v10870_v7 }
 0x81f   : > { %14225 = vmatmul.mubr.msk.f32.gmra.mrb[28].mxu1 %vm358_vm0, %v10871_v23 }
 0x820   : > { %14227 = vmatprep.mubr.msk.f32.mxu1 %vm358_vm0, %v10872_v35 }
 0x823   : > { %14228 = vmatmul.mubr.msk.f32.gmra.mrb[30].mxu1 %vm358_vm0, %v10873_v57 }
 0x824   : > { %14238 = vmatprep.mubr.msk.f32.mxu1 %vm358_vm0, %v11263_v27 }
 0x827   : > { %14239 = vmatmul.mubr.msk.f32.vlgmr.msra.gmra.mrb[0].mxu1 %vm358_vm0, %v11264_v2 }
 0x828   : > { %14241 = vmatprep.mubr.msk.f32.mxu1 %vm358_vm0, %v11265_v4 }
 0x82b   : > { %14242 = vmatmul.mubr.msk.f32.gmra.mrb[2].mxu1 %vm358_vm0, %v11266_v3 }
 0x82c   : > { %14244 = vmatprep.mubr.msk.f32.mxu1 %vm358_vm0, %v11267_v56 }
 0x82f   : > { %14245 = vmatmul.mubr.msk.f32.gmra.mrb[4].mxu1 %vm358_vm0, %v11268_v25 }
 0x830   : > { %14247 = vmatprep.mubr.msk.f32.mxu1 %vm358_vm0, %v11269_v52 }
 0x833   : > { %14248 = vmatmul.mubr.msk.f32.gmra.mrb[6].mxu1 %vm358_vm0, %v11270_v17 }
 0x834   : > { %14250 = vmatprep.mubr.msk.f32.mxu1 %vm358_vm0, %v11271_v45 }
 0x837   : > { %14251 = vmatmul.mubr.msk.f32.gmra.mrb[8].mxu1 %vm358_vm0, %v11272_v22 }
 0x838   : > { %14253 = vmatprep.mubr.msk.f32.mxu1 %vm358_vm0, %v11273_v30 }
 0x839   : > { %v11758_v47 = vpop.permute.xlu0 %11757 }
 0x83b   : > { %14254 = vmatmul.mubr.msk.f32.gmra.mrb[10].mxu1 %vm358_vm0, %v11274_v29 }
 0x83c   : > { %14256 = vmatprep.mubr.msk.f32.mxu1 %vm358_vm0, %v11275_v15  ;;  %v11763_v11 = vpop.permute.xlu1 %11762 }
 0x83f   : > { %14257 = vmatmul.mubr.msk.f32.gmra.mrb[12].mxu1 %vm358_vm0, %v11276_v41  ;;  %v11773_v32 = vpop.permute.xlu0 %11772 }
 0x840   : > { %14259 = vmatprep.mubr.msk.f32.mxu1 %vm358_vm0, %v11277_v5  ;;  %v11768_v39 = vpop.permute.xlu1 %11767 }
 0x843   : > { %14260 = vmatmul.mubr.msk.f32.gmra.mrb[14].mxu1 %vm358_vm0, %v11278_v42 }
 0x844   : > { %14262 = vmatprep.mubr.msk.f32.mxu1 %vm358_vm0, %v11279_v8  ;;  %v11778_v38 = vpop.permute.xlu1 %11777  ;;  %v11783_v46 = vpop.permute.xlu0 %11782 }
 0x847   : > { %14263 = vmatmul.mubr.msk.f32.gmra.mrb[16].mxu1 %vm358_vm0, %v11280_v50 }
 0x848   : > { %14265 = vmatprep.mubr.msk.f32.mxu1 %vm358_vm0, %v11281_v61  ;;  %v11788_v1 = vpop.permute.xlu1 %11787  ;;  %v11793_v9 = vpop.permute.xlu0 %11792 }
 0x84b   : > { %14266 = vmatmul.mubr.msk.f32.gmra.mrb[18].mxu1 %vm358_vm0, %v11282_v28 }
 0x84c   : > { %14268 = vmatprep.mubr.msk.f32.mxu1 %vm358_vm0, %v11283_v20  ;;  %v20696_v7 = vpop.permute.xlu1 %11797  ;;  %v20703_v23 = vpop.permute.xlu0 %11802 }
 0x84f   : > { %14269 = vmatmul.mubr.msk.f32.gmra.mrb[20].mxu1 %vm358_vm0, %v11284_v26 }
 0x850   : > { %14271 = vmatprep.mubr.msk.f32.mxu1 %vm358_vm0, %v11285_v54  ;;  %v20707_v4 = vpop.permute.xlu1 %11807  ;;  %v20709_v25 = vpop.permute.xlu0 %11812 }
 0x853   : > { %14272 = vmatmul.mubr.msk.f32.gmra.mrb[22].mxu1 %vm358_vm0, %v11286_v6 }
 0x854   : > { %14274 = vmatprep.mubr.msk.f32.mxu1 %vm358_vm0, %v11287_v18  ;;  %v20716_v42 = vpop.permute.xlu1 %11817  ;;  %v20719_v50 = vpop.permute.xlu0 %11822 }
 0x857   : > { %14275 = vmatmul.mubr.msk.f32.gmra.mrb[24].mxu1 %vm358_vm0, %v11288_v19 }
 0x858   : > { %14277 = vmatprep.mubr.msk.f32.mxu1 %vm358_vm0, %v11289_v16  ;;  %v20725_v44 = vpop.permute.xlu1 %11827 }
 0x85b   : > { %14278 = vmatmul.mubr.msk.f32.gmra.mrb[26].mxu1 %vm358_vm0, %v11290_v55 }
 0x85c   : > { %14280 = vmatprep.mubr.msk.f32.mxu1 %vm358_vm0, %v11291_v31  ;;  %v11833_v31 = vpop.permute.xlu0 %11832 }
 0x85f   : > { %14281 = vmatmul.mubr.msk.f32.gmra.mrb[28].mxu1 %vm358_vm0, %v11292_v58 }
 0x860   : > { %14283 = vmatprep.mubr.msk.f32.mxu1 %vm358_vm0, %v11293_v49 }
 0x863   : > { %14284 = vmatmul.mubr.msk.f32.gmra.mrb[30].mxu1 %vm358_vm0, %v11294_v13 }
 0x8fa   : > { %v14240_v35 = vpop.f32.mrb[0].mxu1 }
 0x8fb   : > { %v11660_v57 = vadd.f32 %v14240_v35, %v20701_v43  ;;  %v11461_v48 = vpop.f32.mrb[1].mxu1 }
 0x8fc   : > { %v11659_v27 = vadd.f32 %v20701_v43, %v11461_v48 }
 0x8fd   : > { %v11692_v2 = vmax.f32 %v11660_v57, 0.0  ;;  %v11838_v57 = vpop.permute.xlu1 %11837 }
 0x8fe   : > { %v11691_v3 = vmax.f32 %v11659_v27, 0.0  ;;  %v14243_v56 = vpop.f32.mrb[2].mxu1 }
 0x8ff   : > { %v11916_v52 = vmul.f32 %v11763_v11, %v11692_v2  ;;  %v11662_v17 = vadd.f32 %v14243_v56, %v20701_v43  ;;  %v11471_v45 = vpop.f32.mrb[3].mxu1  ;;  %v11843_v2 = vpop.permute.xlu0 %11842 }
 0x900   : > { %v11915_v22 = vmul.f32 %v11758_v47, %v11691_v3  ;;  %v11661_v30 = vadd.f32 %v20701_v43, %v11471_v45 }
 0x901   : > { %v11949_v29 = vsel %vm11947_vm3, %v11916_v52, 0.0  ;;  %v11694_v15 = vmax.f32 %v11662_v17, 0.0 }
 0x902   : > { %v11948_v62 = vsel %vm11947_vm3, %v11915_v22, 0.0  ;;  %v11693_v10 = vmax.f32 %v11661_v30, 0.0  ;;  %v14246_v41 = vpop.f32.mrb[4].mxu1 }
 0x903   : > { %v11950_v5 = vadd.f32 %v11949_v29, %v11948_v62  ;;  %v11664_v60 = vadd.f32 %v14246_v41, %v20701_v43  ;;  %v11481_v0 = vpop.f32.mrb[5].mxu1  ;;  %v11918_v8 = vmul.f32 %v11773_v32, %v11694_v15 }
 0x904   : > { %v11917_v63 = vmul.f32 %v11768_v39, %v11693_v10  ;;  %v11663_v33 = vadd.f32 %v20701_v43, %v11481_v0 }
 0x905   : > { %v11696_v61 = vmax.f32 %v11664_v60, 0.0  ;;  %v11953_v21 = vsel %vm11947_vm3, %v11918_v8, 0.0 }
 0x906   : > { %v11951_v51 = vsel %vm11947_vm3, %v11917_v63, 0.0  ;;  %v11695_v34 = vmax.f32 %v11663_v33, 0.0  ;;  %v14249_v28 = vpop.f32.mrb[6].mxu1  ;;  %v11853_v63 = vpop.permute.xlu0 %11852 }
 0x907   : > { %v11952_v20 = vadd.f32 %v11951_v51, %v11950_v5  ;;  %v11666_v26 = vadd.f32 %v14249_v28, %v20701_v43  ;;  %v11491_v54 = vpop.f32.mrb[7].mxu1  ;;  %v11920_v6 = vmul.f32 %v11783_v46, %v11696_v61  ;;  %v11848_v5 = vpop.permute.xlu1 %11847 }
 0x908   : > { %v11919_v18 = vmul.f32 %v11778_v38, %v11695_v34  ;;  %v11665_v24 = vadd.f32 %v20701_v43, %v11491_v54 }
 0x909   : > { %v11954_v19 = vadd.f32 %v11953_v21, %v11952_v20  ;;  %v11698_v16 = vmax.f32 %v11666_v26, 0.0  ;;  %v11957_v59 = vsel %vm11947_vm3, %v11920_v6, 0.0 }
 0x90a   : > { %v11955_v53 = vsel %vm11947_vm3, %v11919_v18, 0.0  ;;  %v11697_v55 = vmax.f32 %v11665_v24, 0.0  ;;  %v14252_v14 = vpop.f32.mrb[8].mxu1 }
 0x90b   : > { %v11956_v37 = vadd.f32 %v11955_v53, %v11954_v19  ;;  %v11668_v36 = vadd.f32 %v14252_v14, %v20701_v43  ;;  %v11501_v58 = vpop.f32.mrb[9].mxu1  ;;  %v11922_v49 = vmul.f32 %v11793_v9, %v11698_v16  ;;  %v11858_v16 = vpop.permute.xlu1 %11857 }
 0x90c   : > { %v11921_v40 = vmul.f32 %v11788_v1, %v11697_v55  ;;  %v11667_v12 = vadd.f32 %v20701_v43, %v11501_v58  ;;  %v11863_v14 = vpop.permute.xlu0 %11862 }
 0x90d   : > { %v11958_v13 = vadd.f32 %v11957_v59, %v11956_v37  ;;  %v11700_v11 = vmax.f32 %v11668_v36, 0.0  ;;  %v11961_v48 = vsel %vm11947_vm3, %v11922_v49, 0.0 }
 0x90e   : > { %v11959_v47 = vsel %vm11947_vm3, %v11921_v40, 0.0  ;;  %v11699_v39 = vmax.f32 %v11667_v12, 0.0  ;;  %v14255_v32 = vpop.f32.mrb[10].mxu1 }
 0x90f   : > { %v11960_v38 = vadd.f32 %v11959_v47, %v11958_v13  ;;  %v11670_v46 = vadd.f32 %v14255_v32, %v20701_v43  ;;  %v11511_v35 = vpop.f32.mrb[11].mxu1  ;;  %v11924_v27 = vmul.f32 %v20703_v23, %v11700_v11 }
 0x910   : > { %v11923_v9 = vmul.f32 %v20696_v7, %v11699_v39  ;;  %v11669_v1 = vadd.f32 %v20701_v43, %v11511_v35 }
 0x911   : > { %v11962_v3 = vadd.f32 %v11961_v48, %v11960_v38  ;;  %v11702_v56 = vmax.f32 %v11670_v46, 0.0  ;;  %v11965_v15 = vsel %vm11947_vm3, %v11924_v27, 0.0  ;;  %v11868_v38 = vpop.permute.xlu1 %11867  ;;  %v11873_v27 = vpop.permute.xlu0 %11872 }
 0x912   : > { %v11963_v52 = vsel %vm11947_vm3, %v11923_v9, 0.0  ;;  %v11701_v17 = vmax.f32 %v11669_v1, 0.0  ;;  %v14258_v45 = vpop.f32.mrb[12].mxu1 }
 0x913   : > { %v11964_v22 = vadd.f32 %v11963_v52, %v11962_v3  ;;  %v11672_v30 = vadd.f32 %v14258_v45, %v20701_v43  ;;  %v11521_v29 = vpop.f32.mrb[13].mxu1  ;;  %v11926_v62 = vmul.f32 %v20709_v25, %v11702_v56 }
 0x914   : > { %v11925_v23 = vmul.f32 %v20707_v4, %v11701_v17  ;;  %v11671_v7 = vadd.f32 %v20701_v43, %v11521_v29 }
 0x915   : > { %v11966_v10 = vadd.f32 %v11965_v15, %v11964_v22  ;;  %v11704_v41 = vmax.f32 %v11672_v30, 0.0  ;;  %v11969_v34 = vsel %vm11947_vm3, %v11926_v62, 0.0 }
 0x916   : > { %v11967_v60 = vsel %vm11947_vm3, %v11925_v23, 0.0  ;;  %v11703_v0 = vmax.f32 %v11671_v7, 0.0  ;;  %v14261_v8 = vpop.f32.mrb[14].mxu1  ;;  %v11878_v7 = vpop.permute.xlu1 %11877 }
 0x917   : > { %v11968_v33 = vadd.f32 %v11967_v60, %v11966_v10  ;;  %v11674_v61 = vadd.f32 %v14261_v8, %v20701_v43  ;;  %v11531_v51 = vpop.f32.mrb[15].mxu1  ;;  %v11928_v25 = vmul.f32 %v20719_v50, %v11704_v41 }
 0x918   : > { %v11927_v4 = vmul.f32 %v20716_v42, %v11703_v0  ;;  %v11673_v28 = vadd.f32 %v20701_v43, %v11531_v51 }
 0x919   : > { %v11970_v20 = vadd.f32 %v11969_v34, %v11968_v33  ;;  %v11706_v26 = vmax.f32 %v11674_v61, 0.0  ;;  %v11973_v53 = vsel %vm11947_vm3, %v11928_v25, 0.0 }
 0x91a   : > { %v11971_v54 = vsel %vm11947_vm3, %v11927_v4, 0.0  ;;  %v11705_v21 = vmax.f32 %v11673_v28, 0.0  ;;  %v14264_v6 = vpop.f32.mrb[16].mxu1 }
 0x91b   : > { %v11972_v18 = vadd.f32 %v11971_v54, %v11970_v20  ;;  %v11676_v24 = vadd.f32 %v14264_v6, %v20701_v43  ;;  %v11541_v19 = vpop.f32.mrb[17].mxu1  ;;  %v11930_v55 = vmul.f32 %v11833_v31, %v11706_v26 }
 0x91c   : > { %v11929_v50 = vmul.f32 %v20725_v44, %v11705_v21  ;;  %v11675_v42 = vadd.f32 %v20701_v43, %v11541_v19 }
 0x91d   : > { %v11974_v37 = vadd.f32 %v11973_v53, %v11972_v18  ;;  %v11708_v36 = vmax.f32 %v11676_v24, 0.0  ;;  %v11977_v11 = vsel %vm11947_vm3, %v11930_v55, 0.0  ;;  %v11888_v18 = vpop.permute.xlu1 %11887 }
 0x91e   : > { %v11975_v58 = vsel %vm11947_vm3, %v11929_v50, 0.0  ;;  %v11707_v59 = vmax.f32 %v11675_v42, 0.0  ;;  %v14267_v49 = vpop.f32.mrb[18].mxu1 }
 0x91f   : > { %v11976_v40 = vadd.f32 %v11975_v58, %v11974_v37  ;;  %v11678_v12 = vadd.f32 %v14267_v49, %v20701_v43  ;;  %v11551_v13 = vpop.f32.mrb[19].mxu1  ;;  %v11932_v47 = vmul.f32 %v11843_v2, %v11708_v36 }
 0x920   : > { %v11931_v39 = vmul.f32 %v11838_v57, %v11707_v59  ;;  %v11677_v31 = vadd.f32 %v20701_v43, %v11551_v13 }
 0x921   : > { %v11978_v44 = vadd.f32 %v11977_v11, %v11976_v40  ;;  %v11710_v32 = vmax.f32 %v11678_v12, 0.0  ;;  %v11981_v56 = vsel %vm11947_vm3, %v11932_v47, 0.0 }
 0x922   : > { %v11979_v46 = vsel %vm11947_vm3, %v11931_v39, 0.0  ;;  %v11709_v35 = vmax.f32 %v11677_v31, 0.0  ;;  %v14270_v48 = vpop.f32.mrb[20].mxu1 }
 0x923   : > { %v11980_v9 = vadd.f32 %v11979_v46, %v11978_v44  ;;  %v11680_v1 = vadd.f32 %v14270_v48, %v20701_v43  ;;  %v11561_v3 = vpop.f32.mrb[21].mxu1  ;;  %v11934_v52 = vmul.f32 %v11853_v63, %v11710_v32  ;;  %v11898_v46 = vpop.permute.xlu1 %11897 }
 0x924   : > { %v11933_v17 = vmul.f32 %v11848_v5, %v11709_v35  ;;  %v11679_v57 = vadd.f32 %v20701_v43, %v11561_v3  ;;  %v11883_v5 = vpop.permute.xlu0 %11882 }
 0x925   : > { %v11982_v2 = vadd.f32 %v11981_v56, %v11980_v9  ;;  %v11712_v45 = vmax.f32 %v11680_v1, 0.0  ;;  %v11985_v10 = vsel %vm11947_vm3, %v11934_v52, 0.0 }
 0x926   : > { %v11983_v22 = vsel %vm11947_vm3, %v11933_v17, 0.0  ;;  %v11711_v30 = vmax.f32 %v11679_v57, 0.0  ;;  %v14273_v29 = vpop.f32.mrb[22].mxu1 }
 0x927   : > { %v11984_v15 = vadd.f32 %v11983_v22, %v11982_v2  ;;  %v11682_v62 = vadd.f32 %v14273_v29, %v20701_v43  ;;  %v11571_v23 = vpop.f32.mrb[23].mxu1  ;;  %v11936_v41 = vmul.f32 %v11863_v14, %v11712_v45 }
 0x928   : > { %v11935_v60 = vmul.f32 %v11858_v16, %v11711_v30  ;;  %v11681_v0 = vadd.f32 %v20701_v43, %v11571_v23  ;;  %v11893_v53 = vpop.permute.xlu0 %11892  ;;  %v11908_v23 = vpop.permute.xlu1 %11907 }
 0x929   : > { %v11986_v8 = vadd.f32 %v11985_v10, %v11984_v15  ;;  %v11714_v63 = vmax.f32 %v11682_v62, 0.0  ;;  %v11989_v28 = vsel %vm11947_vm3, %v11936_v41, 0.0 }
 0x92a   : > { %v11987_v33 = vsel %vm11947_vm3, %v11935_v60, 0.0  ;;  %v11713_v61 = vmax.f32 %v11681_v0, 0.0  ;;  %v14276_v51 = vpop.f32.mrb[24].mxu1 }
 0x92b   : > { %v11988_v34 = vadd.f32 %v11987_v33, %v11986_v8  ;;  %v11684_v25 = vadd.f32 %v14276_v51, %v20701_v43  ;;  %v11581_v4 = vpop.f32.mrb[25].mxu1  ;;  %v11938_v20 = vmul.f32 %v11873_v27, %v11714_v63 }
 0x92c   : > { %v11937_v26 = vmul.f32 %v11868_v38, %v11713_v61  ;;  %v11683_v54 = vadd.f32 %v20701_v43, %v11581_v4  ;;  %v11903_v35 = vpop.permute.xlu0 %11902 }
 0x92d   : > { %v11990_v21 = vadd.f32 %v11989_v28, %v11988_v34  ;;  %v11716_v6 = vmax.f32 %v11684_v25, 0.0  ;;  %v11993_v14 = vsel %vm11947_vm3, %v11938_v20, 0.0  ;;  %v12018_v20 = vld [vmem:[%s20804_s8] sm:$0x1] }
 0x92e   : > { %v11991_v24 = vsel %vm11947_vm3, %v11937_v26, 0.0  ;;  %v11715_v19 = vmax.f32 %v11683_v54, 0.0  ;;  %v14279_v16 = vpop.f32.mrb[26].mxu1 }
 0x92f   : > { %v11992_v55 = vadd.f32 %v11991_v24, %v11990_v21  ;;  %v11686_v50 = vadd.f32 %v14279_v16, %v20701_v43  ;;  %v11591_v42 = vpop.f32.mrb[27].mxu1  ;;  %v11940_v37 = vmul.f32 %v11883_v5, %v11716_v6  ;;  %v12024_v6 = vld [vmem:[#allocation3] sm:$0x1] }
 0x930   : > { %v11939_v36 = vmul.f32 %v11878_v7, %v11715_v19  ;;  %v11685_v58 = vadd.f32 %v20701_v43, %v11591_v42  ;;  %v11913_v7 = vpop.permute.xlu0 %11912 }
 0x931   : > { %v11994_v59 = vadd.f32 %v11993_v14, %v11992_v55  ;;  %v11718_v49 = vmax.f32 %v11686_v50, 0.0  ;;  %v11997_v31 = vsel %vm11947_vm3, %v11940_v37, 0.0 }
 0x932   : > { %v11995_v40 = vsel %vm11947_vm3, %v11939_v36, 0.0  ;;  %v11717_v12 = vmax.f32 %v11685_v58, 0.0  ;;  %v14282_v13 = vpop.f32.mrb[28].mxu1 }
 0x933   : > { %v11996_v11 = vadd.f32 %v11995_v40, %v11994_v59  ;;  %v11688_v47 = vadd.f32 %v14282_v13, %v20701_v43  ;;  %v11601_v39 = vpop.f32.mrb[29].mxu1  ;;  %v11942_v44 = vmul.f32 %v11893_v53, %v11718_v49 }
 0x934   : > { %v11941_v32 = vmul.f32 %v11888_v18, %v11717_v12  ;;  %v11687_v38 = vadd.f32 %v20701_v43, %v11601_v39 }
 0x935   : > { %v11998_v48 = vadd.f32 %v11997_v31, %v11996_v11  ;;  %v11720_v27 = vmax.f32 %v11688_v47, 0.0  ;;  %v12001_v57 = vsel %vm11947_vm3, %v11942_v44, 0.0 }
 0x936   : > { %v11999_v9 = vsel %vm11947_vm3, %v11941_v32, 0.0  ;;  %v11719_v1 = vmax.f32 %v11687_v38, 0.0  ;;  %v14285_v3 = vpop.f32.mrb[30].mxu1 }
 0x937   : > { %v12000_v56 = vadd.f32 %v11999_v9, %v11998_v48  ;;  %v11690_v52 = vadd.f32 %v14285_v3, %v20701_v43  ;;  %v11611_v17 = vpop.f32.mrb[31].mxu1  ;;  %v11944_v2 = vmul.f32 %v11903_v35, %v11720_v27 }
 0x938   : > { %v11943_v45 = vmul.f32 %v11898_v46, %v11719_v1  ;;  %v11689_v22 = vadd.f32 %v20701_v43, %v11611_v17 }
 0x939   : > { %v12002_v30 = vadd.f32 %v12001_v57, %v12000_v56  ;;  %v11722_v29 = vmax.f32 %v11690_v52, 0.0  ;;  %v12005_v41 = vsel %vm11947_vm3, %v11944_v2, 0.0 }
 0x93a   : > { %v12003_v15 = vsel %vm11947_vm3, %v11943_v45, 0.0  ;;  %v11721_v62 = vmax.f32 %v11689_v22, 0.0 }
 0x93b   : > { %v12004_v10 = vadd.f32 %v12003_v15, %v12002_v30  ;;  %v11946_v60 = vmul.f32 %v11913_v7, %v11722_v29 }
 0x93c   : > { %v11945_v0 = vmul.f32 %v11908_v23, %v11721_v62 }
 0x93d   : > { %v12006_v5 = vadd.f32 %v12005_v41, %v12004_v10  ;;  %v12009_v33 = vsel %vm11947_vm3, %v11946_v60, 0.0 }
 0x93e   : > { %v12007_v8 = vsel %vm11947_vm3, %v11945_v0, 0.0 }
 0x93f   : > { %v12008_v63 = vadd.f32 %v12007_v8, %v12006_v5 }
 0x941   : > { %v12010_v61 = vadd.f32 %v12009_v33, %v12008_v63 }
 0x943   : > { %v12011_v43 = vrot.slane %v12010_v61, 4 }
 0x945   : > { %v12012_v51 = vadd.f32 %v12011_v43, %v12010_v61 }
 0x947   : > { %v12013_v34 = vrot.slane %v12012_v51, 2 }
 0x949   : > { %v12014_v25 = vadd.f32 %v12013_v34, %v12012_v51 }
 0x94b   : > { %v12015_v4 = vrot.slane %v12014_v25, 1 }
 0x94d   : > { %v12016_v28 = vadd.f32 %v12015_v4, %v12014_v25 }
 0x94f   : > { %v12017_v26 = vmul.f32 0.0625, %v12016_v28 }
 0x951   : > { %v12019_v54 = vmul.f32 %v12018_v20, %v12017_v26 }
 0x953   : > { %v12021_v21 = vsel %vm12020_vm4, %v12019_v54, 0.0 }
 0x954   : > { %12022 = vadd.xlane.f32.xlu1 %v12021_v21 }
 0x9e1   : > { %v12023_v18 = vpop.xlane.xlu1 %12022 }
 0x9e2   : > { %v12025_v24 = vadd.f32 %v12024_v6, %v12023_v18 }
 0x9e4   : > { %v12680_v19 = vmul.f32 -1.442695, %v12025_v24 }
 0x9e6   : > { %14939 = vpow2.f32 %v12680_v19 }
 0x9f0   : > { %v14940_v16 = vpop.eup %14939 }
 0x9f1   : > { %v12029_v53 = vadd.f32 1.0, %v14940_v16 }
 0x9f3   : > { %14941 = vrcp.f32 %v12029_v53 }
 0x9fd   : > { %v14942_v55 = vpop.eup %14941 }
 0x9fe   : > { %12034 = vperm.xlu0 %14938, %v14942_v55  }
 0xa7d   : > { %v12035_v50 = vpop.permute.xlu0 %12034 }
 0xa7e   : > { %12037 = vst [vmem:[%s357_s28] sm:$0x1] %v12035_v50 }
 0xa7f PF: > { %s22_s15 = sadd.s32 1, %s15015_s15  }
 0xa80   : > { %p19_p4 = scmp.ge.s32.totalorder %s22_s15, 4  }
 0xa82   :  { %21 = sbr.rel (!%p19_p4) target bundleno = 3 (0x3), region = 90 }

</bundles_post_ra>
